<compile_context>
chip_gen: v7x
topology: tpu7x:2x2x1
jax: 0.10.0
libtpu: 0.0.40
codegen_flags: <defaults>
</compile_context>

<pallas_src>
import functools

import jax
import jax.numpy as jnp
import numpy as np
from jax import lax
from jax.experimental import pallas as pl
from jax.experimental.pallas import tpu as pltpu

EPS = 1e-5
LANES = 128
SUBLANES = 8


def _round_up(v, m):
    return (v + m - 1) // m * m


# ------------------------------ Pallas kernel ------------------------------ #

def _bottleneck_kernel(x_ref, mask_ref, w1_ref, b1_ref, w2_ref, b2_ref,
                       w3_ref, b3_ref, o_ref, o1_buf, *, wp, guard):
    """Fused Bottleneck for one batch element.

    x_ref   : (m, cxp)  bf16 -- spatially zero-padded, flattened NHWC image,
                                channel-padded to cxp (= padded out channels).
    mask_ref: (m, 1)    f32  -- 1.0 on real (interior) pixels, 0.0 on the ring.
    o_ref   : (m, c3p)  bf16 -- same flat padded layout as the input.
    o1_buf  : VMEM (m + 2*guard, planes_p) bf16 scratch; zero guard strips make
              every 3x3 tap a constant row shift of the flat layout.
    """
    m = x_ref.shape[0]
    planes_p = w1_ref.shape[1]

    x = x_ref[...]                                     # (m, cxp) bf16
    mask = mask_ref[...]                               # (m, 1)   f32

    # ---- conv1 (1x1, BN scale folded into w1) + bias + relu ---- #
    y1 = jnp.dot(x, w1_ref[...], preferred_element_type=jnp.float32)
    y1 = jnp.maximum(y1 + b1_ref[...], 0.0) * mask     # zero the padding ring

    # Zero-guarded bf16 scratch.  Only the guard strips need (re)zeroing --
    # the interior is fully overwritten just below.  Doing it every step is
    # cheap (2*guard rows) and is correct under megacore grid sharding.
    zeros_guard = jnp.zeros((guard, planes_p), jnp.bfloat16)
    o1_buf[pl.ds(0, guard), :] = zeros_guard
    o1_buf[pl.ds(guard + m, guard), :] = zeros_guard
    o1_buf[pl.ds(guard, m), :] = y1.astype(jnp.bfloat16)

    # ---- conv2 (3x3, padding=1, stride=1, BN scale folded) + bias + relu --- #
    # Each tap (dy, dx) of the stencil is a constant row shift of the flat
    # padded layout -> 9 accumulated MXU matmuls (K = planes_p >= 128).
    acc = jnp.zeros((m, planes_p), jnp.float32)
    for k in range(9):
        dy, dx = divmod(k, 3)
        start = guard + (dy - 1) * wp + (dx - 1)       # static, dy taps 8-aligned
        acc = acc + jnp.dot(o1_buf[pl.ds(start, m), :], w2_ref[k],
                            preferred_element_type=jnp.float32)
    y2 = jnp.maximum(acc + b2_ref[...], 0.0)
    # NOTE: padding-ring rows of y2/y3 are garbage (bias leaks into them);
    # they are dropped by the wrapper's interior slice and can never feed
    # back into interior pixels because conv3 is 1x1 (pointwise).

    # ---- conv3 (1x1, BN scale folded) + bias + residual add + relu ---- #
    y3 = jnp.dot(y2.astype(jnp.bfloat16), w3_ref[...],
                 preferred_element_type=jnp.float32)
    y3 = y3 + b3_ref[...] + x.astype(jnp.float32)      # residual = x (bf16)
    o_ref[...] = jnp.maximum(y3, 0.0).astype(o_ref.dtype)   # bf16 writeback


# ------------------------- one-time parameter prep ------------------------- #

def prepare_params(params, eps=EPS):
    """Fold BN into the conv weights, lane-pad, transpose, cast -- ONCE."""
    w1 = jnp.asarray(params["w1"], jnp.float32)    # (planes, cin, 1, 1)
    w2 = jnp.asarray(params["w2"], jnp.float32)    # (planes, planes, 3, 3)
    w3 = jnp.asarray(params["w3"], jnp.float32)    # (planes*4, planes, 1, 1)
    planes, cin = w1.shape[0], w1.shape[1]
    c3 = w3.shape[0]
    if c3 != cin:
        # TODO(synk): downsample path (strided 1x1 conv on the residual).
        raise NotImplementedError(
            "fused Bottleneck requires inplanes == planes*expansion "
            "(downsample=None)")
    planes_p = _round_up(planes, LANES)   # lane-dense intermediates / scratch
    c3p = _round_up(c3, LANES)            # lane-dense output stores
    cxp = c3p                             # input/residual channels match output

    def fold(g, be, rm, rv):
        g = jnp.asarray(g, jnp.float32)
        be = jnp.asarray(be, jnp.float32)
        rm = jnp.asarray(rm, jnp.float32)
        rv = jnp.asarray(rv, jnp.float32)
        s = g / jnp.sqrt(rv + eps)
        return s, be - rm * s

    s1, b1 = fold(params["g1"], params["be1"], params["rm1"], params["rv1"])
    s2, b2 = fold(params["g2"], params["be2"], params["rm2"], params["rv2"])
    s3, b3 = fold(params["g3"], params["be3"], params["rm3"], params["rv3"])

    # Fold BN scales into the conv weights (per output channel), f32 math.
    w1f = (w1.reshape(planes, cin) * s1[:, None]).T                 # (cin, planes)
    w2f = jnp.transpose(w2 * s2[:, None, None, None],
                        (2, 3, 1, 0)).reshape(9, planes, planes)    # (9, Cin, Cout)
    w3f = (w3.reshape(c3, planes) * s3[:, None]).T                  # (planes, c3)

    w1p = jnp.zeros((cxp, planes_p), jnp.bfloat16).at[:cin, :planes].set(
        w1f.astype(jnp.bfloat16))
    w2p = jnp.zeros((9, planes_p, planes_p), jnp.bfloat16).at[:, :planes, :planes].set(
        w2f.astype(jnp.bfloat16))
    w3p = jnp.zeros((planes_p, c3p), jnp.bfloat16).at[:planes, :c3].set(
        w3f.astype(jnp.bfloat16))
    b1p = jnp.zeros((1, planes_p), jnp.float32).at[0, :planes].set(b1)
    b2p = jnp.zeros((1, planes_p), jnp.float32).at[0, :planes].set(b2)
    b3p = jnp.zeros((1, c3p), jnp.float32).at[0, :c3].set(b3)

    return {"w1": w1p, "b1": b1p, "w2": w2p, "b2": b2p, "w3": w3p, "b3": b3p}


# --------------------------- VMEM budget helper ----------------------------- #

def _derive_vmem_limit(m, cxp, c3p, planes_p, guard):
    """Derive vmem_limit_bytes from the real block sizes + headroom.

    Capped at 48 MiB so it always leaves headroom on v7x (64 MiB physical)."""
    bf, f32 = 2, 4
    in_blk = 2 * m * cxp * bf                 # double-buffered input block
    out_blk = 2 * m * c3p * bf                # double-buffered output block
    weights = (cxp * planes_p + 9 * planes_p * planes_p + planes_p * c3p) * bf
    biases = (2 * planes_p + c3p) * f32
    mask = m * f32
    scratch = (m + 2 * guard) * planes_p * bf
    interm = 3 * m * max(planes_p, c3p) * f32  # y1 / acc / y3 live f32 values
    need = in_blk + out_blk + weights + biases + mask + scratch + interm
    need = int(need * 1.5) + (2 << 20)         # headroom
    return max(16 << 20, min(need, 48 << 20))


# ------------------------------ forward (jit) ------------------------------ #

@functools.partial(jax.jit, static_argnames=("stride",))
def bottleneck_forward(x_nchw, prepped, stride=1):
    """Fused Pallas Bottleneck forward.  x: NCHW float32; downsample=None."""
    if stride != 1:
        # TODO(synk): stride != 1 needs strided 3x3 taps + a downsample branch.
        raise NotImplementedError("fused Bottleneck kernel supports stride=1 only")

    n, cin, h, w = x_nchw.shape
    planes_p = prepped["w1"].shape[1]
    cxp = prepped["w1"].shape[0]
    c3p = prepped["w3"].shape[1]
    c3 = cin                                   # no-downsample: out ch == in ch
    assert cxp == c3p and cin <= cxp

    hp = h + 2
    wp = _round_up(w + 2, SUBLANES)            # sublane-aligned padded row width
    m = hp * wp                                # wp % 8 == 0  =>  m % 8 == 0
    guard = _round_up(wp + 1, SUBLANES)

    # NCHW -> NHWC, spatial zero-pad for the 3x3 (row width padded to wp),
    # lane-pad channels, flatten spatial dims, cast to bf16.  XLA fuses this
    # into one relayout pass.
    # TODO(synk): in a full ResNet, keep activations in this flat padded NHWC
    #             bf16 layout between blocks instead of relayouting per block.
    xp = jnp.transpose(x_nchw, (0, 2, 3, 1))
    xp = jnp.pad(xp, ((0, 0), (1, 1), (1, wp - (w + 1)), (0, cxp - cin)))
    xp = xp.reshape(n, m, cxp).astype(jnp.bfloat16)

    # Interior mask, built once at trace time.  It is batch-invariant and has
    # a constant index_map, so Pallas DMAs it a single time (VMEM-resident for
    # the whole grid) -- cost is negligible and it avoids relying on in-kernel
    # vector integer div/mod lowering for the column test.
    idx = np.arange(m)
    rows, cols = idx // wp, idx % wp
    interior = (rows >= 1) & (rows <= h) & (cols >= 1) & (cols <= w)
    mask = jnp.asarray(interior.astype(np.float32).reshape(m, 1))

    kernel = functools.partial(_bottleneck_kernel, wp=wp, guard=guard)

    def const(nd):
        return lambda b: (0,) * nd

    out = pl.pallas_call(
        kernel,
        out_shape=jax.ShapeDtypeStruct((n, m, c3p), jnp.bfloat16),
        grid=(n,),
        in_specs=[
            pl.BlockSpec((None, m, cxp), lambda b: (b, 0, 0)),     # x / residual
            pl.BlockSpec((m, 1), const(2)),                        # interior mask
            pl.BlockSpec((cxp, planes_p), const(2)),               # w1 (BN folded)
            pl.BlockSpec((1, planes_p), const(2)),                 # b1
            pl.BlockSpec((9, planes_p, planes_p), const(3)),       # w2 taps
            pl.BlockSpec((1, planes_p), const(2)),                 # b2
            pl.BlockSpec((planes_p, c3p), const(2)),               # w3
            pl.BlockSpec((1, c3p), const(2)),                      # b3
        ],
        out_specs=pl.BlockSpec((None, m, c3p), lambda b: (b, 0, 0)),
        scratch_shapes=[pltpu.VMEM((m + 2 * guard, planes_p), jnp.bfloat16)],
        compiler_params=pltpu.CompilerParams(
            dimension_semantics=("parallel",),
            vmem_limit_bytes=_derive_vmem_limit(m, cxp, c3p, planes_p, guard)),
    )(xp, mask,
      prepped["w1"], prepped["b1"],
      prepped["w2"], prepped["b2"],
      prepped["w3"], prepped["b3"])

    # Drop lane padding / padding ring / flat padding; back to NCHW f32.
    out = out[:, :, :c3].reshape(n, hp, wp, c3)[:, 1:1 + h, 1:1 + w, :]
    return jnp.transpose(out, (0, 3, 1, 2)).astype(jnp.float32)


# --------------------------- pure-JAX reference ---------------------------- #

def reference_forward(x_nchw, params, stride=1, eps=EPS):
    def conv(v, wgt, s, pad):
        return lax.conv_general_dilated(
            v, wgt, window_strides=(s, s), padding=[(pad, pad), (pad, pad)],
            dimension_numbers=("NCHW", "OIHW", "NCHW"))

    def bn(v, g, be, rm, rv):
        sc = g / jnp.sqrt(rv + eps)
        return v * sc.reshape(1, -1, 1, 1) + (be - rm * sc).reshape(1, -1, 1, 1)

    relu = lambda v: jnp.maximum(v, 0.0)
    p = params
    out = relu(bn(conv(x_nchw, p["w1"], 1, 0), p["g1"], p["be1"], p["rm1"], p["rv1"]))
    out = relu(bn(conv(out, p["w2"], stride, 1), p["g2"], p["be2"], p["rm2"], p["rv2"]))
    out = bn(conv(out, p["w3"], 1, 0), p["g3"], p["be3"], p["rm3"], p["rv3"])
    return relu(out + x_nchw)


# ---------------------------------- main ----------------------------------- #

if __name__ == "__main__":
    inplanes, planes = 16, 4          # expansion=4 -> out channels == inplanes
    N, H, W = 2, 16, 16
    stride = 1

    key = jax.random.PRNGKey(0)
    ks = jax.random.split(key, 16)
    params = {
        "w1": 0.1 * jax.random.normal(ks[0], (planes, inplanes, 1, 1), jnp.float32),
        "g1": 1.0 + 0.1 * jax.random.normal(ks[1], (planes,), jnp.float32),
        "be1": 0.1 * jax.random.normal(ks[2], (planes,), jnp.float32),
        "rm1": 0.1 * jax.random.normal(ks[10], (planes,), jnp.float32),
        "rv1": 1.0 + 0.2 * jax.random.uniform(ks[11], (planes,), jnp.float32),
        "w2": 0.1 * jax.random.normal(ks[3], (planes, planes, 3, 3), jnp.float32),
        "g2": 1.0 + 0.1 * jax.random.normal(ks[4], (planes,), jnp.float32),
        "be2": 0.1 * jax.random.normal(ks[5], (planes,), jnp.float32),
        "rm2": 0.1 * jax.random.normal(ks[12], (planes,), jnp.float32),
        "rv2": 1.0 + 0.2 * jax.random.uniform(ks[13], (planes,), jnp.float32),
        "w3": 0.1 * jax.random.normal(ks[6], (planes * 4, planes, 1, 1), jnp.float32),
        "g3": 1.0 + 0.1 * jax.random.normal(ks[7], (planes * 4,), jnp.float32),
        "be3": 0.1 * jax.random.normal(ks[8], (planes * 4,), jnp.float32),
        "rm3": 0.1 * jax.random.normal(ks[14], (planes * 4,), jnp.float32),
        "rv3": 1.0 + 0.2 * jax.random.uniform(ks[15], (planes * 4,), jnp.float32),
    }
    x = jax.random.normal(ks[9], (N, inplanes, H, W), jnp.float32)

    prepped = prepare_params(params)                     # one-time weight prep
    out = bottleneck_forward(x, prepped, stride=stride)
    out = jax.block_until_ready(out)

    ref = reference_forward(x, params, stride=stride)
    # bf16 MXU inputs, bf16-folded BN weights and bf16 writeback -> loosened
    # tolerance vs the f32 reference.
    np.testing.assert_allclose(np.asarray(out), np.asarray(ref),
                               rtol=2e-2, atol=3e-2)
    assert out.shape == (N, planes * 4, H, W)
    print("KERNEL_OK")
</pallas_src>

<mosaic_0001>
module attributes {stable_mosaic.version = 11 : i64} {
  func.func @_bottleneck_kernel(%arg0: i32, %arg1: memref<1x432x128xbf16, #tpu.memory_space<vmem>>, %arg2: memref<432x1xf32, #tpu.memory_space<vmem>>, %arg3: memref<128x128xbf16, #tpu.memory_space<vmem>>, %arg4: memref<1x128xf32, #tpu.memory_space<vmem>>, %arg5: memref<9x128x128xbf16, #tpu.memory_space<vmem>>, %arg6: memref<1x128xf32, #tpu.memory_space<vmem>>, %arg7: memref<128x128xbf16, #tpu.memory_space<vmem>>, %arg8: memref<1x128xf32, #tpu.memory_space<vmem>>, %arg9: memref<1x432x128xbf16, #tpu.memory_space<vmem>>, %arg10: memref<496x128xbf16, #tpu.memory_space<vmem>>) attributes {dimension_semantics = [#tpu.dimension_semantics<parallel>], iteration_bounds = array<i64: 2>, scalar_prefetch = 0 : i64, scratch_operands = 1 : i64, tpu.core_type = #tpu.core_type<tc>, window_params = [{transform_indices = @transform_0, window_bounds = array<i64: 1, 432, 128>}, {pipeline_mode = #tpu.pipeline_mode<synchronous>, transform_indices = @transform_1, window_bounds = array<i64: 432, 1>}, {pipeline_mode = #tpu.pipeline_mode<synchronous>, transform_indices = @transform_2, window_bounds = array<i64: 128, 128>}, {pipeline_mode = #tpu.pipeline_mode<synchronous>, transform_indices = @transform_3, window_bounds = array<i64: 1, 128>}, {pipeline_mode = #tpu.pipeline_mode<synchronous>, transform_indices = @transform_4, window_bounds = array<i64: 9, 128, 128>}, {pipeline_mode = #tpu.pipeline_mode<synchronous>, transform_indices = @transform_5, window_bounds = array<i64: 1, 128>}, {pipeline_mode = #tpu.pipeline_mode<synchronous>, transform_indices = @transform_6, window_bounds = array<i64: 128, 128>}, {pipeline_mode = #tpu.pipeline_mode<synchronous>, transform_indices = @transform_7, window_bounds = array<i64: 1, 128>}, {transform_indices = @transform_8, window_bounds = array<i64: 1, 432, 128>}]} {
    %c0 = arith.constant 0 : index
    %c0_0 = arith.constant 0 : index
    %c0_1 = arith.constant 0 : index
    %0 = vector.load %arg1[%c0, %c0_0, %c0_1] : memref<1x432x128xbf16, #tpu.memory_space<vmem>>, vector<1x432x128xbf16>
    %1 = vector.shape_cast %0 : vector<1x432x128xbf16> to vector<432x128xbf16>
    %c0_2 = arith.constant 0 : index
    %c0_3 = arith.constant 0 : index
    %2 = vector.load %arg2[%c0_2, %c0_3] : memref<432x1xf32, #tpu.memory_space<vmem>>, vector<432x1xf32>
    %c0_4 = arith.constant 0 : index
    %c0_5 = arith.constant 0 : index
    %3 = vector.load %arg3[%c0_4, %c0_5] : memref<128x128xbf16, #tpu.memory_space<vmem>>, vector<128x128xbf16>
    %cst = arith.constant dense<0.000000e+00> : vector<432x128xf32>
    %4 = tpu.matmul %1, %3, %cst {dimension_numbers = #tpu.dot_dimension_numbers<[1], [0], [0], [1], [0, 0, 1, 1], [], []>} : vector<432x128xbf16>, vector<128x128xbf16>, vector<432x128xf32> -> vector<432x128xf32>
    %c0_6 = arith.constant 0 : index
    %c0_7 = arith.constant 0 : index
    %5 = vector.load %arg4[%c0_6, %c0_7] : memref<1x128xf32, #tpu.memory_space<vmem>>, vector<1x128xf32>
    %6 = vector.broadcast %5 : vector<1x128xf32> to vector<432x128xf32>
    %7 = arith.addf %4, %6 : vector<432x128xf32>
    %cst_8 = arith.constant 0.000000e+00 : f32
    %8 = vector.broadcast %cst_8 : f32 to vector<432x128xf32>
    %9 = arith.maximumf %7, %8 : vector<432x128xf32>
    %10 = vector.broadcast %2 : vector<432x1xf32> to vector<432x128xf32>
    %11 = arith.mulf %9, %10 : vector<432x128xf32>
    %cst_9 = arith.constant 0.000000e+00 : bf16
    %12 = vector.broadcast %cst_9 : bf16 to vector<32x128xbf16>
    %c0_10 = arith.constant 0 : index
    %c0_11 = arith.constant 0 : index
    %13 = vector.load %arg10[%c0_10, %c0_11] : memref<496x128xbf16, #tpu.memory_space<vmem>>, vector<32x128xbf16>
    tpu.vector_store %arg10[%c0_10, %c0_11], %12 {strides = array<i32>} : memref<496x128xbf16, #tpu.memory_space<vmem>>, vector<32x128xbf16>,
    %c464 = arith.constant 464 : index
    %c0_12 = arith.constant 0 : index
    %14 = vector.load %arg10[%c464, %c0_12] : memref<496x128xbf16, #tpu.memory_space<vmem>>, vector<32x128xbf16>
    tpu.vector_store %arg10[%c464, %c0_12], %12 {strides = array<i32>} : memref<496x128xbf16, #tpu.memory_space<vmem>>, vector<32x128xbf16>,
    %15 = arith.truncf %11 : vector<432x128xf32> to vector<432x128xbf16>
    %c32 = arith.constant 32 : index
    %c0_13 = arith.constant 0 : index
    %16 = vector.load %arg10[%c32, %c0_13] : memref<496x128xbf16, #tpu.memory_space<vmem>>, vector<432x128xbf16>
    tpu.vector_store %arg10[%c32, %c0_13], %15 {strides = array<i32>} : memref<496x128xbf16, #tpu.memory_space<vmem>>, vector<432x128xbf16>,
    %cst_14 = arith.constant 0.000000e+00 : f32
    %17 = vector.broadcast %cst_14 : f32 to vector<432x128xf32>
    %c7 = arith.constant 7 : index
    %c0_15 = arith.constant 0 : index
    %18 = vector.load %arg10[%c7, %c0_15] : memref<496x128xbf16, #tpu.memory_space<vmem>>, vector<432x128xbf16>
    %c0_16 = arith.constant 0 : index
    %c0_17 = arith.constant 0 : index
    %c0_18 = arith.constant 0 : index
    %19 = vector.load %arg5[%c0_16, %c0_17, %c0_18] : memref<9x128x128xbf16, #tpu.memory_space<vmem>>, vector<1x128x128xbf16>
    %20 = vector.shape_cast %19 : vector<1x128x128xbf16> to vector<128x128xbf16>
    %cst_19 = arith.constant dense<0.000000e+00> : vector<432x128xf32>
    %21 = tpu.matmul %18, %20, %cst_19 {dimension_numbers = #tpu.dot_dimension_numbers<[1], [0], [0], [1], [0, 0, 1, 1], [], []>} : vector<432x128xbf16>, vector<128x128xbf16>, vector<432x128xf32> -> vector<432x128xf32>
    %22 = arith.addf %17, %21 : vector<432x128xf32>
    %c8 = arith.constant 8 : index
    %c0_20 = arith.constant 0 : index
    %23 = vector.load %arg10[%c8, %c0_20] : memref<496x128xbf16, #tpu.memory_space<vmem>>, vector<432x128xbf16>
    %c1 = arith.constant 1 : index
    %c0_21 = arith.constant 0 : index
    %c0_22 = arith.constant 0 : index
    %24 = vector.load %arg5[%c1, %c0_21, %c0_22] : memref<9x128x128xbf16, #tpu.memory_space<vmem>>, vector<1x128x128xbf16>
    %25 = vector.shape_cast %24 : vector<1x128x128xbf16> to vector<128x128xbf16>
    %cst_23 = arith.constant dense<0.000000e+00> : vector<432x128xf32>
    %26 = tpu.matmul %23, %25, %cst_23 {dimension_numbers = #tpu.dot_dimension_numbers<[1], [0], [0], [1], [0, 0, 1, 1], [], []>} : vector<432x128xbf16>, vector<128x128xbf16>, vector<432x128xf32> -> vector<432x128xf32>
    %27 = arith.addf %22, %26 : vector<432x128xf32>
    %c9 = arith.constant 9 : index
    %c0_24 = arith.constant 0 : index
    %28 = vector.load %arg10[%c9, %c0_24] : memref<496x128xbf16, #tpu.memory_space<vmem>>, vector<432x128xbf16>
    %c2 = arith.constant 2 : index
    %c0_25 = arith.constant 0 : index
    %c0_26 = arith.constant 0 : index
    %29 = vector.load %arg5[%c2, %c0_25, %c0_26] : memref<9x128x128xbf16, #tpu.memory_space<vmem>>, vector<1x128x128xbf16>
    %30 = vector.shape_cast %29 : vector<1x128x128xbf16> to vector<128x128xbf16>
    %cst_27 = arith.constant dense<0.000000e+00> : vector<432x128xf32>
    %31 = tpu.matmul %28, %30, %cst_27 {dimension_numbers = #tpu.dot_dimension_numbers<[1], [0], [0], [1], [0, 0, 1, 1], [], []>} : vector<432x128xbf16>, vector<128x128xbf16>, vector<432x128xf32> -> vector<432x128xf32>
    %32 = arith.addf %27, %31 : vector<432x128xf32>
    %c31 = arith.constant 31 : index
    %c0_28 = arith.constant 0 : index
    %33 = vector.load %arg10[%c31, %c0_28] : memref<496x128xbf16, #tpu.memory_space<vmem>>, vector<432x128xbf16>
    %c3 = arith.constant 3 : index
    %c0_29 = arith.constant 0 : index
    %c0_30 = arith.constant 0 : index
    %34 = vector.load %arg5[%c3, %c0_29, %c0_30] : memref<9x128x128xbf16, #tpu.memory_space<vmem>>, vector<1x128x128xbf16>
    %35 = vector.shape_cast %34 : vector<1x128x128xbf16> to vector<128x128xbf16>
    %cst_31 = arith.constant dense<0.000000e+00> : vector<432x128xf32>
    %36 = tpu.matmul %33, %35, %cst_31 {dimension_numbers = #tpu.dot_dimension_numbers<[1], [0], [0], [1], [0, 0, 1, 1], [], []>} : vector<432x128xbf16>, vector<128x128xbf16>, vector<432x128xf32> -> vector<432x128xf32>
    %37 = arith.addf %32, %36 : vector<432x128xf32>
    %c32_32 = arith.constant 32 : index
    %c0_33 = arith.constant 0 : index
    %38 = vector.load %arg10[%c32_32, %c0_33] : memref<496x128xbf16, #tpu.memory_space<vmem>>, vector<432x128xbf16>
    %c4 = arith.constant 4 : index
    %c0_34 = arith.constant 0 : index
    %c0_35 = arith.constant 0 : index
    %39 = vector.load %arg5[%c4, %c0_34, %c0_35] : memref<9x128x128xbf16, #tpu.memory_space<vmem>>, vector<1x128x128xbf16>
    %40 = vector.shape_cast %39 : vector<1x128x128xbf16> to vector<128x128xbf16>
    %cst_36 = arith.constant dense<0.000000e+00> : vector<432x128xf32>
    %41 = tpu.matmul %38, %40, %cst_36 {dimension_numbers = #tpu.dot_dimension_numbers<[1], [0], [0], [1], [0, 0, 1, 1], [], []>} : vector<432x128xbf16>, vector<128x128xbf16>, vector<432x128xf32> -> vector<432x128xf32>
    %42 = arith.addf %37, %41 : vector<432x128xf32>
    %c33 = arith.constant 33 : index
    %c0_37 = arith.constant 0 : index
    %43 = vector.load %arg10[%c33, %c0_37] : memref<496x128xbf16, #tpu.memory_space<vmem>>, vector<432x128xbf16>
    %c5 = arith.constant 5 : index
    %c0_38 = arith.constant 0 : index
    %c0_39 = arith.constant 0 : index
    %44 = vector.load %arg5[%c5, %c0_38, %c0_39] : memref<9x128x128xbf16, #tpu.memory_space<vmem>>, vector<1x128x128xbf16>
    %45 = vector.shape_cast %44 : vector<1x128x128xbf16> to vector<128x128xbf16>
    %cst_40 = arith.constant dense<0.000000e+00> : vector<432x128xf32>
    %46 = tpu.matmul %43, %45, %cst_40 {dimension_numbers = #tpu.dot_dimension_numbers<[1], [0], [0], [1], [0, 0, 1, 1], [], []>} : vector<432x128xbf16>, vector<128x128xbf16>, vector<432x128xf32> -> vector<432x128xf32>
    %47 = arith.addf %42, %46 : vector<432x128xf32>
    %c55 = arith.constant 55 : index
    %c0_41 = arith.constant 0 : index
    %48 = vector.load %arg10[%c55, %c0_41] : memref<496x128xbf16, #tpu.memory_space<vmem>>, vector<432x128xbf16>
    %c6 = arith.constant 6 : index
    %c0_42 = arith.constant 0 : index
    %c0_43 = arith.constant 0 : index
    %49 = vector.load %arg5[%c6, %c0_42, %c0_43] : memref<9x128x128xbf16, #tpu.memory_space<vmem>>, vector<1x128x128xbf16>
    %50 = vector.shape_cast %49 : vector<1x128x128xbf16> to vector<128x128xbf16>
    %cst_44 = arith.constant dense<0.000000e+00> : vector<432x128xf32>
    %51 = tpu.matmul %48, %50, %cst_44 {dimension_numbers = #tpu.dot_dimension_numbers<[1], [0], [0], [1], [0, 0, 1, 1], [], []>} : vector<432x128xbf16>, vector<128x128xbf16>, vector<432x128xf32> -> vector<432x128xf32>
    %52 = arith.addf %47, %51 : vector<432x128xf32>
    %c56 = arith.constant 56 : index
    %c0_45 = arith.constant 0 : index
    %53 = vector.load %arg10[%c56, %c0_45] : memref<496x128xbf16, #tpu.memory_space<vmem>>, vector<432x128xbf16>
    %c7_46 = arith.constant 7 : index
    %c0_47 = arith.constant 0 : index
    %c0_48 = arith.constant 0 : index
    %54 = vector.load %arg5[%c7_46, %c0_47, %c0_48] : memref<9x128x128xbf16, #tpu.memory_space<vmem>>, vector<1x128x128xbf16>
    %55 = vector.shape_cast %54 : vector<1x128x128xbf16> to vector<128x128xbf16>
    %cst_49 = arith.constant dense<0.000000e+00> : vector<432x128xf32>
    %56 = tpu.matmul %53, %55, %cst_49 {dimension_numbers = #tpu.dot_dimension_numbers<[1], [0], [0], [1], [0, 0, 1, 1], [], []>} : vector<432x128xbf16>, vector<128x128xbf16>, vector<432x128xf32> -> vector<432x128xf32>
    %57 = arith.addf %52, %56 : vector<432x128xf32>
    %c57 = arith.constant 57 : index
    %c0_50 = arith.constant 0 : index
    %58 = vector.load %arg10[%c57, %c0_50] : memref<496x128xbf16, #tpu.memory_space<vmem>>, vector<432x128xbf16>
    %c8_51 = arith.constant 8 : index
    %c0_52 = arith.constant 0 : index
    %c0_53 = arith.constant 0 : index
    %59 = vector.load %arg5[%c8_51, %c0_52, %c0_53] : memref<9x128x128xbf16, #tpu.memory_space<vmem>>, vector<1x128x128xbf16>
    %60 = vector.shape_cast %59 : vector<1x128x128xbf16> to vector<128x128xbf16>
    %cst_54 = arith.constant dense<0.000000e+00> : vector<432x128xf32>
    %61 = tpu.matmul %58, %60, %cst_54 {dimension_numbers = #tpu.dot_dimension_numbers<[1], [0], [0], [1], [0, 0, 1, 1], [], []>} : vector<432x128xbf16>, vector<128x128xbf16>, vector<432x128xf32> -> vector<432x128xf32>
    %62 = arith.addf %57, %61 : vector<432x128xf32>
    %c0_55 = arith.constant 0 : index
    %c0_56 = arith.constant 0 : index
    %63 = vector.load %arg6[%c0_55, %c0_56] : memref<1x128xf32, #tpu.memory_space<vmem>>, vector<1x128xf32>
    %64 = vector.broadcast %63 : vector<1x128xf32> to vector<432x128xf32>
    %65 = arith.addf %62, %64 : vector<432x128xf32>
    %cst_57 = arith.constant 0.000000e+00 : f32
    %66 = vector.broadcast %cst_57 : f32 to vector<432x128xf32>
    %67 = arith.maximumf %65, %66 : vector<432x128xf32>
    %68 = arith.truncf %67 : vector<432x128xf32> to vector<432x128xbf16>
    %c0_58 = arith.constant 0 : index
    %c0_59 = arith.constant 0 : index
    %69 = vector.load %arg7[%c0_58, %c0_59] : memref<128x128xbf16, #tpu.memory_space<vmem>>, vector<128x128xbf16>
    %cst_60 = arith.constant dense<0.000000e+00> : vector<432x128xf32>
    %70 = tpu.matmul %68, %69, %cst_60 {dimension_numbers = #tpu.dot_dimension_numbers<[1], [0], [0], [1], [0, 0, 1, 1], [], []>} : vector<432x128xbf16>, vector<128x128xbf16>, vector<432x128xf32> -> vector<432x128xf32>
    %c0_61 = arith.constant 0 : index
    %c0_62 = arith.constant 0 : index
    %71 = vector.load %arg8[%c0_61, %c0_62] : memref<1x128xf32, #tpu.memory_space<vmem>>, vector<1x128xf32>
    %72 = vector.broadcast %71 : vector<1x128xf32> to vector<432x128xf32>
    %73 = arith.addf %70, %72 : vector<432x128xf32>
    %74 = arith.extf %1 : vector<432x128xbf16> to vector<432x128xf32>
    %75 = arith.addf %73, %74 : vector<432x128xf32>
    %cst_63 = arith.constant 0.000000e+00 : f32
    %76 = vector.broadcast %cst_63 : f32 to vector<432x128xf32>
    %77 = arith.maximumf %75, %76 : vector<432x128xf32>
    %78 = arith.truncf %77 : vector<432x128xf32> to vector<432x128xbf16>
    %c0_64 = arith.constant 0 : index
    %c0_65 = arith.constant 0 : index
    %c0_66 = arith.constant 0 : index
    %79 = vector.load %arg9[%c0_64, %c0_65, %c0_66] : memref<1x432x128xbf16, #tpu.memory_space<vmem>>, vector<1x432x128xbf16>
    %80 = vector.shape_cast %79 : vector<1x432x128xbf16> to vector<432x128xbf16>
    %81 = vector.shape_cast %78 : vector<432x128xbf16> to vector<1x432x128xbf16>
    tpu.vector_store %arg9[%c0_64, %c0_65, %c0_66], %81 {strides = array<i32>} : memref<1x432x128xbf16, #tpu.memory_space<vmem>>, vector<1x432x128xbf16>,
    return
  }
  func.func @transform_0(%arg0: i32) -> (i32, i32, i32) {
    %c0_i32 = arith.constant 0 : i32
    %c0_i32_0 = arith.constant 0 : i32
    %c0_i32_1 = arith.constant 0 : i32
    return %arg0, %c0_i32, %c0_i32_0 : i32, i32, i32
  }
  func.func @transform_1(%arg0: i32) -> (i32, i32) {
    %c0_i32 = arith.constant 0 : i32
    %c0_i32_0 = arith.constant 0 : i32
    %c0_i32_1 = arith.constant 0 : i32
    return %c0_i32, %c0_i32_0 : i32, i32
  }
  func.func @transform_2(%arg0: i32) -> (i32, i32) {
    %c0_i32 = arith.constant 0 : i32
    %c0_i32_0 = arith.constant 0 : i32
    %c0_i32_1 = arith.constant 0 : i32
    return %c0_i32, %c0_i32_0 : i32, i32
  }
  func.func @transform_3(%arg0: i32) -> (i32, i32) {
    %c0_i32 = arith.constant 0 : i32
    %c0_i32_0 = arith.constant 0 : i32
    %c0_i32_1 = arith.constant 0 : i32
    return %c0_i32, %c0_i32_0 : i32, i32
  }
  func.func @transform_4(%arg0: i32) -> (i32, i32, i32) {
    %c0_i32 = arith.constant 0 : i32
    %c0_i32_0 = arith.constant 0 : i32
    %c0_i32_1 = arith.constant 0 : i32
    %c0_i32_2 = arith.constant 0 : i32
    return %c0_i32, %c0_i32_0, %c0_i32_1 : i32, i32, i32
  }
  func.func @transform_5(%arg0: i32) -> (i32, i32) {
    %c0_i32 = arith.constant 0 : i32
    %c0_i32_0 = arith.constant 0 : i32
    %c0_i32_1 = arith.constant 0 : i32
    return %c0_i32, %c0_i32_0 : i32, i32
  }
  func.func @transform_6(%arg0: i32) -> (i32, i32) {
    %c0_i32 = arith.constant 0 : i32
    %c0_i32_0 = arith.constant 0 : i32
    %c0_i32_1 = arith.constant 0 : i32
    return %c0_i32, %c0_i32_0 : i32, i32
  }
  func.func @transform_7(%arg0: i32) -> (i32, i32) {
    %c0_i32 = arith.constant 0 : i32
    %c0_i32_0 = arith.constant 0 : i32
    %c0_i32_1 = arith.constant 0 : i32
    return %c0_i32, %c0_i32_0 : i32, i32
  }
  func.func @transform_8(%arg0: i32) -> (i32, i32, i32) {
    %c0_i32 = arith.constant 0 : i32
    %c0_i32_0 = arith.constant 0 : i32
    %c0_i32_1 = arith.constant 0 : i32
    return %arg0, %c0_i32, %c0_i32_0 : i32, i32, i32
  }
}

</mosaic_0001>

<bundles_post_ra>
// kernel: bottleneck_forward.1
= control target key start
LH: loop header
LB: loop body
LE: loop exit
PB: predicated region body
PF: predicated region fallthrough
CT: control target
= control target key end

     0   :  { %s9759_s27 = smov 0   ;;  %s13388_s0 = inlined_call_operand.vmem [shape: bf16[2,432,128], index: 0, kind: input, shape index: {}]   ;;  %s13389_s1 = inlined_call_operand.vmem [shape: f32[432,1], index: 1, kind: input, shape index: {}]   ;;  %s13390_s2 = inlined_call_operand.vmem [shape: bf16[128,128], index: 2, kind: input, shape index: {}]   ;;  %s13391_s3 = inlined_call_operand.vmem [shape: f32[1,128], index: 3, kind: input, shape index: {}]   ;;  %s13392_s4 = inlined_call_operand.vmem [shape: bf16[9,128,128], index: 4, kind: input, shape index: {}]   ;;  %s13393_s5 = inlined_call_operand.vmem [shape: f32[1,128], index: 5, kind: input, shape index: {}]   ;;  %s13394_s6 = inlined_call_operand.vmem [shape: bf16[128,128], index: 6, kind: input, shape index: {}]   ;;  %s13395_s7 = inlined_call_operand.vmem [shape: f32[1,128], index: 7, kind: input, shape index: {}]   ;;  %s13396_s8 = inlined_call_operand.vmem [shape: bf16[2,432,128], index: 8, kind: output, shape index: {}]  }
   0x1 LB: > { %s7172_s28 = sadd.s32 4294967295, %s9709_s27   ;;  %p7176_p0 = scmp.ge.s32.totalorder %s9709_s27, 1  ;;  %s9709_s27 = sphi %s9759_s27, %s18_s27  }
   0x2   : > { %p262_p1 = scmp.lt.s32.totalorder %s9709_s27, 3 }
   0x4   : > { %p263_p2 = pnand %p7176_p0, %p262_p1 }
   0x6   : > { %266 = sbr.rel (%p263_p2) target bundleno = 1786 (0x6fa), region = 52 }
   0xd   : > { %v9475_v0 = vld [vmem:[%s13390_s2] sm:$0xff]   ;;  %v13438_v1 = vmov 0.0   ;;  %v9476_v2 = vld [vmem:[%s13390_s2 + $0x8] sm:$0xff]   ;;  %v9712_v3 = vmov 0   ;;  %v9477_v5 = vld [vmem:[%s13390_s2 + $0x10] sm:$0xff]   ;;  %vm9713_vm0 = vmmov 0  }
   0xe   : > { %8081 = vmatprep.subr.bf16.mxu0 %v13438_v1  ;;  %9445 = vmatprep.subr.bf16.mxu1 %v13438_v1  ;;  %1275 = vst [vmem:[#allocation2] sm:$0xff] %v9712_v3  ;;  %1276 = vst [vmem:[#allocation2 + $0x8] sm:$0xff] %v9712_v3  ;;  %v361_v4 = vld [vmem:[%s13389_s1] sm:$0xff]  ;;  %v362_v6 = vld [vmem:[%s13389_s1 + $0x8] sm:$0xff]  ;;  %p296_p3 = scmp.lt.s32.totalorder %s7172_s28, 1  ;;  %vm1423_vm1 = vcmask 1043456  }
   0xf   : > { %8082 = vmatpush3.bf16.msra.mxu0 %v9475_v0  ;;  %9453 = vmatpush3.bf16.msra.mxu1 %v9475_v0  ;;  %1277 = vst [vmem:[#allocation2 + $0xe8] sm:$0xff] %v9712_v3  ;;  %1278 = vst [vmem:[#allocation2 + $0xf0] sm:$0xff] %v9712_v3  ;;  %v363_v7 = vld [vmem:[%s13389_s1 + $0x10] sm:$0xff]  ;;  %v364_v8 = vld [vmem:[%s13389_s1 + $0x18] sm:$0xff]  ;;  %vm1803_vm2 = vsmask.f32 4352 }
  0x10   : > { %8083 = vmatprep.subr.bf16.mxu0 %v13438_v1  ;;  %9446 = vmatprep.subr.bf16.mxu1 %v13438_v1  ;;  %v9478_v9 = vld [vmem:[%s13390_s2 + $0x18] sm:$0xff]   ;;  %v365_v10 = vld [vmem:[%s13389_s1 + $0x20] sm:$0xff]  ;;  %v366_v11 = vld [vmem:[%s13389_s1 + $0x28] sm:$0xff]  ;;  %s13962_s28 = smov (!%p296_p3, %s7172_s28), 1  ;;  %vm2397_vm3 = vsmask.f32 3328 }
  0x11   : > { %9473 = vset.pattern.permute.xlu0 %v9712_v3  ;;  %9474 = vset.pattern.permute.xlu1 %v9712_v3  ;;  %v9479_v12 = vld [vmem:[%s13390_s2 + $0x20] sm:$0xff]   ;;  %v367_v13 = vld [vmem:[%s13389_s1 + $0x30] sm:$0xff]  ;;  %v368_v14 = vld [vmem:[%s13389_s1 + $0x38] sm:$0xff]  ;;  %s9461_s17 = smul.u32 216, %s13962_s28  ;;  %vm2942_vm4 = vsmask.f32 256 }
  0x12   : > { %953 = vperm.xlu0 %9473, %v361_v4   ;;  %8097 = vmatprep.mubr.msk.bf16.mxu0 %vm9713_vm0, %v13438_v1  ;;  %v9480_v15 = vld [vmem:[%s13390_s2 + $0x28] sm:$0xff]   ;;  %v369_v16 = vld [vmem:[%s13389_s1 + $0x40] sm:$0xff]  ;;  %v9481_v18 = vld [vmem:[%s13390_s2 + $0x30] sm:$0xff]   ;;  %vm3954_vm5 = vsmask.f32 7424 }
  0x13   : > { %8084 = vmatpush3.bf16.msra.mxu0 %v9476_v2  ;;  %9454 = vmatpush3.bf16.msra.mxu1 %v9476_v2  ;;  %v370_v17 = vld [vmem:[%s13389_s1 + $0x48] sm:$0xff]  ;;  %v371_v19 = vld [vmem:[%s13389_s1 + $0x50] sm:$0xff]  ;;  %s9857_s26 = scalar_lea.vmem %s13388_s0, %s9461_s17  ;;  %v9482_v20 = vld [vmem:[%s13390_s2 + $0x38] sm:$0xff]   ;;  %s13279_s13 = scalar_lea.vmem %s13396_s8, %s9461_s17 }
  0x14   : > { %8085 = vmatprep.subr.bf16.mxu0 %v13438_v1  ;;  %9447 = vmatprep.subr.bf16.mxu1 %v13438_v1  ;;  %v372_v21 = vld [vmem:[%s13389_s1 + $0x58] sm:$0xff]  ;;  %v307_v22 = vld [vmem:[%s9857_s26] sm:$0xff]   ;;  %v335_v23 = vld [vmem:[%s9857_s26 + $0x70] sm:$0xff]  }
  0x15   : > { %963 = vperm.xlu1 %9474, %v363_v7   ;;  %8153 = vmatprep.mubr.msk.bf16.mxu1 %vm9713_vm0, %v13438_v1  ;;  %v373_v24 = vld [vmem:[%s13389_s1 + $0x60] sm:$0xff]  ;;  %v374_v25 = vld [vmem:[%s13389_s1 + $0x68] sm:$0xff]  ;;  %v375_v26 = vld [vmem:[%s13389_s1 + $0x70] sm:$0xff] }
  0x16   : > { %958 = vperm.xlu0 %9473, %v362_v6   ;;  %v376_v27 = vld [vmem:[%s13389_s1 + $0x78] sm:$0xff]  ;;  %v309_v28 = vld [vmem:[%s9857_s26 + $0x8] sm:$0xff]   ;;  %v377_v30 = vld [vmem:[%s13389_s1 + $0x80] sm:$0xff] }
  0x17   : > { %8086 = vmatpush3.bf16.msra.mxu0 %v9477_v5  ;;  %9455 = vmatpush3.bf16.msra.mxu1 %v9477_v5  ;;  %v337_v29 = vld [vmem:[%s9857_s26 + $0x78] sm:$0xff]   ;;  %v9510_v31 = vld [vmem:[%s13392_s4 + $0x40] sm:$0xff]   ;;  %v378_v32 = vld [vmem:[%s13389_s1 + $0x88] sm:$0xff] }
  0x18   : > { %8087 = vmatprep.subr.bf16.mxu0 %v13438_v1  ;;  %9448 = vmatprep.subr.bf16.mxu1 %v13438_v1  ;;  %v9511_v33 = vld [vmem:[%s13392_s4 + $0x48] sm:$0xff]   ;;  %v379_v34 = vld [vmem:[%s13389_s1 + $0x90] sm:$0xff]  ;;  %v380_v35 = vld [vmem:[%s13389_s1 + $0x98] sm:$0xff] }
  0x19   : > { %968 = vperm.xlu1 %9474, %v364_v8   ;;  %v311_v36 = vld [vmem:[%s9857_s26 + $0x10] sm:$0xff]   ;;  %v339_v37 = vld [vmem:[%s9857_s26 + $0x80] sm:$0xff]   ;;  %v382_v40 = vld [vmem:[%s13389_s1 + $0xa8] sm:$0xff] }
  0x1a   : > { %973 = vperm.xlu0 %9473, %v365_v10   ;;  %v381_v38 = vld [vmem:[%s13389_s1 + $0xa0] sm:$0xff]  ;;  %v9512_v39 = vld [vmem:[%s13392_s4 + $0x50] sm:$0xff]   ;;  %v384_v42 = vld [vmem:[%s13389_s1 + $0xb8] sm:$0xff] }
  0x1b   : > { %8088 = vmatpush3.bf16.msra.mxu0 %v9478_v9  ;;  %9456 = vmatpush3.bf16.msra.mxu1 %v9478_v9  ;;  %v383_v41 = vld [vmem:[%s13389_s1 + $0xb0] sm:$0xff]  ;;  %v313_v43 = vld [vmem:[%s9857_s26 + $0x18] sm:$0xff]   ;;  %v341_v44 = vld [vmem:[%s9857_s26 + $0x88] sm:$0xff]  }
  0x1c   : > { %8089 = vmatprep.subr.bf16.mxu0 %v13438_v1  ;;  %9449 = vmatprep.subr.bf16.mxu1 %v13438_v1  ;;  %v385_v45 = vld [vmem:[%s13389_s1 + $0xc0] sm:$0xff]  ;;  %v386_v46 = vld [vmem:[%s13389_s1 + $0xc8] sm:$0xff]  ;;  %v387_v47 = vld [vmem:[%s13389_s1 + $0xd0] sm:$0xff] }
  0x1d   : > { %978 = vperm.xlu1 %9474, %v366_v11   ;;  %v9513_v48 = vld [vmem:[%s13392_s4 + $0x58] sm:$0xff]   ;;  %v315_v50 = vld [vmem:[%s9857_s26 + $0x20] sm:$0xff]   ;;  %v343_v51 = vld [vmem:[%s9857_s26 + $0x90] sm:$0xff]  }
  0x1e   : > { %983 = vperm.xlu0 %9473, %v367_v13   ;;  %v388_v49 = vld [vmem:[%s13389_s1 + $0xd8] sm:$0xff]  ;;  %v389_v52 = vld [vmem:[%s13389_s1 + $0xe0] sm:$0xff]  ;;  %v390_v53 = vld [vmem:[%s13389_s1 + $0xe8] sm:$0xff] }
  0x1f   : > { %8090 = vmatpush3.bf16.msra.mxu0 %v9479_v12  ;;  %9457 = vmatpush3.bf16.msra.mxu1 %v9479_v12  ;;  %v391_v54 = vld [vmem:[%s13389_s1 + $0xf0] sm:$0xff]  ;;  %v392_v55 = vld [vmem:[%s13389_s1 + $0xf8] sm:$0xff]  ;;  %v317_v56 = vld [vmem:[%s9857_s26 + $0x28] sm:$0xff]  }
  0x20   : > { %8091 = vmatprep.subr.bf16.mxu0 %v13438_v1  ;;  %9450 = vmatprep.subr.bf16.mxu1 %v13438_v1  ;;  %v345_v57 = vld [vmem:[%s9857_s26 + $0x98] sm:$0xff]   ;;  %v393_v58 = vld [vmem:[%s13389_s1 + $0x100] sm:$0xff]  ;;  %v394_v59 = vld [vmem:[%s13389_s1 + $0x108] sm:$0xff] }
  0x21   : > { %988 = vperm.xlu1 %9474, %v368_v14   ;;  %v395_v60 = vld [vmem:[%s13389_s1 + $0x110] sm:$0xff]  ;;  %v9514_v61 = vld [vmem:[%s13392_s4 + $0x60] sm:$0xff]   ;;  %v396_v62 = vld [vmem:[%s13389_s1 + $0x118] sm:$0xff] }
  0x22   : > { %993 = vperm.xlu0 %9473, %v369_v16   ;;  %v319_v63 = vld [vmem:[%s9857_s26 + $0x30] sm:$0xff]   ;;  %v347_v0 = vld [vmem:[%s9857_s26 + $0xa0] sm:$0xff]   ;;  %v398_v4 = vld [vmem:[%s13389_s1 + $0x128] sm:$0xff] }
  0x23   : > { %8092 = vmatpush3.bf16.msra.mxu0 %v9480_v15  ;;  %9458 = vmatpush3.bf16.msra.mxu1 %v9480_v15  ;;  %v397_v2 = vld [vmem:[%s13389_s1 + $0x120] sm:$0xff]  ;;  %v399_v5 = vld [vmem:[%s13389_s1 + $0x130] sm:$0xff]  ;;  %v400_v6 = vld [vmem:[%s13389_s1 + $0x138] sm:$0xff] }
  0x24   : > { %8093 = vmatprep.subr.bf16.mxu0 %v13438_v1  ;;  %9451 = vmatprep.subr.bf16.mxu1 %v13438_v1  ;;  %v321_v7 = vld [vmem:[%s9857_s26 + $0x38] sm:$0xff]   ;;  %v349_v8 = vld [vmem:[%s9857_s26 + $0xa8] sm:$0xff]   ;;  %v401_v9 = vld [vmem:[%s13389_s1 + $0x140] sm:$0xff] }
  0x25   : > { %998 = vperm.xlu1 %9474, %v370_v17   ;;  %v9515_v10 = vld [vmem:[%s13392_s4 + $0x68] sm:$0xff]   ;;  %v403_v12 = vld [vmem:[%s13389_s1 + $0x150] sm:$0xff]  ;;  %v9516_v13 = vld [vmem:[%s13392_s4] sm:$0xff]  }
  0x26   : > { %1003 = vperm.xlu0 %9473, %v371_v19   ;;  %v402_v11 = vld [vmem:[%s13389_s1 + $0x148] sm:$0xff]  ;;  %v404_v14 = vld [vmem:[%s13389_s1 + $0x158] sm:$0xff]  ;;  %v323_v15 = vld [vmem:[%s9857_s26 + $0x40] sm:$0xff]  }
  0x27   : > { %8094 = vmatpush3.bf16.msra.mxu0 %v9481_v18  ;;  %9459 = vmatpush3.bf16.msra.mxu1 %v9481_v18  ;;  %v351_v16 = vld [vmem:[%s9857_s26 + $0xb0] sm:$0xff]   ;;  %v9517_v17 = vld [vmem:[%s13392_s4 + $0x8] sm:$0xff]   ;;  %v405_v18 = vld [vmem:[%s13389_s1 + $0x160] sm:$0xff] }
  0x28   : > { %8095 = vmatprep.subr.bf16.mxu0 %v13438_v1  ;;  %9452 = vmatprep.subr.bf16.mxu1 %v13438_v1  ;;  %v406_v19 = vld [vmem:[%s13389_s1 + $0x168] sm:$0xff] }
  0x29   : > { %1008 = vperm.xlu1 %9474, %v372_v21   ;;  %v9519_v21 = vld [vmem:[%s13392_s4 + $0x10] sm:$0xff]  }
  0x2a   : > { %1013 = vperm.xlu0 %9473, %v373_v24   ;;  %v325_v24 = vld [vmem:[%s9857_s26 + $0x48] sm:$0xff]  }
  0x2b   : > { %8096 = vmatpush3.bf16.msra.mxu0 %v9482_v20  ;;  %9460 = vmatpush3.bf16.msra.mxu1 %v9482_v20  ;;  %v9518_v20 = vld [vmem:[%s13392_s4 + $0x70] sm:$0xff]  }
  0x2c   : > { %8205 = vmatprep.subr.bf16.mxu1 %v13438_v1  ;;  %8329 = vmatprep.subr.bf16.mxu0 %v13438_v1 }
  0x2d   : > { %1018 = vperm.xlu1 %9474, %v374_v25   ;;  %v353_v25 = vld [vmem:[%s9857_s26 + $0xb8] sm:$0xff]  }
  0x2e   : > { %8098 = vmatmul.mubr.bf16.vlgmr.msra.gmra.mrb[0].mxu0 %v307_v22  ;;  %8154 = vmatmul.mubr.bf16.vlgmr.msra.gmra.mrb[0].mxu1 %v335_v23  ;;  %v407_v22 = vld [vmem:[%s13389_s1 + $0x170] sm:$0xff]  ;;  %v408_v23 = vld [vmem:[%s13389_s1 + $0x178] sm:$0xff] }
  0x2f   : > { %8101 = vmatprep.mubr.msk.bf16.mxu0 %vm9713_vm0, %v13438_v1  ;;  %8157 = vmatprep.mubr.msk.bf16.mxu1 %vm9713_vm0, %v13438_v1 }
  0x30   : > { %1023 = vperm.xlu0 %9473, %v375_v26   ;;  %8206 = vmatpush3.bf16.msra.mxu1 %v9510_v31  ;;  %v9520_v26 = vld [vmem:[%s13392_s4 + $0x18] sm:$0xff]  }
  0x31   : > { %1028 = vperm.xlu1 %9474, %v376_v27   ;;  %8207 = vmatprep.subr.bf16.mxu1 %v13438_v1  ;;  %v409_v27 = vld [vmem:[%s13389_s1 + $0x180] sm:$0xff]  ;;  %v412_v31 = vld [vmem:[%s13389_s1 + $0x198] sm:$0xff] }
  0x32   : > { %8330 = vmatpush3.bf16.msra.mxu0 %v9516_v13 }
  0x33   : > { %8331 = vmatprep.subr.bf16.mxu0 %v13438_v1 }
  0x34   : > { %1033 = vperm.xlu0 %9473, %v377_v30   ;;  %8208 = vmatpush3.bf16.msra.mxu1 %v9511_v33  ;;  %v411_v30 = vld [vmem:[%s13389_s1 + $0x190] sm:$0xff]  ;;  %v355_v33 = vld [vmem:[%s9857_s26 + $0xc0] sm:$0xff]  }
  0x35   : > { %1038 = vperm.xlu1 %9474, %v378_v32   ;;  %8209 = vmatprep.subr.bf16.mxu1 %v13438_v1  ;;  %v327_v32 = vld [vmem:[%s9857_s26 + $0x50] sm:$0xff]  }
  0x36   : > { %8102 = vmatmul.mubr.bf16.gmra.mrb[4].mxu0 %v309_v28  ;;  %8158 = vmatmul.mubr.bf16.gmra.mrb[4].mxu1 %v337_v29  ;;  %v410_v28 = vld [vmem:[%s13389_s1 + $0x188] sm:$0xff]  ;;  %v9521_v29 = vld [vmem:[%s13392_s4 + $0x20] sm:$0xff]  }
  0x37   : > { %8105 = vmatprep.mubr.msk.bf16.mxu0 %vm9713_vm0, %v13438_v1  ;;  %8161 = vmatprep.mubr.msk.bf16.mxu1 %vm9713_vm0, %v13438_v1 }
  0x38   : > { %1043 = vperm.xlu0 %9473, %v379_v34   ;;  %8210 = vmatpush3.bf16.msra.mxu1 %v9512_v39  ;;  %v9523_v34 = vld [vmem:[%s13392_s4 + $0x28] sm:$0xff]  }
  0x39   : > { %1048 = vperm.xlu1 %9474, %v380_v35   ;;  %8211 = vmatprep.subr.bf16.mxu1 %v13438_v1  ;;  %v413_v35 = vld [vmem:[%s13389_s1 + $0x1a0] sm:$0xff]  ;;  %v357_v39 = vld [vmem:[%s9857_s26 + $0xc8] sm:$0xff]  }
  0x3a   : > { %8332 = vmatpush3.bf16.msra.mxu0 %v9517_v17 }
  0x3b   : > { %8333 = vmatprep.subr.bf16.mxu0 %v13438_v1 }
  0x3c   : > { %1053 = vperm.xlu0 %9473, %v381_v38   ;;  %8212 = vmatpush3.bf16.msra.mxu1 %v9513_v48  ;;  %v329_v38 = vld [vmem:[%s9857_s26 + $0x58] sm:$0xff]   ;;  %v333_v48 = vld [vmem:[%s9857_s26 + $0x68] sm:$0xff]  }
  0x3d   : > { %1058 = vperm.xlu1 %9474, %v382_v40   ;;  %8213 = vmatprep.subr.bf16.mxu1 %v13438_v1  ;;  %v9522_v40 = vld [vmem:[%s13392_s4 + $0x78] sm:$0xff]  }
  0x3e   : > { %8106 = vmatmul.mubr.bf16.gmra.mrb[8].mxu0 %v311_v36  ;;  %8162 = vmatmul.mubr.bf16.gmra.mrb[8].mxu1 %v339_v37  ;;  %v414_v36 = vld [vmem:[%s13389_s1 + $0x1a8] sm:$0xff]  ;;  %v9524_v37 = vld [vmem:[%s13392_s4 + $0x30] sm:$0xff]  }
  0x3f   : > { %8109 = vmatprep.mubr.msk.bf16.mxu0 %vm9713_vm0, %v13438_v1  ;;  %8165 = vmatprep.mubr.msk.bf16.mxu1 %vm9713_vm0, %v13438_v1 }
  0x40   : > { %1063 = vperm.xlu0 %9473, %v383_v41   ;;  %8214 = vmatpush3.bf16.msra.mxu1 %v9514_v61  ;;  %v9525_v41 = vld [vmem:[%s13392_s4 + $0x38] sm:$0xff]   ;;  %v9527_v61 = vld [vmem:[%s13392_s4 + $0x88] sm:$0xff]  }
  0x41   : > { %1068 = vperm.xlu1 %9474, %v384_v42   ;;  %8215 = vmatprep.subr.bf16.mxu1 %v13438_v1  ;;  %v331_v42 = vld [vmem:[%s9857_s26 + $0x60] sm:$0xff]  }
  0x42   : > { %8334 = vmatpush3.bf16.msra.mxu0 %v9519_v21 }
  0x43   : > { %8335 = vmatprep.subr.bf16.mxu0 %v13438_v1 }
  0x44   : > { %1073 = vperm.xlu0 %9473, %v385_v45   ;;  %8216 = vmatpush3.bf16.msra.mxu1 %v9515_v10  ;;  %v1377_v45 = vld [vmem:[#allocation2] sm:$0xf0] }
  0x45   : > { %1078 = vperm.xlu1 %9474, %v386_v46   ;;  %8217 = vmatprep.subr.bf16.mxu1 %v13438_v1 }
  0x46   : > { %8110 = vmatmul.mubr.bf16.gmra.mrb[12].mxu0 %v313_v43  ;;  %8166 = vmatmul.mubr.bf16.gmra.mrb[12].mxu1 %v341_v44  ;;  %v359_v43 = vld [vmem:[%s9857_s26 + $0xd0] sm:$0xff]   ;;  %v1333_v44 = vld [vmem:[#allocation2] sm:$0xf8] }
  0x47   : > { %8113 = vmatprep.mubr.msk.bf16.mxu0 %vm9713_vm0, %v13438_v1  ;;  %8169 = vmatprep.mubr.msk.bf16.mxu1 %vm9713_vm0, %v13438_v1  ;;  %v1805_v46 = vshrl.u32 %v1333_v44, 16 }
  0x48   : > { %1083 = vperm.xlu0 %9473, %v387_v47   ;;  %8218 = vmatpush3.bf16.msra.mxu1 %v9518_v20  ;;  %v1808_v47 = vshll.u32 %v1333_v44, 16 }
  0x49   : > { %1088 = vperm.xlu1 %9474, %v388_v49   ;;  %8219 = vmatprep.subr.bf16.mxu1 %v13438_v1  ;;  %v1424_v49 = vrot.slane %v1377_v45, 4 }
  0x4a   : > { %8336 = vmatpush3.bf16.msra.mxu0 %v9520_v26 }
  0x4b   : > { %8337 = vmatprep.subr.bf16.mxu0 %v13438_v1 }
  0x4c   : > { %1093 = vperm.xlu0 %9473, %v389_v52   ;;  %8220 = vmatpush3.bf16.msra.mxu1 %v9522_v40 }
  0x4d   : > { %1098 = vperm.xlu1 %9474, %v390_v53   ;;  %8453 = vmatprep.subr.bf16.mxu1 %v13438_v1  ;;  %v1810_v53 = vrot.slane %v1808_v47, 4 }
  0x4e   : > { %8114 = vmatmul.mubr.bf16.gmra.mrb[16].mxu0 %v315_v50  ;;  %8170 = vmatmul.mubr.bf16.gmra.mrb[16].mxu1 %v343_v51  ;;  %v10139_v50 = vrot.slane %v9712_v3, 4  ;;  %v1807_v51 = vrot.slane %v1805_v46, 3 }
  0x4f   : > { %8117 = vmatprep.mubr.msk.bf16.mxu0 %vm9713_vm0, %v13438_v1  ;;  %8173 = vmatprep.mubr.msk.bf16.mxu1 %vm9713_vm0, %v13438_v1 }
  0x50   : > { %1103 = vperm.xlu0 %9473, %v391_v54   ;;  %8338 = vmatpush3.bf16.msra.mxu0 %v9521_v29  ;;  %v1426_v52 = vsel %vm1423_vm1, %v1424_v49, %v10139_v50  ;;  %v1815_v54 = vrot.slane %v9712_v3, 3 }
  0x51   : > { %1108 = vperm.xlu1 %9474, %v392_v55   ;;  %8339 = vmatprep.subr.bf16.mxu0 %v13438_v1  ;;  %v9526_v55 = vld [vmem:[%s13392_s4 + $0x80] sm:$0xff]  }
  0x54   : > { %1113 = vperm.xlu0 %9473, %v393_v58   ;;  %8340 = vmatpush3.bf16.msra.mxu0 %v9523_v34 }
  0x55   : > { %1118 = vperm.xlu1 %9474, %v394_v59   ;;  %8341 = vmatprep.subr.bf16.mxu0 %v13438_v1  ;;  %v2407_v59 = vrot.slane %v9712_v3, 5 }
  0x56   : > { %8118 = vmatmul.mubr.bf16.gmra.mrb[20].mxu0 %v317_v56  ;;  %8174 = vmatmul.mubr.bf16.gmra.mrb[20].mxu1 %v345_v57  ;;  %v1811_v56 = vor.u32 %v1810_v53, %v1807_v51  ;;  %v10150_v57 = vor.u32 %v1815_v54, %v10139_v50 }
  0x57   : > { %8121 = vmatprep.mubr.msk.bf16.mxu0 %vm9713_vm0, %v13438_v1  ;;  %8177 = vmatprep.mubr.msk.bf16.mxu1 %vm9713_vm0, %v13438_v1 }
  0x58   : > { %1123 = vperm.xlu0 %9473, %v395_v60   ;;  %8342 = vmatpush3.bf16.msra.mxu0 %v9524_v37  ;;  %v1820_v58 = vsel %vm1803_vm2, %v1811_v56, %v10150_v57  ;;  %v10159_v60 = vor.u32 %v2407_v59, %v10139_v50 }
  0x59   : > { %1128 = vperm.xlu1 %9474, %v396_v62   ;;  %8343 = vmatprep.subr.bf16.mxu0 %v13438_v1 }
  0x5c   : > { %1133 = vperm.xlu0 %9473, %v397_v2   ;;  %8344 = vmatpush3.bf16.msra.mxu0 %v9525_v41 }
  0x5d   : > { %1138 = vperm.xlu1 %9474, %v398_v4   ;;  %8577 = vmatprep.subr.bf16.mxu0 %v13438_v1 }
  0x5e   : > { %8122 = vmatmul.mubr.bf16.gmra.mrb[24].mxu0 %v319_v63  ;;  %8178 = vmatmul.mubr.bf16.gmra.mrb[24].mxu1 %v347_v0 }
  0x5f   : > { %8125 = vmatprep.mubr.msk.bf16.mxu0 %vm9713_vm0, %v13438_v1  ;;  %8181 = vmatprep.mubr.msk.bf16.mxu1 %vm9713_vm0, %v13438_v1 }
  0x60   : > { %1143 = vperm.xlu0 %9473, %v399_v5  }
  0x61   : > { %1148 = vperm.xlu1 %9474, %v400_v6  }
  0x64   : > { %1153 = vperm.xlu0 %9473, %v401_v9   ;;  %v9528_v9 = vld [vmem:[%s13392_s4 + $0x90] sm:$0xff]  }
  0x65   : > { %1158 = vperm.xlu1 %9474, %v402_v11  }
  0x66   : > { %8126 = vmatmul.mubr.bf16.gmra.mrb[28].mxu0 %v321_v7  ;;  %8182 = vmatmul.mubr.bf16.gmra.mrb[28].mxu1 %v349_v8 }
  0x67   : > { %8129 = vmatprep.mubr.msk.bf16.mxu0 %vm9713_vm0, %v13438_v1  ;;  %8185 = vmatprep.mubr.msk.bf16.mxu1 %vm9713_vm0, %v13438_v1 }
  0x68   : > { %1163 = vperm.xlu0 %9473, %v403_v12  }
  0x69   : > { %1168 = vperm.xlu1 %9474, %v404_v14  }
  0x6c   : > { %1173 = vperm.xlu0 %9473, %v405_v18   ;;  %v9529_v18 = vld [vmem:[%s13392_s4 + $0x98] sm:$0xff]  }
  0x6d   : > { %1178 = vperm.xlu1 %9474, %v406_v19  }
  0x6e   : > { %8130 = vmatmul.mubr.bf16.gmra.mrb[32].mxu0 %v323_v15  ;;  %8186 = vmatmul.mubr.bf16.gmra.mrb[32].mxu1 %v351_v16 }
  0x6f   : > { %8133 = vmatprep.mubr.msk.bf16.mxu0 %vm9713_vm0, %v13438_v1  ;;  %8189 = vmatprep.mubr.msk.bf16.mxu1 %vm9713_vm0, %v13438_v1 }
  0x70   : > { %1183 = vperm.xlu0 %9473, %v407_v22  }
  0x71   : > { %1188 = vperm.xlu1 %9474, %v408_v23  }
  0x74   : > { %1193 = vperm.xlu0 %9473, %v409_v27  }
  0x75   : > { %1198 = vperm.xlu1 %9474, %v410_v28   ;;  %v10230_v28 = vld [vmem:[%s13391_s3] ss:$0 sm:$0xff] }
  0x76   : > { %8134 = vmatmul.mubr.bf16.gmra.mrb[36].mxu0 %v325_v24  ;;  %8190 = vmatmul.mubr.bf16.gmra.mrb[36].mxu1 %v353_v25  ;;  %v9530_v25 = vld [vmem:[%s13392_s4 + $0xa0] sm:$0xff]  }
  0x77   : > { %8137 = vmatprep.mubr.msk.bf16.mxu0 %vm9713_vm0, %v13438_v1  ;;  %8193 = vmatprep.mubr.msk.bf16.mxu1 %vm9713_vm0, %v13438_v1 }
  0x78   : > { %1203 = vperm.xlu0 %9473, %v411_v30  }
  0x79   : > { %1208 = vperm.xlu1 %9474, %v412_v31  }
  0x7c   : > { %1213 = vperm.xlu0 %9473, %v413_v35  }
  0x7d   : > { %1218 = vperm.xlu1 %9474, %v414_v36  }
  0x7e   : > { %8138 = vmatmul.mubr.bf16.gmra.mrb[40].mxu0 %v327_v32  ;;  %8194 = vmatmul.mubr.bf16.gmra.mrb[40].mxu1 %v355_v33 }
  0x7f   : > { %8141 = vmatprep.mubr.msk.bf16.mxu0 %vm9713_vm0, %v13438_v1  ;;  %8197 = vmatprep.mubr.msk.bf16.mxu1 %vm9713_vm0, %v13438_v1 }
  0x86   : > { %8142 = vmatmul.mubr.bf16.gmra.mrb[44].mxu0 %v329_v38  ;;  %8198 = vmatmul.mubr.bf16.gmra.mrb[44].mxu1 %v357_v39 }
  0x87   : > { %8145 = vmatprep.mubr.msk.bf16.mxu0 %vm9713_vm0, %v13438_v1  ;;  %8201 = vmatprep.mubr.msk.bf16.mxu1 %vm9713_vm0, %v13438_v1 }
  0x8e   : > { %8146 = vmatmul.mubr.bf16.gmra.mrb[48].mxu0 %v331_v42  ;;  %8202 = vmatmul.mubr.bf16.gmra.mrb[48].mxu1 %v359_v43 }
  0x8f   : > { %8149 = vmatprep.mubr.msk.bf16.mxu0 %vm9713_vm0, %v13438_v1  ;;  %8221 = vmatprep.mubr.msk.bf16.mxu1 %vm9713_vm0, %v13438_v1 }
  0x91   : > { %v954_v62 = vpop.permute.xlu0 %953 }
  0x94   : > { %v10167_v63 = vpop.permute.xlu1 %963 }
  0x95   : > { %v959_v0 = vpop.permute.xlu0 %958 }
  0x96   : > { %8150 = vmatmul.mubr.bf16.gmra.mrb[52].mxu0 %v333_v48  ;;  %8222 = vmatmul.mubr.bf16.vlgmr.msra.gmra.mrb[52].mxu1 %v1426_v52 }
  0x97   : > { %8345 = vmatprep.mubr.msk.bf16.mxu0 %vm9713_vm0, %v13438_v1  ;;  %8454 = vmatpush3.bf16.msra.mxu1 %v9526_v55 }
  0x98   : > { %8225 = vmatprep.mubr.msk.bf16.mxu1 %vm9713_vm0, %v13438_v1  ;;  %8455 = vmatprep.subr.bf16.mxu1 %v13438_v1  ;;  %v10169_v2 = vpop.permute.xlu1 %968 }
  0x99   : > { %v10171_v3 = vpop.permute.xlu0 %973 }
  0x9b   : > { %8456 = vmatpush3.bf16.msra.mxu1 %v9527_v61 }
  0x9c   : > { %8457 = vmatprep.subr.bf16.mxu1 %v13438_v1  ;;  %v10173_v4 = vpop.permute.xlu1 %978 }
  0x9d   : > { %v10175_v5 = vpop.permute.xlu0 %983 }
  0x9e   : > { %8346 = vmatmul.mubr.bf16.vlgmr.msra.gmra.mrb[56].mxu0 %v1820_v58 }
  0x9f   : > { %8349 = vmatprep.mubr.msk.bf16.mxu0 %vm9713_vm0, %v13438_v1  ;;  %8458 = vmatpush3.bf16.msra.mxu1 %v9528_v9 }
  0xa0   : > { %v10177_v6 = vpop.permute.xlu1 %988  ;;  %8459 = vmatprep.subr.bf16.mxu1 %v13438_v1 }
  0xa1   : > { %v10179_v7 = vpop.permute.xlu0 %993 }
  0xa3   : > { %8460 = vmatpush3.bf16.msra.mxu1 %v9529_v18 }
  0xa4   : > { %v10181_v8 = vpop.permute.xlu1 %998  ;;  %8461 = vmatprep.subr.bf16.mxu1 %v13438_v1 }
  0xa5   : > { %v10187_v10 = vpop.permute.xlu0 %1003 }
  0xa7   : > { %8462 = vmatpush3.bf16.msra.mxu1 %v9530_v25 }
  0xa8   : > { %v10189_v11 = vpop.permute.xlu1 %1008  ;;  %8463 = vmatprep.subr.bf16.mxu1 %v13438_v1 }
  0xa9   : > { %v10191_v12 = vpop.permute.xlu0 %1013 }
  0xac   : > { %v10193_v13 = vpop.permute.xlu1 %1018 }
  0xaf   : > { %v10195_v14 = vpop.permute.xlu0 %1023 }
  0xb0   : > { %v10197_v15 = vpop.permute.xlu1 %1028 }
  0xb3   : > { %v10199_v16 = vpop.permute.xlu0 %1033 }
  0xb4   : > { %v10201_v17 = vpop.permute.xlu1 %1038 }
  0xb7   : > { %v10207_v19 = vpop.permute.xlu0 %1043 }
  0xb8   : > { %v10209_v20 = vpop.permute.xlu1 %1048 }
  0xbb   : > { %v10211_v21 = vpop.permute.xlu0 %1053 }
  0xbc   : > { %v10213_v22 = vpop.permute.xlu1 %1058 }
  0xbf   : > { %v10215_v23 = vpop.permute.xlu0 %1063 }
  0xc0   : > { %v10217_v24 = vpop.permute.xlu1 %1068 }
  0xc3   : > { %v10223_v26 = vpop.permute.xlu0 %1073 }
  0xc4   : > { %v10225_v27 = vpop.permute.xlu1 %1078 }
  0xc7   : > { %v10232_v29 = vpop.permute.xlu0 %1083 }
  0xc8   : > { %v10234_v30 = vpop.permute.xlu1 %1088 }
  0xcb   : > { %v1094_v47 = vpop.permute.xlu0 %1093 }
  0xcc   : > { %v1099_v48 = vpop.permute.xlu1 %1098 }
 0x101   : > { %v682_v31 = vpop.f32.mrb[0].mxu0  ;;  %v794_v32 = vpop.f32.mrb[0].mxu1 }
 0x102   : > { %v683_v33 = vadd.f32 %v10230_v28, %v682_v31  ;;  %v795_v34 = vadd.f32 %v10230_v28, %v794_v32  ;;  %v8099_v35 = vpop.f32.mrb[1].mxu0  ;;  %v8155_v36 = vpop.f32.mrb[1].mxu1 }
 0x103   : > { %v685_v37 = vpop.f32.mrb[2].mxu0  ;;  %v797_v38 = vpop.f32.mrb[2].mxu1  ;;  %v9531_v36 = vld [vmem:[%s13392_s4 + $0xa8] sm:$0xff]  }
 0x104   : > { %v897_v39 = vmax.f32 %v683_v33, 0.0  ;;  %v925_v40 = vmax.f32 %v795_v34, 0.0  ;;  %v686_v41 = vadd.f32 %v10230_v28, %v685_v37  ;;  %v798_v42 = vadd.f32 %v10230_v28, %v797_v38  ;;  %v8100_v43 = vpop.f32.mrb[3].mxu0  ;;  %v8156_v44 = vpop.f32.mrb[3].mxu1  ;;  %8464 = vmatpush3.bf16.msra.mxu1 %v9531_v36 }
 0x105   : > { %v1104_v43 = vpop.permute.xlu0 %1103  ;;  %v1109_v44 = vpop.permute.xlu1 %1108  ;;  %8465 = vmatprep.subr.bf16.mxu1 %v13438_v1 }
 0x106   : > { %v898_v45 = vmax.f32 %v686_v41, 0.0  ;;  %v926_v46 = vmax.f32 %v798_v42, 0.0  ;;  %v1221_v49 = vmul.f32 %v954_v62, %v897_v39  ;;  %v1249_v51 = vmul.f32 %v1094_v47, %v925_v40 }
 0x108   : > { %v1222_v52 = vmul.f32 %v959_v0, %v898_v45  ;;  %v1250_v53 = vmul.f32 %v1099_v48, %v926_v46 }
 0x109   : > { %v690_v54 = vpop.f32.mrb[4].mxu0  ;;  %v802_v55 = vpop.f32.mrb[4].mxu1 }
 0x10a   : > { %v10240_v56 = vpack.c.bf16 %v1222_v52, %v1221_v49  ;;  %v1293_v58 = vpack.c.bf16 %v1250_v53, %v1249_v51  ;;  %v691_v59 = vadd.f32 %v10230_v28, %v690_v54  ;;  %v803_v61 = vadd.f32 %v10230_v28, %v802_v55  ;;  %v8103_v9 = vpop.f32.mrb[5].mxu0  ;;  %v8159_v18 = vpop.f32.mrb[5].mxu1 }
 0x10b   : > { %v693_v25 = vpop.f32.mrb[6].mxu0  ;;  %v805_v31 = vpop.f32.mrb[6].mxu1 }
 0x10c   : > { %1306 = vst [vmem:[#allocation2 + $0x10] sm:$0xff] %v10240_v56  ;;  %1320 = vst [vmem:[#allocation2 + $0x80] sm:$0xff] %v1293_v58  ;;  %v899_v62 = vmax.f32 %v691_v59, 0.0  ;;  %v927_v32 = vmax.f32 %v803_v61, 0.0  ;;  %v694_v0 = vadd.f32 %v10230_v28, %v693_v25  ;;  %v806_v33 = vadd.f32 %v10230_v28, %v805_v31  ;;  %v8104_v34 = vpop.f32.mrb[7].mxu0  ;;  %v8160_v35 = vpop.f32.mrb[7].mxu1 }
 0x10d   : > { %v1427_v37 = vrot.slane %v10240_v56, 4  ;;  %v1822_v38 = vshrl.u32 %v10240_v56, 16  ;;  %v1825_v39 = vshll.u32 %v10240_v56, 16 }
 0x10e   : > { %v1223_v40 = vmul.f32 %v10167_v63, %v899_v62  ;;  %v900_v41 = vmax.f32 %v694_v0, 0.0  ;;  %v928_v42 = vmax.f32 %v806_v33, 0.0  ;;  %v1251_v49 = vmul.f32 %v1104_v43, %v927_v32  ;;  %v1119_v43 = vpop.permute.xlu1 %1118 }
 0x10f   : > { %v1428_v45 = vsel %vm1423_vm1, %v10139_v50, %v1427_v37  ;;  %v1824_v46 = vrot.slane %v1822_v38, 3  ;;  %v1827_v47 = vrot.slane %v1825_v39, 4  ;;  %v2410_v48 = vrot.slane %v1822_v38, 4 }
 0x110   : > { %v1224_v51 = vmul.f32 %v10169_v2, %v900_v41  ;;  %v1252_v52 = vmul.f32 %v1109_v44, %v928_v42  ;;  %8226 = vmatmul.mubr.bf16.gmra.mrb[56].mxu1 %v1428_v45  ;;  %v2411_v53 = vrot.slane %v1825_v39, 5  ;;  %v1114_v42 = vpop.permute.xlu0 %1113 }
 0x111   : > { %v698_v63 = vpop.f32.mrb[8].mxu0  ;;  %v810_v54 = vpop.f32.mrb[8].mxu1  ;;  %v1828_v55 = vor.u32 %v1827_v47, %v1824_v46  ;;  %8229 = vmatprep.mubr.msk.bf16.mxu1 %vm9713_vm0, %v13438_v1 }
 0x112   : > { %v10260_v56 = vpack.c.bf16 %v1224_v51, %v1223_v40  ;;  %v1294_v50 = vpack.c.bf16 %v1252_v52, %v1251_v49  ;;  %v699_v58 = vadd.f32 %v10230_v28, %v698_v63  ;;  %v811_v59 = vadd.f32 %v10230_v28, %v810_v54  ;;  %v8107_v61 = vpop.f32.mrb[9].mxu0  ;;  %v8163_v9 = vpop.f32.mrb[9].mxu1 }
 0x113   : > { %v701_v18 = vpop.f32.mrb[10].mxu0  ;;  %v813_v2 = vpop.f32.mrb[10].mxu1  ;;  %v1829_v25 = vsel %vm1803_vm2, %v10150_v57, %v1828_v55  ;;  %v10266_v31 = vor.u32 %v2411_v53, %v2410_v48 }
 0x114   : > { %1307 = vst [vmem:[#allocation2 + $0x18] sm:$0xff] %v10260_v56  ;;  %1321 = vst [vmem:[#allocation2 + $0x88] sm:$0xff] %v1294_v50  ;;  %v901_v62 = vmax.f32 %v699_v58, 0.0  ;;  %v929_v32 = vmax.f32 %v811_v59, 0.0  ;;  %v702_v0 = vadd.f32 %v10230_v28, %v701_v18  ;;  %v814_v33 = vadd.f32 %v10230_v28, %v813_v2  ;;  %v8108_v34 = vpop.f32.mrb[11].mxu0  ;;  %v8164_v35 = vpop.f32.mrb[11].mxu1  ;;  %8350 = vmatmul.mubr.bf16.gmra.mrb[60].mxu0 %v1829_v25 }
 0x115   : > { %v1429_v36 = vrot.slane %v10260_v56, 4  ;;  %8353 = vmatprep.mubr.msk.bf16.mxu0 %vm9713_vm0, %v13438_v1  ;;  %v1831_v57 = vshrl.u32 %v10260_v56, 16  ;;  %v1834_v38 = vshll.u32 %v10260_v56, 16 }
 0x116   : > { %v1225_v39 = vmul.f32 %v10171_v3, %v901_v62  ;;  %v902_v40 = vmax.f32 %v702_v0, 0.0  ;;  %v930_v41 = vmax.f32 %v814_v33, 0.0  ;;  %v1253_v47 = vmul.f32 %v1114_v42, %v929_v32 }
 0x117   : > { %v1430_v44 = vsel %vm1423_vm1, %v1427_v37, %v1429_v36  ;;  %v1833_v45 = vrot.slane %v1831_v57, 3  ;;  %v1836_v46 = vrot.slane %v1834_v38, 4  ;;  %v10288_v37 = vsel %vm2397_vm3, %v10159_v60, %v10266_v31 }
 0x118   : > { %v1226_v48 = vmul.f32 %v10173_v4, %v902_v40  ;;  %v1254_v49 = vmul.f32 %v1119_v43, %v930_v41  ;;  %8230 = vmatmul.mubr.bf16.gmra.mrb[60].mxu1 %v1430_v44  ;;  %v1124_v40 = vpop.permute.xlu0 %1123  ;;  %v1129_v41 = vpop.permute.xlu1 %1128 }
 0x119   : > { %v706_v51 = vpop.f32.mrb[12].mxu0  ;;  %v818_v3 = vpop.f32.mrb[12].mxu1  ;;  %v1837_v52 = vor.u32 %v1836_v46, %v1833_v45  ;;  %8233 = vmatprep.mubr.msk.bf16.mxu1 %vm9713_vm0, %v13438_v1 }
 0x11a   : > { %v10290_v53 = vpack.c.bf16 %v1226_v48, %v1225_v39  ;;  %v10292_v63 = vpack.c.bf16 %v1254_v49, %v1253_v47  ;;  %v707_v54 = vadd.f32 %v10230_v28, %v706_v51  ;;  %v819_v4 = vadd.f32 %v10230_v28, %v818_v3  ;;  %v8111_v50 = vpop.f32.mrb[13].mxu0  ;;  %v8167_v58 = vpop.f32.mrb[13].mxu1 }
 0x11b   : > { %v709_v59 = vpop.f32.mrb[14].mxu0  ;;  %v821_v61 = vpop.f32.mrb[14].mxu1  ;;  %v1838_v9 = vsel %vm1803_vm2, %v1828_v55, %v1837_v52 }
 0x11c   : > { %1308 = vst [vmem:[#allocation2 + $0x20] sm:$0xff] %v10290_v53  ;;  %1322 = vst [vmem:[#allocation2 + $0x90] sm:$0xff] %v10292_v63  ;;  %v903_v18 = vmax.f32 %v707_v54, 0.0  ;;  %v931_v2 = vmax.f32 %v819_v4, 0.0  ;;  %v710_v25 = vadd.f32 %v10230_v28, %v709_v59  ;;  %v822_v62 = vadd.f32 %v10230_v28, %v821_v61  ;;  %v8112_v32 = vpop.f32.mrb[15].mxu0  ;;  %v8168_v0 = vpop.f32.mrb[15].mxu1  ;;  %8354 = vmatmul.mubr.bf16.gmra.mrb[64].mxu0 %v1838_v9 }
 0x11d   : > { %v1431_v33 = vrot.slane %v10290_v53, 4  ;;  %8357 = vmatprep.mubr.msk.bf16.mxu0 %vm9713_vm0, %v13438_v1  ;;  %v13404_v55 = vshrl.u32 %v10290_v53, 16  ;;  %v13403_v34 = vshll.u32 %v10290_v53, 16 }
 0x11e   : > { %v904_v35 = vmax.f32 %v710_v25, 0.0  ;;  %v932_v39 = vmax.f32 %v822_v62, 0.0  ;;  %v1227_v45 = vmul.f32 %v10175_v5, %v903_v18  ;;  %v1255_v46 = vmul.f32 %v1124_v40, %v931_v2 }
 0x11f   : > { %v1432_v42 = vsel %vm1423_vm1, %v1429_v36, %v1431_v33  ;;  %v1842_v43 = vrot.slane %v13404_v55, 3  ;;  %v1845_v44 = vrot.slane %v13403_v34, 4 }
 0x120   : > { %v1228_v47 = vmul.f32 %v10177_v6, %v904_v35  ;;  %v1256_v48 = vmul.f32 %v1129_v41, %v932_v39  ;;  %8234 = vmatmul.mubr.bf16.gmra.mrb[64].mxu1 %v1432_v42  ;;  %v1134_v41 = vpop.permute.xlu0 %1133  ;;  %v1139_v42 = vpop.permute.xlu1 %1138 }
 0x121   : > { %v714_v49 = vpop.f32.mrb[16].mxu0  ;;  %v826_v51 = vpop.f32.mrb[16].mxu1  ;;  %v1846_v3 = vor.u32 %v1845_v44, %v1842_v43  ;;  %8237 = vmatprep.mubr.msk.bf16.mxu1 %vm9713_vm0, %v13438_v1 }
 0x122   : > { %v10315_v36 = vpack.c.bf16 %v1228_v47, %v1227_v45  ;;  %v10317_v54 = vpack.c.bf16 %v1256_v48, %v1255_v46  ;;  %v715_v4 = vadd.f32 %v10230_v28, %v714_v49  ;;  %v827_v50 = vadd.f32 %v10230_v28, %v826_v51  ;;  %v8115_v5 = vpop.f32.mrb[17].mxu0  ;;  %v8171_v58 = vpop.f32.mrb[17].mxu1  ;;  %v9532_v51 = vld [vmem:[%s13392_s4 + $0xb0] sm:$0xff]  }
 0x123   : > { %v717_v59 = vpop.f32.mrb[18].mxu0  ;;  %v829_v6 = vpop.f32.mrb[18].mxu1  ;;  %v1847_v61 = vsel %vm1803_vm2, %v1837_v52, %v1846_v3  ;;  %v13405_v5 = vrot.slane %v10292_v63, 4  ;;  %8466 = vmatpush3.bf16.msra.mxu1 %v9532_v51 }
 0x124   : > { %13514 = vst [vmem:[#allocation3_spill] sm:$0xff] %v10317_v54  ;;  %1309 = vst [vmem:[#allocation2 + $0x28] sm:$0xff] %v10315_v36  ;;  %v905_v9 = vmax.f32 %v715_v4, 0.0  ;;  %v933_v18 = vmax.f32 %v827_v50, 0.0  ;;  %v718_v2 = vadd.f32 %v10230_v28, %v717_v59  ;;  %v830_v25 = vadd.f32 %v10230_v28, %v829_v6  ;;  %v8116_v62 = vpop.f32.mrb[19].mxu0  ;;  %v8172_v32 = vpop.f32.mrb[19].mxu1  ;;  %8358 = vmatmul.mubr.bf16.gmra.mrb[68].mxu0 %v1847_v61 }
 0x125   : > { %1323 = vst [vmem:[#allocation2 + $0x98] sm:$0xff] %v10317_v54  ;;  %v1433_v0 = vrot.slane %v10315_v36, 4  ;;  %8361 = vmatprep.mubr.msk.bf16.mxu0 %vm9713_vm0, %v13438_v1  ;;  %v13402_v52 = vshrl.u32 %v10315_v36, 16  ;;  %v13401_v35 = vshll.u32 %v10315_v36, 16  ;;  %v1461_v58 = vrot.slane %v10317_v54, 4  ;;  %8467 = vmatprep.subr.bf16.mxu1 %v13438_v1 }
 0x126   : > { %v906_v39 = vmax.f32 %v718_v2, 0.0  ;;  %v934_v40 = vmax.f32 %v830_v25, 0.0  ;;  %v1229_v46 = vmul.f32 %v10179_v7, %v905_v9  ;;  %v1257_v47 = vmul.f32 %v1134_v41, %v933_v18 }
 0x127   : > { %v1434_v43 = vsel %vm1423_vm1, %v1431_v33, %v1433_v0  ;;  %v1851_v44 = vrot.slane %v13402_v52, 3  ;;  %v1854_v45 = vrot.slane %v13401_v35, 4  ;;  %v10355_v62 = vsel %vm1423_vm1, %v13405_v5, %v1461_v58 }
 0x128   : > { %v1230_v48 = vmul.f32 %v10181_v8, %v906_v39  ;;  %v1258_v49 = vmul.f32 %v1139_v42, %v934_v40  ;;  %8238 = vmatmul.mubr.bf16.gmra.mrb[68].mxu1 %v1434_v43 }
 0x129   : > { %v722_v4 = vpop.f32.mrb[20].mxu0  ;;  %v834_v50 = vpop.f32.mrb[20].mxu1  ;;  %v1855_v33 = vor.u32 %v1854_v45, %v1851_v44  ;;  %8241 = vmatprep.mubr.msk.bf16.mxu1 %vm9713_vm0, %v13438_v1 }
 0x12a   : > { %v10345_v7 = vpack.c.bf16 %v1230_v48, %v1229_v46  ;;  %v10347_v59 = vpack.c.bf16 %v1258_v49, %v1257_v47  ;;  %v723_v8 = vadd.f32 %v10230_v28, %v722_v4  ;;  %v835_v6 = vadd.f32 %v10230_v28, %v834_v50  ;;  %v8119_v61 = vpop.f32.mrb[21].mxu0  ;;  %v8175_v9 = vpop.f32.mrb[21].mxu1 }
 0x12b   : > { %v725_v18 = vpop.f32.mrb[22].mxu0  ;;  %v837_v2 = vpop.f32.mrb[22].mxu1  ;;  %v1856_v25 = vsel %vm1803_vm2, %v1846_v3, %v1855_v33 }
 0x12c   : > { %13515 = vst [vmem:[#allocation4_spill] sm:$0xff] %v10347_v59  ;;  %1310 = vst [vmem:[#allocation2 + $0x30] sm:$0xff] %v10345_v7  ;;  %v907_v32 = vmax.f32 %v723_v8, 0.0  ;;  %v935_v39 = vmax.f32 %v835_v6, 0.0  ;;  %v726_v40 = vadd.f32 %v10230_v28, %v725_v18  ;;  %v838_v41 = vadd.f32 %v10230_v28, %v837_v2  ;;  %v8120_v42 = vpop.f32.mrb[23].mxu0  ;;  %v8176_v43 = vpop.f32.mrb[23].mxu1  ;;  %8362 = vmatmul.mubr.bf16.gmra.mrb[72].mxu0 %v1856_v25 }
 0x12d   : > { %1324 = vst [vmem:[#allocation2 + $0xa0] sm:$0xff] %v10347_v59  ;;  %v1435_v3 = vrot.slane %v10345_v7, 4  ;;  %8365 = vmatprep.mubr.msk.bf16.mxu0 %vm9713_vm0, %v13438_v1  ;;  %v13400_v44 = vshrl.u32 %v10345_v7, 16  ;;  %v13399_v45 = vshll.u32 %v10345_v7, 16  ;;  %v1144_v48 = vpop.permute.xlu0 %1143  ;;  %v1149_v49 = vpop.permute.xlu1 %1148  ;;  %v1463_v18 = vrot.slane %v10347_v59, 4 }
 0x12e   : > { %v908_v46 = vmax.f32 %v726_v40, 0.0  ;;  %v936_v47 = vmax.f32 %v838_v41, 0.0  ;;  %v1231_v51 = vmul.f32 %v10187_v10, %v907_v32  ;;  %v1259_v6 = vmul.f32 %v1144_v48, %v935_v39 }
 0x12f   : > { %v1436_v4 = vsel %vm1423_vm1, %v1433_v0, %v1435_v3  ;;  %v1860_v50 = vrot.slane %v13400_v44, 3  ;;  %v1863_v8 = vrot.slane %v13399_v45, 4 }
 0x130   : > { %v1232_v61 = vmul.f32 %v10189_v11, %v908_v46  ;;  %v1260_v9 = vmul.f32 %v1149_v49, %v936_v47  ;;  %8242 = vmatmul.mubr.bf16.gmra.mrb[72].mxu1 %v1436_v4  ;;  %v10385_v47 = vsel %vm1423_vm1, %v1461_v58, %v1463_v18 }
 0x131   : > { %v730_v2 = vpop.f32.mrb[24].mxu0  ;;  %v842_v25 = vpop.f32.mrb[24].mxu1  ;;  %v1864_v40 = vor.u32 %v1863_v8, %v1860_v50  ;;  %8245 = vmatprep.mubr.msk.bf16.mxu1 %vm9713_vm0, %v13438_v1 }
 0x132   : > { %v10377_v10 = vpack.c.bf16 %v1232_v61, %v1231_v51  ;;  %v10379_v0 = vpack.c.bf16 %v1260_v9, %v1259_v6  ;;  %v731_v32 = vadd.f32 %v10230_v28, %v730_v2  ;;  %v843_v39 = vadd.f32 %v10230_v28, %v842_v25  ;;  %v8123_v41 = vpop.f32.mrb[25].mxu0  ;;  %v8179_v11 = vpop.f32.mrb[25].mxu1 }
 0x133   : > { %v733_v42 = vpop.f32.mrb[26].mxu0  ;;  %v845_v43 = vpop.f32.mrb[26].mxu1  ;;  %v1865_v46 = vsel %vm1803_vm2, %v1855_v33, %v1864_v40 }
 0x134   : > { %13516 = vst [vmem:[#allocation5_spill] sm:$0xff] %v10379_v0  ;;  %1311 = vst [vmem:[#allocation2 + $0x38] sm:$0xff] %v10377_v10  ;;  %v909_v48 = vmax.f32 %v731_v32, 0.0  ;;  %v937_v49 = vmax.f32 %v843_v39, 0.0  ;;  %v734_v51 = vadd.f32 %v10230_v28, %v733_v42  ;;  %v846_v4 = vadd.f32 %v10230_v28, %v845_v43  ;;  %v8124_v50 = vpop.f32.mrb[27].mxu0  ;;  %v8180_v8 = vpop.f32.mrb[27].mxu1  ;;  %8366 = vmatmul.mubr.bf16.gmra.mrb[76].mxu0 %v1865_v46 }
 0x135   : > { %1325 = vst [vmem:[#allocation2 + $0xa8] sm:$0xff] %v10379_v0  ;;  %v1437_v6 = vrot.slane %v10377_v10, 4  ;;  %8369 = vmatprep.mubr.msk.bf16.mxu0 %vm9713_vm0, %v13438_v1  ;;  %v13398_v33 = vshrl.u32 %v10377_v10, 16  ;;  %v13397_v58 = vshll.u32 %v10377_v10, 16  ;;  %v1154_v2 = vpop.permute.xlu0 %1153  ;;  %v1159_v25 = vpop.permute.xlu1 %1158 }
 0x136   : > { %v910_v61 = vmax.f32 %v734_v51, 0.0  ;;  %v938_v9 = vmax.f32 %v846_v4, 0.0  ;;  %v1233_v32 = vmul.f32 %v10191_v12, %v909_v48  ;;  %v1261_v42 = vmul.f32 %v1154_v2, %v937_v49 }
 0x137   : > { %v1438_v39 = vsel %vm1423_vm1, %v1435_v3, %v1437_v6  ;;  %v1869_v41 = vrot.slane %v13398_v33, 3  ;;  %v1872_v11 = vrot.slane %v13397_v58, 4  ;;  %v1465_v51 = vrot.slane %v10379_v0, 4 }
 0x138   : > { %v1234_v43 = vmul.f32 %v10193_v13, %v910_v61  ;;  %v1262_v46 = vmul.f32 %v1159_v25, %v938_v9  ;;  %8246 = vmatmul.mubr.bf16.gmra.mrb[76].mxu1 %v1438_v39 }
 0x139   : > { %v738_v4 = vpop.f32.mrb[28].mxu0  ;;  %v850_v50 = vpop.f32.mrb[28].mxu1  ;;  %v1873_v8 = vor.u32 %v1872_v11, %v1869_v41  ;;  %8249 = vmatprep.mubr.msk.bf16.mxu1 %vm9713_vm0, %v13438_v1  ;;  %v10414_v39 = vsel %vm1423_vm1, %v1463_v18, %v1465_v51 }
 0x13a   : > { %v10406_v12 = vpack.c.bf16 %v1234_v43, %v1233_v32  ;;  %v10408_v3 = vpack.c.bf16 %v1262_v46, %v1261_v42  ;;  %v739_v48 = vadd.f32 %v10230_v28, %v738_v4  ;;  %v851_v49 = vadd.f32 %v10230_v28, %v850_v50  ;;  %v8127_v2 = vpop.f32.mrb[29].mxu0  ;;  %v8183_v13 = vpop.f32.mrb[29].mxu1 }
 0x13b   : > { %v741_v61 = vpop.f32.mrb[30].mxu0  ;;  %v853_v9 = vpop.f32.mrb[30].mxu1  ;;  %v1874_v25 = vsel %vm1803_vm2, %v1864_v40, %v1873_v8 }
 0x13c   : > { %13517 = vst [vmem:[#allocation6_spill] sm:$0xff] %v10408_v3  ;;  %1312 = vst [vmem:[#allocation2 + $0x40] sm:$0xff] %v10406_v12  ;;  %v911_v32 = vmax.f32 %v739_v48, 0.0  ;;  %v939_v41 = vmax.f32 %v851_v49, 0.0  ;;  %v742_v11 = vadd.f32 %v10230_v28, %v741_v61  ;;  %v854_v42 = vadd.f32 %v10230_v28, %v853_v9  ;;  %v8128_v43 = vpop.f32.mrb[31].mxu0  ;;  %v8184_v46 = vpop.f32.mrb[31].mxu1  ;;  %8370 = vmatmul.mubr.bf16.gmra.mrb[80].mxu0 %v1874_v25 }
 0x13d   : > { %1326 = vst [vmem:[#allocation2 + $0xb0] sm:$0xff] %v10408_v3  ;;  %v1439_v4 = vrot.slane %v10406_v12, 4  ;;  %8373 = vmatprep.mubr.msk.bf16.mxu0 %vm9713_vm0, %v13438_v1  ;;  %v13416_v18 = vshrl.u32 %v10406_v12, 16  ;;  %v13412_v40 = vshll.u32 %v10406_v12, 16  ;;  %v1164_v48 = vpop.permute.xlu0 %1163  ;;  %v1169_v49 = vpop.permute.xlu1 %1168 }
 0x13e   : > { %v912_v50 = vmax.f32 %v742_v11, 0.0  ;;  %v940_v2 = vmax.f32 %v854_v42, 0.0  ;;  %v1235_v13 = vmul.f32 %v10195_v14, %v911_v32  ;;  %v1263_v43 = vmul.f32 %v1164_v48, %v939_v41 }
 0x13f   : > { %v1440_v61 = vsel %vm1423_vm1, %v1437_v6, %v1439_v4  ;;  %v1878_v9 = vrot.slane %v13416_v18, 3  ;;  %v1881_v25 = vrot.slane %v13412_v40, 4  ;;  %v1467_v11 = vrot.slane %v10408_v3, 4 }
 0x140   : > { %v1236_v46 = vmul.f32 %v10197_v15, %v912_v50  ;;  %v1264_v58 = vmul.f32 %v1169_v49, %v940_v2  ;;  %8250 = vmatmul.mubr.bf16.gmra.mrb[80].mxu1 %v1440_v61 }
 0x141   : > { %v746_v42 = vpop.f32.mrb[32].mxu0  ;;  %v858_v33 = vpop.f32.mrb[32].mxu1  ;;  %v1882_v45 = vor.u32 %v1881_v25, %v1878_v9  ;;  %8253 = vmatprep.mubr.msk.bf16.mxu1 %vm9713_vm0, %v13438_v1  ;;  %v10445_v61 = vsel %vm1423_vm1, %v1465_v51, %v1467_v11  ;;  %v9534_v51 = vld [vmem:[%s13392_s4 + $0xc0] sm:$0xff]  }
 0x142   : > { %v10435_v14 = vpack.c.bf16 %v1236_v46, %v1235_v13  ;;  %v10437_v6 = vpack.c.bf16 %v1264_v58, %v1263_v43  ;;  %v747_v32 = vadd.f32 %v10230_v28, %v746_v42  ;;  %v859_v41 = vadd.f32 %v10230_v28, %v858_v33  ;;  %v8131_v48 = vpop.f32.mrb[33].mxu0  ;;  %v8187_v15 = vpop.f32.mrb[33].mxu1  ;;  %8578 = vmatpush3.bf16.msra.mxu0 %v9534_v51 }
 0x143   : > { %v749_v50 = vpop.f32.mrb[34].mxu0  ;;  %v861_v2 = vpop.f32.mrb[34].mxu1  ;;  %v1883_v49 = vsel %vm1803_vm2, %v1873_v8, %v1882_v45  ;;  %v9533_v8 = vld [vmem:[%s13392_s4 + $0xb8] sm:$0xff]   ;;  %8579 = vmatprep.subr.bf16.mxu0 %v13438_v1 }
 0x144   : > { %13518 = vst [vmem:[#allocation7_spill] sm:$0xff] %v10437_v6  ;;  %1313 = vst [vmem:[#allocation2 + $0x48] sm:$0xff] %v10435_v14  ;;  %v913_v58 = vmax.f32 %v747_v32, 0.0  ;;  %v941_v13 = vmax.f32 %v859_v41, 0.0  ;;  %v750_v9 = vadd.f32 %v10230_v28, %v749_v50  ;;  %v862_v33 = vadd.f32 %v10230_v28, %v861_v2  ;;  %v8132_v25 = vpop.f32.mrb[35].mxu0  ;;  %v8188_v43 = vpop.f32.mrb[35].mxu1  ;;  %8374 = vmatmul.mubr.bf16.gmra.mrb[84].mxu0 %v1883_v49 }
 0x145   : > { %1327 = vst [vmem:[#allocation2 + $0xb8] sm:$0xff] %v10437_v6  ;;  %v1441_v46 = vrot.slane %v10435_v14, 4  ;;  %8377 = vmatprep.mubr.msk.bf16.mxu0 %vm9713_vm0, %v13438_v1  ;;  %v13411_v42 = vshrl.u32 %v10435_v14, 16  ;;  %v13410_v32 = vshll.u32 %v10435_v14, 16  ;;  %8468 = vmatpush3.bf16.msra.mxu1 %v9533_v8  ;;  %v1174_v15 = vpop.permute.xlu0 %1173  ;;  %v1179_v50 = vpop.permute.xlu1 %1178  ;;  %v1469_v51 = vrot.slane %v10437_v6, 4 }
 0x146   : > { %v914_v41 = vmax.f32 %v750_v9, 0.0  ;;  %v942_v48 = vmax.f32 %v862_v33, 0.0  ;;  %v1237_v2 = vmul.f32 %v10199_v16, %v913_v58  ;;  %8701 = vmatprep.subr.bf16.mxu1 %v13438_v1  ;;  %v1265_v9 = vmul.f32 %v1174_v15, %v941_v13  ;;  %v9535_v16 = vld [vmem:[%s13392_s4 + $0xc8] sm:$0xff]  }
 0x147   : > { %v1442_v49 = vsel %vm1423_vm1, %v1439_v4, %v1441_v46  ;;  %v1887_v25 = vrot.slane %v13411_v42, 3  ;;  %v1890_v43 = vrot.slane %v13410_v32, 4  ;;  %8580 = vmatpush3.bf16.msra.mxu0 %v9535_v16 }
 0x148   : > { %v1238_v33 = vmul.f32 %v10201_v17, %v914_v41  ;;  %v1266_v8 = vmul.f32 %v1179_v50, %v942_v48  ;;  %8254 = vmatmul.mubr.bf16.gmra.mrb[84].mxu1 %v1442_v49  ;;  %8581 = vmatprep.subr.bf16.mxu0 %v13438_v1 }
 0x149   : > { %v754_v4 = vpop.f32.mrb[36].mxu0  ;;  %v866_v58 = vpop.f32.mrb[36].mxu1  ;;  %v1891_v44 = vor.u32 %v1890_v43, %v1887_v25  ;;  %8257 = vmatprep.mubr.msk.bf16.mxu1 %vm9713_vm0, %v13438_v1 }
 0x14a   : > { %v10477_v35 = vpack.c.bf16 %v1238_v33, %v1237_v2  ;;  %v10479_v52 = vpack.c.bf16 %v1266_v8, %v1265_v9  ;;  %v755_v17 = vadd.f32 %v10230_v28, %v754_v4  ;;  %v867_v13 = vadd.f32 %v10230_v28, %v866_v58  ;;  %v8135_v41 = vpop.f32.mrb[37].mxu0  ;;  %v8191_v48 = vpop.f32.mrb[37].mxu1 }
 0x14b   : > { %v757_v15 = vpop.f32.mrb[38].mxu0  ;;  %v869_v50 = vpop.f32.mrb[38].mxu1  ;;  %v1892_v49 = vsel %vm1803_vm2, %v1882_v45, %v1891_v44  ;;  %v10489_v2 = vsel %vm1423_vm1, %v1467_v11, %v1469_v51  ;;  %v9536_v11 = vld [vmem:[%s13392_s4 + $0xd0] sm:$0xff]  }
 0x14c   : > { %13519 = vst [vmem:[#allocation8_spill] sm:$0xff] %v10479_v52  ;;  %1314 = vst [vmem:[#allocation2 + $0x50] sm:$0xff] %v10477_v35  ;;  %v915_v25 = vmax.f32 %v755_v17, 0.0  ;;  %v943_v43 = vmax.f32 %v867_v13, 0.0  ;;  %v758_v9 = vadd.f32 %v10230_v28, %v757_v15  ;;  %v870_v33 = vadd.f32 %v10230_v28, %v869_v50  ;;  %v8136_v45 = vpop.f32.mrb[39].mxu0  ;;  %v8192_v8 = vpop.f32.mrb[39].mxu1  ;;  %8378 = vmatmul.mubr.bf16.gmra.mrb[88].mxu0 %v1892_v49 }
 0x14d   : > { %1328 = vst [vmem:[#allocation2 + $0xc0] sm:$0xff] %v10479_v52  ;;  %v1443_v16 = vrot.slane %v10477_v35, 4  ;;  %8381 = vmatprep.mubr.msk.bf16.mxu0 %vm9713_vm0, %v13438_v1  ;;  %v13409_v4 = vshrl.u32 %v10477_v35, 16  ;;  %v13406_v58 = vshll.u32 %v10477_v35, 16  ;;  %8582 = vmatpush3.bf16.msra.mxu0 %v9536_v11  ;;  %v1184_v41 = vpop.permute.xlu0 %1183  ;;  %v1189_v48 = vpop.permute.xlu1 %1188 }
 0x14e   : > { %v916_v17 = vmax.f32 %v758_v9, 0.0  ;;  %v944_v13 = vmax.f32 %v870_v33, 0.0  ;;  %v1239_v15 = vmul.f32 %v10207_v19, %v915_v25  ;;  %8583 = vmatprep.subr.bf16.mxu0 %v13438_v1  ;;  %v1267_v8 = vmul.f32 %v1184_v41, %v943_v43  ;;  %v9537_v19 = vld [vmem:[%s13392_s4 + $0xd8] sm:$0xff]  }
 0x14f   : > { %v1444_v50 = vsel %vm1423_vm1, %v1441_v46, %v1443_v16  ;;  %v1896_v49 = vrot.slane %v13409_v4, 3  ;;  %v1899_v45 = vrot.slane %v13406_v58, 4  ;;  %v1471_v33 = vrot.slane %v10479_v52, 4 }
 0x150   : > { %v1240_v34 = vmul.f32 %v10209_v20, %v916_v17  ;;  %v1268_v9 = vmul.f32 %v1189_v48, %v944_v13  ;;  %8258 = vmatmul.mubr.bf16.gmra.mrb[88].mxu1 %v1444_v50 }
 0x151   : > { %v762_v46 = vpop.f32.mrb[40].mxu0  ;;  %v874_v25 = vpop.f32.mrb[40].mxu1  ;;  %v1900_v11 = vor.u32 %v1899_v45, %v1896_v49  ;;  %8261 = vmatprep.mubr.msk.bf16.mxu1 %vm9713_vm0, %v13438_v1  ;;  %8584 = vmatpush3.bf16.msra.mxu0 %v9537_v19 }
 0x152   : > { %v10518_v55 = vpack.c.bf16 %v1240_v34, %v1239_v15  ;;  %v10520_v5 = vpack.c.bf16 %v1268_v9, %v1267_v8  ;;  %v763_v20 = vadd.f32 %v10230_v28, %v762_v46  ;;  %v875_v43 = vadd.f32 %v10230_v28, %v874_v25  ;;  %v8139_v17 = vpop.f32.mrb[41].mxu0  ;;  %v8195_v13 = vpop.f32.mrb[41].mxu1  ;;  %8585 = vmatprep.subr.bf16.mxu0 %v13438_v1 }
 0x153   : > { %v765_v41 = vpop.f32.mrb[42].mxu0  ;;  %v877_v48 = vpop.f32.mrb[42].mxu1  ;;  %v1901_v50 = vsel %vm1803_vm2, %v1891_v44, %v1900_v11  ;;  %v10530_v34 = vsel %vm1423_vm1, %v1469_v51, %v1471_v33  ;;  %v9538_v51 = vld [vmem:[%s13392_s4 + $0xe0] sm:$0xff]  }
 0x154   : > { %1315 = vst [vmem:[#allocation2 + $0x58] sm:$0xff] %v10518_v55  ;;  %1329 = vst [vmem:[#allocation2 + $0xc8] sm:$0xff] %v10520_v5  ;;  %v917_v15 = vmax.f32 %v763_v20, 0.0  ;;  %v945_v49 = vmax.f32 %v875_v43, 0.0  ;;  %v766_v45 = vadd.f32 %v10230_v28, %v765_v41  ;;  %v878_v8 = vadd.f32 %v10230_v28, %v877_v48  ;;  %v8140_v44 = vpop.f32.mrb[43].mxu0  ;;  %v8196_v9 = vpop.f32.mrb[43].mxu1  ;;  %8382 = vmatmul.mubr.bf16.gmra.mrb[92].mxu0 %v1901_v50 }
 0x155   : > { %v1445_v19 = vrot.slane %v10518_v55, 4  ;;  %8385 = vmatprep.mubr.msk.bf16.mxu0 %vm9713_vm0, %v13438_v1  ;;  %v13408_v46 = vshrl.u32 %v10518_v55, 16  ;;  %v13407_v25 = vshll.u32 %v10518_v55, 16  ;;  %v1194_v20 = vpop.permute.xlu0 %1193  ;;  %8586 = vmatpush3.bf16.msra.mxu0 %v9538_v51  ;;  %v1199_v41 = vpop.permute.xlu1 %1198 }
 0x156   : > { %v1241_v43 = vmul.f32 %v10211_v21, %v917_v15  ;;  %v918_v17 = vmax.f32 %v766_v45, 0.0  ;;  %v946_v13 = vmax.f32 %v878_v8, 0.0  ;;  %v1269_v48 = vmul.f32 %v1194_v20, %v945_v49  ;;  %8587 = vmatprep.subr.bf16.mxu0 %v13438_v1 }
 0x157   : > { %v1446_v50 = vsel %vm1423_vm1, %v1443_v16, %v1445_v19  ;;  %v1905_v44 = vrot.slane %v13408_v46, 3  ;;  %v1908_v9 = vrot.slane %v13407_v25, 4  ;;  %v1473_v15 = vrot.slane %v10520_v5, 4  ;;  %v9539_v16 = vld [vmem:[%s13392_s4 + $0xe8] sm:$0xff]  }
 0x158   : > { %v1242_v58 = vmul.f32 %v10213_v22, %v918_v17  ;;  %v1270_v21 = vmul.f32 %v1199_v41, %v946_v13  ;;  %8262 = vmatmul.mubr.bf16.gmra.mrb[92].mxu1 %v1446_v50  ;;  %v2029_v49 = vshrl.u32 %v10520_v5, 16  ;;  %v2032_v20 = vshll.u32 %v10520_v5, 16 }
 0x159   : > { %v770_v45 = vpop.f32.mrb[44].mxu0  ;;  %v882_v8 = vpop.f32.mrb[44].mxu1  ;;  %v10560_v51 = vor.u32 %v1908_v9, %v1905_v44  ;;  %8265 = vmatprep.mubr.msk.bf16.mxu1 %vm9713_vm0, %v13438_v1  ;;  %v10567_v22 = vrot.slane %v1831_v57, 4  ;;  %8588 = vmatpush3.bf16.msra.mxu0 %v9539_v16  ;;  %v10582_v57 = vsel %vm1423_vm1, %v1471_v33, %v1473_v15  ;;  %v9540_v33 = vld [vmem:[%s13392_s4 + $0xf0] sm:$0xff]  }
 0x15a   : > { %v10569_v17 = vpack.c.bf16 %v1242_v58, %v1241_v43  ;;  %v10571_v13 = vpack.c.bf16 %v1270_v21, %v1269_v48  ;;  %v771_v41 = vadd.f32 %v10230_v28, %v770_v45  ;;  %v883_v50 = vadd.f32 %v10230_v28, %v882_v8  ;;  %v8143_v25 = vpop.f32.mrb[45].mxu0  ;;  %v8199_v44 = vpop.f32.mrb[45].mxu1  ;;  %8589 = vmatprep.subr.bf16.mxu0 %v13438_v1 }
 0x15b   : > { %v773_v9 = vpop.f32.mrb[46].mxu0  ;;  %v885_v46 = vpop.f32.mrb[46].mxu1  ;;  %v1910_v4 = vsel %vm1803_vm2, %v1900_v11, %v10560_v51  ;;  %v2031_v58 = vrot.slane %v2029_v49, 3  ;;  %v2034_v43 = vrot.slane %v2032_v20, 4 }
 0x15c   : > { %1316 = vst [vmem:[#allocation2 + $0x60] sm:$0xff] %v10569_v17  ;;  %1330 = vst [vmem:[#allocation2 + $0xd0] sm:$0xff] %v10571_v13  ;;  %v919_v25 = vmax.f32 %v771_v41, 0.0  ;;  %v947_v48 = vmax.f32 %v883_v50, 0.0  ;;  %v774_v21 = vadd.f32 %v10230_v28, %v773_v9  ;;  %v886_v11 = vadd.f32 %v10230_v28, %v885_v46  ;;  %v8144_v16 = vpop.f32.mrb[47].mxu0  ;;  %v8200_v45 = vpop.f32.mrb[47].mxu1  ;;  %8386 = vmatmul.mubr.bf16.gmra.mrb[96].mxu0 %v1910_v4 }
 0x15d   : > { %v1447_v8 = vrot.slane %v10569_v17, 4  ;;  %8389 = vmatprep.mubr.msk.bf16.mxu0 %vm9713_vm0, %v13438_v1  ;;  %v13414_v44 = vshrl.u32 %v10569_v17, 16  ;;  %v13413_v41 = vshll.u32 %v10569_v17, 16  ;;  %v10599_v50 = vrot.slane %v1834_v38, 5  ;;  %v1204_v46 = vpop.permute.xlu0 %1203  ;;  %8590 = vmatpush3.bf16.msra.mxu0 %v9540_v33  ;;  %v1209_v32 = vpop.permute.xlu1 %1208 }
 0x15e   : > { %v1243_v4 = vmul.f32 %v10215_v23, %v919_v25  ;;  %v920_v9 = vmax.f32 %v774_v21, 0.0  ;;  %v948_v16 = vmax.f32 %v886_v11, 0.0  ;;  %v10602_v45 = vor.u32 %v2034_v43, %v2031_v58  ;;  %8591 = vmatprep.subr.bf16.mxu0 %v13438_v1 }
 0x15f   : > { %v1271_v42 = vmul.f32 %v1204_v46, %v947_v48  ;;  %v1448_v40 = vsel %vm1423_vm1, %v1445_v19, %v1447_v8  ;;  %v1914_v56 = vrot.slane %v13414_v44, 3  ;;  %v1917_v38 = vrot.slane %v13413_v41, 4 }
 0x160   : > { %v1244_v23 = vmul.f32 %v10217_v24, %v920_v9  ;;  %v1272_v58 = vmul.f32 %v1209_v32, %v948_v16  ;;  %8266 = vmatmul.mubr.bf16.gmra.mrb[96].mxu1 %v1448_v40  ;;  %v2502_v43 = vrot.slane %v2029_v49, 4  ;;  %v2503_v25 = vrot.slane %v2032_v20, 5  ;;  %v9542_v24 = vld [vmem:[%s13392_s4 + $0xf8] sm:$0xff]  }
 0x161   : > { %v778_v48 = vpop.f32.mrb[48].mxu0  ;;  %v890_v21 = vpop.f32.mrb[48].mxu1  ;;  %v10615_v11 = vor.u32 %v1917_v38, %v1914_v56  ;;  %8269 = vmatprep.mubr.msk.bf16.mxu1 %vm9713_vm0, %v13438_v1  ;;  %v13415_v19 = vrot.slane %v10571_v13, 4  ;;  %v2038_v33 = vshrl.u32 %v10571_v13, 16  ;;  %v2041_v46 = vshll.u32 %v10571_v13, 16  ;;  %8592 = vmatpush3.bf16.msra.mxu0 %v9542_v24 }
 0x162   : > { %v10625_v40 = vpack.c.bf16 %v1244_v23, %v1243_v4  ;;  %v1304_v32 = vpack.c.bf16 %v1272_v58, %v1271_v42  ;;  %v779_v49 = vadd.f32 %v10230_v28, %v778_v48  ;;  %v891_v20 = vadd.f32 %v10230_v28, %v890_v21  ;;  %v8147_v9 = vpop.f32.mrb[49].mxu0  ;;  %v8203_v16 = vpop.f32.mrb[49].mxu1  ;;  %8825 = vmatprep.subr.bf16.mxu0 %v13438_v1 }
 0x163   : > { %v781_v56 = vpop.f32.mrb[50].mxu0  ;;  %v893_v38 = vpop.f32.mrb[50].mxu1  ;;  %v1919_v41 = vsel %vm1803_vm2, %v10560_v51, %v10615_v11  ;;  %v10632_v44 = vor.u32 %v2503_v25, %v2502_v43  ;;  %v10639_v42 = vsel %vm1423_vm1, %v1473_v15, %v13415_v19  ;;  %v2040_v4 = vrot.slane %v2038_v33, 3  ;;  %v9617_v51 = vld [vmem:[%s13391_s3] ss:$0 sm:$0xff] }
 0x164   : > { %1317 = vst [vmem:[#allocation2 + $0x68] sm:$0xff] %v10625_v40  ;;  %1331 = vst [vmem:[#allocation2 + $0xd8] sm:$0xff] %v1304_v32  ;;  %v921_v28 = vmax.f32 %v779_v49, 0.0  ;;  %v949_v23 = vmax.f32 %v891_v20, 0.0  ;;  %v782_v58 = vadd.f32 %v9617_v51, %v781_v56  ;;  %v894_v43 = vadd.f32 %v9617_v51, %v893_v38  ;;  %v8148_v25 = vpop.f32.mrb[51].mxu0  ;;  %8390 = vmatmul.mubr.bf16.gmra.mrb[100].mxu0 %v1919_v41  ;;  %v8204_v48 = vpop.f32.mrb[51].mxu1 }
 0x165   : > { %13520 = vst [vmem:[#allocation9_spill] sm:$0xff] %v10632_v44  ;;  %v1214_v5 = vpop.permute.xlu0 %1213  ;;  %v1449_v15 = vrot.slane %v10625_v40, 4  ;;  %8393 = vmatprep.mubr.msk.bf16.mxu0 %vm9713_vm0, %v13438_v1  ;;  %v1921_v21 = vshrl.u32 %v10625_v40, 16  ;;  %v1924_v24 = vshll.u32 %v10625_v40, 16  ;;  %v2043_v32 = vrot.slane %v2041_v46, 4  ;;  %v1219_v41 = vpop.permute.xlu1 %1218 }
 0x166   : > { %v1245_v49 = vmul.f32 %v10223_v26, %v921_v28  ;;  %v1273_v20 = vmul.f32 %v1214_v5, %v949_v23  ;;  %v922_v9 = vmax.f32 %v782_v58, 0.0  ;;  %v950_v16 = vmax.f32 %v894_v43, 0.0 }
 0x167   : > { %v1450_v56 = vsel %vm1423_vm1, %v1447_v8, %v1449_v15  ;;  %v1923_v38 = vrot.slane %v1921_v21, 3  ;;  %v1926_v25 = vrot.slane %v1924_v24, 4  ;;  %v10659_v48 = vor.u32 %v2043_v32, %v2040_v4 }
 0x168   : > { %v1246_v19 = vmul.f32 %v10225_v27, %v922_v9  ;;  %v1274_v18 = vmul.f32 %v1219_v41, %v950_v16  ;;  %8270 = vmatmul.mubr.bf16.gmra.mrb[100].mxu1 %v1450_v56  ;;  %v2506_v26 = vrot.slane %v2038_v33, 4  ;;  %v2507_v28 = vrot.slane %v2041_v46, 5 }
 0x169   : > { %v786_v23 = vpop.f32.mrb[52].mxu0  ;;  %v1927_v58 = vor.u32 %v1926_v25, %v1923_v38  ;;  %8273 = vmatprep.mubr.msk.bf16.mxu1 %vm9713_vm0, %v13438_v1  ;;  %v10667_v8 = vsel %vm1803_vm2, %v10602_v45, %v10659_v48  ;;  %v1588_v43 = vpop.f32.mrb[52].mxu1  ;;  %v10677_v56 = vor.u32 %v10599_v50, %v10567_v22 }
 0x16a   : > { %v10669_v5 = vpack.c.bf16 %v1246_v19, %v1245_v49  ;;  %v1305_v4 = vpack.c.bf16 %v1274_v18, %v1273_v20  ;;  %v787_v32 = vadd.f32 %v9617_v51, %v786_v23  ;;  %v8151_v27 = vpop.f32.mrb[53].mxu0  ;;  %v10671_v9 = vor.u32 %v2507_v28, %v2506_v26  ;;  %v8223_v33 = vpop.f32.mrb[53].mxu1 }
 0x16b   : > { %v789_v46 = vpop.f32.mrb[54].mxu0  ;;  %v1928_v16 = vsel %vm1803_vm2, %v10615_v11, %v1927_v58  ;;  %v1591_v41 = vpop.f32.mrb[54].mxu1 }
 0x16c   : > { %13521 = vst [vmem:[#allocation10_spill] sm:$0xff] %v10671_v9  ;;  %1318 = vst [vmem:[#allocation2 + $0x70] sm:$0xff] %v10669_v5  ;;  %v923_v19 = vmax.f32 %v787_v32, 0.0  ;;  %v790_v49 = vadd.f32 %v9617_v51, %v789_v46  ;;  %v8152_v18 = vpop.f32.mrb[55].mxu0  ;;  %8394 = vmatmul.mubr.bf16.gmra.mrb[104].mxu0 %v1928_v16  ;;  %v1451_v20 = vrot.slane %v10669_v5, 4  ;;  %v1930_v38 = vshrl.u32 %v10669_v5, 16 }
 0x16d   : > { %1332 = vst [vmem:[#allocation2 + $0xe0] sm:$0xff] %v1305_v4  ;;  %v8224_v25 = vpop.f32.mrb[55].mxu1  ;;  %8397 = vmatprep.mubr.msk.bf16.mxu0 %vm9713_vm0, %v13438_v1  ;;  %v13421_v11 = vshll.u32 %v10669_v5, 16  ;;  %v10695_v4 = vsel %vm2397_vm3, %v10266_v31, %v10677_v56 }
 0x16e   : > { %v924_v26 = vmax.f32 %v790_v49, 0.0  ;;  %v1452_v22 = vsel %vm1423_vm1, %v1449_v15, %v1451_v20  ;;  %v1932_v50 = vrot.slane %v1930_v38, 3  ;;  %v1247_v28 = vmul.f32 %v10232_v29, %v923_v19 }
 0x16f   : > { %v1935_v51 = vrot.slane %v13421_v11, 4 }
 0x170   : > { %v1248_v23 = vmul.f32 %v10234_v30, %v924_v26  ;;  %8274 = vmatmul.mubr.bf16.gmra.mrb[104].mxu1 %v1452_v22  ;;  %v10717_v26 = vld [vmem:[#allocation2 + $0x80] sm:$0xff] }
 0x171   : > { %v1936_v32 = vor.u32 %v1935_v51, %v1932_v50  ;;  %8277 = vmatprep.mubr.msk.bf16.mxu1 %vm9713_vm0, %v13438_v1  ;;  %v2164_v15 = vpop.f32.mrb[56].mxu0  ;;  %13524 = vst [vmem:[#allocation13_spill] sm:$0xff] %v10717_v26  ;;  %v13418_v50 = vshll.u32 %v10717_v26, 16 }
 0x172   : > { %v10699_v27 = vpack.c.bf16 %v1248_v23, %v1247_v28  ;;  %v10701_v33 = vadd.f32 %v2164_v15, %v1588_v43  ;;  %v8347_v46 = vpop.f32.mrb[57].mxu0  ;;  %v1455_v28 = vrot.slane %v10717_v26, 4 }
 0x173   : > { %v1937_v29 = vsel %vm1803_vm2, %v1927_v58, %v1936_v32  ;;  %v2167_v16 = vpop.f32.mrb[58].mxu0  ;;  %v1953_v15 = vrot.slane %v13418_v50, 4  ;;  %v13526_v46 = vshrl.u32 %v10406_v12, 16  ;;  %v13529_v50 = vshll.u32 %v10435_v14, 16 }
 0x174   : > { %13522 = vst [vmem:[#allocation11_spill] sm:$0xff] %v10701_v33  ;;  %1319 = vst [vmem:[#allocation2 + $0x78] sm:$0xff] %v10699_v27  ;;  %8398 = vmatmul.mubr.bf16.gmra.mrb[108].mxu0 %v1937_v29  ;;  %v1453_v30 = vrot.slane %v10699_v27, 4  ;;  %v13420_v31 = vshrl.u32 %v10699_v27, 16  ;;  %v13419_v19 = vshll.u32 %v10699_v27, 16  ;;  %v10708_v49 = vadd.f32 %v2167_v16, %v1591_v41  ;;  %v8348_v18 = vpop.f32.mrb[59].mxu0 }
 0x175   : > { %8401 = vmatprep.mubr.msk.bf16.mxu0 %vm9713_vm0, %v13438_v1  ;;  %v13417_v41 = vshrl.u32 %v10717_v26, 16  ;;  %v2434_v29 = vrot.slane %v13526_v46, 4  ;;  %v13527_v18 = vshll.u32 %v10406_v12, 16  ;;  %v13530_v46 = vshrl.u32 %v10477_v35, 16  ;;  %v11160_v33 = vld [vmem:[#allocation2 + $0xd8] sm:$0xff] }
 0x176   : > { %13523 = vst [vmem:[#allocation12_spill] sm:$0xff] %v10708_v49  ;;  %v1454_v43 = vsel %vm1423_vm1, %v1451_v20, %v1453_v30  ;;  %v1941_v58 = vrot.slane %v13420_v31, 3  ;;  %v1944_v25 = vrot.slane %v13419_v19, 4  ;;  %v10724_v20 = vld [vmem:[#allocation2 + $0x88] sm:$0xff]  ;;  %v2439_v19 = vrot.slane %v13529_v50, 5  ;;  %13584 = vst [vmem:[#allocation49_spill] sm:$0xff] %v11160_v33 }
 0x177   : > { %13525 = vst [vmem:[#allocation14_spill] sm:$0xff] %v10724_v20  ;;  %v1950_v23 = vrot.slane %v13417_v41, 3  ;;  %v13423_v16 = vshrl.u32 %v10724_v20, 16  ;;  %v2442_v11 = vrot.slane %v13530_v46, 4  ;;  %v1457_v50 = vrot.slane %v10724_v20, 4 }
 0x178   : > { %8278 = vmatmul.mubr.bf16.gmra.mrb[108].mxu1 %v1454_v43  ;;  %v1945_v22 = vor.u32 %v1944_v25, %v1941_v58  ;;  %v2435_v43 = vrot.slane %v13527_v18, 5  ;;  %v1456_v58 = vsel %vm1423_vm1, %v1453_v30, %v1455_v28  ;;  %v13528_v25 = vshrl.u32 %v10435_v14, 16 }
 0x179   : > { %8281 = vmatprep.mubr.msk.bf16.mxu1 %vm9713_vm0, %v13438_v1  ;;  %v1954_v31 = vor.u32 %v1953_v15, %v1950_v23  ;;  %v1959_v12 = vrot.slane %v13423_v16, 3  ;;  %v13533_v46 = vshll.u32 %v10518_v55, 16 }
 0x17a   : > { %v1946_v51 = vsel %vm1803_vm2, %v1936_v32, %v1945_v22  ;;  %v13422_v32 = vshll.u32 %v10724_v20, 16  ;;  %v10742_v41 = vor.u32 %v2435_v43, %v2434_v29  ;;  %v13531_v29 = vshll.u32 %v10477_v35, 16  ;;  %v10768_v35 = vld [vmem:[#allocation2 + $0x90] sm:$0xff] }
 0x17b   : > { %v1955_v14 = vsel %vm1803_vm2, %v1945_v22, %v1954_v31  ;;  %13534 = vst [vmem:[#allocation15_spill] sm:$0xff] %v10768_v35 }
 0x17c   : > { %8402 = vmatmul.mubr.bf16.gmra.mrb[112].mxu0 %v1946_v51  ;;  %v2438_v51 = vrot.slane %v13528_v25, 4  ;;  %v1962_v30 = vrot.slane %v13422_v32, 4  ;;  %v2443_v43 = vrot.slane %v13531_v29, 5  ;;  %v2447_v32 = vrot.slane %v13533_v46, 5 }
 0x17d   : > { %8405 = vmatprep.mubr.msk.bf16.mxu0 %vm9713_vm0, %v13438_v1 }
 0x17e   : > { %v2440_v18 = vor.u32 %v2439_v19, %v2438_v51  ;;  %v2444_v15 = vor.u32 %v2443_v43, %v2442_v11  ;;  %v13437_v19 = vshrl.u32 %v10768_v35, 16  ;;  %v1963_v22 = vor.u32 %v1962_v30, %v1959_v12 }
 0x17f   : > { %v13535_v11 = vshrl.u32 %v10569_v17, 16  ;;  %v2454_v12 = vrot.slane %v1921_v21, 4  ;;  %v2455_v30 = vrot.slane %v1924_v24, 5 }
 0x180   : > { %8282 = vmatmul.mubr.bf16.gmra.mrb[112].mxu1 %v1456_v58  ;;  %v10760_v23 = vsel %vm2397_vm3, %v10742_v41, %v2440_v18  ;;  %v13532_v58 = vshrl.u32 %v10518_v55, 16  ;;  %v10772_v51 = vsel %vm2397_vm3, %v2440_v18, %v2444_v15  ;;  %v13436_v55 = vshll.u32 %v10768_v35, 16 }
 0x181   : > { %8285 = vmatprep.mubr.msk.bf16.mxu1 %vm9713_vm0, %v13438_v1  ;;  %v2450_v43 = vrot.slane %v13535_v11, 4  ;;  %v2458_v18 = vrot.slane %v1930_v38, 4  ;;  %v13537_v11 = vshll.u32 %v10669_v5, 16  ;;  %v13538_v38 = vshrl.u32 %v10699_v27, 16 }
 0x182   : > { %v2446_v25 = vrot.slane %v13532_v58, 4  ;;  %v13536_v58 = vshll.u32 %v10569_v17, 16  ;;  %v1968_v17 = vrot.slane %v13437_v19, 3  ;;  %v13435_v5 = vshrl.u32 %v10317_v54, 16 }
 0x184   : > { %8406 = vmatmul.mubr.bf16.gmra.mrb[116].mxu0 %v1955_v14  ;;  %v2448_v29 = vor.u32 %v2447_v32, %v2446_v25  ;;  %v1458_v14 = vsel %vm1423_vm1, %v1455_v28, %v1457_v50  ;;  %v2451_v46 = vrot.slane %v13536_v58, 5  ;;  %v1964_v28 = vsel %vm1803_vm2, %v1954_v31, %v1963_v22 }
 0x185   : > { %8409 = vmatprep.mubr.msk.bf16.mxu0 %vm9713_vm0, %v13438_v1  ;;  %v2456_v25 = vor.u32 %v2455_v30, %v2454_v12  ;;  %v2462_v31 = vrot.slane %v13538_v38, 4  ;;  %v10814_v30 = vld [vmem:[#allocation2 + $0x98] sm:$0xff] }
 0x186   : > { %v10781_v16 = vsel %vm2397_vm3, %v2444_v15, %v2448_v29  ;;  %v2452_v32 = vor.u32 %v2451_v46, %v2450_v43  ;;  %v1971_v15 = vrot.slane %v13436_v55, 4  ;;  %v2459_v43 = vrot.slane %v13537_v11, 5  ;;  %13541 = vst [vmem:[#allocation16_spill] sm:$0xff] %v10814_v30 }
 0x187   : > { %v13432_v11 = vshll.u32 %v10347_v59, 16  ;;  %v13554_v55 = vshll.u32 %v10377_v10, 16 }
 0x188   : > { %8286 = vmatmul.mubr.bf16.gmra.mrb[116].mxu1 %v1458_v14  ;;  %v10797_v21 = vsel %vm2397_vm3, %v2448_v29, %v2452_v32  ;;  %v10804_v40 = vsel %vm2397_vm3, %v2452_v32, %v2456_v25  ;;  %v2460_v24 = vor.u32 %v2459_v43, %v2458_v18  ;;  %v13539_v14 = vshll.u32 %v10699_v27, 16 }
 0x189   : > { %8289 = vmatprep.mubr.msk.bf16.mxu1 %vm9713_vm0, %v13438_v1  ;;  %v13540_v29 = vrot.slane %v10292_v63, 4  ;;  %v1972_v12 = vor.u32 %v1971_v15, %v1968_v17 }
 0x18a   : > { %v2463_v58 = vrot.slane %v13539_v14, 5  ;;  %v10818_v32 = vsel %vm2397_vm3, %v2456_v25, %v2460_v24  ;;  %v13433_v25 = vshrl.u32 %v10347_v59, 16 }
 0x18b   : > { %v1460_v46 = vsel %vm1423_vm1, %v1457_v50, %v13540_v29  ;;  %v1973_v27 = vsel %vm1803_vm2, %v1963_v22, %v1972_v12  ;;  %v1977_v50 = vrot.slane %v13435_v5, 3 }
 0x18c   : > { %8410 = vmatmul.mubr.bf16.gmra.mrb[120].mxu0 %v1964_v28  ;;  %v13434_v28 = vshll.u32 %v10814_v30, 16  ;;  %v10820_v18 = vor.u32 %v2463_v58, %v2462_v31  ;;  %v1986_v43 = vrot.slane %v13433_v25, 3  ;;  %v13431_v31 = vshrl.u32 %v10379_v0, 16 }
 0x18d   : > { %8413 = vmatprep.mubr.msk.bf16.mxu0 %vm9713_vm0, %v13438_v1  ;;  %v13549_v25 = vshrl.u32 %v10315_v36, 16 }
 0x18e   : > { %13542 = vst [vmem:[#allocation17_spill] sm:$0xff] %v10820_v18  ;;  %v10826_v63 = vsel %vm2397_vm3, %v2460_v24, %v10820_v18  ;;  %v1980_v17 = vrot.slane %v13434_v28, 4  ;;  %v1989_v24 = vrot.slane %v13432_v11, 4  ;;  %v1995_v58 = vrot.slane %v13431_v31, 3  ;;  %v10984_v28 = vld [vmem:[#allocation2 + $0x50] sm:$0xff] }
 0x190   : > { %8290 = vmatmul.mubr.bf16.gmra.mrb[120].mxu1 %v1460_v46  ;;  %v1981_v15 = vor.u32 %v1980_v17, %v1977_v50  ;;  %v1990_v38 = vor.u32 %v1989_v24, %v1986_v43  ;;  %v10862_v46 = vsel %vm2397_vm3, %v10632_v44, %v10671_v9  ;;  %v13427_v43 = vshrl.u32 %v10437_v6, 16  ;;  %v11136_v9 = vld [vmem:[#allocation2 + $0xb8] sm:$0xff]  ;;  %v11142_v44 = vld [vmem:[#allocation2 + $0xc0] sm:$0xff] }
 0x191   : > { %8293 = vmatprep.mubr.msk.bf16.mxu1 %vm9713_vm0, %v13438_v1  ;;  %13543 = vst [vmem:[#allocation18_spill] sm:$0xff] %v10862_v46  ;;  %13579 = vst [vmem:[#allocation44_spill] sm:$0xff] %v11136_v9  ;;  %v5227_v46 = vld [vmem:[#allocation2 + $0x18] sm:$0xf0] }
 0x192   : > { %v1982_v22 = vsel %vm1803_vm2, %v1972_v12, %v1981_v15  ;;  %v1991_v14 = vsel %vm1803_vm2, %v1981_v15, %v1990_v38  ;;  %v13429_v12 = vshrl.u32 %v10408_v3, 16  ;;  %13580 = vst [vmem:[#allocation45_spill] sm:$0xff] %v11142_v44 }
 0x194   : > { %8414 = vmatmul.mubr.bf16.gmra.mrb[124].mxu0 %v1973_v27  ;;  %v13428_v27 = vshll.u32 %v10408_v3, 16  ;;  %v2004_v17 = vrot.slane %v13429_v12, 3 }
 0x195   : > { %8417 = vmatprep.mubr.msk.bf16.mxu0 %vm9713_vm0, %v13438_v1 }
 0x196   : > { %v2007_v15 = vrot.slane %v13428_v27, 4  ;;  %v10964_v27 = vld [vmem:[#allocation2 + $0x48] sm:$0xff] }
 0x198   : > { %8294 = vmatmul.mubr.bf16.gmra.mrb[124].mxu1 %v10355_v62  ;;  %v13430_v62 = vshll.u32 %v10379_v0, 16 }
 0x199   : > { %8297 = vmatprep.mubr.msk.bf16.mxu1 %vm9713_vm0, %v13438_v1 }
 0x19a   : > { %v1998_v29 = vrot.slane %v13430_v62, 4  ;;  %v3004_v62 = vshrl.u32 %v10964_v27, 16 }
 0x19c   : > { %8418 = vmatmul.mubr.bf16.gmra.mrb[128].mxu0 %v1982_v22  ;;  %v2008_v22 = vor.u32 %v2007_v15, %v2004_v17 }
 0x19d   : > { %8421 = vmatprep.mubr.msk.bf16.mxu0 %vm9713_vm0, %v13438_v1 }
 0x1a0   : > { %8298 = vmatmul.mubr.bf16.gmra.mrb[128].mxu1 %v10385_v47  ;;  %v1999_v47 = vor.u32 %v1998_v29, %v1995_v58  ;;  %v13425_v29 = vshrl.u32 %v10479_v52, 16 }
 0x1a1   : > { %8301 = vmatprep.mubr.msk.bf16.mxu1 %vm9713_vm0, %v13438_v1 }
 0x1a2   : > { %v2000_v50 = vsel %vm1803_vm2, %v1990_v38, %v1999_v47  ;;  %v2009_v24 = vsel %vm1803_vm2, %v1999_v47, %v2008_v22  ;;  %v2013_v38 = vrot.slane %v13427_v43, 3 }
 0x1a4   : > { %8422 = vmatmul.mubr.bf16.gmra.mrb[132].mxu0 %v1991_v14 }
 0x1a5   : > { %8425 = vmatprep.mubr.msk.bf16.mxu0 %vm9713_vm0, %v13438_v1 }
 0x1a8   : > { %8302 = vmatmul.mubr.bf16.gmra.mrb[132].mxu1 %v10414_v39  ;;  %v13426_v39 = vshll.u32 %v10437_v6, 16  ;;  %v11188_v6 = vld [vmem:[#allocation2] sm:$0xff] }
 0x1a9   : > { %8305 = vmatprep.mubr.msk.bf16.mxu1 %vm9713_vm0, %v13438_v1  ;;  %13589 = vst [vmem:[#allocation52_spill] sm:$0xff] %v11188_v6 }
 0x1aa   : > { %v2016_v14 = vrot.slane %v13426_v39, 4  ;;  %v2897_v39 = vld [vmem:[#allocation2 + $0x8] sm:$0x80] }
 0x1ac   : > { %8426 = vmatmul.mubr.bf16.gmra.mrb[136].mxu0 %v2000_v50  ;;  %v2017_v58 = vor.u32 %v2016_v14, %v2013_v38  ;;  %v2022_v50 = vrot.slane %v13425_v29, 3  ;;  %v9620_v14 = vld [vmem:[#allocation2] sm:$0xf0] }
 0x1ad   : > { %8429 = vmatprep.mubr.msk.bf16.mxu0 %vm9713_vm0, %v13438_v1 }
 0x1ae   : > { %v2018_v47 = vsel %vm1803_vm2, %v2008_v22, %v2017_v58 }
 0x1b0   : > { %8306 = vmatmul.mubr.bf16.gmra.mrb[136].mxu1 %v10445_v61  ;;  %v13424_v61 = vshll.u32 %v10479_v52, 16 }
 0x1b1   : > { %8309 = vmatprep.mubr.msk.bf16.mxu1 %vm9713_vm0, %v13438_v1 }
 0x1b2   : > { %v2025_v17 = vrot.slane %v13424_v61, 4 }
 0x1b4   : > { %8430 = vmatmul.mubr.bf16.gmra.mrb[140].mxu0 %v2009_v24  ;;  %v2026_v15 = vor.u32 %v2025_v17, %v2022_v50  ;;  %v1360_v24 = vld [vmem:[#allocation2 + $0xd8] sm:$0xf] }
 0x1b5   : > { %8433 = vmatprep.mubr.msk.bf16.mxu0 %vm9713_vm0, %v13438_v1  ;;  %v2050_v38 = vshll.u32 %v1360_v24, 16 }
 0x1b6   : > { %v2036_v22 = vsel %vm1803_vm2, %v2026_v15, %v10602_v45  ;;  %v2898_v45 = vld [vmem:[#allocation2 + $0x10] sm:$0xff] }
 0x1b7   : > { %v2052_v17 = vrot.slane %v2050_v38, 4  ;;  %v2948_v29 = vshrl.u32 %v2898_v45, 16 }
 0x1b8   : > { %8310 = vmatmul.mubr.bf16.gmra.mrb[140].mxu1 %v10489_v2  ;;  %v2027_v2 = vsel %vm1803_vm2, %v2017_v58, %v2026_v15  ;;  %v2402_v58 = vshll.u32 %v9620_v14, 16 }
 0x1b9   : > { %8313 = vmatprep.mubr.msk.bf16.mxu1 %vm9713_vm0, %v13438_v1  ;;  %v2950_v38 = vrot.slane %v2948_v29, 7 }
 0x1bc   : > { %8434 = vmatmul.mubr.bf16.gmra.mrb[144].mxu0 %v2018_v47  ;;  %v1477_v47 = vrot.slane %v1360_v24, 4 }
 0x1bd   : > { %8437 = vmatprep.mubr.msk.bf16.mxu0 %vm9713_vm0, %v13438_v1 }
 0x1c0   : > { %8314 = vmatmul.mubr.bf16.gmra.mrb[144].mxu1 %v10530_v34  ;;  %v2047_v34 = vshrl.u32 %v1360_v24, 16 }
 0x1c1   : > { %8317 = vmatprep.mubr.msk.bf16.mxu1 %vm9713_vm0, %v13438_v1 }
 0x1c2   : > { %v2049_v50 = vrot.slane %v2047_v34, 3  ;;  %v2944_v34 = vshrl.u32 %v2897_v39, 16 }
 0x1c4   : > { %8438 = vmatmul.mubr.bf16.gmra.mrb[148].mxu0 %v2027_v2  ;;  %v2404_v2 = vrot.slane %v2402_v58, 5  ;;  %v2053_v61 = vor.u32 %v2052_v17, %v2049_v50  ;;  %v2951_v58 = vshll.u32 %v2898_v45, 16 }
 0x1c5   : > { %8441 = vmatprep.mubr.msk.bf16.mxu0 %vm9713_vm0, %v13438_v1 }
 0x1c6   : > { %v2953_v50 = vor.u32 %v2951_v58, %v2950_v38 }
 0x1c8   : > { %8318 = vmatmul.mubr.bf16.gmra.mrb[148].mxu1 %v10582_v57  ;;  %v2399_v57 = vshrl.u32 %v9620_v14, 16  ;;  %v2899_v14 = vld [vmem:[#allocation2 + $0x18] sm:$0xff] }
 0x1c9   : > { %8321 = vmatprep.mubr.msk.bf16.mxu1 %vm9713_vm0, %v13438_v1  ;;  %v2956_v17 = vshrl.u32 %v2899_v14, 16 }
 0x1ca   : > { %v2401_v15 = vrot.slane %v2399_v57, 4  ;;  %v9541_v57 = vld [vmem:[%s13392_s4 + $0x100] sm:$0xff]  }
 0x1cc   : > { %8442 = vmatmul.mubr.bf16.gmra.mrb[152].mxu0 %v2036_v22  ;;  %v13544_v22 = vrot.slane %v10571_v13, 4  ;;  %v2405_v24 = vor.u32 %v2404_v2, %v2401_v15 }
 0x1cd   : > { %8445 = vmatprep.mubr.msk.bf16.mxu0 %vm9713_vm0, %v13438_v1 }
 0x1ce   : > { %v2409_v13 = vsel %vm2397_vm3, %v2405_v24, %v10159_v60  ;;  %v9543_v60 = vld [vmem:[%s13392_s4 + $0x108] sm:$0xff]   ;;  %v9544_v24 = vld [vmem:[%s13392_s4 + $0x110] sm:$0xff]  }
 0x1d0   : > { %8322 = vmatmul.mubr.bf16.gmra.mrb[152].mxu1 %v10639_v42  ;;  %v1478_v42 = vsel %vm1423_vm1, %v13544_v22, %v1477_v47  ;;  %v2946_v47 = vrot.slane %v2944_v34, 7  ;;  %v2959_v22 = vshll.u32 %v2899_v14, 16  ;;  %v10947_v34 = vld [vmem:[#allocation2 + $0x30] sm:$0xff] }
 0x1d1   : > { %8325 = vmatprep.mubr.msk.bf16.mxu1 %vm9713_vm0, %v13438_v1 }
 0x1d2   : > { %v2954_v29 = vsel %vm2942_vm4, %v2946_v47, %v2953_v50  ;;  %v10955_v50 = vld [vmem:[#allocation2 + $0x40] sm:$0xff] }
 0x1d4   : > { %8446 = vmatmul.mubr.bf16.gmra.mrb[156].mxu0 %v10667_v8  ;;  %v2054_v8 = vsel %vm1803_vm2, %v10659_v48, %v2053_v61  ;;  %v2900_v48 = vld [vmem:[#allocation2 + $0x20] sm:$0xff]  ;;  %v10940_v61 = vrot.slane %v2956_v17, 7 }
 0x1d5   : > { %8449 = vmatprep.mubr.msk.bf16.mxu0 %vm9713_vm0, %v13438_v1  ;;  %v2964_v45 = vshrl.u32 %v2900_v48, 16 }
 0x1d6   : > { %v2961_v58 = vor.u32 %v2959_v22, %v10940_v61 }
 0x1d7   : > { %v10953_v47 = vrot.slane %v2964_v45, 7  ;;  %v2967_v45 = vshll.u32 %v2900_v48, 16 }
 0x1d8   : > { %8326 = vmatmul.mubr.bf16.gmra.mrb[156].mxu1 %v1478_v42  ;;  %v2901_v42 = vld [vmem:[#allocation2 + $0x28] sm:$0xff] }
 0x1d9   : > { %8469 = vmatprep.mubr.msk.bf16.mxu1 %vm9713_vm0, %v13438_v1  ;;  %v2972_v43 = vshrl.u32 %v2901_v42, 16  ;;  %v2969_v48 = vor.u32 %v2967_v45, %v10953_v47 }
 0x1db   : > { %v2974_v11 = vrot.slane %v2972_v43, 7 }
 0x1dc   : > { %8450 = vmatmul.mubr.bf16.gmra.mrb[160].mxu0 %v2054_v8 }
 0x1dd   : > { %8593 = vmatprep.mubr.msk.bf16.mxu0 %vm9713_vm0, %v13438_v1 }
 0x1e0   : > { %8470 = vmatmul.mubr.bf16.vlgmr.msra.gmra.mrb[160].mxu1 %v2409_v13  ;;  %v10949_v13 = vld [vmem:[#allocation2 + $0x38] sm:$0xff] }
 0x1e1   : > { %8702 = vmatpush3.bf16.msra.mxu1 %v9541_v57  ;;  %8473 = vmatprep.mubr.msk.bf16.mxu1 %vm9713_vm0, %v13438_v1  ;;  %v2988_v22 = vshrl.u32 %v10949_v13, 16 }
 0x1e2   : > { %8703 = vmatprep.subr.bf16.mxu1 %v13438_v1 }
 0x1e3   : > { %v1596_v39 = vpop.f32.mrb[56].mxu1  ;;  %v2990_v43 = vrot.slane %v2988_v22, 7  ;;  %v2991_v22 = vshll.u32 %v10949_v13, 16 }
 0x1e4   : > { %v8227_v15 = vpop.f32.mrb[57].mxu1  ;;  %8594 = vmatmul.mubr.bf16.vlgmr.msra.gmra.mrb[164].mxu0 %v2954_v29 }
 0x1e5   : > { %v1599_v2 = vpop.f32.mrb[58].mxu1  ;;  %8597 = vmatprep.mubr.msk.bf16.mxu0 %vm9713_vm0, %v13438_v1  ;;  %8704 = vmatpush3.bf16.msra.mxu1 %v9543_v60  ;;  %v13546_v60 = vshrl.u32 %v10290_v53, 16  ;;  %v13547_v15 = vshll.u32 %v10290_v53, 16  ;;  %v2993_v13 = vor.u32 %v2991_v22, %v2990_v43 }
 0x1e6   : > { %v8228_v8 = vpop.f32.mrb[59].mxu1  ;;  %8705 = vmatprep.subr.bf16.mxu1 %v13438_v1 }
 0x1e7   : > { %v2172_v57 = vpop.f32.mrb[60].mxu0  ;;  %v2418_v29 = vrot.slane %v13546_v60, 4  ;;  %v2419_v8 = vrot.slane %v13547_v15, 5  ;;  %v2962_v15 = vsel %vm2942_vm4, %v2950_v38, %v2961_v58  ;;  %v13551_v58 = vshrl.u32 %v10345_v7, 16 }
 0x1e8   : > { %v10957_v14 = vadd.f32 %v2172_v57, %v1596_v39  ;;  %v8351_v17 = vpop.f32.mrb[61].mxu0  ;;  %8474 = vmatmul.mubr.bf16.gmra.mrb[164].mxu1 %v10288_v37  ;;  %v2980_v39 = vshrl.u32 %v10947_v34, 16  ;;  %v9545_v37 = vld [vmem:[%s13392_s4 + $0x118] sm:$0xff]  }
 0x1e9   : > { %v2175_v12 = vpop.f32.mrb[62].mxu0  ;;  %8477 = vmatprep.mubr.msk.bf16.mxu1 %vm9713_vm0, %v13438_v1  ;;  %8706 = vmatpush3.bf16.msra.mxu1 %v9544_v24  ;;  %v2996_v17 = vshrl.u32 %v10955_v50, 16  ;;  %v2420_v24 = vor.u32 %v2419_v8, %v2418_v29  ;;  %v2426_v45 = vrot.slane %v13551_v58, 4  ;;  %v2975_v8 = vshll.u32 %v2901_v42, 16 }
 0x1ea   : > { %13545 = vst [vmem:[#allocation19_spill] sm:$0xff] %v10957_v14  ;;  %v10973_v57 = vadd.f32 %v2175_v12, %v1599_v2  ;;  %v8352_v53 = vpop.f32.mrb[63].mxu0  ;;  %8707 = vmatprep.subr.bf16.mxu1 %v13438_v1  ;;  %v2422_v12 = vrot.slane %v13549_v25, 4  ;;  %v13550_v2 = vshll.u32 %v10315_v36, 16  ;;  %v2982_v38 = vrot.slane %v2980_v39, 7  ;;  %v9546_v36 = vld [vmem:[%s13392_s4 + $0x120] sm:$0xff]  }
 0x1eb   : > { %v1604_v60 = vpop.f32.mrb[60].mxu1  ;;  %v2431_v39 = vrot.slane %v13554_v55, 5  ;;  %v2998_v19 = vrot.slane %v2996_v17, 7  ;;  %v2999_v55 = vshll.u32 %v10955_v50, 16  ;;  %v11122_v14 = vld [vmem:[#allocation2 + $0xa8] sm:$0xff] }
 0x1ec   : > { %13548 = vst [vmem:[#allocation20_spill] sm:$0xff] %v10973_v57  ;;  %v8231_v31 = vpop.f32.mrb[61].mxu1  ;;  %8598 = vmatmul.mubr.bf16.gmra.mrb[168].mxu0 %v2962_v15  ;;  %v2423_v53 = vrot.slane %v13550_v2, 5  ;;  %v13553_v15 = vshrl.u32 %v10377_v10, 16  ;;  %13576 = vst [vmem:[#allocation42_spill] sm:$0xff] %v11122_v14 }
 0x1ed   : > { %v1607_v5 = vpop.f32.mrb[62].mxu1  ;;  %8601 = vmatprep.mubr.msk.bf16.mxu0 %vm9713_vm0, %v13438_v1  ;;  %v13552_v31 = vshll.u32 %v10345_v7, 16  ;;  %8708 = vmatpush3.bf16.msra.mxu1 %v9545_v37  ;;  %v2983_v7 = vshll.u32 %v10947_v34, 16  ;;  %v11002_v37 = vrot.slane %v3004_v62, 7  ;;  %v3007_v62 = vshll.u32 %v10964_v27, 16  ;;  %v11023_v27 = vld [vmem:[#allocation2 + $0x58] sm:$0xff] }
 0x1ee   : > { %v8232_v25 = vpop.f32.mrb[63].mxu1  ;;  %v2430_v2 = vrot.slane %v13553_v15, 4  ;;  %8709 = vmatprep.subr.bf16.mxu1 %v13438_v1  ;;  %v2977_v15 = vor.u32 %v2975_v8, %v2974_v11  ;;  %v2424_v10 = vor.u32 %v2423_v53, %v2422_v12  ;;  %v3001_v53 = vor.u32 %v2999_v55, %v2998_v19  ;;  %v11064_v55 = vld [vmem:[#allocation2 + $0x40] sm:$0xff] }
 0x1ef   : > { %v2427_v29 = vrot.slane %v13552_v31, 5  ;;  %v2180_v58 = vpop.f32.mrb[64].mxu0  ;;  %v3012_v31 = vshrl.u32 %v10984_v28, 16  ;;  %v2985_v34 = vor.u32 %v2983_v7, %v2982_v38  ;;  %v2970_v8 = vsel %vm2942_vm4, %v10940_v61, %v2969_v48  ;;  %v11032_v7 = vld [vmem:[#allocation2 + $0x20] sm:$0xff]  ;;  %13561 = vst [vmem:[#allocation27_spill] sm:$0xff] %v11064_v55 }
 0x1f0   : > { %v11005_v25 = vadd.f32 %v2180_v58, %v1604_v60  ;;  %v8355_v42 = vpop.f32.mrb[65].mxu0  ;;  %8478 = vmatmul.mubr.bf16.gmra.mrb[168].mxu1 %v10695_v4  ;;  %v9547_v60 = vld [vmem:[%s13392_s4 + $0x128] sm:$0xff]   ;;  %v2432_v12 = vor.u32 %v2431_v39, %v2430_v2  ;;  %v2978_v2 = vsel %vm2942_vm4, %v10953_v47, %v2977_v15  ;;  %v11030_v39 = vsel %vm2397_vm3, %v2420_v24, %v2424_v10 }
 0x1f1   : > { %v2183_v17 = vpop.f32.mrb[66].mxu0  ;;  %8481 = vmatprep.mubr.msk.bf16.mxu1 %vm9713_vm0, %v13438_v1  ;;  %v2428_v57 = vor.u32 %v2427_v29, %v2426_v45  ;;  %8710 = vmatpush3.bf16.msra.mxu1 %v9546_v36  ;;  %v3009_v45 = vor.u32 %v3007_v62, %v11002_v37  ;;  %v11021_v29 = vrot.slane %v3012_v31, 7  ;;  %13557 = vst [vmem:[#allocation23_spill] sm:$0xff] %v11032_v7  ;;  %v3015_v47 = vshll.u32 %v10984_v28, 16  ;;  %v11048_v31 = vld [vmem:[#allocation2 + $0x30] sm:$0xff]  ;;  %v11062_v28 = vld [vmem:[#allocation2 + $0x38] sm:$0xff] }
 0x1f2   : > { %13555 = vst [vmem:[#allocation21_spill] sm:$0xff] %v11005_v25  ;;  %v11015_v58 = vadd.f32 %v2183_v17, %v1607_v5  ;;  %v8356_v4 = vpop.f32.mrb[67].mxu0  ;;  %8711 = vmatprep.subr.bf16.mxu1 %v13438_v1  ;;  %v2421_v5 = vsel %vm2397_vm3, %v10677_v56, %v2420_v24  ;;  %v11037_v48 = vsel %vm2942_vm4, %v2974_v11, %v2985_v34  ;;  %v11046_v24 = vld [vmem:[#allocation2 + $0x28] sm:$0xff]  ;;  %13559 = vst [vmem:[#allocation25_spill] sm:$0xff] %v11048_v31  ;;  %v11076_v62 = vld [vmem:[#allocation2 + $0x50] sm:$0xff] }
 0x1f3   : > { %v1612_v50 = vpop.f32.mrb[64].mxu1  ;;  %v11040_v22 = vsel %vm2397_vm3, %v2424_v10, %v2428_v57  ;;  %v11043_v56 = vsel %vm2942_vm4, %v2982_v38, %v2993_v13  ;;  %13558 = vst [vmem:[#allocation24_spill] sm:$0xff] %v11046_v24  ;;  %v11051_v15 = vsel %vm2397_vm3, %v2428_v57, %v2432_v12  ;;  %v11054_v11 = vsel %vm2942_vm4, %v2990_v43, %v3001_v53  ;;  %v11074_v13 = vld [vmem:[#allocation2 + $0x48] sm:$0xff]  ;;  %v11110_v43 = vld [vmem:[#allocation2 + $0x98] sm:$0xff] }
 0x1f4   : > { %13556 = vst [vmem:[#allocation22_spill] sm:$0xff] %v11015_v58  ;;  %v8235_v36 = vpop.f32.mrb[65].mxu1  ;;  %8602 = vmatmul.mubr.bf16.gmra.mrb[172].mxu0 %v2970_v8  ;;  %v11058_v10 = vsel %vm2397_vm3, %v2432_v12, %v10742_v41  ;;  %13560 = vst [vmem:[#allocation26_spill] sm:$0xff] %v11062_v28  ;;  %v11067_v34 = vsel %vm2942_vm4, %v2998_v19, %v3009_v45  ;;  %v11070_v57 = vor.u32 %v3015_v47, %v11021_v29  ;;  %v11083_v8 = vld [vmem:[#allocation2 + $0x58] sm:$0xff]  ;;  %v11085_v45 = vld [vmem:[#allocation2 + $0x60] sm:$0xff] }
 0x1f5   : > { %v1615_v61 = vpop.f32.mrb[66].mxu1  ;;  %8605 = vmatprep.mubr.msk.bf16.mxu0 %vm9713_vm0, %v13438_v1  ;;  %8712 = vmatpush3.bf16.msra.mxu1 %v9547_v60  ;;  %13562 = vst [vmem:[#allocation28_spill] sm:$0xff] %v11074_v13  ;;  %13563 = vst [vmem:[#allocation29_spill] sm:$0xff] %v11076_v62  ;;  %v11097_v38 = vld [vmem:[#allocation2 + $0x88] sm:$0xff]  ;;  %v11116_v41 = vld [vmem:[#allocation2 + $0xa0] sm:$0xff]  ;;  %v13590_v30 = vshrl.u32 %v11046_v24, 16 }
 0x1f6   : > { %v8236_v42 = vpop.f32.mrb[67].mxu1  ;;  %8713 = vmatprep.subr.bf16.mxu1 %v13438_v1  ;;  %13565 = vst [vmem:[#allocation31_spill] sm:$0xff] %v11083_v8  ;;  %13566 = vst [vmem:[#allocation32_spill] sm:$0xff] %v11085_v45  ;;  %v11130_v12 = vld [vmem:[#allocation2 + $0xb0] sm:$0xff] }
 0x1f7   : > { %v2188_v17 = vpop.f32.mrb[68].mxu0  ;;  %13569 = vst [vmem:[#allocation35_spill] sm:$0xff] %v11097_v38  ;;  %v11108_v42 = vld [vmem:[#allocation2 + $0x90] sm:$0xff]  ;;  %13574 = vst [vmem:[#allocation40_spill] sm:$0xff] %v11110_v43  ;;  %v5736_v54 = vrot.slane %v13590_v30, 4  ;;  %v13594_v30 = vshrl.u32 %v11062_v28, 16 }
 0x1f8   : > { %v11078_v60 = vadd.f32 %v2188_v17, %v1612_v50  ;;  %v8359_v4 = vpop.f32.mrb[69].mxu0  ;;  %8482 = vmatmul.mubr.bf16.gmra.mrb[172].mxu1 %v2421_v5  ;;  %v11093_v17 = vld [vmem:[#allocation2 + $0x68] sm:$0xff]  ;;  %v11104_v50 = vld [vmem:[#allocation2 + $0x70] sm:$0xff]  ;;  %v11106_v5 = vld [vmem:[#allocation2 + $0x78] sm:$0xff]  ;;  %13573 = vst [vmem:[#allocation39_spill] sm:$0xff] %v11108_v42 }
 0x1f9   : > { %v2191_v36 = vpop.f32.mrb[70].mxu0  ;;  %8485 = vmatprep.mubr.msk.bf16.mxu1 %vm9713_vm0, %v13438_v1  ;;  %13567 = vst [vmem:[#allocation33_spill] sm:$0xff] %v11093_v17  ;;  %v11095_v4 = vld [vmem:[#allocation2 + $0x80] sm:$0xff]  ;;  %13571 = vst [vmem:[#allocation37_spill] sm:$0xff] %v11104_v50 }
 0x1fa   : > { %13564 = vst [vmem:[#allocation30_spill] sm:$0xff] %v11078_v60  ;;  %13568 = vst [vmem:[#allocation34_spill] sm:$0xff] %v11095_v4  ;;  %v11099_v53 = vadd.f32 %v2191_v36, %v1615_v61  ;;  %v8360_v19 = vpop.f32.mrb[71].mxu0  ;;  %v13577_v61 = vmov 0.0  }
 0x1fb   : > { %13572 = vst [vmem:[#allocation38_spill] sm:$0xff] %v11106_v5  ;;  %v1620_v1 = vpop.f32.mrb[68].mxu1  ;;  %13575 = vst [vmem:[#allocation41_spill] sm:$0xff] %v11116_v41  ;;  %v11150_v19 = vld [vmem:[#allocation2 + $0xc8] sm:$0xff] }
 0x1fc   : > { %13570 = vst [vmem:[#allocation36_spill] sm:$0xff] %v11099_v53  ;;  %v8239_v47 = vpop.f32.mrb[69].mxu1  ;;  %8606 = vmatmul.mubr.bf16.gmra.mrb[176].mxu0 %v2978_v2  ;;  %13578 = vst [vmem:[#allocation43_spill] sm:$0xff] %v11130_v12  ;;  %v11152_v2 = vld [vmem:[#allocation2 + $0xd0] sm:$0xff] }
 0x1fd   : > { %v1623_v60 = vpop.f32.mrb[70].mxu1  ;;  %8609 = vmatprep.mubr.msk.bf16.mxu0 %vm9713_vm0, %v13577_v61  ;;  %13582 = vst [vmem:[#allocation47_spill] sm:$0xff] %v11150_v19  ;;  %13583 = vst [vmem:[#allocation48_spill] sm:$0xff] %v11152_v2 }
 0x1fe   : > { %v8240_v53 = vpop.f32.mrb[71].mxu1 }
 0x1ff   : > { %v2196_v36 = vpop.f32.mrb[72].mxu0  ;;  %v9548_v53 = vld [vmem:[%s13392_s4 + $0x130] sm:$0xff]  }
 0x200   : > { %v11144_v58 = vadd.f32 %v2196_v36, %v1620_v1  ;;  %v8363_v25 = vpop.f32.mrb[73].mxu0  ;;  %8486 = vmatmul.mubr.bf16.gmra.mrb[176].mxu1 %v11030_v39  ;;  %v5725_v1 = vshrl.u32 %v5227_v46, 16 }
 0x201   : > { %v2199_v47 = vpop.f32.mrb[74].mxu0  ;;  %8489 = vmatprep.mubr.msk.bf16.mxu1 %vm9713_vm0, %v13577_v61  ;;  %v11170_v25 = vld [vmem:[#allocation2 + $0xe0] sm:$0xff]  ;;  %8714 = vmatpush3.bf16.msra.mxu1 %v9548_v53  ;;  %v13588_v53 = vshll.u32 %v11032_v7, 16 }
 0x202   : > { %13581 = vst [vmem:[#allocation46_spill] sm:$0xff] %v11144_v58  ;;  %v11162_v49 = vadd.f32 %v2199_v47, %v1623_v60  ;;  %v8364_v52 = vpop.f32.mrb[75].mxu0  ;;  %13586 = vst [vmem:[#allocation51_spill] sm:$0xff] %v11170_v25  ;;  %8715 = vmatprep.subr.bf16.mxu1 %v13577_v61  ;;  %v5727_v36 = vrot.slane %v5725_v1, 4 }
 0x203   : > { %v1628_v39 = vpop.f32.mrb[72].mxu1  ;;  %v5733_v58 = vrot.slane %v13588_v53, 5  ;;  %v13591_v52 = vshll.u32 %v11046_v24, 16  ;;  %v13593_v53 = vshll.u32 %v11048_v31, 16  ;;  %v13700_v24 = vld [vmem:[#allocation10_spill] sm:$0xff] }
 0x204   : > { %13585 = vst [vmem:[#allocation50_spill] sm:$0xff] %v11162_v49  ;;  %v8243_v47 = vpop.f32.mrb[73].mxu1  ;;  %8610 = vmatmul.mubr.bf16.gmra.mrb[180].mxu0 %v11037_v48  ;;  %v5728_v49 = vshll.u32 %v5227_v46, 16  ;;  %v13595_v46 = vshll.u32 %v11062_v28, 16 }
 0x205   : > { %v1631_v0 = vpop.f32.mrb[74].mxu1  ;;  %8613 = vmatprep.mubr.msk.bf16.mxu0 %vm9713_vm0, %v13577_v61  ;;  %v13587_v47 = vshrl.u32 %v11032_v7, 16  ;;  %v5737_v18 = vrot.slane %v13591_v52, 5 }
 0x206   : > { %v8244_v3 = vpop.f32.mrb[75].mxu1  ;;  %v5730_v59 = vrot.slane %v5728_v49, 5  ;;  %v13599_v49 = vshrl.u32 %v11074_v13, 16 }
 0x207   : > { %v5732_v48 = vrot.slane %v13587_v47, 4  ;;  %v2204_v35 = vpop.f32.mrb[76].mxu0  ;;  %v13592_v47 = vshrl.u32 %v11048_v31, 16  ;;  %v5741_v3 = vrot.slane %v13593_v53, 5  ;;  %v5738_v52 = vor.u32 %v5737_v18, %v5736_v54 }
 0x208   : > { %v11199_v7 = vadd.f32 %v2204_v35, %v1628_v39  ;;  %v8367_v26 = vpop.f32.mrb[77].mxu0  ;;  %8490 = vmatmul.mubr.bf16.gmra.mrb[180].mxu1 %v11040_v22  ;;  %v5731_v1 = vor.u32 %v5730_v59, %v5727_v36  ;;  %v5745_v53 = vrot.slane %v13595_v46, 5  ;;  %v13596_v35 = vshrl.u32 %v11064_v55, 16 }
 0x209   : > { %v5734_v60 = vor.u32 %v5733_v58, %v5732_v48  ;;  %v5740_v20 = vrot.slane %v13592_v47, 4  ;;  %v5744_v58 = vrot.slane %v13594_v30, 4  ;;  %v2207_v48 = vpop.f32.mrb[78].mxu0  ;;  %8493 = vmatprep.mubr.msk.bf16.mxu1 %vm9713_vm0, %v13577_v61  ;;  %v13598_v36 = vshll.u32 %v11064_v55, 16 }
 0x20a   : > { %v5748_v26 = vrot.slane %v13596_v35, 4  ;;  %v11211_v39 = vadd.f32 %v2207_v48, %v1631_v0  ;;  %v8368_v22 = vpop.f32.mrb[79].mxu0  ;;  %v5752_v31 = vrot.slane %v13599_v49, 4  ;;  %v13602_v0 = vshll.u32 %v11074_v13, 16 }
 0x20b   : > { %v5742_v47 = vor.u32 %v5741_v3, %v5740_v20  ;;  %v11214_v59 = vsel %vm2397_vm3, %v5731_v1, %v5734_v60  ;;  %v5749_v30 = vrot.slane %v13598_v36, 5  ;;  %v1636_v54 = vpop.f32.mrb[76].mxu1  ;;  %v11221_v20 = vsel %vm2397_vm3, %v5734_v60, %v5738_v52 }
 0x20c   : > { %13597 = vst [vmem:[#allocation53_spill] sm:$0xff] %v11214_v59  ;;  %13600 = vst [vmem:[#allocation54_spill] sm:$0xff] %v11221_v20  ;;  %v5746_v46 = vor.u32 %v5745_v53, %v5744_v58  ;;  %v5753_v3 = vrot.slane %v13602_v0, 5  ;;  %v8247_v48 = vpop.f32.mrb[77].mxu1  ;;  %8614 = vmatmul.mubr.bf16.gmra.mrb[184].mxu0 %v11043_v56  ;;  %v13603_v35 = vshrl.u32 %v11076_v62, 16  ;;  %v13604_v49 = vshll.u32 %v11076_v62, 16 }
 0x20d   : > { %v11224_v18 = vsel %vm2397_vm3, %v5738_v52, %v5742_v47  ;;  %v5750_v1 = vor.u32 %v5749_v30, %v5748_v26  ;;  %v13605_v60 = vshrl.u32 %v11083_v8, 16  ;;  %v1639_v59 = vpop.f32.mrb[78].mxu1  ;;  %8617 = vmatprep.mubr.msk.bf16.mxu0 %vm9713_vm0, %v13577_v61  ;;  %v13607_v56 = vshll.u32 %v11083_v8, 16 }
 0x20e   : > { %13601 = vst [vmem:[#allocation55_spill] sm:$0xff] %v11224_v18  ;;  %v5756_v22 = vrot.slane %v13603_v35, 4  ;;  %v5757_v36 = vrot.slane %v13604_v49, 5  ;;  %v11238_v58 = vsel %vm2397_vm3, %v5742_v47, %v5746_v46  ;;  %v5754_v52 = vor.u32 %v5753_v3, %v5752_v31  ;;  %v8248_v0 = vpop.f32.mrb[79].mxu1 }
 0x20f   : > { %v5760_v20 = vrot.slane %v13605_v60, 4  ;;  %13606 = vst [vmem:[#allocation56_spill] sm:$0xff] %v11238_v58  ;;  %v5761_v53 = vrot.slane %v13607_v56, 5  ;;  %v13608_v26 = vshrl.u32 %v11085_v45, 16  ;;  %v11245_v48 = vsel %vm2397_vm3, %v5746_v46, %v5750_v1  ;;  %v2212_v47 = vpop.f32.mrb[80].mxu0 }
 0x210   : > { %13609 = vst [vmem:[#allocation57_spill] sm:$0xff] %v11245_v48  ;;  %v5758_v35 = vor.u32 %v5757_v36, %v5756_v22  ;;  %v13610_v49 = vshll.u32 %v11085_v45, 16  ;;  %v13611_v18 = vshrl.u32 %v11093_v17, 16  ;;  %v11252_v31 = vsel %vm2397_vm3, %v5750_v1, %v5754_v52  ;;  %v8371_v22 = vpop.f32.mrb[81].mxu0  ;;  %8494 = vmatmul.mubr.bf16.gmra.mrb[184].mxu1 %v11051_v15 }
 0x211   : > { %v5764_v30 = vrot.slane %v13608_v26, 4  ;;  %13612 = vst [vmem:[#allocation58_spill] sm:$0xff] %v11252_v31  ;;  %v5762_v3 = vor.u32 %v5761_v53, %v5760_v20  ;;  %v13613_v56 = vshll.u32 %v11093_v17, 16  ;;  %v13614_v26 = vshrl.u32 %v11104_v50, 16  ;;  %v2215_v31 = vpop.f32.mrb[82].mxu0  ;;  %8497 = vmatprep.mubr.msk.bf16.mxu1 %vm9713_vm0, %v13577_v61 }
 0x212   : > { %v5765_v60 = vrot.slane %v13610_v49, 5  ;;  %v5768_v62 = vrot.slane %v13611_v18, 4  ;;  %v11258_v46 = vadd.f32 %v2212_v47, %v1636_v54  ;;  %v11262_v36 = vsel %vm2397_vm3, %v5754_v52, %v5758_v35 }
 0x213   : > { %v5769_v58 = vrot.slane %v13613_v56, 5  ;;  %v5772_v0 = vrot.slane %v13614_v26, 4  ;;  %13615 = vst [vmem:[#allocation59_spill] sm:$0xff] %v11262_v36  ;;  %v13616_v49 = vshll.u32 %v11104_v50, 16  ;;  %v11269_v20 = vsel %vm2397_vm3, %v5758_v35, %v5762_v3  ;;  %v1644_v36 = vpop.f32.mrb[80].mxu1 }
 0x214   : > { %v5766_v18 = vor.u32 %v5765_v60, %v5764_v30  ;;  %13617 = vst [vmem:[#allocation60_spill] sm:$0xff] %v11269_v20  ;;  %v13618_v54 = vshrl.u32 %v11106_v5, 16  ;;  %v13619_v15 = vshll.u32 %v11106_v5, 16  ;;  %v11275_v52 = vadd.f32 %v2215_v31, %v1639_v59  ;;  %v8372_v30 = vpop.f32.mrb[83].mxu0  ;;  %v8251_v31 = vpop.f32.mrb[81].mxu1  ;;  %8618 = vmatmul.mubr.bf16.gmra.mrb[188].mxu0 %v11054_v11 }
 0x215   : > { %v5773_v1 = vrot.slane %v13616_v49, 5  ;;  %v5770_v53 = vor.u32 %v5769_v58, %v5768_v62  ;;  %v13621_v22 = vshrl.u32 %v11095_v4, 16  ;;  %v13623_v58 = vshll.u32 %v11095_v4, 16  ;;  %8621 = vmatprep.mubr.msk.bf16.mxu0 %vm9713_vm0, %v13577_v61 }
 0x216   : > { %v5776_v47 = vrot.slane %v13618_v54, 4  ;;  %v5777_v56 = vrot.slane %v13619_v15, 5  ;;  %v11278_v60 = vsel %vm2397_vm3, %v5762_v3, %v5766_v18  ;;  %v13624_v15 = vshrl.u32 %v11097_v38, 16 }
 0x217   : > { %13620 = vst [vmem:[#allocation61_spill] sm:$0xff] %v11278_v60  ;;  %v5774_v26 = vor.u32 %v5773_v1, %v5772_v0  ;;  %v5780_v49 = vrot.slane %v13621_v22, 4  ;;  %v11283_v35 = vsel %vm2397_vm3, %v5766_v18, %v5770_v53  ;;  %v5781_v54 = vrot.slane %v13623_v58, 5  ;;  %v1647_v22 = vpop.f32.mrb[82].mxu1 }
 0x218   : > { %13622 = vst [vmem:[#allocation62_spill] sm:$0xff] %v11283_v35  ;;  %v5778_v62 = vor.u32 %v5777_v56, %v5776_v47  ;;  %v5784_v59 = vrot.slane %v13624_v15, 4  ;;  %v13626_v0 = vshll.u32 %v11097_v38, 16  ;;  %v13627_v30 = vshrl.u32 %v11108_v42, 16  ;;  %8498 = vmatmul.mubr.bf16.gmra.mrb[188].mxu1 %v11058_v10 }
 0x219   : > { %v11291_v3 = vsel %vm2397_vm3, %v5770_v53, %v5774_v26  ;;  %v13628_v47 = vshll.u32 %v11108_v42, 16  ;;  %v5782_v11 = vor.u32 %v5781_v54, %v5780_v49  ;;  %v13630_v53 = vshrl.u32 %v11110_v43, 16  ;;  %v2220_v42 = vpop.f32.mrb[84].mxu0  ;;  %8501 = vmatprep.mubr.msk.bf16.mxu1 %vm9713_vm0, %v13577_v61 }
 0x21a   : > { %13625 = vst [vmem:[#allocation63_spill] sm:$0xff] %v11291_v3  ;;  %v5785_v1 = vrot.slane %v13626_v0, 5  ;;  %v5788_v18 = vrot.slane %v13627_v30, 4  ;;  %v11302_v58 = vsel %vm2397_vm3, %v5774_v26, %v5778_v62  ;;  %v13631_v31 = vshll.u32 %v11110_v43, 16  ;;  %v8252_v3 = vpop.f32.mrb[83].mxu1 }
 0x21b   : > { %v5789_v56 = vrot.slane %v13628_v47, 5  ;;  %13629 = vst [vmem:[#allocation64_spill] sm:$0xff] %v11302_v58  ;;  %v5792_v15 = vrot.slane %v13630_v53, 4  ;;  %v13632_v60 = vshrl.u32 %v11116_v41, 16  ;;  %v13633_v20 = vshll.u32 %v11116_v41, 16 }
 0x21c   : > { %v5793_v0 = vrot.slane %v13631_v31, 5  ;;  %v5786_v35 = vor.u32 %v5785_v1, %v5784_v59  ;;  %v11313_v26 = vsel %vm2397_vm3, %v5778_v62, %v5782_v11  ;;  %v13635_v54 = vshrl.u32 %v11122_v14, 16  ;;  %v8375_v59 = vpop.f32.mrb[85].mxu0  ;;  %8622 = vmatmul.mubr.bf16.gmra.mrb[192].mxu0 %v11067_v34  ;;  %v9550_v34 = vld [vmem:[%s13392_s4 + $0x140] sm:$0xff]  }
 0x21d   : > { %v5790_v30 = vor.u32 %v5789_v56, %v5788_v18  ;;  %v5796_v47 = vrot.slane %v13632_v60, 4  ;;  %v5797_v48 = vrot.slane %v13633_v20, 5  ;;  %13634 = vst [vmem:[#allocation65_spill] sm:$0xff] %v11313_v26  ;;  %v13636_v58 = vshll.u32 %v11122_v14, 16  ;;  %v2223_v1 = vpop.f32.mrb[86].mxu0  ;;  %8625 = vmatprep.mubr.msk.bf16.mxu0 %vm9713_vm0, %v13577_v61  ;;  %8826 = vmatpush3.bf16.msra.mxu0 %v9550_v34 }
 0x21e   : > { %v5794_v49 = vor.u32 %v5793_v0, %v5792_v15  ;;  %v5800_v53 = vrot.slane %v13635_v54, 4  ;;  %v11319_v3 = vadd.f32 %v2220_v42, %v1644_v36  ;;  %v11323_v60 = vsel %vm2397_vm3, %v5782_v11, %v5786_v35  ;;  %v8376_v15 = vpop.f32.mrb[87].mxu0  ;;  %v1652_v54 = vpop.f32.mrb[84].mxu1  ;;  %8827 = vmatprep.subr.bf16.mxu0 %v13577_v61 }
 0x21f   : > { %v5801_v31 = vrot.slane %v13636_v58, 5  ;;  %13637 = vst [vmem:[#allocation66_spill] sm:$0xff] %v11323_v60  ;;  %v11326_v20 = vsel %vm2397_vm3, %v5786_v35, %v5790_v30  ;;  %v5798_v62 = vor.u32 %v5797_v48, %v5796_v47  ;;  %v13640_v42 = vshrl.u32 %v11130_v12, 16 }
 0x220   : > { %13638 = vst [vmem:[#allocation67_spill] sm:$0xff] %v11326_v20  ;;  %v11331_v18 = vsel %vm2397_vm3, %v5790_v30, %v5794_v49  ;;  %v13641_v10 = vshll.u32 %v11130_v12, 16  ;;  %v11337_v11 = vadd.f32 %v2223_v1, %v1647_v22  ;;  %v13643_v48 = vshrl.u32 %v11136_v9, 16  ;;  %8502 = vmatmul.mubr.bf16.gmra.mrb[192].mxu1 %v10760_v23 }
 0x221   : > { %13639 = vst [vmem:[#allocation68_spill] sm:$0xff] %v11331_v18  ;;  %v5802_v56 = vor.u32 %v5801_v31, %v5800_v53  ;;  %v5804_v36 = vrot.slane %v13640_v42, 4  ;;  %v11340_v35 = vsel %vm2397_vm3, %v5794_v49, %v5798_v62  ;;  %v13644_v47 = vshll.u32 %v11136_v9, 16  ;;  %8505 = vmatprep.mubr.msk.bf16.mxu1 %vm9713_vm0, %v13577_v61  ;;  %v13680_v9 = vld [vmem:[#allocation16_spill] sm:$0xff] }
 0x222   : > { %v5805_v58 = vrot.slane %v13641_v10, 5  ;;  %13642 = vst [vmem:[#allocation69_spill] sm:$0xff] %v11340_v35  ;;  %v5808_v0 = vrot.slane %v13643_v48, 4  ;;  %v13646_v59 = vshrl.u32 %v11142_v44, 16  ;;  %v13647_v22 = vshll.u32 %v11142_v44, 16  ;;  %v8255_v10 = vpop.f32.mrb[85].mxu1 }
 0x223   : > { %v5809_v30 = vrot.slane %v13644_v47, 5  ;;  %v11347_v53 = vsel %vm2397_vm3, %v5798_v62, %v5802_v56  ;;  %v13648_v15 = vshrl.u32 %v11150_v19, 16  ;;  %v13649_v47 = vshll.u32 %v11150_v19, 16 }
 0x224   : > { %13645 = vst [vmem:[#allocation70_spill] sm:$0xff] %v11347_v53  ;;  %v5806_v31 = vor.u32 %v5805_v58, %v5804_v36  ;;  %v5812_v42 = vrot.slane %v13646_v59, 4  ;;  %v5813_v1 = vrot.slane %v13647_v22, 5  ;;  %v13650_v62 = vshrl.u32 %v11152_v2, 16  ;;  %v1655_v36 = vpop.f32.mrb[86].mxu1  ;;  %v9549_v58 = vld [vmem:[%s13392_s4 + $0x138] sm:$0xff]  }
 0x225   : > { %v5810_v49 = vor.u32 %v5809_v30, %v5808_v0  ;;  %v5816_v48 = vrot.slane %v13648_v15, 4  ;;  %v5817_v35 = vrot.slane %v13649_v47, 5  ;;  %v13652_v59 = vshll.u32 %v11152_v2, 16  ;;  %v8256_v47 = vpop.f32.mrb[87].mxu1  ;;  %8716 = vmatpush3.bf16.msra.mxu1 %v9549_v58 }
 0x226   : > { %v5820_v53 = vrot.slane %v13650_v62, 4  ;;  %v11369_v0 = vsel %vm2397_vm3, %v5802_v56, %v5806_v31  ;;  %v5814_v30 = vor.u32 %v5813_v1, %v5812_v42  ;;  %v13653_v10 = vshrl.u32 %v11160_v33, 16  ;;  %v2228_v56 = vpop.f32.mrb[88].mxu0  ;;  %8949 = vmatprep.subr.bf16.mxu1 %v13577_v61 }
 0x227   : > { %13651 = vst [vmem:[#allocation71_spill] sm:$0xff] %v11369_v0  ;;  %v5821_v22 = vrot.slane %v13652_v59, 5  ;;  %v11376_v62 = vsel %vm2397_vm3, %v5806_v31, %v5810_v49  ;;  %v5818_v18 = vor.u32 %v5817_v35, %v5816_v48  ;;  %v13655_v20 = vshll.u32 %v11160_v33, 16  ;;  %v8379_v48 = vpop.f32.mrb[89].mxu0  ;;  %v13671_v0 = vld [vmem:[#allocation14_spill] sm:$0xff] }
 0x228   : > { %v5824_v15 = vrot.slane %v13653_v10, 4  ;;  %13654 = vst [vmem:[#allocation72_spill] sm:$0xff] %v11376_v62  ;;  %v13656_v26 = vshrl.u32 %v11170_v25, 16  ;;  %v11383_v42 = vsel %vm2397_vm3, %v5810_v49, %v5814_v30  ;;  %v13658_v59 = vshll.u32 %v11170_v25, 16  ;;  %v2231_v58 = vpop.f32.mrb[90].mxu0  ;;  %8506 = vmatmul.mubr.bf16.gmra.mrb[196].mxu1 %v10772_v51 }
 0x229   : > { %v5825_v60 = vrot.slane %v13655_v20, 5  ;;  %13657 = vst [vmem:[#allocation73_spill] sm:$0xff] %v11383_v42  ;;  %v5822_v1 = vor.u32 %v5821_v22, %v5820_v53  ;;  %v13659_v31 = vshrl.u32 %v11188_v6, 16  ;;  %v11389_v35 = vadd.f32 %v2228_v56, %v1652_v54  ;;  %v8380_v22 = vpop.f32.mrb[91].mxu0  ;;  %v1660_v56 = vpop.f32.mrb[88].mxu1  ;;  %8509 = vmatprep.mubr.msk.bf16.mxu1 %vm9713_vm0, %v13577_v61 }
 0x22a   : > { %v5828_v19 = vrot.slane %v13656_v26, 4  ;;  %v5829_v10 = vrot.slane %v13658_v59, 5  ;;  %v11394_v26 = vsel %vm2397_vm3, %v5814_v30, %v5818_v18  ;;  %v13661_v49 = vshll.u32 %v11188_v6, 16 }
 0x22b   : > { %v5832_v47 = vrot.slane %v13659_v31, 4  ;;  %13660 = vst [vmem:[#allocation74_spill] sm:$0xff] %v11394_v26  ;;  %v5826_v20 = vor.u32 %v5825_v60, %v5824_v15  ;;  %v11402_v54 = vsel %vm2397_vm3, %v5818_v18, %v5822_v1  ;;  %v11404_v23 = vadd.f32 %v2231_v58, %v1655_v36  ;;  %v9551_v60 = vld [vmem:[%s13392_s4 + $0x148] sm:$0xff]   ;;  %v2908_v31 = vld [vmem:[#allocation2 + $0x60] sm:$0xff] }
 0x22c   : > { %v5833_v53 = vrot.slane %v13661_v49, 5  ;;  %13662 = vst [vmem:[#allocation75_spill] sm:$0xff] %v11402_v54  ;;  %v5830_v34 = vor.u32 %v5829_v10, %v5828_v19  ;;  %v3018_v59 = vsel %vm2942_vm4, %v11002_v37, %v11070_v57  ;;  %v13665_v18 = vshrl.u32 %v11023_v27, 16  ;;  %v8259_v10 = vpop.f32.mrb[89].mxu1  ;;  %8828 = vmatpush3.bf16.msra.mxu0 %v9551_v60  ;;  %v9552_v37 = vld [vmem:[%s13392_s4 + $0x150] sm:$0xff]  }
 0x22d   : > { %v11410_v30 = vsel %vm2397_vm3, %v5822_v1, %v5826_v20  ;;  %8626 = vmatmul.mubr.bf16.gmra.mrb[196].mxu0 %v3018_v59  ;;  %v3023_v48 = vshll.u32 %v11023_v27, 16  ;;  %8829 = vmatprep.subr.bf16.mxu0 %v13577_v61  ;;  %v9553_v59 = vld [vmem:[%s13392_s4 + $0x158] sm:$0xff]  }
 0x22e   : > { %13663 = vst [vmem:[#allocation76_spill] sm:$0xff] %v11410_v30  ;;  %v11412_v15 = vor.u32 %v5833_v53, %v5832_v47  ;;  %v3022_v19 = vrot.slane %v13665_v18, 7  ;;  %v11420_v36 = vsel %vm2397_vm3, %v5826_v20, %v5830_v34  ;;  %v1663_v47 = vpop.f32.mrb[90].mxu1  ;;  %8629 = vmatprep.mubr.msk.bf16.mxu0 %vm9713_vm0, %v13577_v61  ;;  %v2236_v20 = vpop.f32.mrb[92].mxu0  ;;  %v3028_v53 = vshrl.u32 %v2908_v31, 16 }
 0x22f   : > { %13666 = vst [vmem:[#allocation78_spill] sm:$0xff] %v11420_v36  ;;  %v8260_v57 = vpop.f32.mrb[91].mxu1  ;;  %v11433_v58 = vadd.f32 %v2236_v20, %v1660_v56 }
 0x230   : > { %13664 = vst [vmem:[#allocation77_spill] sm:$0xff] %v11412_v15  ;;  %v11424_v1 = vsel %vm2397_vm3, %v5830_v34, %v11412_v15  ;;  %v3025_v49 = vor.u32 %v3023_v48, %v3022_v19  ;;  %v8383_v34 = vpop.f32.mrb[93].mxu0  ;;  %8830 = vmatpush3.bf16.msra.mxu0 %v9552_v37  ;;  %v1668_v18 = vpop.f32.mrb[92].mxu1  ;;  %v3030_v10 = vrot.slane %v3028_v53, 7  ;;  %v2909_v48 = vld [vmem:[#allocation2 + $0x68] sm:$0xff]  ;;  %v9554_v37 = vld [vmem:[%s13392_s4 + $0x160] sm:$0xff]   ;;  %8510 = vmatmul.mubr.bf16.gmra.mrb[200].mxu1 %v10781_v16 }
 0x231   : > { %13667 = vst [vmem:[#allocation79_spill] sm:$0xff] %v11424_v1  ;;  %v2239_v22 = vpop.f32.mrb[94].mxu0  ;;  %8831 = vmatprep.subr.bf16.mxu0 %v13577_v61  ;;  %v8263_v51 = vpop.f32.mrb[93].mxu1  ;;  %8513 = vmatprep.mubr.msk.bf16.mxu1 %vm9713_vm0, %v13577_v61  ;;  %v2910_v16 = vld [vmem:[#allocation2 + $0x70] sm:$0xff] }
 0x232   : > { %v11438_v27 = vadd.f32 %v2239_v22, %v1663_v47  ;;  %v8384_v60 = vpop.f32.mrb[95].mxu0  ;;  %v3026_v56 = vsel %vm2942_vm4, %v11021_v29, %v3025_v49  ;;  %v1671_v57 = vpop.f32.mrb[94].mxu1  ;;  %v3031_v47 = vshll.u32 %v2908_v31, 16  ;;  %v3036_v29 = vshrl.u32 %v2909_v48, 16 }
 0x233   : > { %v8264_v20 = vpop.f32.mrb[95].mxu1  ;;  %v2244_v34 = vpop.f32.mrb[96].mxu0 }
 0x234   : > { %8832 = vmatpush3.bf16.msra.mxu0 %v9553_v59  ;;  %v3033_v22 = vor.u32 %v3031_v47, %v3030_v10  ;;  %v11452_v49 = vadd.f32 %v2244_v34, %v1668_v18  ;;  %v8387_v53 = vpop.f32.mrb[97].mxu0  ;;  %v1676_v51 = vpop.f32.mrb[96].mxu1  ;;  %v3038_v47 = vrot.slane %v3036_v29, 7 }
 0x235   : > { %8630 = vmatmul.mubr.bf16.gmra.mrb[200].mxu0 %v3026_v56  ;;  %8833 = vmatprep.subr.bf16.mxu0 %v13577_v61  ;;  %v2247_v60 = vpop.f32.mrb[98].mxu0  ;;  %v9555_v56 = vld [vmem:[%s13392_s4 + $0x168] sm:$0xff]   ;;  %v8267_v20 = vpop.f32.mrb[97].mxu1  ;;  %v9556_v53 = vld [vmem:[%s13392_s4 + $0x170] sm:$0xff]  }
 0x236   : > { %8633 = vmatprep.mubr.msk.bf16.mxu0 %vm9713_vm0, %v13577_v61  ;;  %v11457_v31 = vadd.f32 %v2247_v60, %v1671_v57  ;;  %v8388_v59 = vpop.f32.mrb[99].mxu0  ;;  %v3034_v18 = vsel %vm2942_vm4, %v3022_v19, %v3033_v22  ;;  %v1679_v34 = vpop.f32.mrb[98].mxu1  ;;  %v3039_v57 = vshll.u32 %v2909_v48, 16  ;;  %v3044_v19 = vshrl.u32 %v2910_v16, 16  ;;  %v9558_v20 = vld [vmem:[%s13392_s4 + $0x178] sm:$0xff]  }
 0x237   : > { %v2252_v60 = vpop.f32.mrb[100].mxu0 }
 0x238   : > { %8834 = vmatpush3.bf16.msra.mxu0 %v9554_v37  ;;  %v8268_v37 = vpop.f32.mrb[99].mxu1  ;;  %v3041_v59 = vor.u32 %v3039_v57, %v3038_v47  ;;  %v11470_v22 = vadd.f32 %v2252_v60, %v1676_v51  ;;  %v8391_v29 = vpop.f32.mrb[101].mxu0  ;;  %8514 = vmatmul.mubr.bf16.gmra.mrb[204].mxu1 %v10797_v21  ;;  %v2911_v21 = vld [vmem:[#allocation2 + $0x78] sm:$0xff] }
 0x239   : > { %8835 = vmatprep.subr.bf16.mxu0 %v13577_v61  ;;  %8517 = vmatprep.mubr.msk.bf16.mxu1 %vm9713_vm0, %v13577_v61  ;;  %v3046_v37 = vrot.slane %v3044_v19, 7  ;;  %v3052_v15 = vshrl.u32 %v2911_v21, 16 }
 0x23a   : > { %v3042_v51 = vsel %vm2942_vm4, %v3030_v10, %v3041_v59 }
 0x23b   : > { %v1684_v57 = vpop.f32.mrb[100].mxu1 }
 0x23c   : > { %8836 = vmatpush3.bf16.msra.mxu0 %v9555_v56  ;;  %v8271_v60 = vpop.f32.mrb[101].mxu1 }
 0x23d   : > { %8634 = vmatmul.mubr.bf16.gmra.mrb[204].mxu0 %v3034_v18  ;;  %8837 = vmatprep.subr.bf16.mxu0 %v13577_v61  ;;  %v2255_v18 = vpop.f32.mrb[102].mxu0  ;;  %v1687_v29 = vpop.f32.mrb[102].mxu1 }
 0x23e   : > { %8637 = vmatprep.mubr.msk.bf16.mxu0 %vm9713_vm0, %v13577_v61  ;;  %v11475_v48 = vadd.f32 %v2255_v18, %v1679_v34  ;;  %v8392_v56 = vpop.f32.mrb[103].mxu0  ;;  %v3047_v34 = vshll.u32 %v2910_v16, 16 }
 0x23f   : > { %v2260_v18 = vpop.f32.mrb[104].mxu0 }
 0x240   : > { %8838 = vmatpush3.bf16.msra.mxu0 %v9556_v53  ;;  %v8272_v53 = vpop.f32.mrb[103].mxu1  ;;  %v3049_v56 = vor.u32 %v3047_v34, %v3046_v37  ;;  %v11485_v1 = vadd.f32 %v2260_v18, %v1684_v57  ;;  %v8395_v36 = vpop.f32.mrb[105].mxu0  ;;  %8518 = vmatmul.mubr.bf16.gmra.mrb[208].mxu1 %v10804_v40  ;;  %v2912_v40 = vld [vmem:[#allocation2 + $0x80] sm:$0xff] }
 0x241   : > { %8839 = vmatprep.subr.bf16.mxu0 %v13577_v61  ;;  %v2263_v10 = vpop.f32.mrb[106].mxu0  ;;  %8521 = vmatprep.mubr.msk.bf16.mxu1 %vm9713_vm0, %v13577_v61  ;;  %v3055_v36 = vshll.u32 %v2911_v21, 16 }
 0x242   : > { %v11490_v59 = vadd.f32 %v2263_v10, %v1687_v29  ;;  %v8396_v19 = vpop.f32.mrb[107].mxu0 }
 0x243   : > { %v1692_v16 = vpop.f32.mrb[104].mxu1 }
 0x244   : > { %8840 = vmatpush3.bf16.msra.mxu0 %v9558_v20  ;;  %v3050_v20 = vsel %vm2942_vm4, %v3038_v47, %v3049_v56  ;;  %v8275_v60 = vpop.f32.mrb[105].mxu1 }
 0x245   : > { %8638 = vmatmul.mubr.bf16.gmra.mrb[208].mxu0 %v3042_v51  ;;  %9073 = vmatprep.subr.bf16.mxu0 %v13577_v61  ;;  %v3054_v51 = vrot.slane %v3052_v15, 7  ;;  %v1695_v34 = vpop.f32.mrb[106].mxu1  ;;  %v3060_v15 = vshrl.u32 %v2912_v40, 16  ;;  %v2913_v60 = vld [vmem:[#allocation2 + $0x88] sm:$0xff] }
 0x246   : > { %8641 = vmatprep.mubr.msk.bf16.mxu0 %vm9713_vm0, %v13577_v61  ;;  %v8276_v57 = vpop.f32.mrb[107].mxu1  ;;  %v3071_v62 = vshll.u32 %v2913_v60, 16 }
 0x247   : > { %v2268_v53 = vpop.f32.mrb[108].mxu0  ;;  %v3057_v18 = vor.u32 %v3055_v36, %v3054_v51 }
 0x248   : > { %v11495_v30 = vadd.f32 %v2268_v53, %v1692_v16  ;;  %v8399_v29 = vpop.f32.mrb[109].mxu0  ;;  %8522 = vmatmul.mubr.bf16.gmra.mrb[212].mxu1 %v10818_v32  ;;  %v3062_v16 = vrot.slane %v3060_v15, 7  ;;  %v3063_v53 = vshll.u32 %v2912_v40, 16 }
 0x249   : > { %v2271_v10 = vpop.f32.mrb[110].mxu0  ;;  %8525 = vmatprep.mubr.msk.bf16.mxu1 %vm9713_vm0, %v13577_v61  ;;  %v3058_v21 = vsel %vm2942_vm4, %v3046_v37, %v3057_v18  ;;  %v3068_v29 = vshrl.u32 %v2913_v60, 16  ;;  %v13668_v37 = vld [vmem:[#allocation13_spill] sm:$0xff] }
 0x24a   : > { %v11500_v47 = vadd.f32 %v2271_v10, %v1695_v34  ;;  %v8400_v56 = vpop.f32.mrb[111].mxu0  ;;  %v13669_v18 = vshrl.u32 %v13668_v37, 16 }
 0x24b   : > { %v1700_v19 = vpop.f32.mrb[108].mxu1  ;;  %v3065_v56 = vor.u32 %v3063_v53, %v3062_v16 }
 0x24d   : > { %8642 = vmatmul.mubr.bf16.gmra.mrb[212].mxu0 %v3050_v20  ;;  %v8279_v20 = vpop.f32.mrb[109].mxu1 }
 0x24e   : > { %8645 = vmatprep.mubr.msk.bf16.mxu0 %vm9713_vm0, %v13577_v61  ;;  %v1703_v36 = vpop.f32.mrb[110].mxu1  ;;  %v13670_v20 = vshll.u32 %v13668_v37, 16  ;;  %v13672_v37 = vshrl.u32 %v13671_v0, 16 }
 0x24f   : > { %v8280_v32 = vpop.f32.mrb[111].mxu1  ;;  %v2276_v57 = vpop.f32.mrb[112].mxu0 }
 0x250   : > { %v11505_v54 = vadd.f32 %v2276_v57, %v1700_v19  ;;  %v8403_v34 = vpop.f32.mrb[113].mxu0  ;;  %8526 = vmatmul.mubr.bf16.gmra.mrb[216].mxu1 %v10826_v63  ;;  %v2467_v15 = vrot.slane %v13670_v20, 5  ;;  %v3066_v19 = vsel %vm2942_vm4, %v3054_v51, %v3065_v56  ;;  %v3070_v57 = vrot.slane %v3068_v29, 7  ;;  %v2914_v63 = vld [vmem:[#allocation2 + $0x90] sm:$0xff] }
 0x251   : > { %v2279_v10 = vpop.f32.mrb[114].mxu0  ;;  %8529 = vmatprep.mubr.msk.bf16.mxu1 %vm9713_vm0, %v13577_v61  ;;  %v2470_v20 = vrot.slane %v13672_v37, 4  ;;  %v13674_v51 = vshll.u32 %v13671_v0, 16  ;;  %v3076_v56 = vshrl.u32 %v2914_v63, 16  ;;  %v2915_v0 = vld [vmem:[#allocation2 + $0x98] sm:$0xff] }
 0x252   : > { %v11514_v32 = vadd.f32 %v2279_v10, %v1703_v36  ;;  %v8404_v40 = vpop.f32.mrb[115].mxu0  ;;  %v13673_v10 = vld [vmem:[#allocation17_spill] sm:$0xff]  ;;  %v3073_v6 = vor.u32 %v3071_v62, %v3070_v57 }
 0x253   : > { %v1708_v26 = vpop.f32.mrb[112].mxu1  ;;  %v2471_v29 = vrot.slane %v13674_v51, 5  ;;  %v3078_v62 = vrot.slane %v3076_v56, 7 }
 0x254   : > { %v8283_v34 = vpop.f32.mrb[113].mxu1  ;;  %v3074_v37 = vsel %vm2942_vm4, %v3062_v16, %v3073_v6 }
 0x255   : > { %8646 = vmatmul.mubr.bf16.gmra.mrb[216].mxu0 %v3058_v21  ;;  %v2466_v21 = vrot.slane %v13669_v18, 4  ;;  %v1711_v53 = vpop.f32.mrb[114].mxu1 }
 0x256   : > { %8649 = vmatprep.mubr.msk.bf16.mxu0 %vm9713_vm0, %v13577_v61  ;;  %v8284_v18 = vpop.f32.mrb[115].mxu1 }
 0x257   : > { %v2468_v42 = vor.u32 %v2467_v15, %v2466_v21  ;;  %v2284_v36 = vpop.f32.mrb[116].mxu0 }
 0x258   : > { %v8407_v21 = vpop.f32.mrb[117].mxu0 }
 0x259   : > { %v2469_v40 = vsel %vm2397_vm3, %v13673_v10, %v2468_v42  ;;  %v2287_v15 = vpop.f32.mrb[118].mxu0  ;;  %v2472_v10 = vor.u32 %v2471_v29, %v2470_v20  ;;  %v3084_v20 = vshrl.u32 %v2915_v0, 16 }
 0x25a   : > { %8530 = vmatmul.mubr.bf16.gmra.mrb[220].mxu1 %v2469_v40  ;;  %v11529_v60 = vadd.f32 %v2287_v15, %v1711_v53  ;;  %v8408_v34 = vpop.f32.mrb[119].mxu0  ;;  %v13675_v40 = vld [vmem:[#allocation15_spill] sm:$0xff] }
 0x25b   : > { %8533 = vmatprep.mubr.msk.bf16.mxu1 %vm9713_vm0, %v13577_v61  ;;  %v1716_v18 = vpop.f32.mrb[116].mxu1  ;;  %v13676_v21 = vshrl.u32 %v13675_v40, 16  ;;  %v2473_v15 = vsel %vm2397_vm3, %v2468_v42, %v2472_v10  ;;  %v13677_v6 = vshll.u32 %v13675_v40, 16  ;;  %v2916_v40 = vld [vmem:[#allocation2 + $0xa0] sm:$0xff] }
 0x25c   : > { %v8287_v25 = vpop.f32.mrb[117].mxu1 }
 0x25d   : > { %8650 = vmatmul.mubr.bf16.gmra.mrb[220].mxu0 %v3066_v19  ;;  %v11525_v19 = vadd.f32 %v2284_v36, %v1708_v26  ;;  %v1719_v51 = vpop.f32.mrb[118].mxu1  ;;  %v3079_v26 = vshll.u32 %v2914_v63, 16  ;;  %v2474_v33 = vrot.slane %v13676_v21, 4  ;;  %v2475_v16 = vrot.slane %v13677_v6, 5 }
 0x25e   : > { %8653 = vmatprep.mubr.msk.bf16.mxu0 %vm9713_vm0, %v13577_v61  ;;  %v8288_v36 = vpop.f32.mrb[119].mxu1 }
 0x25f   : > { %v2292_v53 = vpop.f32.mrb[120].mxu0  ;;  %v3081_v34 = vor.u32 %v3079_v26, %v3078_v62  ;;  %v2476_v42 = vor.u32 %v2475_v16, %v2474_v33  ;;  %v3086_v26 = vrot.slane %v3084_v20, 7 }
 0x260   : > { %v11539_v25 = vadd.f32 %v2292_v53, %v1716_v18  ;;  %v8411_v29 = vpop.f32.mrb[121].mxu0  ;;  %v3087_v18 = vshll.u32 %v2915_v0, 16 }
 0x261   : > { %v2295_v56 = vpop.f32.mrb[122].mxu0  ;;  %v3082_v21 = vsel %vm2942_vm4, %v3070_v57, %v3081_v34  ;;  %v13681_v57 = vshll.u32 %v13680_v9, 16  ;;  %v3092_v34 = vshrl.u32 %v2916_v40, 16  ;;  %v2917_v9 = vld [vmem:[#allocation2 + $0xa8] sm:$0xff] }
 0x262   : > { %8534 = vmatmul.mubr.bf16.gmra.mrb[224].mxu1 %v2473_v15  ;;  %v11543_v63 = vadd.f32 %v2295_v56, %v1719_v51  ;;  %v13678_v15 = vld [vmem:[#allocation3_spill] sm:$0xff]  ;;  %v2477_v56 = vsel %vm2397_vm3, %v2472_v10, %v2476_v42 }
 0x263   : > { %8537 = vmatprep.mubr.msk.bf16.mxu1 %vm9713_vm0, %v13577_v61  ;;  %v1724_v36 = vpop.f32.mrb[120].mxu1  ;;  %v13679_v29 = vshrl.u32 %v13678_v15, 16  ;;  %v2479_v33 = vrot.slane %v13681_v57, 5 }
 0x264   : > { %v8291_v2 = vpop.f32.mrb[121].mxu1 }
 0x265   : > { %8654 = vmatmul.mubr.bf16.gmra.mrb[224].mxu0 %v3074_v37  ;;  %v8412_v37 = vpop.f32.mrb[123].mxu0  ;;  %v1727_v6 = vpop.f32.mrb[122].mxu1  ;;  %v2478_v44 = vrot.slane %v13679_v29, 4 }
 0x266   : > { %8657 = vmatprep.mubr.msk.bf16.mxu0 %vm9713_vm0, %v13577_v61  ;;  %v8292_v53 = vpop.f32.mrb[123].mxu1  ;;  %v3089_v37 = vor.u32 %v3087_v18, %v3086_v26  ;;  %v3094_v18 = vrot.slane %v3092_v34, 7 }
 0x267   : > { %v2300_v51 = vpop.f32.mrb[124].mxu0  ;;  %v2480_v10 = vor.u32 %v2479_v33, %v2478_v44 }
 0x268   : > { %v11553_v2 = vadd.f32 %v2300_v51, %v1724_v36  ;;  %v8415_v16 = vpop.f32.mrb[125].mxu0  ;;  %v3090_v15 = vsel %vm2942_vm4, %v3078_v62, %v3089_v37  ;;  %v3095_v36 = vshll.u32 %v2916_v40, 16  ;;  %v3100_v37 = vshrl.u32 %v2917_v9, 16 }
 0x269   : > { %v2303_v20 = vpop.f32.mrb[126].mxu0 }
 0x26a   : > { %8538 = vmatmul.mubr.bf16.gmra.mrb[228].mxu1 %v2477_v56  ;;  %v11557_v0 = vadd.f32 %v2303_v20, %v1727_v6  ;;  %v13682_v56 = vld [vmem:[#allocation4_spill] sm:$0xff]  ;;  %v2481_v20 = vsel %vm2397_vm3, %v2476_v42, %v2480_v10 }
 0x26b   : > { %8541 = vmatprep.mubr.msk.bf16.mxu1 %vm9713_vm0, %v13577_v61  ;;  %v1732_v53 = vpop.f32.mrb[124].mxu1  ;;  %v13683_v16 = vshrl.u32 %v13682_v56, 16  ;;  %v13684_v62 = vshll.u32 %v13682_v56, 16  ;;  %v2918_v56 = vld [vmem:[#allocation2 + $0xb0] sm:$0xff] }
 0x26c   : > { %v8295_v29 = vpop.f32.mrb[125].mxu1 }
 0x26d   : > { %8658 = vmatmul.mubr.bf16.gmra.mrb[228].mxu0 %v3082_v21  ;;  %v8416_v21 = vpop.f32.mrb[127].mxu0  ;;  %v1735_v57 = vpop.f32.mrb[126].mxu1  ;;  %v2482_v12 = vrot.slane %v13683_v16, 4  ;;  %v2483_v44 = vrot.slane %v13684_v62, 5 }
 0x26e   : > { %8661 = vmatprep.mubr.msk.bf16.mxu0 %vm9713_vm0, %v13577_v61  ;;  %v8296_v51 = vpop.f32.mrb[127].mxu1  ;;  %v3097_v21 = vor.u32 %v3095_v36, %v3094_v18  ;;  %v3102_v36 = vrot.slane %v3100_v37, 7 }
 0x26f   : > { %v2308_v6 = vpop.f32.mrb[128].mxu0  ;;  %v2484_v42 = vor.u32 %v2483_v44, %v2482_v12 }
 0x270   : > { %v11567_v33 = vadd.f32 %v2308_v6, %v1732_v53  ;;  %v8419_v34 = vpop.f32.mrb[129].mxu0  ;;  %v3098_v16 = vsel %vm2942_vm4, %v3086_v26, %v3097_v21  ;;  %v3103_v53 = vshll.u32 %v2917_v9, 16  ;;  %v3108_v21 = vshrl.u32 %v2918_v56, 16 }
 0x272   : > { %8542 = vmatmul.mubr.bf16.gmra.mrb[232].mxu1 %v2481_v20  ;;  %v13685_v20 = vld [vmem:[#allocation5_spill] sm:$0xff] }
 0x273   : > { %8545 = vmatprep.mubr.msk.bf16.mxu1 %vm9713_vm0, %v13577_v61  ;;  %v1740_v51 = vpop.f32.mrb[128].mxu1  ;;  %v13686_v34 = vshrl.u32 %v13685_v20, 16  ;;  %v13687_v26 = vshll.u32 %v13685_v20, 16  ;;  %v2919_v20 = vld [vmem:[#allocation2 + $0xb8] sm:$0xff] }
 0x274   : > { %v8299_v14 = vpop.f32.mrb[129].mxu1 }
 0x275   : > { %8662 = vmatmul.mubr.bf16.gmra.mrb[232].mxu0 %v3090_v15  ;;  %v2311_v15 = vpop.f32.mrb[130].mxu0  ;;  %v1743_v62 = vpop.f32.mrb[130].mxu1  ;;  %v2486_v41 = vrot.slane %v13686_v34, 4  ;;  %v2487_v12 = vrot.slane %v13687_v26, 5 }
 0x276   : > { %8665 = vmatprep.mubr.msk.bf16.mxu0 %vm9713_vm0, %v13577_v61  ;;  %v11571_v40 = vadd.f32 %v2311_v15, %v1735_v57  ;;  %v8420_v29 = vpop.f32.mrb[131].mxu0  ;;  %v8300_v6 = vpop.f32.mrb[131].mxu1  ;;  %v2485_v15 = vsel %vm2397_vm3, %v2480_v10, %v2484_v42 }
 0x277   : > { %v2316_v57 = vpop.f32.mrb[132].mxu0  ;;  %v3105_v29 = vor.u32 %v3103_v53, %v3102_v36  ;;  %v2488_v10 = vor.u32 %v2487_v12, %v2486_v41  ;;  %v3110_v53 = vrot.slane %v3108_v21, 7 }
 0x278   : > { %v11581_v14 = vadd.f32 %v2316_v57, %v1740_v51  ;;  %v8423_v44 = vpop.f32.mrb[133].mxu0  ;;  %v3111_v51 = vshll.u32 %v2918_v56, 16 }
 0x279   : > { %v2319_v37 = vpop.f32.mrb[134].mxu0  ;;  %v3106_v34 = vsel %vm2942_vm4, %v3094_v18, %v3105_v29  ;;  %v3116_v29 = vshrl.u32 %v2919_v20, 16 }
 0x27a   : > { %8546 = vmatmul.mubr.bf16.gmra.mrb[236].mxu1 %v2485_v15  ;;  %v11585_v9 = vadd.f32 %v2319_v37, %v1743_v62  ;;  %v13688_v15 = vld [vmem:[#allocation6_spill] sm:$0xff]  ;;  %v2489_v37 = vsel %vm2397_vm3, %v2484_v42, %v2488_v10 }
 0x27b   : > { %8549 = vmatprep.mubr.msk.bf16.mxu1 %vm9713_vm0, %v13577_v61  ;;  %v1748_v6 = vpop.f32.mrb[132].mxu1  ;;  %v13689_v44 = vshrl.u32 %v13688_v15, 16  ;;  %v13690_v18 = vshll.u32 %v13688_v15, 16  ;;  %v2920_v15 = vld [vmem:[#allocation2 + $0xc0] sm:$0xff] }
 0x27c   : > { %v8303_v43 = vpop.f32.mrb[133].mxu1 }
 0x27d   : > { %8666 = vmatmul.mubr.bf16.gmra.mrb[236].mxu0 %v3098_v16  ;;  %v8424_v16 = vpop.f32.mrb[135].mxu0  ;;  %v1751_v26 = vpop.f32.mrb[134].mxu1  ;;  %v2490_v38 = vrot.slane %v13689_v44, 4  ;;  %v2491_v41 = vrot.slane %v13690_v18, 5 }
 0x27e   : > { %8669 = vmatprep.mubr.msk.bf16.mxu0 %vm9713_vm0, %v13577_v61  ;;  %v8304_v57 = vpop.f32.mrb[135].mxu1  ;;  %v3113_v16 = vor.u32 %v3111_v51, %v3110_v53  ;;  %v3118_v51 = vrot.slane %v3116_v29, 7 }
 0x27f   : > { %v2324_v62 = vpop.f32.mrb[136].mxu0  ;;  %v2492_v42 = vor.u32 %v2491_v41, %v2490_v38 }
 0x280   : > { %v11595_v43 = vadd.f32 %v2324_v62, %v1748_v6  ;;  %v8427_v12 = vpop.f32.mrb[137].mxu0  ;;  %v3114_v44 = vsel %vm2942_vm4, %v3102_v36, %v3113_v16  ;;  %v3119_v6 = vshll.u32 %v2919_v20, 16  ;;  %v3124_v16 = vshrl.u32 %v2920_v15, 16 }
 0x281   : > { %v2327_v21 = vpop.f32.mrb[138].mxu0 }
 0x282   : > { %8550 = vmatmul.mubr.bf16.gmra.mrb[240].mxu1 %v2489_v37  ;;  %v11599_v56 = vadd.f32 %v2327_v21, %v1751_v26  ;;  %v13691_v37 = vld [vmem:[#allocation7_spill] sm:$0xff]  ;;  %v2493_v21 = vsel %vm2397_vm3, %v2488_v10, %v2492_v42 }
 0x283   : > { %8553 = vmatprep.mubr.msk.bf16.mxu1 %vm9713_vm0, %v13577_v61  ;;  %v1756_v57 = vpop.f32.mrb[136].mxu1  ;;  %v13692_v12 = vshrl.u32 %v13691_v37, 16  ;;  %v13693_v36 = vshll.u32 %v13691_v37, 16  ;;  %v2921_v37 = vld [vmem:[#allocation2 + $0xc8] sm:$0xff] }
 0x284   : > { %v8307_v4 = vpop.f32.mrb[137].mxu1 }
 0x285   : > { %8670 = vmatmul.mubr.bf16.gmra.mrb[240].mxu0 %v3106_v34  ;;  %v8428_v34 = vpop.f32.mrb[139].mxu0  ;;  %v1759_v18 = vpop.f32.mrb[138].mxu1  ;;  %v2494_v5 = vrot.slane %v13692_v12, 4  ;;  %v2495_v38 = vrot.slane %v13693_v36, 5 }
 0x286   : > { %8673 = vmatprep.mubr.msk.bf16.mxu0 %vm9713_vm0, %v13577_v61  ;;  %v8308_v62 = vpop.f32.mrb[139].mxu1  ;;  %v3121_v34 = vor.u32 %v3119_v6, %v3118_v51  ;;  %v3126_v6 = vrot.slane %v3124_v16, 7 }
 0x287   : > { %v2332_v26 = vpop.f32.mrb[140].mxu0  ;;  %v2496_v10 = vor.u32 %v2495_v38, %v2494_v5 }
 0x288   : > { %v11609_v4 = vadd.f32 %v2332_v26, %v1756_v57  ;;  %v8431_v41 = vpop.f32.mrb[141].mxu0  ;;  %v3122_v12 = vsel %vm2942_vm4, %v3110_v53, %v3121_v34  ;;  %v3127_v57 = vshll.u32 %v2920_v15, 16  ;;  %v3132_v34 = vshrl.u32 %v2921_v37, 16 }
 0x289   : > { %v2335_v29 = vpop.f32.mrb[142].mxu0 }
 0x28a   : > { %8554 = vmatmul.mubr.bf16.gmra.mrb[244].mxu1 %v2493_v21  ;;  %v11613_v20 = vadd.f32 %v2335_v29, %v1759_v18  ;;  %v13694_v21 = vld [vmem:[#allocation8_spill] sm:$0xff]  ;;  %v2497_v29 = vsel %vm2397_vm3, %v2492_v42, %v2496_v10 }
 0x28b   : > { %8557 = vmatprep.mubr.msk.bf16.mxu1 %vm9713_vm0, %v13577_v61  ;;  %v1764_v62 = vpop.f32.mrb[140].mxu1  ;;  %v13695_v41 = vshrl.u32 %v13694_v21, 16  ;;  %v13696_v53 = vshll.u32 %v13694_v21, 16  ;;  %v2922_v21 = vld [vmem:[#allocation2 + $0xd0] sm:$0xff] }
 0x28c   : > { %v8311_v50 = vpop.f32.mrb[141].mxu1 }
 0x28d   : > { %8674 = vmatmul.mubr.bf16.gmra.mrb[244].mxu0 %v3114_v44  ;;  %v8432_v44 = vpop.f32.mrb[143].mxu0  ;;  %v1767_v36 = vpop.f32.mrb[142].mxu1  ;;  %v2498_v17 = vrot.slane %v13695_v41, 4  ;;  %v2499_v5 = vrot.slane %v13696_v53, 5 }
 0x28e   : > { %8677 = vmatprep.mubr.msk.bf16.mxu0 %vm9713_vm0, %v13577_v61  ;;  %v8312_v26 = vpop.f32.mrb[143].mxu1  ;;  %v3129_v44 = vor.u32 %v3127_v57, %v3126_v6  ;;  %v3134_v57 = vrot.slane %v3132_v34, 7 }
 0x28f   : > { %v2340_v18 = vpop.f32.mrb[144].mxu0  ;;  %v2500_v42 = vor.u32 %v2499_v5, %v2498_v17 }
 0x290   : > { %v11623_v50 = vadd.f32 %v2340_v18, %v1764_v62  ;;  %v8435_v38 = vpop.f32.mrb[145].mxu0  ;;  %v3130_v41 = vsel %vm2942_vm4, %v3118_v51, %v3129_v44  ;;  %v3135_v62 = vshll.u32 %v2921_v37, 16 }
 0x291   : > { %v2343_v16 = vpop.f32.mrb[146].mxu0  ;;  %v2501_v38 = vsel %vm2397_vm3, %v2496_v10, %v2500_v42  ;;  %v2923_v10 = vld [vmem:[#allocation2 + $0xd8] sm:$0xff] }
 0x292   : > { %8558 = vmatmul.mubr.bf16.gmra.mrb[248].mxu1 %v2497_v29  ;;  %v11627_v15 = vadd.f32 %v2343_v16, %v1767_v36  ;;  %v3137_v36 = vor.u32 %v3135_v62, %v3134_v57  ;;  %v3140_v16 = vshrl.u32 %v2922_v21, 16  ;;  %v13697_v62 = vld [vmem:[#allocation9_spill] sm:$0xff] }
 0x293   : > { %8561 = vmatprep.mubr.msk.bf16.mxu1 %vm9713_vm0, %v13577_v61  ;;  %v1772_v26 = vpop.f32.mrb[144].mxu1 }
 0x294   : > { %v8315_v45 = vpop.f32.mrb[145].mxu1  ;;  %v3138_v37 = vsel %vm2942_vm4, %v3126_v6, %v3137_v36  ;;  %v3142_v5 = vrot.slane %v3140_v16, 7  ;;  %v2379_v6 = vld [vmem:[#allocation2 + $0xd8] sm:$0x1f] }
 0x295   : > { %8678 = vmatmul.mubr.bf16.gmra.mrb[248].mxu0 %v3122_v12  ;;  %v8436_v12 = vpop.f32.mrb[147].mxu0  ;;  %v1775_v53 = vpop.f32.mrb[146].mxu1 }
 0x296   : > { %8681 = vmatprep.mubr.msk.bf16.mxu0 %vm9713_vm0, %v13577_v61  ;;  %v8316_v18 = vpop.f32.mrb[147].mxu1 }
 0x297   : > { %v2348_v29 = vpop.f32.mrb[148].mxu0  ;;  %v2505_v18 = vsel %vm2397_vm3, %v2500_v42, %v13697_v62  ;;  %v2511_v42 = vshrl.u32 %v2379_v6, 16  ;;  %v2514_v62 = vshll.u32 %v2379_v6, 16 }
 0x298   : > { %v11633_v12 = vadd.f32 %v2348_v29, %v1772_v26  ;;  %v8439_v8 = vpop.f32.mrb[149].mxu0 }
 0x299   : > { %v2351_v17 = vpop.f32.mrb[150].mxu0  ;;  %v3143_v8 = vshll.u32 %v2922_v21, 16 }
 0x29a   : > { %8562 = vmatmul.mubr.bf16.gmra.mrb[252].mxu1 %v2501_v38  ;;  %v11637_v45 = vadd.f32 %v2351_v17, %v1775_v53  ;;  %v8440_v51 = vpop.f32.mrb[151].mxu0  ;;  %v3148_v38 = vshrl.u32 %v2923_v10, 16 }
 0x29b   : > { %8565 = vmatprep.mubr.msk.bf16.mxu1 %vm9713_vm0, %v13577_v61  ;;  %v1780_v44 = vpop.f32.mrb[148].mxu1  ;;  %v3145_v53 = vor.u32 %v3143_v8, %v3142_v5 }
 0x29c   : > { %v8319_v34 = vpop.f32.mrb[149].mxu1 }
 0x29d   : > { %8682 = vmatmul.mubr.bf16.gmra.mrb[252].mxu0 %v3130_v41  ;;  %v1783_v41 = vpop.f32.mrb[150].mxu1  ;;  %v3146_v34 = vsel %vm2942_vm4, %v3134_v57, %v3145_v53  ;;  %v13698_v53 = vld [vmem:[#allocation18_spill] sm:$0xff] }
 0x29e   : > { %8685 = vmatprep.mubr.msk.bf16.mxu0 %vm9713_vm0, %v13577_v61  ;;  %v8320_v26 = vpop.f32.mrb[151].mxu1 }
 0x29f   : > { %v2356_v29 = vpop.f32.mrb[152].mxu0  ;;  %v3150_v26 = vrot.slane %v3148_v38, 7 }
 0x2a0   : > { %v11644_v17 = vadd.f32 %v2356_v29, %v1780_v44  ;;  %v8443_v51 = vpop.f32.mrb[153].mxu0  ;;  %v2924_v44 = vld [vmem:[#allocation2 + $0xe0] sm:$0xff] }
 0x2a1   : > { %v2359_v36 = vpop.f32.mrb[154].mxu0 }
 0x2a2   : > { %8566 = vmatmul.mubr.bf16.gmra.mrb[0].mxu1 %v2505_v18  ;;  %v11648_v16 = vadd.f32 %v2359_v36, %v1783_v41  ;;  %v3151_v18 = vshll.u32 %v2923_v10, 16  ;;  %v2513_v41 = vrot.slane %v2511_v42, 4  ;;  %v2516_v36 = vrot.slane %v2514_v62, 5 }
 0x2a3   : > { %8569 = vmatprep.mubr.msk.bf16.mxu1 %vm9713_vm0, %v13577_v61  ;;  %v1788_v21 = vpop.f32.mrb[152].mxu1 }
 0x2a4   : > { %v8323_v8 = vpop.f32.mrb[153].mxu1  ;;  %v3153_v55 = vor.u32 %v3151_v18, %v3150_v26 }
 0x2a5   : > { %8686 = vmatmul.mubr.bf16.gmra.mrb[0].mxu0 %v3138_v37  ;;  %v8444_v37 = vpop.f32.mrb[155].mxu0  ;;  %v1791_v29 = vpop.f32.mrb[154].mxu1 }
 0x2a6   : > { %8689 = vmatprep.mubr.msk.bf16.mxu0 %vm9713_vm0, %v13577_v61  ;;  %v8324_v51 = vpop.f32.mrb[155].mxu1  ;;  %v3156_v37 = vshrl.u32 %v2924_v44, 16  ;;  %v3154_v10 = vsel %vm2942_vm4, %v3142_v5, %v3153_v55  ;;  %v3910_v55 = vld [vmem:[#allocation2 + $0x18] sm:$0xff] }
 0x2a7   : > { %v2364_v13 = vpop.f32.mrb[156].mxu0  ;;  %v2517_v51 = vor.u32 %v2516_v36, %v2513_v41 }
 0x2a8   : > { %v11653_v28 = vadd.f32 %v2364_v13, %v1788_v21  ;;  %v8447_v57 = vpop.f32.mrb[157].mxu0  ;;  %v3158_v18 = vrot.slane %v3156_v37, 7  ;;  %v3159_v13 = vshll.u32 %v2924_v44, 16 }
 0x2a9   : > { %v2367_v38 = vpop.f32.mrb[158].mxu0  ;;  %v3909_v57 = vld [vmem:[#allocation2 + $0x10] sm:$0xff] }
 0x2aa   : > { %8570 = vmatmul.mubr.bf16.gmra.mrb[4].mxu1 %v13698_v53  ;;  %v11658_v6 = vadd.f32 %v2367_v38, %v1791_v29  ;;  %v2518_v29 = vsel %vm2397_vm3, %v13700_v24, %v2517_v51  ;;  %v3161_v38 = vor.u32 %v3159_v13, %v3158_v18  ;;  %v3958_v41 = vshll.u32 %v3909_v57, 16 }
 0x2ab   : > { %8573 = vmatprep.mubr.msk.bf16.mxu1 %vm9713_vm0, %v13577_v61  ;;  %v1796_v8 = vpop.f32.mrb[156].mxu1 }
 0x2ac   : > { %13699 = vst [vmem:[#allocation13_spill] sm:$0xff] %v11658_v6  ;;  %v8327_v42 = vpop.f32.mrb[157].mxu1  ;;  %v3960_v18 = vrot.slane %v3958_v41, 1  ;;  %v9559_v41 = vld [vmem:[%s13392_s4 + $0x188] sm:$0xff]  }
 0x2ad   : > { %8690 = vmatmul.mubr.bf16.gmra.mrb[4].mxu0 %v3146_v34  ;;  %v8448_v34 = vpop.f32.mrb[159].mxu0  ;;  %v1799_v62 = vpop.f32.mrb[158].mxu1  ;;  %v3963_v42 = vshll.u32 %v3910_v55, 16 }
 0x2ae   : > { %8693 = vmatprep.mubr.msk.bf16.mxu0 %vm9713_vm0, %v13577_v61  ;;  %v8328_v21 = vpop.f32.mrb[159].mxu1 }
 0x2af   : > { %v2372_v53 = vpop.f32.mrb[160].mxu0  ;;  %v13702_v21 = vld [vmem:[#allocation11_spill] sm:$0xff] }
 0x2b0   : > { %v11665_v34 = vadd.f32 %v2372_v53, %v1796_v8  ;;  %v8451_v6 = vpop.f32.mrb[161].mxu0 }
 0x2b1   : > { %v2375_v5 = vpop.f32.mrb[162].mxu0  ;;  %v9557_v6 = vld [vmem:[%s13392_s4 + $0x180] sm:$0xff]  }
 0x2b2   : > { %8574 = vmatmul.mubr.bf16.gmra.mrb[8].mxu1 %v2518_v29  ;;  %v11669_v36 = vadd.f32 %v2375_v5, %v1799_v62  ;;  %v8452_v44 = vpop.f32.mrb[163].mxu0  ;;  %v13703_v62 = vld [vmem:[#allocation12_spill] sm:$0xff]  ;;  %v3956_v5 = vshrl.u32 %v3909_v57, 16 }
 0x2b3   : > { %8717 = vmatprep.mubr.msk.bf16.mxu1 %vm9713_vm0, %v13577_v61  ;;  %v2628_v37 = vpop.f32.mrb[160].mxu1 }
 0x2b4   : > { %13701 = vst [vmem:[#allocation14_spill] sm:$0xff] %v11669_v36  ;;  %v2843_v24 = vadd.f32 %v2628_v37, %v13702_v21  ;;  %v8471_v51 = vpop.f32.mrb[161].mxu1  ;;  %v9622_v37 = vld [vmem:[#allocation2 + $0x10] sm:$0xff] }
 0x2b5   : > { %8694 = vmatmul.mubr.bf16.gmra.mrb[8].mxu0 %v3154_v10  ;;  %v3162_v10 = vsel %vm2942_vm4, %v3150_v26, %v3161_v38  ;;  %v2631_v8 = vpop.f32.mrb[162].mxu1  ;;  %v3965_v26 = vrot.slane %v3963_v42, 1  ;;  %v3961_v51 = vor.u32 %v3960_v18, %v3956_v5  ;;  %v13707_v5 = vld [vmem:[#allocation20_spill] sm:$0xff] }
 0x2b6   : > { %8697 = vmatprep.mubr.msk.bf16.mxu0 %vm9713_vm0, %v13577_v61  ;;  %v2844_v13 = vadd.f32 %v2631_v8, %v13703_v62  ;;  %v8472_v53 = vpop.f32.mrb[163].mxu1 }
 0x2b7   : > { %v3272_v29 = vpop.f32.mrb[164].mxu0  ;;  %v13706_v53 = vld [vmem:[#allocation19_spill] sm:$0xff] }
 0x2b8   : > { %v11679_v38 = vadd.f32 %v3272_v29, %v2843_v24  ;;  %v8595_v44 = vpop.f32.mrb[165].mxu0  ;;  %v3966_v24 = vsel %vm3954_vm5, %v3961_v51, %v3965_v26  ;;  %v3967_v51 = vshrl.u32 %v3910_v55, 16 }
 0x2b9   : > { %v3275_v21 = vpop.f32.mrb[166].mxu0 }
 0x2ba   : > { %13704 = vst [vmem:[#allocation17_spill] sm:$0xff] %v11679_v38  ;;  %8718 = vmatmul.mubr.bf16.vlgmr.msra.gmra.mrb[12].mxu1 %v9622_v37  ;;  %v11686_v8 = vadd.f32 %v3275_v21, %v2844_v13  ;;  %v8596_v57 = vpop.f32.mrb[167].mxu0  ;;  %v9560_v13 = vld [vmem:[%s13392_s4 + $0x190] sm:$0xff]   ;;  %v9625_v38 = vld [vmem:[#allocation2 + $0x28] sm:$0xff] }
 0x2bb   : > { %8950 = vmatpush3.bf16.msra.mxu1 %v9557_v6  ;;  %8721 = vmatprep.mubr.msk.bf16.mxu1 %vm9713_vm0, %v13577_v61  ;;  %v2636_v42 = vpop.f32.mrb[164].mxu1 }
 0x2bc   : > { %13705 = vst [vmem:[#allocation15_spill] sm:$0xff] %v11686_v8  ;;  %8951 = vmatprep.subr.bf16.mxu1 %v13577_v61  ;;  %v2845_v6 = vadd.f32 %v2636_v42, %v13706_v53  ;;  %v8475_v29 = vpop.f32.mrb[165].mxu1  ;;  %v9623_v53 = vld [vmem:[#allocation2 + $0x18] sm:$0xff] }
 0x2bd   : > { %8698 = vmatmul.mubr.bf16.gmra.mrb[12].mxu0 %v3162_v10  ;;  %v3911_v10 = vld [vmem:[#allocation2 + $0x20] sm:$0xff]  ;;  %v2639_v18 = vpop.f32.mrb[166].mxu1  ;;  %v3912_v29 = vld [vmem:[#allocation2 + $0x28] sm:$0xff] }
 0x2be   : > { %8841 = vmatprep.mubr.msk.bf16.mxu0 %vm9713_vm0, %v13577_v61  ;;  %v3971_v62 = vshll.u32 %v3911_v10, 16  ;;  %v2846_v44 = vadd.f32 %v2639_v18, %v13707_v5  ;;  %v8476_v37 = vpop.f32.mrb[167].mxu1  ;;  %v9561_v18 = vld [vmem:[%s13392_s4 + $0x198] sm:$0xff]  }
 0x2bf   : > { %8952 = vmatpush3.bf16.msra.mxu1 %v9559_v41  ;;  %v3280_v21 = vpop.f32.mrb[168].mxu0  ;;  %v3969_v41 = vor.u32 %v3967_v51, %v3965_v26  ;;  %v3979_v37 = vshll.u32 %v3912_v29, 16 }
 0x2c0   : > { %8953 = vmatprep.subr.bf16.mxu1 %v13577_v61  ;;  %v3973_v57 = vrot.slane %v3971_v62, 1  ;;  %v11698_v42 = vadd.f32 %v3280_v21, %v2845_v6  ;;  %v13710_v21 = vld [vmem:[#allocation21_spill] sm:$0xff] }
 0x2c2   : > { %13708 = vst [vmem:[#allocation3_spill] sm:$0xff] %v11698_v42  ;;  %8722 = vmatmul.mubr.bf16.gmra.mrb[16].mxu1 %v9623_v53  ;;  %v3974_v6 = vsel %vm3954_vm5, %v3969_v41, %v3973_v57 }
 0x2c3   : > { %8725 = vmatprep.mubr.msk.bf16.mxu1 %vm9713_vm0, %v13577_v61  ;;  %8954 = vmatpush3.bf16.msra.mxu1 %v9560_v13  ;;  %v2644_v62 = vpop.f32.mrb[168].mxu1  ;;  %v13711_v13 = vld [vmem:[#allocation22_spill] sm:$0xff] }
 0x2c4   : > { %8955 = vmatprep.subr.bf16.mxu1 %v13577_v61  ;;  %v8479_v26 = vpop.f32.mrb[169].mxu1 }
 0x2c5   : > { %8842 = vmatmul.mubr.bf16.vlgmr.msra.gmra.mrb[16].mxu0 %v3966_v24  ;;  %v8599_v24 = vpop.f32.mrb[169].mxu0  ;;  %v2647_v51 = vpop.f32.mrb[170].mxu1  ;;  %v3913_v26 = vld [vmem:[#allocation2 + $0x30] sm:$0xff] }
 0x2c6   : > { %8845 = vmatprep.mubr.msk.bf16.mxu0 %vm9713_vm0, %v13577_v61  ;;  %v3283_v8 = vpop.f32.mrb[170].mxu0  ;;  %v2847_v24 = vadd.f32 %v2644_v62, %v13710_v21  ;;  %v8480_v53 = vpop.f32.mrb[171].mxu1  ;;  %v9624_v21 = vld [vmem:[#allocation2 + $0x20] sm:$0xff] }
 0x2c7   : > { %v11705_v5 = vadd.f32 %v3283_v8, %v2846_v44  ;;  %v8600_v55 = vpop.f32.mrb[171].mxu0  ;;  %8956 = vmatpush3.bf16.msra.mxu1 %v9561_v18  ;;  %v9562_v8 = vld [vmem:[%s13392_s4 + $0x1a0] sm:$0xff]   ;;  %v2848_v44 = vadd.f32 %v2647_v51, %v13711_v13  ;;  %v9563_v51 = vld [vmem:[%s13392_s4 + $0x1a8] sm:$0xff]   ;;  %v3987_v53 = vshll.u32 %v3913_v26, 16 }
 0x2c8   : > { %8957 = vmatprep.subr.bf16.mxu1 %v13577_v61  ;;  %v3288_v41 = vpop.f32.mrb[172].mxu0  ;;  %v3975_v55 = vshrl.u32 %v3911_v10, 16 }
 0x2c9   : > { %13709 = vst [vmem:[#allocation16_spill] sm:$0xff] %v11705_v5  ;;  %v3981_v5 = vrot.slane %v3979_v37, 1  ;;  %v11717_v62 = vadd.f32 %v3288_v41, %v2847_v24  ;;  %v13714_v41 = vld [vmem:[#allocation30_spill] sm:$0xff] }
 0x2ca   : > { %8726 = vmatmul.mubr.bf16.gmra.mrb[20].mxu1 %v9624_v21  ;;  %v3977_v18 = vor.u32 %v3975_v55, %v3973_v57 }
 0x2cb   : > { %13712 = vst [vmem:[#allocation4_spill] sm:$0xff] %v11717_v62  ;;  %8729 = vmatprep.mubr.msk.bf16.mxu1 %vm9713_vm0, %v13577_v61  ;;  %8958 = vmatpush3.bf16.msra.mxu1 %v9562_v8  ;;  %v2652_v37 = vpop.f32.mrb[172].mxu1  ;;  %v13715_v8 = vld [vmem:[#allocation36_spill] sm:$0xff] }
 0x2cc   : > { %8959 = vmatprep.subr.bf16.mxu1 %v13577_v61  ;;  %v3982_v24 = vsel %vm3954_vm5, %v3977_v18, %v3981_v5  ;;  %v8483_v57 = vpop.f32.mrb[173].mxu1 }
 0x2cd   : > { %8846 = vmatmul.mubr.bf16.gmra.mrb[20].mxu0 %v3974_v6  ;;  %v8603_v6 = vpop.f32.mrb[173].mxu0  ;;  %v2655_v55 = vpop.f32.mrb[174].mxu1 }
 0x2ce   : > { %8849 = vmatprep.mubr.msk.bf16.mxu0 %vm9713_vm0, %v13577_v61  ;;  %v3291_v42 = vpop.f32.mrb[174].mxu0  ;;  %v2849_v6 = vadd.f32 %v2652_v37, %v13714_v41  ;;  %v2850_v21 = vadd.f32 %v2655_v55, %v13715_v8  ;;  %v3914_v37 = vld [vmem:[#allocation2 + $0x38] sm:$0xff] }
 0x2cf   : > { %v11724_v13 = vadd.f32 %v3291_v42, %v2848_v44  ;;  %v8604_v10 = vpop.f32.mrb[175].mxu0  ;;  %8960 = vmatpush3.bf16.msra.mxu1 %v9563_v51  ;;  %v8484_v42 = vpop.f32.mrb[175].mxu1 }
 0x2d0   : > { %8961 = vmatprep.subr.bf16.mxu1 %v13577_v61  ;;  %v3296_v44 = vpop.f32.mrb[176].mxu0  ;;  %v3983_v10 = vshrl.u32 %v3912_v29, 16  ;;  %v3995_v42 = vshll.u32 %v3914_v37, 16  ;;  %v13718_v29 = vld [vmem:[#allocation46_spill] sm:$0xff] }
 0x2d1   : > { %13713 = vst [vmem:[#allocation5_spill] sm:$0xff] %v11724_v13  ;;  %v3989_v13 = vrot.slane %v3987_v53, 1  ;;  %v11733_v62 = vadd.f32 %v3296_v44, %v2849_v6  ;;  %v8607_v18 = vpop.f32.mrb[177].mxu0 }
 0x2d2   : > { %8730 = vmatmul.mubr.bf16.gmra.mrb[24].mxu1 %v9625_v38  ;;  %v3985_v41 = vor.u32 %v3983_v10, %v3981_v5  ;;  %v13719_v38 = vld [vmem:[#allocation50_spill] sm:$0xff] }
 0x2d3   : > { %13716 = vst [vmem:[#allocation6_spill] sm:$0xff] %v11733_v62  ;;  %8733 = vmatprep.mubr.msk.bf16.mxu1 %vm9713_vm0, %v13577_v61  ;;  %v2660_v55 = vpop.f32.mrb[176].mxu1  ;;  %v3991_v62 = vshrl.u32 %v3913_v26, 16 }
 0x2d4   : > { %v3990_v8 = vsel %vm3954_vm5, %v3985_v41, %v3989_v13  ;;  %v2851_v53 = vadd.f32 %v2660_v55, %v13718_v29  ;;  %v8487_v6 = vpop.f32.mrb[177].mxu1  ;;  %v3915_v41 = vld [vmem:[#allocation2 + $0x40] sm:$0xff] }
 0x2d5   : > { %8850 = vmatmul.mubr.bf16.gmra.mrb[24].mxu0 %v3982_v24  ;;  %v3299_v24 = vpop.f32.mrb[178].mxu0  ;;  %v2663_v44 = vpop.f32.mrb[178].mxu1  ;;  %v3993_v55 = vor.u32 %v3991_v62, %v3989_v13  ;;  %v9564_v6 = vld [vmem:[%s13392_s4 + $0x1b0] sm:$0xff]  }
 0x2d6   : > { %8853 = vmatprep.mubr.msk.bf16.mxu0 %vm9713_vm0, %v13577_v61  ;;  %v11737_v51 = vadd.f32 %v3299_v24, %v2850_v21  ;;  %v8608_v57 = vpop.f32.mrb[179].mxu0  ;;  %v2852_v5 = vadd.f32 %v2663_v44, %v13719_v38  ;;  %v8488_v10 = vpop.f32.mrb[179].mxu1  ;;  %v3997_v21 = vrot.slane %v3995_v42, 1  ;;  %8962 = vmatpush3.bf16.msra.mxu1 %v9564_v6 }
 0x2d7   : > { %v3304_v18 = vpop.f32.mrb[180].mxu0  ;;  %8963 = vmatprep.subr.bf16.mxu1 %v13577_v61 }
 0x2d8   : > { %13717 = vst [vmem:[#allocation7_spill] sm:$0xff] %v11737_v51  ;;  %v11744_v24 = vadd.f32 %v3304_v18, %v2851_v53  ;;  %v8611_v57 = vpop.f32.mrb[181].mxu0  ;;  %v9626_v51 = vld [vmem:[#allocation2 + $0x30] sm:$0xff]  ;;  %v3998_v42 = vsel %vm3954_vm5, %v3993_v55, %v3997_v21  ;;  %v4003_v53 = vshll.u32 %v3915_v41, 16  ;;  %v9627_v55 = vld [vmem:[#allocation2 + $0x38] sm:$0xff] }
 0x2d9   : > { %v3307_v36 = vpop.f32.mrb[182].mxu0 }
 0x2da   : > { %8734 = vmatmul.mubr.bf16.gmra.mrb[28].mxu1 %v9626_v51  ;;  %v8612_v29 = vpop.f32.mrb[183].mxu0  ;;  %v4005_v10 = vrot.slane %v4003_v53, 1 }
 0x2db   : > { %8737 = vmatprep.mubr.msk.bf16.mxu1 %vm9713_vm0, %v13577_v61  ;;  %v2668_v26 = vpop.f32.mrb[180].mxu1 }
 0x2dc   : > { %v2853_v44 = vadd.f32 %v2668_v26, %v11199_v7  ;;  %v8491_v51 = vpop.f32.mrb[181].mxu1  ;;  %v3916_v7 = vld [vmem:[#allocation2 + $0x48] sm:$0xff] }
 0x2dd   : > { %8854 = vmatmul.mubr.bf16.gmra.mrb[28].mxu0 %v3990_v8  ;;  %v11748_v8 = vadd.f32 %v3307_v36, %v2852_v5  ;;  %v2671_v62 = vpop.f32.mrb[182].mxu1  ;;  %v3999_v5 = vshrl.u32 %v3914_v37, 16 }
 0x2de   : > { %8857 = vmatprep.mubr.msk.bf16.mxu0 %vm9713_vm0, %v13577_v61  ;;  %v2854_v36 = vadd.f32 %v2671_v62, %v11211_v39  ;;  %v8492_v13 = vpop.f32.mrb[183].mxu1  ;;  %v4011_v62 = vshll.u32 %v3916_v7, 16 }
 0x2df   : > { %v3312_v38 = vpop.f32.mrb[184].mxu0  ;;  %v4001_v6 = vor.u32 %v3999_v5, %v3997_v21  ;;  %v4007_v5 = vshrl.u32 %v3915_v41, 16 }
 0x2e0   : > { %v11759_v18 = vadd.f32 %v3312_v38, %v2853_v44  ;;  %v8615_v57 = vpop.f32.mrb[185].mxu0 }
 0x2e1   : > { %v3315_v29 = vpop.f32.mrb[186].mxu0  ;;  %v4006_v39 = vsel %vm3954_vm5, %v4001_v6, %v4005_v10  ;;  %v3917_v6 = vld [vmem:[#allocation2 + $0x50] sm:$0xff] }
 0x2e2   : > { %8738 = vmatmul.mubr.bf16.gmra.mrb[32].mxu1 %v9627_v55  ;;  %v11763_v26 = vadd.f32 %v3315_v29, %v2854_v36  ;;  %v4013_v36 = vrot.slane %v4011_v62, 1  ;;  %v9628_v29 = vld [vmem:[#allocation2 + $0x40] sm:$0xff] }
 0x2e3   : > { %8741 = vmatprep.mubr.msk.bf16.mxu1 %vm9713_vm0, %v13577_v61  ;;  %v2676_v51 = vpop.f32.mrb[184].mxu1 }
 0x2e4   : > { %v2855_v37 = vadd.f32 %v2676_v51, %v11258_v46  ;;  %v8495_v53 = vpop.f32.mrb[185].mxu1  ;;  %v4009_v46 = vor.u32 %v4007_v5, %v4005_v10  ;;  %v4015_v5 = vshrl.u32 %v3916_v7, 16 }
 0x2e5   : > { %8858 = vmatmul.mubr.bf16.gmra.mrb[32].mxu0 %v3998_v42  ;;  %v8616_v42 = vpop.f32.mrb[187].mxu0  ;;  %v2679_v44 = vpop.f32.mrb[186].mxu1 }
 0x2e6   : > { %8861 = vmatprep.mubr.msk.bf16.mxu0 %vm9713_vm0, %v13577_v61  ;;  %v2856_v21 = vadd.f32 %v2679_v44, %v11275_v52  ;;  %v8496_v13 = vpop.f32.mrb[187].mxu1  ;;  %v4014_v52 = vsel %vm3954_vm5, %v4009_v46, %v4013_v36  ;;  %v4019_v44 = vshll.u32 %v3917_v6, 16  ;;  %v3918_v46 = vld [vmem:[#allocation2 + $0x58] sm:$0xff] }
 0x2e7   : > { %v3320_v38 = vpop.f32.mrb[188].mxu0 }
 0x2e8   : > { %v11770_v57 = vadd.f32 %v3320_v38, %v2855_v37  ;;  %v8619_v55 = vpop.f32.mrb[189].mxu0 }
 0x2e9   : > { %v3323_v42 = vpop.f32.mrb[190].mxu0 }
 0x2ea   : > { %8742 = vmatmul.mubr.bf16.gmra.mrb[36].mxu1 %v9628_v29  ;;  %v11774_v51 = vadd.f32 %v3323_v42, %v2856_v21  ;;  %v4021_v21 = vrot.slane %v4019_v44, 1  ;;  %v9629_v42 = vld [vmem:[#allocation2 + $0x48] sm:$0xff] }
 0x2eb   : > { %8745 = vmatprep.mubr.msk.bf16.mxu1 %vm9713_vm0, %v13577_v61  ;;  %v2684_v53 = vpop.f32.mrb[188].mxu1 }
 0x2ec   : > { %v2857_v41 = vadd.f32 %v2684_v53, %v11319_v3  ;;  %v8499_v62 = vpop.f32.mrb[189].mxu1  ;;  %v4017_v3 = vor.u32 %v4015_v5, %v4013_v36 }
 0x2ed   : > { %8862 = vmatmul.mubr.bf16.gmra.mrb[36].mxu0 %v4006_v39  ;;  %v8620_v39 = vpop.f32.mrb[191].mxu0  ;;  %v2687_v37 = vpop.f32.mrb[190].mxu1 }
 0x2ee   : > { %8865 = vmatprep.mubr.msk.bf16.mxu0 %vm9713_vm0, %v13577_v61  ;;  %v2858_v10 = vadd.f32 %v2687_v37, %v11337_v11  ;;  %v8500_v13 = vpop.f32.mrb[191].mxu1  ;;  %v4022_v11 = vsel %vm3954_vm5, %v4017_v3, %v4021_v21  ;;  %v4027_v37 = vshll.u32 %v3918_v46, 16  ;;  %v9630_v3 = vld [vmem:[#allocation2 + $0x50] sm:$0xff] }
 0x2ef   : > { %v3328_v38 = vpop.f32.mrb[192].mxu0 }
 0x2f0   : > { %v11781_v55 = vadd.f32 %v3328_v38, %v2857_v41  ;;  %v8623_v29 = vpop.f32.mrb[193].mxu0  ;;  %v9566_v38 = vld [vmem:[%s13392_s4 + $0x1c0] sm:$0xff]  }
 0x2f1   : > { %v3331_v39 = vpop.f32.mrb[194].mxu0  ;;  %v4023_v29 = vshrl.u32 %v3917_v6, 16  ;;  %9074 = vmatpush3.bf16.msra.mxu0 %v9566_v38 }
 0x2f2   : > { %8746 = vmatmul.mubr.bf16.gmra.mrb[40].mxu1 %v9629_v42  ;;  %v11785_v53 = vadd.f32 %v3331_v39, %v2858_v10  ;;  %v9565_v10 = vld [vmem:[%s13392_s4 + $0x1b8] sm:$0xff]   ;;  %9075 = vmatprep.subr.bf16.mxu0 %v13577_v61 }
 0x2f3   : > { %8749 = vmatprep.mubr.msk.bf16.mxu1 %vm9713_vm0, %v13577_v61  ;;  %v2692_v62 = vpop.f32.mrb[192].mxu1  ;;  %8964 = vmatpush3.bf16.msra.mxu1 %v9565_v10 }
 0x2f4   : > { %v2859_v7 = vadd.f32 %v2692_v62, %v11389_v35  ;;  %v8503_v44 = vpop.f32.mrb[193].mxu1  ;;  %v4029_v35 = vrot.slane %v4027_v37, 1  ;;  %v4025_v62 = vor.u32 %v4023_v29, %v4021_v21  ;;  %9197 = vmatprep.subr.bf16.mxu1 %v13577_v61 }
 0x2f5   : > { %8866 = vmatmul.mubr.bf16.gmra.mrb[40].mxu0 %v4014_v52  ;;  %v8624_v52 = vpop.f32.mrb[195].mxu0  ;;  %v2695_v41 = vpop.f32.mrb[194].mxu1 }
 0x2f6   : > { %8869 = vmatprep.mubr.msk.bf16.mxu0 %vm9713_vm0, %v13577_v61  ;;  %v2860_v36 = vadd.f32 %v2695_v41, %v11404_v23  ;;  %v8504_v13 = vpop.f32.mrb[195].mxu1  ;;  %v11800_v52 = vld [vmem:[#allocation2 + $0x60] sm:$0xff]  ;;  %v4030_v44 = vsel %vm3954_vm5, %v4025_v62, %v4029_v35  ;;  %v9631_v62 = vld [vmem:[#allocation2 + $0x58] sm:$0xff] }
 0x2f7   : > { %v4035_v21 = vshll.u32 %v11800_v52, 16 }
 0x2fa   : > { %8750 = vmatmul.mubr.bf16.gmra.mrb[44].mxu1 %v9630_v3  ;;  %v4037_v3 = vrot.slane %v4035_v21, 1 }
 0x2fb   : > { %8753 = vmatprep.mubr.msk.bf16.mxu1 %vm9713_vm0, %v13577_v61 }
 0x2fd   : > { %8870 = vmatmul.mubr.bf16.gmra.mrb[44].mxu0 %v4022_v11  ;;  %v9567_v11 = vld [vmem:[%s13392_s4 + $0x1c8] sm:$0xff]  }
 0x2fe   : > { %8873 = vmatprep.mubr.msk.bf16.mxu0 %vm9713_vm0, %v13577_v61  ;;  %9076 = vmatpush3.bf16.msra.mxu0 %v9567_v11 }
 0x2ff   : > { %9077 = vmatprep.subr.bf16.mxu0 %v13577_v61 }
 0x300   : > { %v3336_v5 = vpop.f32.mrb[196].mxu0 }
 0x301   : > { %v11798_v42 = vadd.f32 %v3336_v5, %v2859_v7  ;;  %v8627_v39 = vpop.f32.mrb[197].mxu0  ;;  %v2700_v7 = vpop.f32.mrb[196].mxu1  ;;  %v9568_v5 = vld [vmem:[%s13392_s4 + $0x1d0] sm:$0xff]  }
 0x302   : > { %v3339_v23 = vpop.f32.mrb[198].mxu0  ;;  %v2861_v41 = vadd.f32 %v2700_v7, %v11433_v58  ;;  %v8507_v13 = vpop.f32.mrb[197].mxu1  ;;  %v4031_v39 = vshrl.u32 %v3918_v46, 16  ;;  %8754 = vmatmul.mubr.bf16.gmra.mrb[48].mxu1 %v9631_v62  ;;  %9078 = vmatpush3.bf16.msra.mxu0 %v9568_v5 }
 0x303   : > { %v11807_v6 = vadd.f32 %v3339_v23, %v2860_v36  ;;  %v8628_v37 = vpop.f32.mrb[199].mxu0  ;;  %v2703_v10 = vpop.f32.mrb[198].mxu1  ;;  %8757 = vmatprep.mubr.msk.bf16.mxu1 %vm9713_vm0, %v13577_v61  ;;  %9079 = vmatprep.subr.bf16.mxu0 %v13577_v61 }
 0x304   : > { %v2862_v36 = vadd.f32 %v2703_v10, %v11438_v27  ;;  %v8508_v38 = vpop.f32.mrb[199].mxu1  ;;  %v3920_v37 = vld [vmem:[#allocation2 + $0x68] sm:$0xff]  ;;  %v4033_v11 = vor.u32 %v4031_v39, %v4029_v35  ;;  %v9569_v27 = vld [vmem:[%s13392_s4 + $0x1d8] sm:$0xff]  }
 0x305   : > { %8874 = vmatmul.mubr.bf16.gmra.mrb[48].mxu0 %v4030_v44  ;;  %v2708_v21 = vpop.f32.mrb[200].mxu1  ;;  %v4043_v13 = vshll.u32 %v3920_v37, 16 }
 0x306   : > { %8877 = vmatprep.mubr.msk.bf16.mxu0 %vm9713_vm0, %v13577_v61  ;;  %v2863_v10 = vadd.f32 %v2708_v21, %v11452_v49  ;;  %v8511_v35 = vpop.f32.mrb[201].mxu1  ;;  %9080 = vmatpush3.bf16.msra.mxu0 %v9569_v27 }
 0x307   : > { %v2711_v38 = vpop.f32.mrb[202].mxu1  ;;  %9081 = vmatprep.subr.bf16.mxu0 %v13577_v61  ;;  %v4045_v49 = vrot.slane %v4043_v13, 1 }
 0x308   : > { %v3344_v29 = vpop.f32.mrb[200].mxu0  ;;  %v2864_v5 = vadd.f32 %v2711_v38, %v11457_v31  ;;  %v9571_v31 = vld [vmem:[%s13392_s4 + $0x1e8] sm:$0xff]  }
 0x309   : > { %v11821_v58 = vadd.f32 %v3344_v29, %v2861_v41  ;;  %v8631_v23 = vpop.f32.mrb[201].mxu0  ;;  %v4038_v41 = vsel %vm3954_vm5, %v4033_v11, %v4037_v3  ;;  %v9570_v29 = vld [vmem:[%s13392_s4 + $0x1e0] sm:$0xff]  }
 0x30a   : > { %v3347_v7 = vpop.f32.mrb[202].mxu0  ;;  %v4039_v23 = vshrl.u32 %v11800_v52, 16  ;;  %v9632_v11 = vld [vmem:[#allocation2 + $0x60] sm:$0xff]  ;;  %9082 = vmatpush3.bf16.msra.mxu0 %v9570_v29 }
 0x30b   : > { %13720 = vst [vmem:[#allocation8_spill] sm:$0xff] %v11821_v58  ;;  %v11828_v44 = vadd.f32 %v3347_v7, %v2862_v36  ;;  %v8632_v46 = vpop.f32.mrb[203].mxu0  ;;  %v8512_v36 = vpop.f32.mrb[203].mxu1  ;;  %8758 = vmatmul.mubr.bf16.gmra.mrb[52].mxu1 %v9632_v11  ;;  %9083 = vmatprep.subr.bf16.mxu0 %v13577_v61 }
 0x30c   : > { %v3921_v46 = vld [vmem:[#allocation2 + $0x70] sm:$0xff]  ;;  %v4041_v21 = vor.u32 %v4039_v23, %v4037_v3  ;;  %8761 = vmatprep.mubr.msk.bf16.mxu1 %vm9713_vm0, %v13577_v61  ;;  %v2716_v13 = vpop.f32.mrb[204].mxu1 }
 0x30d   : > { %13721 = vst [vmem:[#allocation9_spill] sm:$0xff] %v11828_v44  ;;  %8878 = vmatmul.mubr.bf16.gmra.mrb[52].mxu0 %v4038_v41  ;;  %v4051_v35 = vshll.u32 %v3921_v46, 16  ;;  %v2865_v38 = vadd.f32 %v2716_v13, %v11470_v22  ;;  %v8515_v3 = vpop.f32.mrb[205].mxu1  ;;  %v3936_v44 = vld [vmem:[#allocation2 + $0xe8] sm:$0x1] }
 0x30e   : > { %8881 = vmatprep.mubr.msk.bf16.mxu0 %vm9713_vm0, %v13577_v61  ;;  %v2719_v36 = vpop.f32.mrb[206].mxu1  ;;  %9084 = vmatpush3.bf16.msra.mxu0 %v9571_v31 }
 0x30f   : > { %v2866_v29 = vadd.f32 %v2719_v36, %v11475_v48  ;;  %9085 = vmatprep.subr.bf16.mxu0 %v13577_v61  ;;  %v4053_v11 = vrot.slane %v4051_v35, 1  ;;  %v9574_v48 = vld [vmem:[%s13392_s4 + $0x1f8] sm:$0xff]  }
 0x310   : > { %v3352_v39 = vpop.f32.mrb[204].mxu0 }
 0x311   : > { %v11841_v62 = vadd.f32 %v3352_v39, %v2863_v10  ;;  %v8635_v7 = vpop.f32.mrb[205].mxu0  ;;  %v4046_v10 = vsel %vm3954_vm5, %v4041_v21, %v4045_v49  ;;  %v9572_v39 = vld [vmem:[%s13392_s4 + $0x1f0] sm:$0xff]   ;;  %v9633_v21 = vld [vmem:[#allocation2 + $0x68] sm:$0xff] }
 0x312   : > { %v3355_v27 = vpop.f32.mrb[206].mxu0  ;;  %v4047_v7 = vshrl.u32 %v3920_v37, 16  ;;  %9086 = vmatpush3.bf16.msra.mxu0 %v9572_v39 }
 0x313   : > { %13722 = vst [vmem:[#allocation18_spill] sm:$0xff] %v11841_v62  ;;  %v11848_v41 = vadd.f32 %v3355_v27, %v2864_v5  ;;  %v8636_v52 = vpop.f32.mrb[207].mxu0  ;;  %v8516_v5 = vpop.f32.mrb[207].mxu1  ;;  %8762 = vmatmul.mubr.bf16.gmra.mrb[56].mxu1 %v9633_v21  ;;  %9087 = vmatprep.subr.bf16.mxu0 %v13577_v61 }
 0x314   : > { %v3922_v52 = vld [vmem:[#allocation2 + $0x78] sm:$0xff]  ;;  %v4049_v31 = vor.u32 %v4047_v7, %v4045_v49  ;;  %8765 = vmatprep.mubr.msk.bf16.mxu1 %vm9713_vm0, %v13577_v61  ;;  %v2724_v35 = vpop.f32.mrb[208].mxu1  ;;  %v4055_v7 = vshrl.u32 %v3921_v46, 16 }
 0x315   : > { %13723 = vst [vmem:[#allocation10_spill] sm:$0xff] %v11848_v41  ;;  %8882 = vmatmul.mubr.bf16.gmra.mrb[56].mxu0 %v4046_v10  ;;  %v4059_v3 = vshll.u32 %v3922_v52, 16  ;;  %v2867_v36 = vadd.f32 %v2724_v35, %v11485_v1  ;;  %v8519_v49 = vpop.f32.mrb[209].mxu1 }
 0x316   : > { %8885 = vmatprep.mubr.msk.bf16.mxu0 %vm9713_vm0, %v13577_v61  ;;  %v2727_v5 = vpop.f32.mrb[210].mxu1  ;;  %9088 = vmatpush3.bf16.msra.mxu0 %v9574_v48 }
 0x317   : > { %v2868_v39 = vadd.f32 %v2727_v5, %v11490_v59  ;;  %9321 = vmatprep.subr.bf16.mxu0 %v13577_v61  ;;  %v3923_v59 = vld [vmem:[#allocation2 + $0x80] sm:$0xff]  ;;  %v4063_v5 = vshrl.u32 %v3922_v52, 16 }
 0x318   : > { %v3360_v23 = vpop.f32.mrb[208].mxu0 }
 0x319   : > { %v11860_v22 = vadd.f32 %v3360_v23, %v2865_v38  ;;  %v8639_v27 = vpop.f32.mrb[209].mxu0  ;;  %v4054_v38 = vsel %vm3954_vm5, %v4049_v31, %v4053_v11  ;;  %v9634_v31 = vld [vmem:[#allocation2 + $0x70] sm:$0xff] }
 0x31a   : > { %v3363_v13 = vpop.f32.mrb[210].mxu0  ;;  %v4061_v27 = vrot.slane %v4059_v3, 1 }
 0x31b   : > { %13724 = vst [vmem:[#allocation11_spill] sm:$0xff] %v11860_v22  ;;  %v11867_v10 = vadd.f32 %v3363_v13, %v2866_v29  ;;  %v8640_v37 = vpop.f32.mrb[211].mxu0  ;;  %v8520_v29 = vpop.f32.mrb[211].mxu1  ;;  %8766 = vmatmul.mubr.bf16.gmra.mrb[60].mxu1 %v9634_v31  ;;  %v3935_v22 = vld [vmem:[#allocation2 + $0xe0] sm:$0xff] }
 0x31c   : > { %v4057_v37 = vor.u32 %v4055_v7, %v4053_v11  ;;  %8769 = vmatprep.mubr.msk.bf16.mxu1 %vm9713_vm0, %v13577_v61  ;;  %v4067_v11 = vshll.u32 %v3923_v59, 16  ;;  %v4065_v7 = vor.u32 %v4063_v5, %v4061_v27 }
 0x31d   : > { %13725 = vst [vmem:[#allocation12_spill] sm:$0xff] %v11867_v10  ;;  %8886 = vmatmul.mubr.bf16.gmra.mrb[60].mxu0 %v4054_v38  ;;  %v2732_v38 = vpop.f32.mrb[212].mxu1 }
 0x31e   : > { %8889 = vmatprep.mubr.msk.bf16.mxu0 %vm9713_vm0, %v13577_v61  ;;  %v4062_v49 = vsel %vm3954_vm5, %v4057_v37, %v4061_v27  ;;  %v2869_v46 = vadd.f32 %v2732_v38, %v11495_v30  ;;  %v8523_v3 = vpop.f32.mrb[213].mxu1  ;;  %v3924_v37 = vld [vmem:[#allocation2 + $0x88] sm:$0xff] }
 0x31f   : > { %v4075_v3 = vshll.u32 %v3924_v37, 16 }
 0x320   : > { %v3368_v23 = vpop.f32.mrb[212].mxu0 }
 0x321   : > { %v11876_v21 = vadd.f32 %v3368_v23, %v2867_v36  ;;  %v8643_v13 = vpop.f32.mrb[213].mxu0  ;;  %v2735_v36 = vpop.f32.mrb[214].mxu1 }
 0x322   : > { %v3371_v1 = vpop.f32.mrb[214].mxu0  ;;  %v2870_v29 = vadd.f32 %v2735_v36, %v11500_v47  ;;  %v8524_v23 = vpop.f32.mrb[215].mxu1 }
 0x323   : > { %13726 = vst [vmem:[#allocation19_spill] sm:$0xff] %v11876_v21  ;;  %v11880_v35 = vadd.f32 %v3371_v1, %v2868_v39  ;;  %v8644_v48 = vpop.f32.mrb[215].mxu0  ;;  %v9635_v1 = vld [vmem:[#allocation2 + $0x78] sm:$0xff] }
 0x324   : > { %8770 = vmatmul.mubr.bf16.gmra.mrb[64].mxu1 %v9635_v1  ;;  %v4069_v48 = vrot.slane %v4067_v11, 1  ;;  %v3934_v21 = vld [vmem:[#allocation2 + $0xd8] sm:$0xff] }
 0x325   : > { %13727 = vst [vmem:[#allocation20_spill] sm:$0xff] %v11880_v35  ;;  %8890 = vmatmul.mubr.bf16.gmra.mrb[64].mxu0 %v4062_v49  ;;  %8773 = vmatprep.mubr.msk.bf16.mxu1 %vm9713_vm0, %v13577_v61  ;;  %v2740_v49 = vpop.f32.mrb[216].mxu1 }
 0x326   : > { %8893 = vmatprep.mubr.msk.bf16.mxu0 %vm9713_vm0, %v13577_v61  ;;  %v4070_v47 = vsel %vm3954_vm5, %v4065_v7, %v4069_v48  ;;  %v2871_v27 = vadd.f32 %v2740_v49, %v11505_v54  ;;  %v3925_v7 = vld [vmem:[#allocation2 + $0x90] sm:$0xff] }
 0x328   : > { %v3376_v39 = vpop.f32.mrb[216].mxu0 }
 0x329   : > { %v11887_v13 = vadd.f32 %v3376_v39, %v2869_v46  ;;  %v8647_v31 = vpop.f32.mrb[217].mxu0  ;;  %v8527_v46 = vpop.f32.mrb[217].mxu1  ;;  %v4071_v39 = vshrl.u32 %v3923_v59, 16 }
 0x32a   : > { %v3379_v30 = vpop.f32.mrb[218].mxu0  ;;  %v2743_v36 = vpop.f32.mrb[218].mxu1 }
 0x32b   : > { %13728 = vst [vmem:[#allocation21_spill] sm:$0xff] %v11887_v13  ;;  %v11891_v38 = vadd.f32 %v3379_v30, %v2870_v29  ;;  %v8648_v52 = vpop.f32.mrb[219].mxu0  ;;  %v2872_v5 = vadd.f32 %v2743_v36, %v11514_v32  ;;  %v8528_v11 = vpop.f32.mrb[219].mxu1  ;;  %v4077_v29 = vrot.slane %v4075_v3, 1  ;;  %v9636_v30 = vld [vmem:[#allocation2 + $0x80] sm:$0xff]  ;;  %v4073_v54 = vor.u32 %v4071_v39, %v4069_v48  ;;  %v3933_v13 = vld [vmem:[#allocation2 + $0xd0] sm:$0xff] }
 0x32c   : > { %8774 = vmatmul.mubr.bf16.gmra.mrb[68].mxu1 %v9636_v30  ;;  %v4083_v36 = vshll.u32 %v3925_v7, 16  ;;  %v4079_v39 = vshrl.u32 %v3924_v37, 16 }
 0x32d   : > { %13729 = vst [vmem:[#allocation22_spill] sm:$0xff] %v11891_v38  ;;  %8894 = vmatmul.mubr.bf16.gmra.mrb[68].mxu0 %v4070_v47  ;;  %8777 = vmatprep.mubr.msk.bf16.mxu1 %vm9713_vm0, %v13577_v61  ;;  %v2748_v46 = vpop.f32.mrb[220].mxu1  ;;  %v4078_v32 = vsel %vm3954_vm5, %v4073_v54, %v4077_v29  ;;  %v3926_v54 = vld [vmem:[#allocation2 + $0x98] sm:$0xff] }
 0x32e   : > { %8897 = vmatprep.mubr.msk.bf16.mxu0 %vm9713_vm0, %v13577_v61  ;;  %v2873_v59 = vadd.f32 %v2748_v46, %v11525_v19  ;;  %v8531_v3 = vpop.f32.mrb[221].mxu1  ;;  %v4081_v19 = vor.u32 %v4079_v39, %v4077_v29  ;;  %v4087_v39 = vshrl.u32 %v3925_v7, 16 }
 0x330   : > { %v3384_v23 = vpop.f32.mrb[220].mxu0 }
 0x331   : > { %v11898_v31 = vadd.f32 %v3384_v23, %v2871_v27  ;;  %v8651_v1 = vpop.f32.mrb[221].mxu0  ;;  %v2751_v27 = vpop.f32.mrb[222].mxu1 }
 0x332   : > { %v3387_v52 = vpop.f32.mrb[222].mxu0  ;;  %v2874_v48 = vadd.f32 %v2751_v27, %v11529_v60  ;;  %v8532_v11 = vpop.f32.mrb[223].mxu1  ;;  %v4091_v27 = vshll.u32 %v3926_v54, 16 }
 0x333   : > { %13730 = vst [vmem:[#allocation30_spill] sm:$0xff] %v11898_v31  ;;  %v11902_v49 = vadd.f32 %v3387_v52, %v2872_v5  ;;  %v8652_v47 = vpop.f32.mrb[223].mxu0  ;;  %v4085_v5 = vrot.slane %v4083_v36, 1  ;;  %v9637_v52 = vld [vmem:[#allocation2 + $0x88] sm:$0xff] }
 0x334   : > { %8778 = vmatmul.mubr.bf16.gmra.mrb[72].mxu1 %v9637_v52  ;;  %v3932_v31 = vld [vmem:[#allocation2 + $0xc8] sm:$0xff] }
 0x335   : > { %13731 = vst [vmem:[#allocation36_spill] sm:$0xff] %v11902_v49  ;;  %8898 = vmatmul.mubr.bf16.gmra.mrb[72].mxu0 %v4078_v32  ;;  %8781 = vmatprep.mubr.msk.bf16.mxu1 %vm9713_vm0, %v13577_v61  ;;  %v2756_v3 = vpop.f32.mrb[224].mxu1  ;;  %v4086_v60 = vsel %vm3954_vm5, %v4081_v19, %v4085_v5  ;;  %v3927_v19 = vld [vmem:[#allocation2 + $0xa0] sm:$0xff] }
 0x336   : > { %8901 = vmatprep.mubr.msk.bf16.mxu0 %vm9713_vm0, %v13577_v61  ;;  %v2875_v37 = vadd.f32 %v2756_v3, %v11539_v25  ;;  %v8535_v36 = vpop.f32.mrb[225].mxu1  ;;  %v4089_v25 = vor.u32 %v4087_v39, %v4085_v5 }
 0x338   : > { %v3392_v23 = vpop.f32.mrb[224].mxu0 }
 0x339   : > { %v11909_v1 = vadd.f32 %v3392_v23, %v2873_v59  ;;  %v8655_v30 = vpop.f32.mrb[225].mxu0  ;;  %v2759_v59 = vpop.f32.mrb[226].mxu1 }
 0x33a   : > { %v3395_v47 = vpop.f32.mrb[226].mxu0  ;;  %v2876_v29 = vadd.f32 %v2759_v59, %v11543_v63  ;;  %v8536_v11 = vpop.f32.mrb[227].mxu1  ;;  %v4099_v59 = vshll.u32 %v3927_v19, 16 }
 0x33b   : > { %13732 = vst [vmem:[#allocation46_spill] sm:$0xff] %v11909_v1  ;;  %v11913_v46 = vadd.f32 %v3395_v47, %v2874_v48  ;;  %v8656_v32 = vpop.f32.mrb[227].mxu0  ;;  %v4093_v48 = vrot.slane %v4091_v27, 1  ;;  %v9638_v47 = vld [vmem:[#allocation2 + $0x90] sm:$0xff]  ;;  %v3931_v1 = vld [vmem:[#allocation2 + $0xc0] sm:$0xff] }
 0x33c   : > { %8782 = vmatmul.mubr.bf16.gmra.mrb[76].mxu1 %v9638_v47  ;;  %v4101_v39 = vrot.slane %v4099_v59, 1  ;;  %v9639_v47 = vld [vmem:[#allocation2 + $0x98] sm:$0xff] }
 0x33d   : > { %13733 = vst [vmem:[#allocation50_spill] sm:$0xff] %v11913_v46  ;;  %8902 = vmatmul.mubr.bf16.gmra.mrb[76].mxu0 %v4086_v60  ;;  %8785 = vmatprep.mubr.msk.bf16.mxu1 %vm9713_vm0, %v13577_v61  ;;  %v2764_v36 = vpop.f32.mrb[228].mxu1  ;;  %v4094_v63 = vsel %vm3954_vm5, %v4089_v25, %v4093_v48 }
 0x33e   : > { %8905 = vmatprep.mubr.msk.bf16.mxu0 %vm9713_vm0, %v13577_v61  ;;  %v11928_v7 = vadd.f32 %v2764_v36, %v11553_v2  ;;  %v8539_v27 = vpop.f32.mrb[229].mxu1 }
 0x340   : > { %v3400_v23 = vpop.f32.mrb[228].mxu0 }
 0x341   : > { %v11920_v30 = vadd.f32 %v3400_v23, %v2875_v37  ;;  %v8659_v52 = vpop.f32.mrb[229].mxu0  ;;  %v2767_v37 = vpop.f32.mrb[230].mxu1  ;;  %v4095_v23 = vshrl.u32 %v3926_v54, 16 }
 0x342   : > { %v3403_v32 = vpop.f32.mrb[230].mxu0  ;;  %v11933_v5 = vadd.f32 %v2767_v37, %v11557_v0  ;;  %v8540_v11 = vpop.f32.mrb[231].mxu1 }
 0x343   : > { %13734 = vst [vmem:[#allocation80_spill] sm:$0xff] %v11920_v30  ;;  %v11924_v3 = vadd.f32 %v3403_v32, %v2876_v29  ;;  %v8660_v60 = vpop.f32.mrb[231].mxu0  ;;  %v3928_v32 = vld [vmem:[#allocation2 + $0xa8] sm:$0xff]  ;;  %v4097_v25 = vor.u32 %v4095_v23, %v4093_v48  ;;  %v4103_v23 = vshrl.u32 %v3927_v19, 16  ;;  %v3930_v30 = vld [vmem:[#allocation2 + $0xb8] sm:$0xff] }
 0x344   : > { %8786 = vmatmul.mubr.bf16.gmra.mrb[80].mxu1 %v9639_v47 }
 0x345   : > { %13735 = vst [vmem:[#allocation81_spill] sm:$0xff] %v11924_v3  ;;  %8906 = vmatmul.mubr.bf16.gmra.mrb[80].mxu0 %v4094_v63  ;;  %8789 = vmatprep.mubr.msk.bf16.mxu1 %vm9713_vm0, %v13577_v61  ;;  %v2772_v36 = vpop.f32.mrb[232].mxu1  ;;  %v4102_v0 = vsel %vm3954_vm5, %v4097_v25, %v4101_v39  ;;  %v4107_v63 = vshll.u32 %v3928_v32, 16  ;;  %v9640_v25 = vld [vmem:[#allocation2 + $0xa0] sm:$0xff] }
 0x346   : > { %8909 = vmatprep.mubr.msk.bf16.mxu0 %vm9713_vm0, %v13577_v61  ;;  %v11943_v27 = vadd.f32 %v2772_v36, %v11567_v33  ;;  %v8543_v54 = vpop.f32.mrb[233].mxu1  ;;  %v4105_v36 = vor.u32 %v4103_v23, %v4101_v39 }
 0x347   : > { %v2775_v59 = vpop.f32.mrb[234].mxu1 }
 0x348   : > { %v11935_v29 = vpop.f32.mrb[232].mxu0  ;;  %v11948_v37 = vadd.f32 %v2775_v59, %v11571_v40  ;;  %v8544_v48 = vpop.f32.mrb[235].mxu1 }
 0x349   : > { %v8663_v52 = vpop.f32.mrb[233].mxu0 }
 0x34a   : > { %v11937_v2 = vpop.f32.mrb[234].mxu0  ;;  %v4109_v52 = vrot.slane %v4107_v63, 1 }
 0x34b   : > { %v8664_v60 = vpop.f32.mrb[235].mxu0 }
 0x34c   : > { %8790 = vmatmul.mubr.bf16.gmra.mrb[84].mxu1 %v9640_v25  ;;  %v3929_v60 = vld [vmem:[#allocation2 + $0xb0] sm:$0xff]  ;;  %v4110_v40 = vsel %vm3954_vm5, %v4105_v36, %v4109_v52  ;;  %v4111_v25 = vshrl.u32 %v3928_v32, 16  ;;  %v9641_v36 = vld [vmem:[#allocation2 + $0xa8] sm:$0xff] }
 0x34d   : > { %8910 = vmatmul.mubr.bf16.gmra.mrb[84].mxu0 %v4102_v0  ;;  %8793 = vmatprep.mubr.msk.bf16.mxu1 %vm9713_vm0, %v13577_v61  ;;  %v2780_v54 = vpop.f32.mrb[236].mxu1  ;;  %v4115_v59 = vshll.u32 %v3929_v60, 16 }
 0x34e   : > { %8913 = vmatprep.mubr.msk.bf16.mxu0 %vm9713_vm0, %v13577_v61  ;;  %v11958_v48 = vadd.f32 %v2780_v54, %v11581_v14  ;;  %v8547_v19 = vpop.f32.mrb[237].mxu1  ;;  %v4113_v54 = vor.u32 %v4111_v25, %v4109_v52 }
 0x34f   : > { %v2783_v63 = vpop.f32.mrb[238].mxu1 }
 0x350   : > { %v11950_v11 = vpop.f32.mrb[236].mxu0  ;;  %v8548_v39 = vpop.f32.mrb[239].mxu1 }
 0x351   : > { %v8667_v47 = vpop.f32.mrb[237].mxu0 }
 0x352   : > { %v11952_v33 = vpop.f32.mrb[238].mxu0  ;;  %v11963_v47 = vadd.f32 %v2783_v63, %v11585_v9  ;;  %v4123_v63 = vshll.u32 %v3930_v30, 16 }
 0x353   : > { %v8668_v0 = vpop.f32.mrb[239].mxu0 }
 0x354   : > { %v4117_v0 = vrot.slane %v4115_v59, 1  ;;  %8794 = vmatmul.mubr.bf16.gmra.mrb[88].mxu1 %v9641_v36  ;;  %v4119_v36 = vshrl.u32 %v3929_v60, 16 }
 0x355   : > { %8914 = vmatmul.mubr.bf16.gmra.mrb[88].mxu0 %v4110_v40  ;;  %8797 = vmatprep.mubr.msk.bf16.mxu1 %vm9713_vm0, %v13577_v61  ;;  %v2788_v19 = vpop.f32.mrb[240].mxu1 }
 0x356   : > { %8917 = vmatprep.mubr.msk.bf16.mxu0 %vm9713_vm0, %v13577_v61  ;;  %v4118_v9 = vsel %vm3954_vm5, %v4113_v54, %v4117_v0  ;;  %v11973_v39 = vadd.f32 %v2788_v19, %v11595_v43  ;;  %v8551_v32 = vpop.f32.mrb[241].mxu1  ;;  %v9642_v54 = vld [vmem:[#allocation2 + $0xb0] sm:$0xff]  ;;  %v4121_v19 = vor.u32 %v4119_v36, %v4117_v0 }
 0x358   : > { %v11965_v23 = vpop.f32.mrb[240].mxu0 }
 0x359   : > { %v8671_v3 = vpop.f32.mrb[241].mxu0 }
 0x35a   : > { %v11967_v14 = vpop.f32.mrb[242].mxu0  ;;  %v2791_v3 = vpop.f32.mrb[242].mxu1 }
 0x35b   : > { %v8672_v40 = vpop.f32.mrb[243].mxu0  ;;  %v11978_v59 = vadd.f32 %v2791_v3, %v11599_v56  ;;  %v8552_v52 = vpop.f32.mrb[243].mxu1  ;;  %v4131_v3 = vshll.u32 %v3931_v1, 16 }
 0x35c   : > { %v4125_v40 = vrot.slane %v4123_v63, 1  ;;  %8798 = vmatmul.mubr.bf16.gmra.mrb[92].mxu1 %v9642_v54  ;;  %v4127_v54 = vshrl.u32 %v3930_v30, 16 }
 0x35d   : > { %8918 = vmatmul.mubr.bf16.gmra.mrb[92].mxu0 %v4118_v9  ;;  %8801 = vmatprep.mubr.msk.bf16.mxu1 %vm9713_vm0, %v13577_v61  ;;  %v2796_v32 = vpop.f32.mrb[244].mxu1 }
 0x35e   : > { %8921 = vmatprep.mubr.msk.bf16.mxu0 %vm9713_vm0, %v13577_v61  ;;  %v4126_v56 = vsel %vm3954_vm5, %v4121_v19, %v4125_v40  ;;  %v11988_v52 = vadd.f32 %v2796_v32, %v11609_v4  ;;  %v8555_v60 = vpop.f32.mrb[245].mxu1  ;;  %v9643_v19 = vld [vmem:[#allocation2 + $0xb8] sm:$0xff]  ;;  %v4129_v32 = vor.u32 %v4127_v54, %v4125_v40 }
 0x360   : > { %v11980_v25 = vpop.f32.mrb[244].mxu0 }
 0x361   : > { %v8675_v46 = vpop.f32.mrb[245].mxu0 }
 0x362   : > { %v11982_v43 = vpop.f32.mrb[246].mxu0  ;;  %v2799_v46 = vpop.f32.mrb[246].mxu1 }
 0x363   : > { %v8676_v9 = vpop.f32.mrb[247].mxu0  ;;  %v11993_v63 = vadd.f32 %v2799_v46, %v11613_v20  ;;  %v8556_v0 = vpop.f32.mrb[247].mxu1  ;;  %v4139_v46 = vshll.u32 %v3932_v31, 16 }
 0x364   : > { %v4133_v9 = vrot.slane %v4131_v3, 1  ;;  %8802 = vmatmul.mubr.bf16.gmra.mrb[96].mxu1 %v9643_v19  ;;  %v4135_v19 = vshrl.u32 %v3931_v1, 16 }
 0x365   : > { %8922 = vmatmul.mubr.bf16.gmra.mrb[96].mxu0 %v4126_v56  ;;  %8805 = vmatprep.mubr.msk.bf16.mxu1 %vm9713_vm0, %v13577_v61  ;;  %v2804_v60 = vpop.f32.mrb[248].mxu1 }
 0x366   : > { %8925 = vmatprep.mubr.msk.bf16.mxu0 %vm9713_vm0, %v13577_v61  ;;  %v4134_v20 = vsel %vm3954_vm5, %v4129_v32, %v4133_v9  ;;  %v12003_v0 = vadd.f32 %v2804_v60, %v11623_v50  ;;  %v8559_v30 = vpop.f32.mrb[249].mxu1  ;;  %v9644_v32 = vld [vmem:[#allocation2 + $0xc0] sm:$0xff]  ;;  %v4137_v60 = vor.u32 %v4135_v19, %v4133_v9 }
 0x368   : > { %v11995_v36 = vpop.f32.mrb[248].mxu0 }
 0x369   : > { %v8679_v49 = vpop.f32.mrb[249].mxu0 }
 0x36a   : > { %v11997_v4 = vpop.f32.mrb[250].mxu0  ;;  %v2807_v49 = vpop.f32.mrb[250].mxu1 }
 0x36b   : > { %v8680_v56 = vpop.f32.mrb[251].mxu0  ;;  %v12008_v3 = vadd.f32 %v2807_v49, %v11627_v15  ;;  %v8560_v40 = vpop.f32.mrb[251].mxu1  ;;  %v4147_v49 = vshll.u32 %v3933_v13, 16 }
 0x36c   : > { %v4141_v56 = vrot.slane %v4139_v46, 1  ;;  %8806 = vmatmul.mubr.bf16.gmra.mrb[100].mxu1 %v9644_v32  ;;  %v4143_v32 = vshrl.u32 %v3932_v31, 16 }
 0x36d   : > { %8926 = vmatmul.mubr.bf16.gmra.mrb[100].mxu0 %v4134_v20  ;;  %8809 = vmatprep.mubr.msk.bf16.mxu1 %vm9713_vm0, %v13577_v61  ;;  %v2812_v30 = vpop.f32.mrb[252].mxu1 }
 0x36e   : > { %8929 = vmatprep.mubr.msk.bf16.mxu0 %vm9713_vm0, %v13577_v61  ;;  %v4142_v15 = vsel %vm3954_vm5, %v4137_v60, %v4141_v56  ;;  %v12018_v40 = vadd.f32 %v2812_v30, %v11633_v12  ;;  %v8563_v1 = vpop.f32.mrb[253].mxu1  ;;  %v9645_v60 = vld [vmem:[#allocation2 + $0xc8] sm:$0xff]  ;;  %v4145_v30 = vor.u32 %v4143_v32, %v4141_v56 }
 0x370   : > { %v12010_v54 = vpop.f32.mrb[252].mxu0 }
 0x371   : > { %v8683_v38 = vpop.f32.mrb[253].mxu0 }
 0x372   : > { %v12012_v50 = vpop.f32.mrb[254].mxu0  ;;  %v2815_v38 = vpop.f32.mrb[254].mxu1 }
 0x373   : > { %v8684_v20 = vpop.f32.mrb[255].mxu0  ;;  %v12023_v46 = vadd.f32 %v2815_v38, %v11637_v45  ;;  %v8564_v9 = vpop.f32.mrb[255].mxu1  ;;  %v4155_v38 = vshll.u32 %v3934_v21, 16 }
 0x374   : > { %v4149_v20 = vrot.slane %v4147_v49, 1  ;;  %8810 = vmatmul.mubr.bf16.gmra.mrb[104].mxu1 %v9645_v60  ;;  %v4151_v60 = vshrl.u32 %v3933_v13, 16 }
 0x375   : > { %8930 = vmatmul.mubr.bf16.gmra.mrb[104].mxu0 %v4142_v15  ;;  %8813 = vmatprep.mubr.msk.bf16.mxu1 %vm9713_vm0, %v13577_v61  ;;  %v2820_v1 = vpop.f32.mrb[0].mxu1 }
 0x376   : > { %8933 = vmatprep.mubr.msk.bf16.mxu0 %vm9713_vm0, %v13577_v61  ;;  %v4150_v45 = vsel %vm3954_vm5, %v4145_v30, %v4149_v20  ;;  %v12033_v9 = vadd.f32 %v2820_v1, %v11644_v17  ;;  %v8567_v31 = vpop.f32.mrb[1].mxu1  ;;  %v9646_v30 = vld [vmem:[#allocation2 + $0xd0] sm:$0xff]  ;;  %v4153_v1 = vor.u32 %v4151_v60, %v4149_v20 }
 0x378   : > { %v12025_v19 = vpop.f32.mrb[0].mxu0 }
 0x379   : > { %v8687_v35 = vpop.f32.mrb[1].mxu0 }
 0x37a   : > { %v12027_v12 = vpop.f32.mrb[2].mxu0  ;;  %v2823_v35 = vpop.f32.mrb[2].mxu1 }
 0x37b   : > { %v8688_v15 = vpop.f32.mrb[3].mxu0  ;;  %v12038_v49 = vadd.f32 %v2823_v35, %v11648_v16  ;;  %v8568_v56 = vpop.f32.mrb[3].mxu1  ;;  %v4163_v35 = vshll.u32 %v3935_v22, 16 }
 0x37c   : > { %v4157_v15 = vrot.slane %v4155_v38, 1  ;;  %8814 = vmatmul.mubr.bf16.gmra.mrb[108].mxu1 %v9646_v30  ;;  %v13737_v38 = vld [vmem:[#allocation13_spill] sm:$0xff] }
 0x37d   : > { %8934 = vmatmul.mubr.bf16.gmra.mrb[108].mxu0 %v4150_v45  ;;  %8817 = vmatprep.mubr.msk.bf16.mxu1 %vm9713_vm0, %v13577_v61  ;;  %v2828_v31 = vpop.f32.mrb[4].mxu1  ;;  %v4165_v41 = vrot.slane %v4163_v35, 1  ;;  %v4167_v35 = vshrl.u32 %v3935_v22, 16 }
 0x37e   : > { %8937 = vmatprep.mubr.msk.bf16.mxu0 %vm9713_vm0, %v13577_v61  ;;  %v4158_v16 = vsel %vm3954_vm5, %v4153_v1, %v4157_v15  ;;  %v12048_v56 = vadd.f32 %v2828_v31, %v11653_v28  ;;  %v8571_v13 = vpop.f32.mrb[5].mxu1  ;;  %v9647_v1 = vld [vmem:[#allocation2 + $0xd8] sm:$0xff] }
 0x37f   : > { %v4553_v13 = vld [vmem:[#allocation2 + $0x18] sm:$0xf8] }
 0x380   : > { %v12040_v32 = vpop.f32.mrb[4].mxu0  ;;  %13736 = vst [vmem:[#allocation82_spill] sm:$0xff] %v12048_v56  ;;  %v9648_v56 = vld [vmem:[#allocation2 + $0xe0] sm:$0xff] }
 0x381   : > { %v8691_v10 = vpop.f32.mrb[5].mxu0 }
 0x382   : > { %v12042_v17 = vpop.f32.mrb[6].mxu0  ;;  %v2831_v10 = vpop.f32.mrb[6].mxu1 }
 0x383   : > { %v8692_v45 = vpop.f32.mrb[7].mxu0  ;;  %v12053_v30 = vadd.f32 %v2831_v10, %v13737_v38  ;;  %v8572_v20 = vpop.f32.mrb[7].mxu1  ;;  %v4171_v38 = vshll.u32 %v3936_v44, 16 }
 0x384   : > { %v4159_v45 = vshrl.u32 %v3934_v21, 16  ;;  %8818 = vmatmul.mubr.bf16.gmra.mrb[112].mxu1 %v9647_v1  ;;  %v13742_v1 = vld [vmem:[#allocation14_spill] sm:$0xff] }
 0x385   : > { %8938 = vmatmul.mubr.bf16.gmra.mrb[112].mxu0 %v4158_v16  ;;  %13738 = vst [vmem:[#allocation13_spill] sm:$0xff] %v12053_v30  ;;  %8821 = vmatprep.mubr.msk.bf16.mxu1 %vm9713_vm0, %v13577_v61  ;;  %v2836_v58 = vpop.f32.mrb[8].mxu1  ;;  %v4173_v44 = vrot.slane %v4171_v38, 1 }
 0x386   : > { %8941 = vmatprep.mubr.msk.bf16.mxu0 %vm9713_vm0, %v13577_v61  ;;  %v4161_v31 = vor.u32 %v4159_v45, %v4157_v15  ;;  %v12063_v20 = vadd.f32 %v2836_v58, %v11665_v34  ;;  %v8575_v21 = vpop.f32.mrb[9].mxu1  ;;  %v4599_v15 = vshrl.u32 %v4553_v13, 16  ;;  %v4602_v45 = vshll.u32 %v4553_v13, 16 }
 0x388   : > { %v12055_v60 = vpop.f32.mrb[8].mxu0  ;;  %v4166_v10 = vsel %vm3954_vm5, %v4161_v31, %v4165_v41  ;;  %13741 = vst [vmem:[#allocation85_spill] sm:$0xff] %v12063_v20  ;;  %v4169_v31 = vor.u32 %v4167_v35, %v4165_v41  ;;  %v4601_v13 = vrot.slane %v4599_v15, 3  ;;  %v13746_v35 = vld [vmem:[#allocation17_spill] sm:$0xff]  ;;  %v13748_v15 = vld [vmem:[#allocation15_spill] sm:$0xff] }
 0x389   : > { %13739 = vst [vmem:[#allocation83_spill] sm:$0xff] %v12055_v60  ;;  %v8695_v62 = vpop.f32.mrb[9].mxu0  ;;  %v13743_v60 = vld [vmem:[#allocation23_spill] sm:$0xff] }
 0x38a   : > { %v12057_v28 = vpop.f32.mrb[10].mxu0  ;;  %v2839_v62 = vpop.f32.mrb[10].mxu1  ;;  %v13744_v34 = vshrl.u32 %v13743_v60, 16  ;;  %v4174_v41 = vsel %vm3954_vm5, %v4169_v31, %v4173_v44 }
 0x38b   : > { %13740 = vst [vmem:[#allocation84_spill] sm:$0xff] %v12057_v28  ;;  %v8696_v16 = vpop.f32.mrb[11].mxu0  ;;  %v12068_v28 = vadd.f32 %v2839_v62, %v13742_v1  ;;  %v4604_v62 = vrot.slane %v4602_v45, 4 }
 0x38c   : > { %v8576_v16 = vpop.f32.mrb[11].mxu1  ;;  %v4609_v58 = vrot.slane %v13744_v34, 3  ;;  %8822 = vmatmul.mubr.bf16.gmra.mrb[116].mxu1 %v9648_v56  ;;  %v9573_v56 = vld [vmem:[%s13392_s4 + $0x200] sm:$0xff]  }
 0x38d   : > { %8942 = vmatmul.mubr.bf16.gmra.mrb[116].mxu0 %v4166_v10  ;;  %v13745_v10 = vshll.u32 %v13743_v60, 16  ;;  %8965 = vmatprep.mubr.msk.bf16.mxu1 %vm9713_vm0, %v13577_v61  ;;  %v3640_v16 = vpop.f32.mrb[12].mxu1 }
 0x38e   : > { %8945 = vmatprep.mubr.msk.bf16.mxu0 %vm9713_vm0, %v13577_v61  ;;  %v12082_v34 = vadd.f32 %v3640_v16, %v13746_v35  ;;  %v8719_v60 = vpop.f32.mrb[13].mxu1  ;;  %v13749_v16 = vld [vmem:[#allocation24_spill] sm:$0xff] }
 0x38f   : > { %v4612_v21 = vrot.slane %v13745_v10, 4  ;;  %v4605_v10 = vor.u32 %v4604_v62, %v4601_v13  ;;  %v13751_v62 = vshll.u32 %v13749_v16, 16 }
 0x390   : > { %v12070_v30 = vpop.f32.mrb[12].mxu0  ;;  %13747 = vst [vmem:[#allocation14_spill] sm:$0xff] %v12082_v34 }
 0x391   : > { %v8699_v20 = vpop.f32.mrb[13].mxu0  ;;  %v4613_v38 = vor.u32 %v4612_v21, %v4609_v58  ;;  %v9649_v58 = vld [vmem:[#allocation2 + $0x20] sm:$0xff]  ;;  %v4621_v35 = vrot.slane %v13751_v62, 4  ;;  %v13755_v62 = vld [vmem:[#allocation3_spill] sm:$0xff] }
 0x392   : > { %v12076_v22 = vpop.f32.mrb[14].mxu0  ;;  %v3643_v20 = vpop.f32.mrb[14].mxu1  ;;  %v5274_v21 = vrot.slane %v9649_v58, 4 }
 0x393   : > { %v8700_v1 = vpop.f32.mrb[15].mxu0  ;;  %v12090_v45 = vadd.f32 %v3643_v20, %v13748_v15  ;;  %v4614_v44 = vsel %vm1803_vm2, %v4605_v10, %v4613_v38  ;;  %v9650_v20 = vld [vmem:[#allocation2 + $0x18] sm:$0xf0]  ;;  %v9575_v10 = vld [vmem:[%s13392_s4 + $0x208] sm:$0xff]  }
 0x394   : > { %v8720_v1 = vpop.f32.mrb[15].mxu1  ;;  %8966 = vmatmul.mubr.bf16.vlgmr.msra.gmra.mrb[120].mxu1 %v4614_v44  ;;  %v5273_v15 = vrot.slane %v9650_v20, 4 }
 0x395   : > { %8946 = vmatmul.mubr.bf16.gmra.mrb[120].mxu0 %v4174_v41  ;;  %v13750_v41 = vshrl.u32 %v13749_v16, 16  ;;  %9198 = vmatpush3.bf16.msra.mxu1 %v9573_v56  ;;  %v12108_v1 = vadd.f32 %v11935_v29, %v11928_v7  ;;  %v3648_v44 = vpop.f32.mrb[16].mxu1  ;;  %v9576_v7 = vld [vmem:[%s13392_s4 + $0x210] sm:$0xff]   ;;  %v13756_v29 = vld [vmem:[#allocation16_spill] sm:$0xff] }
 0x396   : > { %9089 = vmatprep.mubr.msk.bf16.mxu0 %vm9713_vm0, %v13577_v61  ;;  %8969 = vmatprep.mubr.msk.bf16.mxu1 %vm9713_vm0, %v13577_v61  ;;  %v5275_v56 = vsel %vm1423_vm1, %v5273_v15, %v5274_v21  ;;  %v8723_v20 = vpop.f32.mrb[17].mxu1  ;;  %v9651_v15 = vld [vmem:[#allocation2 + $0x28] sm:$0xff] }
 0x397   : > { %v4618_v13 = vrot.slane %v13750_v41, 3  ;;  %13753 = vst [vmem:[#allocation17_spill] sm:$0xff] %v12108_v1  ;;  %9199 = vmatprep.subr.bf16.mxu1 %v13577_v61  ;;  %v12114_v41 = vadd.f32 %v11937_v2, %v11933_v5 }
 0x398   : > { %v12092_v31 = vpop.f32.mrb[16].mxu0 }
 0x399   : > { %v8843_v60 = vpop.f32.mrb[17].mxu0  ;;  %v4622_v16 = vor.u32 %v4621_v35, %v4618_v13  ;;  %13754 = vst [vmem:[#allocation15_spill] sm:$0xff] %v12114_v41  ;;  %9200 = vmatpush3.bf16.msra.mxu1 %v9575_v10 }
 0x39a   : > { %v12099_v34 = vpop.f32.mrb[18].mxu0  ;;  %v12117_v60 = vadd.f32 %v3648_v44, %v13755_v62  ;;  %9201 = vmatprep.subr.bf16.mxu1 %v13577_v61  ;;  %v13757_v44 = vld [vmem:[#allocation25_spill] sm:$0xff] }
 0x39b   : > { %13752 = vst [vmem:[#allocation23_spill] sm:$0xff] %v12099_v34  ;;  %v8844_v58 = vpop.f32.mrb[19].mxu0  ;;  %v3651_v34 = vpop.f32.mrb[18].mxu1  ;;  %v4623_v2 = vsel %vm1803_vm2, %v4613_v38, %v4622_v16  ;;  %v13759_v10 = vshll.u32 %v13757_v44, 16  ;;  %v9577_v38 = vld [vmem:[%s13392_s4 + $0x218] sm:$0xff]  }
 0x39c   : > { %v12125_v13 = vadd.f32 %v3651_v34, %v13756_v29  ;;  %v8724_v35 = vpop.f32.mrb[19].mxu1  ;;  %v5276_v58 = vrot.slane %v9651_v15, 4  ;;  %8970 = vmatmul.mubr.bf16.gmra.mrb[124].mxu1 %v4623_v2  ;;  %v12144_v34 = vadd.f32 %v11950_v11, %v11943_v27  ;;  %v12150_v15 = vadd.f32 %v11952_v33, %v11948_v37  ;;  %v9578_v27 = vld [vmem:[%s13392_s4 + $0x220] sm:$0xff]   ;;  %v13763_v11 = vld [vmem:[#allocation5_spill] sm:$0xff] }
 0x39d   : > { %9090 = vmatmul.mubr.bf16.vlgmr.msra.gmra.mrb[124].mxu0 %v5275_v56  ;;  %v13758_v56 = vshrl.u32 %v13757_v44, 16  ;;  %v4630_v20 = vrot.slane %v13759_v10, 4  ;;  %8973 = vmatprep.mubr.msk.bf16.mxu1 %vm9713_vm0, %v13577_v61  ;;  %v3656_v35 = vpop.f32.mrb[20].mxu1 }
 0x39e   : > { %9093 = vmatprep.mubr.msk.bf16.mxu0 %vm9713_vm0, %v13577_v61  ;;  %9202 = vmatpush3.bf16.msra.mxu1 %v9576_v7  ;;  %13760 = vst [vmem:[#allocation24_spill] sm:$0xff] %v12144_v34  ;;  %13761 = vst [vmem:[#allocation3_spill] sm:$0xff] %v12150_v15  ;;  %v13762_v7 = vld [vmem:[#allocation4_spill] sm:$0xff] }
 0x39f   : > { %v4627_v62 = vrot.slane %v13758_v56, 3  ;;  %9203 = vmatprep.subr.bf16.mxu1 %v13577_v61  ;;  %v12153_v44 = vadd.f32 %v3656_v35, %v13762_v7  ;;  %v8727_v56 = vpop.f32.mrb[21].mxu1  ;;  %v13764_v35 = vld [vmem:[#allocation26_spill] sm:$0xff] }
 0x3a0   : > { %v12128_v5 = vpop.f32.mrb[20].mxu0  ;;  %v3659_v10 = vpop.f32.mrb[22].mxu1 }
 0x3a1   : > { %v8847_v41 = vpop.f32.mrb[21].mxu0  ;;  %v4631_v2 = vor.u32 %v4630_v20, %v4627_v62  ;;  %v8728_v62 = vpop.f32.mrb[23].mxu1  ;;  %v9652_v20 = vld [vmem:[#allocation2 + $0x30] sm:$0xff] }
 0x3a2   : > { %v12135_v1 = vpop.f32.mrb[22].mxu0  ;;  %v5277_v41 = vsel %vm1423_vm1, %v5274_v21, %v5276_v58  ;;  %9204 = vmatpush3.bf16.msra.mxu1 %v9577_v38  ;;  %v12161_v21 = vadd.f32 %v3659_v10, %v13763_v11  ;;  %v13766_v38 = vshll.u32 %v13764_v35, 16  ;;  %v12180_v10 = vadd.f32 %v11965_v23, %v11958_v48  ;;  %v13769_v48 = vld [vmem:[#allocation7_spill] sm:$0xff] }
 0x3a3   : > { %v8848_v29 = vpop.f32.mrb[23].mxu0  ;;  %9205 = vmatprep.subr.bf16.mxu1 %v13577_v61  ;;  %v4632_v33 = vsel %vm1803_vm2, %v4622_v16, %v4631_v2  ;;  %v9579_v16 = vld [vmem:[%s13392_s4 + $0x228] sm:$0xff]  }
 0x3a4   : > { %v5278_v29 = vrot.slane %v9652_v20, 4  ;;  %v4639_v56 = vrot.slane %v13766_v38, 4  ;;  %8974 = vmatmul.mubr.bf16.gmra.mrb[128].mxu1 %v4632_v33  ;;  %v12186_v20 = vadd.f32 %v11967_v14, %v11963_v47  ;;  %v9653_v14 = vld [vmem:[#allocation2 + $0x38] sm:$0xff] }
 0x3a5   : > { %9094 = vmatmul.mubr.bf16.gmra.mrb[128].mxu0 %v5277_v41  ;;  %v13765_v41 = vshrl.u32 %v13764_v35, 16  ;;  %8977 = vmatprep.mubr.msk.bf16.mxu1 %vm9713_vm0, %v13577_v61  ;;  %v3664_v62 = vpop.f32.mrb[24].mxu1 }
 0x3a6   : > { %9097 = vmatprep.mubr.msk.bf16.mxu0 %vm9713_vm0, %v13577_v61  ;;  %9206 = vmatpush3.bf16.msra.mxu1 %v9578_v27  ;;  %13767 = vst [vmem:[#allocation16_spill] sm:$0xff] %v12186_v20  ;;  %v13768_v27 = vld [vmem:[#allocation6_spill] sm:$0xff] }
 0x3a7   : > { %v4636_v7 = vrot.slane %v13765_v41, 3  ;;  %9207 = vmatprep.subr.bf16.mxu1 %v13577_v61  ;;  %v12189_v35 = vadd.f32 %v3664_v62, %v13768_v27  ;;  %v8731_v41 = vpop.f32.mrb[25].mxu1 }
 0x3a8   : > { %v12164_v37 = vpop.f32.mrb[24].mxu0  ;;  %v3667_v38 = vpop.f32.mrb[26].mxu1 }
 0x3a9   : > { %v8851_v15 = vpop.f32.mrb[25].mxu0  ;;  %v4640_v33 = vor.u32 %v4639_v56, %v4636_v7  ;;  %v12194_v23 = vadd.f32 %v3667_v38, %v13769_v48  ;;  %v5280_v7 = vrot.slane %v9653_v14, 4  ;;  %v13770_v56 = vld [vmem:[#allocation27_spill] sm:$0xff]  ;;  %v12210_v38 = vadd.f32 %v11980_v25, %v11973_v39 }
 0x3aa   : > { %v12171_v34 = vpop.f32.mrb[26].mxu0  ;;  %v5279_v15 = vsel %vm1423_vm1, %v5276_v58, %v5278_v29  ;;  %9208 = vmatpush3.bf16.msra.mxu1 %v9579_v16  ;;  %v13771_v62 = vshrl.u32 %v13770_v56, 16  ;;  %v13772_v27 = vshll.u32 %v13770_v56, 16  ;;  %v12215_v56 = vadd.f32 %v11982_v43, %v11978_v59  ;;  %v13773_v43 = vld [vmem:[#allocation28_spill] sm:$0xff] }
 0x3ab   : > { %v8852_v11 = vpop.f32.mrb[27].mxu0  ;;  %9209 = vmatprep.subr.bf16.mxu1 %v13577_v61  ;;  %v4641_v47 = vsel %vm1803_vm2, %v4631_v2, %v4640_v33 }
 0x3ac   : > { %v8732_v11 = vpop.f32.mrb[27].mxu1  ;;  %v4648_v41 = vrot.slane %v13772_v27, 4  ;;  %8978 = vmatmul.mubr.bf16.gmra.mrb[132].mxu1 %v4641_v47 }
 0x3ad   : > { %9098 = vmatmul.mubr.bf16.gmra.mrb[132].mxu0 %v5279_v15  ;;  %v4645_v15 = vrot.slane %v13771_v62, 3  ;;  %8981 = vmatprep.mubr.msk.bf16.mxu1 %vm9713_vm0, %v13577_v61  ;;  %v3672_v48 = vpop.f32.mrb[28].mxu1  ;;  %v5281_v11 = vsel %vm1423_vm1, %v5278_v29, %v5280_v7 }
 0x3ae   : > { %9101 = vmatprep.mubr.msk.bf16.mxu0 %vm9713_vm0, %v13577_v61  ;;  %v8735_v47 = vpop.f32.mrb[29].mxu1 }
 0x3af   : > { %v4649_v14 = vor.u32 %v4648_v41, %v4645_v15  ;;  %v3675_v62 = vpop.f32.mrb[30].mxu1  ;;  %v9654_v15 = vld [vmem:[#allocation2 + $0x40] sm:$0xff]  ;;  %v13774_v41 = vshrl.u32 %v13773_v43, 16 }
 0x3b0   : > { %v12197_v58 = vpop.f32.mrb[28].mxu0  ;;  %v12223_v39 = vadd.f32 %v3675_v62, %v11748_v8  ;;  %v8736_v25 = vpop.f32.mrb[31].mxu1  ;;  %v5282_v59 = vrot.slane %v9654_v15, 4  ;;  %v12238_v8 = vadd.f32 %v11995_v36, %v11988_v52  ;;  %v9580_v62 = vld [vmem:[%s13392_s4 + $0x230] sm:$0xff]  }
 0x3b1   : > { %v8855_v20 = vpop.f32.mrb[29].mxu0  ;;  %v4650_v29 = vsel %vm1803_vm2, %v4640_v33, %v4649_v14  ;;  %9210 = vmatpush3.bf16.msra.mxu1 %v9580_v62 }
 0x3b2   : > { %v12204_v16 = vpop.f32.mrb[30].mxu0  ;;  %v12218_v20 = vadd.f32 %v3672_v48, %v11744_v24  ;;  %v4654_v24 = vrot.slane %v13774_v41, 3  ;;  %v5283_v15 = vsel %vm1423_vm1, %v5280_v7, %v5282_v59  ;;  %9211 = vmatprep.subr.bf16.mxu1 %v13577_v61 }
 0x3b3   : > { %v8856_v2 = vpop.f32.mrb[31].mxu0 }
 0x3b4   : > { %v13775_v2 = vshll.u32 %v13773_v43, 16  ;;  %8982 = vmatmul.mubr.bf16.gmra.mrb[136].mxu1 %v4650_v29  ;;  %v12246_v29 = vadd.f32 %v11997_v4, %v11993_v63  ;;  %v9655_v4 = vld [vmem:[#allocation2 + $0x48] sm:$0xff] }
 0x3b5   : > { %9102 = vmatmul.mubr.bf16.gmra.mrb[136].mxu0 %v5281_v11  ;;  %8985 = vmatprep.mubr.msk.bf16.mxu1 %vm9713_vm0, %v13577_v61  ;;  %v3680_v25 = vpop.f32.mrb[32].mxu1 }
 0x3b6   : > { %9105 = vmatprep.mubr.msk.bf16.mxu0 %vm9713_vm0, %v13577_v61  ;;  %v4657_v48 = vrot.slane %v13775_v2, 4  ;;  %13776 = vst [vmem:[#allocation25_spill] sm:$0xff] %v12246_v29  ;;  %v12249_v41 = vadd.f32 %v3680_v25, %v11759_v18  ;;  %v8739_v2 = vpop.f32.mrb[33].mxu1  ;;  %v5284_v18 = vrot.slane %v9655_v4, 4 }
 0x3b7   : > { %v3683_v52 = vpop.f32.mrb[34].mxu1 }
 0x3b8   : > { %v12225_v27 = vpop.f32.mrb[32].mxu0  ;;  %v4658_v43 = vor.u32 %v4657_v48, %v4654_v24  ;;  %v12255_v36 = vadd.f32 %v3683_v52, %v11763_v26  ;;  %v8740_v7 = vpop.f32.mrb[35].mxu1  ;;  %v13777_v48 = vld [vmem:[#allocation29_spill] sm:$0xff]  ;;  %v12270_v26 = vadd.f32 %v12010_v54, %v12003_v0 }
 0x3b9   : > { %v8859_v11 = vpop.f32.mrb[33].mxu0  ;;  %v13779_v62 = vshll.u32 %v13777_v48, 16  ;;  %v5285_v7 = vsel %vm1423_vm1, %v5282_v59, %v5284_v18 }
 0x3ba   : > { %v12232_v47 = vpop.f32.mrb[34].mxu0  ;;  %v4659_v63 = vsel %vm1803_vm2, %v4649_v14, %v4658_v43  ;;  %v13778_v11 = vshrl.u32 %v13777_v48, 16  ;;  %13780 = vst [vmem:[#allocation4_spill] sm:$0xff] %v12270_v26  ;;  %v12275_v48 = vadd.f32 %v12012_v50, %v12008_v3  ;;  %v13782_v50 = vld [vmem:[#allocation31_spill] sm:$0xff] }
 0x3bb   : > { %v8860_v33 = vpop.f32.mrb[35].mxu0  ;;  %v4666_v25 = vrot.slane %v13779_v62, 4 }
 0x3bc   : > { %v4663_v33 = vrot.slane %v13778_v11, 3  ;;  %8986 = vmatmul.mubr.bf16.gmra.mrb[140].mxu1 %v4659_v63  ;;  %13781 = vst [vmem:[#allocation5_spill] sm:$0xff] %v12275_v48 }
 0x3bd   : > { %9106 = vmatmul.mubr.bf16.gmra.mrb[140].mxu0 %v5283_v15  ;;  %8989 = vmatprep.mubr.msk.bf16.mxu1 %vm9713_vm0, %v13577_v61  ;;  %v3688_v52 = vpop.f32.mrb[36].mxu1 }
 0x3be   : > { %9109 = vmatprep.mubr.msk.bf16.mxu0 %vm9713_vm0, %v13577_v61  ;;  %v4667_v4 = vor.u32 %v4666_v25, %v4663_v33  ;;  %v12278_v63 = vadd.f32 %v3688_v52, %v11770_v57  ;;  %v8743_v11 = vpop.f32.mrb[37].mxu1  ;;  %v9656_v33 = vld [vmem:[#allocation2 + $0x50] sm:$0xff]  ;;  %v13783_v25 = vshrl.u32 %v13782_v50, 16 }
 0x3bf   : > { %v3691_v62 = vpop.f32.mrb[38].mxu1  ;;  %v5286_v3 = vrot.slane %v9656_v33, 4 }
 0x3c0   : > { %v12257_v24 = vpop.f32.mrb[36].mxu0  ;;  %v12283_v0 = vadd.f32 %v3691_v62, %v11774_v51  ;;  %v8744_v54 = vpop.f32.mrb[39].mxu1  ;;  %v4668_v59 = vsel %vm1803_vm2, %v4658_v43, %v4667_v4  ;;  %v4672_v57 = vrot.slane %v13783_v25, 3  ;;  %v12298_v51 = vadd.f32 %v12025_v19, %v12018_v40 }
 0x3c1   : > { %v8863_v15 = vpop.f32.mrb[37].mxu0  ;;  %v5287_v54 = vsel %vm1423_vm1, %v5284_v18, %v5286_v3 }
 0x3c2   : > { %v12264_v2 = vpop.f32.mrb[38].mxu0  ;;  %13785 = vst [vmem:[#allocation26_spill] sm:$0xff] %v12298_v51 }
 0x3c3   : > { %v8864_v14 = vpop.f32.mrb[39].mxu0 }
 0x3c4   : > { %v13784_v14 = vshll.u32 %v13782_v50, 16  ;;  %8990 = vmatmul.mubr.bf16.gmra.mrb[144].mxu1 %v4668_v59  ;;  %v12303_v50 = vadd.f32 %v12027_v12, %v12023_v46  ;;  %v13787_v12 = vld [vmem:[#allocation32_spill] sm:$0xff] }
 0x3c5   : > { %9110 = vmatmul.mubr.bf16.gmra.mrb[144].mxu0 %v5285_v7  ;;  %8993 = vmatprep.mubr.msk.bf16.mxu1 %vm9713_vm0, %v13577_v61  ;;  %v3696_v62 = vpop.f32.mrb[40].mxu1 }
 0x3c6   : > { %9113 = vmatprep.mubr.msk.bf16.mxu0 %vm9713_vm0, %v13577_v61  ;;  %v4675_v52 = vrot.slane %v13784_v14, 4  ;;  %13786 = vst [vmem:[#allocation6_spill] sm:$0xff] %v12303_v50  ;;  %v12306_v59 = vadd.f32 %v3696_v62, %v11781_v55  ;;  %v8747_v25 = vpop.f32.mrb[41].mxu1  ;;  %v13798_v50 = vld [vmem:[#allocation13_spill] sm:$0xff] }
 0x3c7   : > { %v3699_v14 = vpop.f32.mrb[42].mxu1 }
 0x3c8   : > { %v12285_v15 = vpop.f32.mrb[40].mxu0  ;;  %v4676_v33 = vor.u32 %v4675_v52, %v4672_v57  ;;  %v12311_v40 = vadd.f32 %v3699_v14, %v11785_v53  ;;  %v8748_v19 = vpop.f32.mrb[43].mxu1  ;;  %v9657_v57 = vld [vmem:[#allocation2 + $0x58] sm:$0xff]  ;;  %v13788_v52 = vshrl.u32 %v13787_v12, 16  ;;  %v12326_v53 = vadd.f32 %v12040_v32, %v12033_v9 }
 0x3c9   : > { %v8867_v7 = vpop.f32.mrb[41].mxu0  ;;  %v5288_v46 = vrot.slane %v9657_v57, 4 }
 0x3ca   : > { %v12292_v11 = vpop.f32.mrb[42].mxu0  ;;  %v4677_v18 = vsel %vm1803_vm2, %v4667_v4, %v4676_v33  ;;  %v4681_v55 = vrot.slane %v13788_v52, 3  ;;  %13790 = vst [vmem:[#allocation7_spill] sm:$0xff] %v12326_v53 }
 0x3cb   : > { %v8868_v43 = vpop.f32.mrb[43].mxu0  ;;  %v5289_v19 = vsel %vm1423_vm1, %v5286_v3, %v5288_v46  ;;  %v9581_v3 = vld [vmem:[%s13392_s4 + $0x238] sm:$0xff]  }
 0x3cc   : > { %v13789_v43 = vshll.u32 %v13787_v12, 16  ;;  %8994 = vmatmul.mubr.bf16.gmra.mrb[148].mxu1 %v4677_v18  ;;  %v12331_v12 = vadd.f32 %v12042_v17, %v12038_v49 }
 0x3cd   : > { %9114 = vmatmul.mubr.bf16.gmra.mrb[148].mxu0 %v5287_v54  ;;  %8997 = vmatprep.mubr.msk.bf16.mxu1 %vm9713_vm0, %v13577_v61  ;;  %v3704_v14 = vpop.f32.mrb[44].mxu1 }
 0x3ce   : > { %9117 = vmatprep.mubr.msk.bf16.mxu0 %vm9713_vm0, %v13577_v61  ;;  %v4684_v62 = vrot.slane %v13789_v43, 4  ;;  %13791 = vst [vmem:[#allocation27_spill] sm:$0xff] %v12331_v12  ;;  %v12334_v18 = vadd.f32 %v3704_v14, %v11798_v42  ;;  %v8751_v52 = vpop.f32.mrb[45].mxu1  ;;  %v9658_v42 = vld [vmem:[#allocation2 + $0x60] sm:$0xff]  ;;  %9212 = vmatpush3.bf16.msra.mxu1 %v9581_v3  ;;  %v13802_v3 = vld [vmem:[#allocation9_spill] sm:$0xff] }
 0x3cf   : > { %v3707_v43 = vpop.f32.mrb[46].mxu1  ;;  %v5290_v17 = vrot.slane %v9658_v42, 4 }
 0x3d0   : > { %v12313_v7 = vpop.f32.mrb[44].mxu0  ;;  %v4685_v57 = vor.u32 %v4684_v62, %v4681_v55  ;;  %v12339_v9 = vadd.f32 %v3707_v43, %v11807_v6  ;;  %v8752_v32 = vpop.f32.mrb[47].mxu1  ;;  %v13792_v62 = vld [vmem:[#allocation33_spill] sm:$0xff]  ;;  %v13795_v43 = vld [vmem:[#allocation82_spill] sm:$0xff] }
 0x3d1   : > { %v8871_v54 = vpop.f32.mrb[45].mxu0  ;;  %v13794_v14 = vshll.u32 %v13792_v62, 16  ;;  %v13796_v32 = vld [vmem:[#allocation83_spill] sm:$0xff]  ;;  %v5291_v53 = vsel %vm1423_vm1, %v5288_v46, %v5290_v17 }
 0x3d2   : > { %v12320_v25 = vpop.f32.mrb[46].mxu0  ;;  %v4686_v49 = vsel %vm1803_vm2, %v4676_v33, %v4685_v57  ;;  %v13793_v54 = vshrl.u32 %v13792_v62, 16  ;;  %v12357_v12 = vadd.f32 %v13796_v32, %v13795_v43  ;;  %v13799_v62 = vld [vmem:[#allocation84_spill] sm:$0xff] }
 0x3d3   : > { %v8872_v4 = vpop.f32.mrb[47].mxu0 }
 0x3d4   : > { %v4690_v4 = vrot.slane %v13793_v54, 3  ;;  %8998 = vmatmul.mubr.bf16.gmra.mrb[152].mxu1 %v4686_v49  ;;  %13797 = vst [vmem:[#allocation28_spill] sm:$0xff] %v12357_v12  ;;  %v13801_v49 = vld [vmem:[#allocation8_spill] sm:$0xff] }
 0x3d5   : > { %9118 = vmatmul.mubr.bf16.gmra.mrb[152].mxu0 %v5289_v19  ;;  %v4693_v19 = vrot.slane %v13794_v14, 4  ;;  %9001 = vmatprep.mubr.msk.bf16.mxu1 %vm9713_vm0, %v13577_v61  ;;  %v3712_v42 = vpop.f32.mrb[48].mxu1  ;;  %v12362_v14 = vadd.f32 %v13799_v62, %v13798_v50 }
 0x3d6   : > { %9121 = vmatprep.mubr.msk.bf16.mxu0 %vm9713_vm0, %v13577_v61  ;;  %v8755_v51 = vpop.f32.mrb[49].mxu1 }
 0x3d7   : > { %v4694_v54 = vor.u32 %v4693_v19, %v4690_v4  ;;  %13800 = vst [vmem:[#allocation29_spill] sm:$0xff] %v12362_v14  ;;  %v3715_v48 = vpop.f32.mrb[50].mxu1  ;;  %v9659_v4 = vld [vmem:[#allocation2 + $0x68] sm:$0xff] }
 0x3d8   : > { %v12344_v55 = vpop.f32.mrb[48].mxu0  ;;  %v12370_v43 = vadd.f32 %v3715_v48, %v13802_v3  ;;  %v8756_v32 = vpop.f32.mrb[51].mxu1  ;;  %v5292_v50 = vrot.slane %v9659_v4, 4  ;;  %v13803_v19 = vld [vmem:[#allocation37_spill] sm:$0xff] }
 0x3d9   : > { %v8875_v52 = vpop.f32.mrb[49].mxu0  ;;  %v4695_v46 = vsel %vm1803_vm2, %v4685_v57, %v4694_v54  ;;  %v13804_v62 = vshrl.u32 %v13803_v19, 16  ;;  %v13805_v51 = vshll.u32 %v13803_v19, 16  ;;  %v13806_v48 = vld [vmem:[#allocation85_spill] sm:$0xff]  ;;  %v12390_v19 = vadd.f32 %v12076_v22, %v12068_v28  ;;  %v13811_v22 = vld [vmem:[#allocation38_spill] sm:$0xff] }
 0x3da   : > { %v12351_v6 = vpop.f32.mrb[50].mxu0  ;;  %v12365_v52 = vadd.f32 %v3712_v42, %v13801_v49  ;;  %v12385_v3 = vadd.f32 %v12070_v30, %v13806_v48  ;;  %v5293_v4 = vsel %vm1423_vm1, %v5290_v17, %v5292_v50  ;;  %v13810_v30 = vld [vmem:[#allocation10_spill] sm:$0xff] }
 0x3db   : > { %v8876_v33 = vpop.f32.mrb[51].mxu0  ;;  %v4699_v42 = vrot.slane %v13804_v62, 3  ;;  %13808 = vst [vmem:[#allocation32_spill] sm:$0xff] %v12390_v19  ;;  %v13809_v62 = vld [vmem:[#allocation18_spill] sm:$0xff] }
 0x3dc   : > { %9002 = vmatmul.mubr.bf16.gmra.mrb[156].mxu1 %v4695_v46  ;;  %13807 = vst [vmem:[#allocation31_spill] sm:$0xff] %v12385_v3 }
 0x3dd   : > { %9122 = vmatmul.mubr.bf16.gmra.mrb[156].mxu0 %v5291_v53  ;;  %v4702_v53 = vrot.slane %v13805_v51, 4  ;;  %9005 = vmatprep.mubr.msk.bf16.mxu1 %vm9713_vm0, %v13577_v61 }
 0x3de   : > { %9125 = vmatprep.mubr.msk.bf16.mxu0 %vm9713_vm0, %v13577_v61  ;;  %v3720_v32 = vpop.f32.mrb[52].mxu1 }
 0x3df   : > { %v4703_v12 = vor.u32 %v4702_v53, %v4699_v42  ;;  %v12393_v46 = vadd.f32 %v3720_v32, %v13809_v62  ;;  %v8759_v51 = vpop.f32.mrb[53].mxu1  ;;  %v9660_v42 = vld [vmem:[#allocation2 + $0x70] sm:$0xff]  ;;  %v13812_v53 = vshrl.u32 %v13811_v22, 16  ;;  %v13813_v62 = vshll.u32 %v13811_v22, 16 }
 0x3e0   : > { %v12372_v33 = vpop.f32.mrb[52].mxu0  ;;  %v5294_v28 = vrot.slane %v9660_v42, 4 }
 0x3e1   : > { %v8879_v49 = vpop.f32.mrb[53].mxu0  ;;  %v4704_v17 = vsel %vm1803_vm2, %v4694_v54, %v4703_v12  ;;  %v4708_v32 = vrot.slane %v13812_v53, 3  ;;  %v13816_v53 = vld [vmem:[#allocation23_spill] sm:$0xff] }
 0x3e2   : > { %v12379_v14 = vpop.f32.mrb[54].mxu0  ;;  %v3723_v49 = vpop.f32.mrb[54].mxu1  ;;  %v5295_v42 = vsel %vm1423_vm1, %v5292_v50, %v5294_v28  ;;  %v12418_v22 = vadd.f32 %v13816_v53, %v12090_v45 }
 0x3e3   : > { %v8880_v57 = vpop.f32.mrb[55].mxu0  ;;  %v12398_v48 = vadd.f32 %v3723_v49, %v13810_v30  ;;  %v13814_v49 = vld [vmem:[#allocation14_spill] sm:$0xff] }
 0x3e4   : > { %v8760_v57 = vpop.f32.mrb[55].mxu1  ;;  %9006 = vmatmul.mubr.bf16.gmra.mrb[160].mxu1 %v4704_v17  ;;  %v12413_v30 = vadd.f32 %v12092_v31, %v13814_v49  ;;  %13817 = vst [vmem:[#allocation82_spill] sm:$0xff] %v12418_v22  ;;  %v13819_v31 = vld [vmem:[#allocation12_spill] sm:$0xff] }
 0x3e5   : > { %9126 = vmatmul.mubr.bf16.gmra.mrb[160].mxu0 %v5293_v4  ;;  %v4711_v4 = vrot.slane %v13813_v62, 4  ;;  %9009 = vmatprep.mubr.msk.bf16.mxu1 %vm9713_vm0, %v13577_v61  ;;  %v13818_v62 = vld [vmem:[#allocation11_spill] sm:$0xff] }
 0x3e6   : > { %9129 = vmatprep.mubr.msk.bf16.mxu0 %vm9713_vm0, %v13577_v61  ;;  %13815 = vst [vmem:[#allocation33_spill] sm:$0xff] %v12413_v30  ;;  %v3728_v57 = vpop.f32.mrb[56].mxu1 }
 0x3e7   : > { %v4712_v26 = vor.u32 %v4711_v4, %v4708_v32  ;;  %v12421_v17 = vadd.f32 %v3728_v57, %v13818_v62  ;;  %v9661_v32 = vld [vmem:[#allocation2 + $0x78] sm:$0xff] }
 0x3e8   : > { %v12400_v3 = vpop.f32.mrb[56].mxu0  ;;  %v5296_v45 = vrot.slane %v9661_v32, 4 }
 0x3e9   : > { %v8883_v51 = vpop.f32.mrb[57].mxu0  ;;  %v4713_v50 = vsel %vm1803_vm2, %v4703_v12, %v4712_v26 }
 0x3ea   : > { %v12407_v19 = vpop.f32.mrb[58].mxu0  ;;  %v8763_v51 = vpop.f32.mrb[57].mxu1  ;;  %v5297_v32 = vsel %vm1423_vm1, %v5294_v28, %v5296_v45  ;;  %v9582_v28 = vld [vmem:[%s13394_s6] sm:$0xff]  }
 0x3eb   : > { %v8884_v54 = vpop.f32.mrb[59].mxu0  ;;  %v3731_v29 = vpop.f32.mrb[58].mxu1  ;;  %9322 = vmatpush3.bf16.msra.mxu0 %v9582_v28 }
 0x3ec   : > { %v12426_v49 = vadd.f32 %v3731_v29, %v13819_v31  ;;  %v8764_v54 = vpop.f32.mrb[59].mxu1  ;;  %9010 = vmatmul.mubr.bf16.gmra.mrb[164].mxu1 %v4713_v50  ;;  %v13825_v50 = vld [vmem:[#allocation19_spill] sm:$0xff]  ;;  %9323 = vmatprep.subr.bf16.mxu0 %v13577_v61 }
 0x3ed   : > { %9130 = vmatmul.mubr.bf16.gmra.mrb[164].mxu0 %v5295_v42  ;;  %9013 = vmatprep.mubr.msk.bf16.mxu1 %vm9713_vm0, %v13577_v61  ;;  %v13821_v42 = vld [vmem:[#allocation34_spill] sm:$0xff]  ;;  %v12441_v54 = vadd.f32 %v12128_v5, %v12117_v60 }
 0x3ee   : > { %9133 = vmatprep.mubr.msk.bf16.mxu0 %vm9713_vm0, %v13577_v61  ;;  %v13822_v53 = vshrl.u32 %v13821_v42, 16  ;;  %v13823_v29 = vshll.u32 %v13821_v42, 16  ;;  %v3736_v12 = vpop.f32.mrb[60].mxu1 }
 0x3ef   : > { %13824 = vst [vmem:[#allocation13_spill] sm:$0xff] %v12441_v54  ;;  %v8767_v22 = vpop.f32.mrb[61].mxu1 }
 0x3f0   : > { %v12428_v30 = vpop.f32.mrb[60].mxu0  ;;  %v4717_v62 = vrot.slane %v13822_v53, 3  ;;  %v4720_v51 = vrot.slane %v13823_v29, 4  ;;  %v3739_v53 = vpop.f32.mrb[62].mxu1  ;;  %v13827_v29 = vld [vmem:[#allocation20_spill] sm:$0xff] }
 0x3f1   : > { %v8887_v4 = vpop.f32.mrb[61].mxu0  ;;  %v12454_v60 = vadd.f32 %v3739_v53, %v13827_v29  ;;  %v8768_v5 = vpop.f32.mrb[63].mxu1  ;;  %v9662_v53 = vld [vmem:[#allocation2 + $0x80] sm:$0xff] }
 0x3f2   : > { %v12431_v57 = vpop.f32.mrb[62].mxu0  ;;  %v12445_v4 = vadd.f32 %v3736_v12, %v13825_v50  ;;  %v4721_v42 = vor.u32 %v4720_v51, %v4717_v62  ;;  %v13828_v12 = vld [vmem:[#allocation35_spill] sm:$0xff]  ;;  %v5298_v29 = vrot.slane %v9662_v53, 4  ;;  %v12481_v53 = vadd.f32 %v12171_v34, %v12161_v21 }
 0x3f3   : > { %13820 = vst [vmem:[#allocation83_spill] sm:$0xff] %v12431_v57  ;;  %v8888_v31 = vpop.f32.mrb[63].mxu0  ;;  %v12449_v57 = vadd.f32 %v12135_v1, %v12125_v13  ;;  %v13829_v1 = vshrl.u32 %v13828_v12, 16  ;;  %v13830_v62 = vshll.u32 %v13828_v12, 16 }
 0x3f4   : > { %v4722_v22 = vsel %vm1803_vm2, %v4712_v26, %v4721_v42  ;;  %v12473_v26 = vadd.f32 %v12164_v37, %v12153_v44  ;;  %v5299_v12 = vsel %vm1423_vm1, %v5296_v45, %v5298_v29  ;;  %13833 = vst [vmem:[#allocation9_spill] sm:$0xff] %v12481_v53 }
 0x3f5   : > { %9134 = vmatmul.mubr.bf16.gmra.mrb[168].mxu0 %v5297_v32  ;;  %13826 = vst [vmem:[#allocation84_spill] sm:$0xff] %v12449_v57  ;;  %v4726_v13 = vrot.slane %v13829_v1, 3  ;;  %v4729_v51 = vrot.slane %v13830_v62, 4  ;;  %9014 = vmatmul.mubr.bf16.gmra.mrb[168].mxu1 %v4722_v22  ;;  %v13832_v22 = vld [vmem:[#allocation21_spill] sm:$0xff] }
 0x3f6   : > { %9137 = vmatprep.mubr.msk.bf16.mxu0 %vm9713_vm0, %v13577_v61  ;;  %9017 = vmatprep.mubr.msk.bf16.mxu1 %vm9713_vm0, %v13577_v61  ;;  %13831 = vst [vmem:[#allocation8_spill] sm:$0xff] %v12473_v26 }
 0x3f7   : > { %v3744_v1 = vpop.f32.mrb[64].mxu1  ;;  %v4730_v62 = vor.u32 %v4729_v51, %v4726_v13  ;;  %v9663_v13 = vld [vmem:[#allocation2 + $0x88] sm:$0xff] }
 0x3f8   : > { %v12459_v31 = vpop.f32.mrb[64].mxu0  ;;  %v12477_v28 = vadd.f32 %v3744_v1, %v13832_v22  ;;  %v5300_v51 = vrot.slane %v9663_v13, 4  ;;  %v13835_v1 = vld [vmem:[#allocation39_spill] sm:$0xff] }
 0x3f9   : > { %v8891_v32 = vpop.f32.mrb[65].mxu0  ;;  %v4731_v45 = vsel %vm1803_vm2, %v4721_v42, %v4730_v62  ;;  %v13837_v34 = vshll.u32 %v13835_v1, 16 }
 0x3fa   : > { %v12466_v50 = vpop.f32.mrb[66].mxu0  ;;  %v8771_v32 = vpop.f32.mrb[65].mxu1 }
 0x3fb   : > { %v8892_v5 = vpop.f32.mrb[67].mxu0  ;;  %v3747_v57 = vpop.f32.mrb[66].mxu1  ;;  %v4738_v21 = vrot.slane %v13837_v34, 4 }
 0x3fc   : > { %v13834_v5 = vld [vmem:[#allocation22_spill] sm:$0xff]  ;;  %v8772_v37 = vpop.f32.mrb[67].mxu1 }
 0x3fd   : > { %9138 = vmatmul.mubr.bf16.gmra.mrb[172].mxu0 %v5299_v12  ;;  %v12486_v44 = vadd.f32 %v3747_v57, %v13834_v5  ;;  %v13836_v12 = vshrl.u32 %v13835_v1, 16  ;;  %9018 = vmatmul.mubr.bf16.gmra.mrb[172].mxu1 %v4731_v45  ;;  %v12501_v5 = vadd.f32 %v12197_v58, %v12189_v35  ;;  %v5301_v37 = vsel %vm1423_vm1, %v5298_v29, %v5300_v51 }
 0x3fe   : > { %9141 = vmatprep.mubr.msk.bf16.mxu0 %vm9713_vm0, %v13577_v61  ;;  %9021 = vmatprep.mubr.msk.bf16.mxu1 %vm9713_vm0, %v13577_v61  ;;  %v12509_v45 = vadd.f32 %v12204_v16, %v12194_v23 }
 0x3ff   : > { %v4735_v22 = vrot.slane %v13836_v12, 3  ;;  %13838 = vst [vmem:[#allocation37_spill] sm:$0xff] %v12501_v5  ;;  %v3752_v42 = vpop.f32.mrb[68].mxu1  ;;  %v13839_v12 = vld [vmem:[#allocation30_spill] sm:$0xff] }
 0x400   : > { %v12488_v26 = vpop.f32.mrb[68].mxu0  ;;  %v12505_v54 = vadd.f32 %v3752_v42, %v13839_v12  ;;  %v8775_v1 = vpop.f32.mrb[69].mxu1  ;;  %13840 = vst [vmem:[#allocation85_spill] sm:$0xff] %v12509_v45  ;;  %v13842_v42 = vld [vmem:[#allocation40_spill] sm:$0xff] }
 0x401   : > { %v8895_v32 = vpop.f32.mrb[69].mxu0  ;;  %v4739_v13 = vor.u32 %v4738_v21, %v4735_v22  ;;  %v3755_v34 = vpop.f32.mrb[70].mxu1  ;;  %v9664_v22 = vld [vmem:[#allocation2 + $0x90] sm:$0xff]  ;;  %v13844_v23 = vshll.u32 %v13842_v42, 16 }
 0x402   : > { %v12495_v53 = vpop.f32.mrb[70].mxu0  ;;  %v13841_v32 = vld [vmem:[#allocation36_spill] sm:$0xff]  ;;  %v8776_v58 = vpop.f32.mrb[71].mxu1  ;;  %v5302_v21 = vrot.slane %v9664_v22, 4 }
 0x403   : > { %v8896_v57 = vpop.f32.mrb[71].mxu0  ;;  %v12514_v35 = vadd.f32 %v3755_v34, %v13841_v32  ;;  %v4740_v29 = vsel %vm1803_vm2, %v4730_v62, %v4739_v13  ;;  %v4747_v16 = vrot.slane %v13844_v23, 4  ;;  %v12529_v32 = vadd.f32 %v12225_v27, %v12218_v20 }
 0x404   : > { %v5303_v58 = vsel %vm1423_vm1, %v5300_v51, %v5302_v21 }
 0x405   : > { %9142 = vmatmul.mubr.bf16.gmra.mrb[176].mxu0 %v5301_v37  ;;  %v13843_v37 = vshrl.u32 %v13842_v42, 16  ;;  %9022 = vmatmul.mubr.bf16.gmra.mrb[176].mxu1 %v4740_v29  ;;  %13845 = vst [vmem:[#allocation18_spill] sm:$0xff] %v12529_v32  ;;  %v12537_v29 = vadd.f32 %v12232_v47, %v12223_v39 }
 0x406   : > { %9145 = vmatprep.mubr.msk.bf16.mxu0 %vm9713_vm0, %v13577_v61  ;;  %9025 = vmatprep.mubr.msk.bf16.mxu1 %vm9713_vm0, %v13577_v61 }
 0x407   : > { %v4744_v12 = vrot.slane %v13843_v37, 3  ;;  %v3760_v62 = vpop.f32.mrb[72].mxu1  ;;  %v13846_v37 = vld [vmem:[#allocation46_spill] sm:$0xff]  ;;  %13847 = vst [vmem:[#allocation10_spill] sm:$0xff] %v12537_v29 }
 0x408   : > { %v12516_v57 = vpop.f32.mrb[72].mxu0  ;;  %v12533_v5 = vadd.f32 %v3760_v62, %v13846_v37  ;;  %v8779_v42 = vpop.f32.mrb[73].mxu1  ;;  %v13849_v62 = vld [vmem:[#allocation41_spill] sm:$0xff] }
 0x409   : > { %v8899_v1 = vpop.f32.mrb[73].mxu0  ;;  %v4748_v22 = vor.u32 %v4747_v16, %v4744_v12  ;;  %v3763_v23 = vpop.f32.mrb[74].mxu1  ;;  %v9665_v12 = vld [vmem:[#allocation2 + $0x98] sm:$0xff]  ;;  %v13851_v39 = vshll.u32 %v13849_v62, 16 }
 0x40a   : > { %v12523_v45 = vpop.f32.mrb[74].mxu0  ;;  %v13848_v1 = vld [vmem:[#allocation50_spill] sm:$0xff]  ;;  %v8780_v27 = vpop.f32.mrb[75].mxu1  ;;  %v5304_v16 = vrot.slane %v9665_v12, 4 }
 0x40b   : > { %v8900_v34 = vpop.f32.mrb[75].mxu0  ;;  %v12542_v20 = vadd.f32 %v3763_v23, %v13848_v1  ;;  %v4749_v51 = vsel %vm1803_vm2, %v4739_v13, %v4748_v22  ;;  %v4756_v47 = vrot.slane %v13851_v39, 4  ;;  %v9583_v13 = vld [vmem:[%s13394_s6 + $0x8] sm:$0xff]   ;;  %v12560_v1 = vadd.f32 %v12257_v24, %v12249_v41 }
 0x40c   : > { %v5305_v12 = vsel %vm1423_vm1, %v5302_v21, %v5304_v16  ;;  %9324 = vmatpush3.bf16.msra.mxu0 %v9583_v13  ;;  %v13855_v41 = vld [vmem:[#allocation81_spill] sm:$0xff] }
 0x40d   : > { %9146 = vmatmul.mubr.bf16.gmra.mrb[180].mxu0 %v5303_v58  ;;  %v13850_v58 = vshrl.u32 %v13849_v62, 16  ;;  %9026 = vmatmul.mubr.bf16.gmra.mrb[180].mxu1 %v4749_v51  ;;  %13852 = vst [vmem:[#allocation38_spill] sm:$0xff] %v12560_v1 }
 0x40e   : > { %9149 = vmatprep.mubr.msk.bf16.mxu0 %vm9713_vm0, %v13577_v61  ;;  %9029 = vmatprep.mubr.msk.bf16.mxu1 %vm9713_vm0, %v13577_v61 }
 0x40f   : > { %v4753_v37 = vrot.slane %v13850_v58, 3  ;;  %v3768_v27 = vpop.f32.mrb[76].mxu1  ;;  %v13853_v58 = vld [vmem:[#allocation80_spill] sm:$0xff]  ;;  %9325 = vmatprep.subr.bf16.mxu0 %v13577_v61 }
 0x410   : > { %v12544_v34 = vpop.f32.mrb[76].mxu0  ;;  %v12564_v51 = vadd.f32 %v3768_v27, %v13853_v58  ;;  %v8783_v39 = vpop.f32.mrb[77].mxu1 }
 0x411   : > { %v8903_v42 = vpop.f32.mrb[77].mxu0  ;;  %v4757_v62 = vor.u32 %v4756_v47, %v4753_v37  ;;  %v9666_v47 = vld [vmem:[#allocation2 + $0xa0] sm:$0xff] }
 0x412   : > { %v12551_v29 = vpop.f32.mrb[78].mxu0  ;;  %v12568_v42 = vadd.f32 %v12264_v2, %v12255_v36  ;;  %v5306_v27 = vrot.slane %v9666_v47, 4 }
 0x413   : > { %v8904_v23 = vpop.f32.mrb[79].mxu0  ;;  %v4758_v37 = vsel %vm1803_vm2, %v4748_v22, %v4757_v62 }
 0x414   : > { %13854 = vst [vmem:[#allocation14_spill] sm:$0xff] %v12568_v42  ;;  %v3771_v23 = vpop.f32.mrb[78].mxu1 }
 0x415   : > { %9150 = vmatmul.mubr.bf16.gmra.mrb[184].mxu0 %v5305_v12  ;;  %v12573_v24 = vadd.f32 %v3771_v23, %v13855_v41  ;;  %v8784_v1 = vpop.f32.mrb[79].mxu1  ;;  %v13856_v12 = vld [vmem:[#allocation42_spill] sm:$0xff]  ;;  %9030 = vmatmul.mubr.bf16.gmra.mrb[184].mxu1 %v4758_v37  ;;  %v12589_v23 = vadd.f32 %v12285_v15, %v12278_v63  ;;  %v5307_v41 = vsel %vm1423_vm1, %v5304_v16, %v5306_v27  ;;  %v9667_v16 = vld [vmem:[#allocation2 + $0xa8] sm:$0xff] }
 0x416   : > { %9153 = vmatprep.mubr.msk.bf16.mxu0 %vm9713_vm0, %v13577_v61  ;;  %v13857_v36 = vshrl.u32 %v13856_v12, 16  ;;  %v13858_v58 = vshll.u32 %v13856_v12, 16  ;;  %9033 = vmatprep.mubr.msk.bf16.mxu1 %vm9713_vm0, %v13577_v61 }
 0x417   : > { %13859 = vst [vmem:[#allocation23_spill] sm:$0xff] %v12589_v23  ;;  %v3776_v22 = vpop.f32.mrb[80].mxu1 }
 0x418   : > { %v12576_v21 = vpop.f32.mrb[80].mxu0  ;;  %v4762_v2 = vrot.slane %v13857_v36, 3  ;;  %v4765_v39 = vrot.slane %v13858_v58, 4  ;;  %v13860_v36 = vld [vmem:[#allocation17_spill] sm:$0xff]  ;;  %v8787_v12 = vpop.f32.mrb[81].mxu1  ;;  %v13862_v58 = vld [vmem:[#allocation15_spill] sm:$0xff] }
 0x419   : > { %v8907_v42 = vpop.f32.mrb[81].mxu0  ;;  %v3889_v32 = vadd.f32 %v3776_v22, %v13860_v36  ;;  %v3779_v37 = vpop.f32.mrb[82].mxu1 }
 0x41a   : > { %v12583_v13 = vpop.f32.mrb[82].mxu0  ;;  %v4766_v47 = vor.u32 %v4765_v39, %v4762_v2  ;;  %v12595_v42 = vadd.f32 %v12292_v11, %v12283_v0  ;;  %v8788_v63 = vpop.f32.mrb[83].mxu1  ;;  %v5308_v2 = vrot.slane %v9667_v16, 4  ;;  %v13863_v39 = vld [vmem:[#allocation43_spill] sm:$0xff] }
 0x41b   : > { %v8908_v1 = vpop.f32.mrb[83].mxu0  ;;  %v13864_v22 = vshrl.u32 %v13863_v39, 16 }
 0x41c   : > { %13861 = vst [vmem:[#allocation11_spill] sm:$0xff] %v12595_v42  ;;  %v3890_v1 = vadd.f32 %v3779_v37, %v13862_v58  ;;  %v4767_v23 = vsel %vm1803_vm2, %v4757_v62, %v4766_v47  ;;  %v12613_v62 = vadd.f32 %v12313_v7, %v12306_v59  ;;  %v5309_v16 = vsel %vm1423_vm1, %v5306_v27, %v5308_v2  ;;  %v9668_v27 = vld [vmem:[#allocation2 + $0xb0] sm:$0xff] }
 0x41d   : > { %9154 = vmatmul.mubr.bf16.gmra.mrb[188].mxu0 %v5307_v41  ;;  %v4771_v36 = vrot.slane %v13864_v22, 3  ;;  %v13865_v41 = vshll.u32 %v13863_v39, 16  ;;  %9034 = vmatmul.mubr.bf16.gmra.mrb[188].mxu1 %v4767_v23  ;;  %v13866_v22 = vld [vmem:[#allocation24_spill] sm:$0xff]  ;;  %v12619_v23 = vadd.f32 %v12320_v25, %v12311_v40 }
 0x41e   : > { %9157 = vmatprep.mubr.msk.bf16.mxu0 %vm9713_vm0, %v13577_v61  ;;  %9037 = vmatprep.mubr.msk.bf16.mxu1 %vm9713_vm0, %v13577_v61 }
 0x41f   : > { %v4774_v12 = vrot.slane %v13865_v41, 4  ;;  %v3784_v63 = vpop.f32.mrb[84].mxu1 }
 0x420   : > { %v4420_v15 = vpop.f32.mrb[84].mxu0 }
 0x421   : > { %v12605_v0 = vadd.f32 %v4420_v15, %v3889_v32  ;;  %v8911_v11 = vpop.f32.mrb[85].mxu0  ;;  %v4775_v39 = vor.u32 %v4774_v12, %v4771_v36  ;;  %v3891_v32 = vadd.f32 %v3784_v63, %v13866_v22  ;;  %v8791_v15 = vpop.f32.mrb[85].mxu1  ;;  %v5310_v36 = vrot.slane %v9668_v27, 4  ;;  %v13868_v12 = vld [vmem:[#allocation44_spill] sm:$0xff] }
 0x422   : > { %v4423_v42 = vpop.f32.mrb[86].mxu0  ;;  %v3787_v41 = vpop.f32.mrb[86].mxu1 }
 0x423   : > { %v12609_v37 = vadd.f32 %v4423_v42, %v3890_v1  ;;  %v8912_v58 = vpop.f32.mrb[87].mxu0  ;;  %v13867_v42 = vld [vmem:[#allocation3_spill] sm:$0xff]  ;;  %v8792_v59 = vpop.f32.mrb[87].mxu1  ;;  %v4776_v11 = vsel %vm1803_vm2, %v4766_v47, %v4775_v39  ;;  %v12637_v47 = vadd.f32 %v12344_v55, %v12334_v18  ;;  %v5311_v27 = vsel %vm1423_vm1, %v5308_v2, %v5310_v36  ;;  %v13871_v18 = vld [vmem:[#allocation16_spill] sm:$0xff] }
 0x424   : > { %v3892_v1 = vadd.f32 %v3787_v41, %v13867_v42  ;;  %v13869_v58 = vshrl.u32 %v13868_v12, 16 }
 0x425   : > { %9158 = vmatmul.mubr.bf16.gmra.mrb[192].mxu0 %v5309_v16  ;;  %v13870_v16 = vshll.u32 %v13868_v12, 16  ;;  %9038 = vmatmul.mubr.bf16.gmra.mrb[192].mxu1 %v4776_v11  ;;  %v9584_v11 = vld [vmem:[%s13394_s6 + $0x10] sm:$0xff]  }
 0x426   : > { %9161 = vmatprep.mubr.msk.bf16.mxu0 %vm9713_vm0, %v13577_v61  ;;  %v4780_v63 = vrot.slane %v13869_v58, 3  ;;  %9041 = vmatprep.mubr.msk.bf16.mxu1 %vm9713_vm0, %v13577_v61 }
 0x427   : > { %v4783_v22 = vrot.slane %v13870_v16, 4  ;;  %v3792_v59 = vpop.f32.mrb[88].mxu1  ;;  %9326 = vmatpush3.bf16.msra.mxu0 %v9584_v11  ;;  %v9669_v16 = vld [vmem:[#allocation2 + $0xb8] sm:$0xff] }
 0x428   : > { %v4428_v7 = vpop.f32.mrb[88].mxu0  ;;  %9327 = vmatprep.subr.bf16.mxu0 %v13577_v61 }
 0x429   : > { %v12629_v40 = vadd.f32 %v4428_v7, %v3891_v32  ;;  %v8915_v25 = vpop.f32.mrb[89].mxu0  ;;  %v4784_v12 = vor.u32 %v4783_v22, %v4780_v63  ;;  %v3893_v32 = vadd.f32 %v3792_v59, %v12180_v10  ;;  %v8795_v7 = vpop.f32.mrb[89].mxu1  ;;  %v5312_v22 = vrot.slane %v9669_v16, 4 }
 0x42a   : > { %v4431_v15 = vpop.f32.mrb[90].mxu0  ;;  %v3795_v58 = vpop.f32.mrb[90].mxu1  ;;  %v13872_v25 = vld [vmem:[#allocation45_spill] sm:$0xff] }
 0x42b   : > { %v12633_v41 = vadd.f32 %v4431_v15, %v3892_v1  ;;  %v8916_v42 = vpop.f32.mrb[91].mxu0  ;;  %v12646_v1 = vadd.f32 %v12351_v6, %v12339_v9  ;;  %v3894_v55 = vadd.f32 %v3795_v58, %v13871_v18  ;;  %v8796_v2 = vpop.f32.mrb[91].mxu1  ;;  %v4785_v10 = vsel %vm1803_vm2, %v4775_v39, %v4784_v12 }
 0x42c   : > { %v13873_v15 = vshrl.u32 %v13872_v25, 16  ;;  %v13874_v59 = vshll.u32 %v13872_v25, 16  ;;  %v12665_v58 = vadd.f32 %v12372_v33, %v12365_v52  ;;  %v5313_v2 = vsel %vm1423_vm1, %v5310_v36, %v5312_v22  ;;  %v9670_v36 = vld [vmem:[#allocation2 + $0xc0] sm:$0xff] }
 0x42d   : > { %9162 = vmatmul.mubr.bf16.gmra.mrb[196].mxu0 %v5311_v27  ;;  %9042 = vmatmul.mubr.bf16.gmra.mrb[196].mxu1 %v4785_v10  ;;  %v12671_v10 = vadd.f32 %v12379_v14, %v12370_v43 }
 0x42e   : > { %9165 = vmatprep.mubr.msk.bf16.mxu0 %vm9713_vm0, %v13577_v61  ;;  %v4789_v42 = vrot.slane %v13873_v15, 3  ;;  %v4792_v9 = vrot.slane %v13874_v59, 4  ;;  %9045 = vmatprep.mubr.msk.bf16.mxu1 %vm9713_vm0, %v13577_v61  ;;  %v13875_v59 = vld [vmem:[#allocation47_spill] sm:$0xff] }
 0x42f   : > { %v3800_v18 = vpop.f32.mrb[92].mxu1 }
 0x430   : > { %v4436_v63 = vpop.f32.mrb[92].mxu0  ;;  %v4793_v16 = vor.u32 %v4792_v9, %v4789_v42  ;;  %v5314_v42 = vrot.slane %v9670_v36, 4 }
 0x431   : > { %v12657_v6 = vadd.f32 %v4436_v63, %v3893_v32  ;;  %v8919_v27 = vpop.f32.mrb[93].mxu0  ;;  %v3895_v32 = vadd.f32 %v3800_v18, %v12210_v38  ;;  %v8799_v63 = vpop.f32.mrb[93].mxu1  ;;  %v13876_v38 = vshrl.u32 %v13875_v59, 16 }
 0x432   : > { %v4439_v7 = vpop.f32.mrb[94].mxu0  ;;  %v3803_v25 = vpop.f32.mrb[94].mxu1  ;;  %v4794_v15 = vsel %vm1803_vm2, %v4784_v12, %v4793_v16  ;;  %v13877_v27 = vshll.u32 %v13875_v59, 16  ;;  %v12689_v12 = vadd.f32 %v12400_v3, %v12393_v46  ;;  %v5315_v63 = vsel %vm1423_vm1, %v5312_v22, %v5314_v42  ;;  %v9671_v22 = vld [vmem:[#allocation2 + $0xc8] sm:$0xff] }
 0x433   : > { %v12661_v11 = vadd.f32 %v4439_v7, %v3894_v55  ;;  %v8920_v39 = vpop.f32.mrb[95].mxu0  ;;  %v3896_v55 = vadd.f32 %v3803_v25, %v12215_v56  ;;  %v8800_v52 = vpop.f32.mrb[95].mxu1  ;;  %v4798_v9 = vrot.slane %v13876_v38, 3  ;;  %v5316_v38 = vrot.slane %v9671_v22, 4 }
 0x434   : > { %v4801_v7 = vrot.slane %v13877_v27, 4 }
 0x435   : > { %9166 = vmatmul.mubr.bf16.gmra.mrb[200].mxu0 %v5313_v2  ;;  %9046 = vmatmul.mubr.bf16.gmra.mrb[200].mxu1 %v4794_v15 }
 0x436   : > { %9169 = vmatprep.mubr.msk.bf16.mxu0 %vm9713_vm0, %v13577_v61  ;;  %9049 = vmatprep.mubr.msk.bf16.mxu1 %vm9713_vm0, %v13577_v61  ;;  %v4802_v25 = vor.u32 %v4801_v7, %v4798_v9  ;;  %v13879_v9 = vld [vmem:[#allocation48_spill] sm:$0xff] }
 0x437   : > { %v3808_v2 = vpop.f32.mrb[96].mxu1  ;;  %v13881_v7 = vshll.u32 %v13879_v9, 16 }
 0x438   : > { %v4444_v33 = vpop.f32.mrb[96].mxu0  ;;  %v8803_v52 = vpop.f32.mrb[97].mxu1  ;;  %v4803_v59 = vsel %vm1803_vm2, %v4793_v16, %v4802_v25  ;;  %v12713_v16 = vadd.f32 %v12428_v30, %v12421_v17 }
 0x439   : > { %v12681_v14 = vadd.f32 %v4444_v33, %v3895_v32  ;;  %v8923_v43 = vpop.f32.mrb[97].mxu0  ;;  %v3897_v32 = vadd.f32 %v3808_v2, %v12238_v8  ;;  %v12695_v33 = vadd.f32 %v12407_v19, %v12398_v48  ;;  %v3811_v15 = vpop.f32.mrb[98].mxu1  ;;  %v13880_v8 = vshrl.u32 %v13879_v9, 16 }
 0x43a   : > { %v4447_v39 = vpop.f32.mrb[98].mxu0  ;;  %v8804_v3 = vpop.f32.mrb[99].mxu1  ;;  %v4810_v43 = vrot.slane %v13881_v7, 4  ;;  %v5317_v52 = vsel %vm1423_vm1, %v5314_v42, %v5316_v38  ;;  %v9672_v42 = vld [vmem:[#allocation2 + $0xd0] sm:$0xff]  ;;  %v13885_v7 = vld [vmem:[#allocation49_spill] sm:$0xff] }
 0x43b   : > { %v12685_v56 = vadd.f32 %v4447_v39, %v3896_v55  ;;  %v8924_v18 = vpop.f32.mrb[99].mxu0  ;;  %v13878_v55 = vld [vmem:[#allocation25_spill] sm:$0xff]  ;;  %v4807_v27 = vrot.slane %v13880_v8, 3 }
 0x43c   : > { %v3898_v36 = vadd.f32 %v3811_v15, %v13878_v55  ;;  %v13882_v55 = vld [vmem:[#allocation4_spill] sm:$0xff] }
 0x43d   : > { %9170 = vmatmul.mubr.bf16.gmra.mrb[204].mxu0 %v5315_v63  ;;  %9050 = vmatmul.mubr.bf16.gmra.mrb[204].mxu1 %v4803_v59  ;;  %v4811_v15 = vor.u32 %v4810_v43, %v4807_v27  ;;  %v5318_v27 = vrot.slane %v9672_v42, 4  ;;  %v13886_v43 = vshrl.u32 %v13885_v7, 16 }
 0x43e   : > { %9173 = vmatprep.mubr.msk.bf16.mxu0 %vm9713_vm0, %v13577_v61  ;;  %9053 = vmatprep.mubr.msk.bf16.mxu1 %vm9713_vm0, %v13577_v61 }
 0x43f   : > { %v3816_v63 = vpop.f32.mrb[100].mxu1  ;;  %v4812_v8 = vsel %vm1803_vm2, %v4802_v25, %v4811_v15 }
 0x440   : > { %v4452_v46 = vpop.f32.mrb[100].mxu0  ;;  %v8807_v3 = vpop.f32.mrb[101].mxu1 }
 0x441   : > { %v12705_v19 = vadd.f32 %v4452_v46, %v3897_v32  ;;  %v8927_v48 = vpop.f32.mrb[101].mxu0  ;;  %v3899_v32 = vadd.f32 %v3816_v63, %v13882_v55  ;;  %v13883_v46 = vld [vmem:[#allocation83_spill] sm:$0xff]  ;;  %v3819_v22 = vpop.f32.mrb[102].mxu1 }
 0x442   : > { %v4455_v39 = vpop.f32.mrb[102].mxu0  ;;  %v12719_v59 = vadd.f32 %v13883_v46, %v12426_v49  ;;  %v8808_v30 = vpop.f32.mrb[103].mxu1  ;;  %v4816_v48 = vrot.slane %v13886_v43, 3  ;;  %v12740_v46 = vadd.f32 %v12459_v31, %v12445_v4  ;;  %v13889_v4 = vld [vmem:[#allocation6_spill] sm:$0xff] }
 0x443   : > { %v12709_v18 = vadd.f32 %v4455_v39, %v3898_v36  ;;  %v8928_v2 = vpop.f32.mrb[103].mxu0  ;;  %v13884_v36 = vld [vmem:[#allocation5_spill] sm:$0xff]  ;;  %v13887_v39 = vshll.u32 %v13885_v7, 16  ;;  %v13888_v30 = vld [vmem:[#allocation26_spill] sm:$0xff] }
 0x444   : > { %v3900_v9 = vadd.f32 %v3819_v22, %v13884_v36  ;;  %v5319_v22 = vsel %vm1423_vm1, %v5316_v38, %v5318_v27 }
 0x445   : > { %9174 = vmatmul.mubr.bf16.gmra.mrb[208].mxu0 %v5317_v52  ;;  %v4819_v2 = vrot.slane %v13887_v39, 4  ;;  %9054 = vmatmul.mubr.bf16.gmra.mrb[208].mxu1 %v4812_v8  ;;  %v9585_v52 = vld [vmem:[%s13394_s6 + $0x18] sm:$0xff]  }
 0x446   : > { %9177 = vmatprep.mubr.msk.bf16.mxu0 %vm9713_vm0, %v13577_v61  ;;  %9057 = vmatprep.mubr.msk.bf16.mxu1 %vm9713_vm0, %v13577_v61 }
 0x447   : > { %9328 = vmatpush3.bf16.msra.mxu0 %v9585_v52  ;;  %v4820_v36 = vor.u32 %v4819_v2, %v4816_v48  ;;  %v9673_v48 = vld [vmem:[#allocation2 + $0xd8] sm:$0xff] }
 0x448   : > { %v4460_v17 = vpop.f32.mrb[104].mxu0  ;;  %9329 = vmatprep.subr.bf16.mxu0 %v13577_v61  ;;  %v5320_v39 = vrot.slane %v9673_v48, 4  ;;  %v13890_v2 = vld [vmem:[#allocation51_spill] sm:$0xff] }
 0x449   : > { %v12729_v49 = vadd.f32 %v4460_v17, %v3899_v32  ;;  %v8931_v63 = vpop.f32.mrb[105].mxu0  ;;  %v3824_v32 = vpop.f32.mrb[104].mxu1  ;;  %v4821_v38 = vsel %vm1803_vm2, %v4811_v15, %v4820_v36  ;;  %v12765_v15 = vadd.f32 %v12488_v26, %v12477_v28  ;;  %v12776_v28 = vld [vmem:[#allocation2 + $0xf0] sm:$0xf] }
 0x44a   : > { %v4463_v55 = vpop.f32.mrb[106].mxu0  ;;  %v3901_v17 = vadd.f32 %v3824_v32, %v13888_v30  ;;  %v8811_v8 = vpop.f32.mrb[105].mxu1  ;;  %v13891_v63 = vshrl.u32 %v13890_v2, 16 }
 0x44b   : > { %v12736_v25 = vadd.f32 %v4463_v55, %v3900_v9  ;;  %v8932_v3 = vpop.f32.mrb[107].mxu0  ;;  %v12747_v9 = vadd.f32 %v12466_v50, %v12454_v60  ;;  %v3827_v42 = vpop.f32.mrb[106].mxu1  ;;  %v13892_v55 = vshll.u32 %v13890_v2, 16 }
 0x44c   : > { %v3902_v31 = vadd.f32 %v3827_v42, %v13889_v4  ;;  %v8812_v7 = vpop.f32.mrb[107].mxu1  ;;  %v4825_v52 = vrot.slane %v13891_v63, 3  ;;  %v5321_v42 = vsel %vm1423_vm1, %v5318_v27, %v5320_v39 }
 0x44d   : > { %9178 = vmatmul.mubr.bf16.gmra.mrb[212].mxu0 %v5319_v22  ;;  %v4828_v3 = vrot.slane %v13892_v55, 4  ;;  %9058 = vmatmul.mubr.bf16.gmra.mrb[212].mxu1 %v4821_v38  ;;  %v13893_v7 = vld [vmem:[#allocation7_spill] sm:$0xff]  ;;  %v12771_v38 = vadd.f32 %v12495_v53, %v12486_v44 }
 0x44e   : > { %9181 = vmatprep.mubr.msk.bf16.mxu0 %vm9713_vm0, %v13577_v61  ;;  %9061 = vmatprep.mubr.msk.bf16.mxu1 %vm9713_vm0, %v13577_v61 }
 0x44f   : > { %v3832_v8 = vpop.f32.mrb[108].mxu1  ;;  %v4829_v4 = vor.u32 %v4828_v3, %v4825_v52  ;;  %v9674_v52 = vld [vmem:[#allocation2 + $0xe0] sm:$0xff] }
 0x450   : > { %v4468_v43 = vpop.f32.mrb[108].mxu0  ;;  %v5322_v55 = vrot.slane %v9674_v52, 4  ;;  %v13895_v3 = vld [vmem:[#allocation52_spill] sm:$0xff] }
 0x451   : > { %v12757_v60 = vadd.f32 %v4468_v43, %v3901_v17  ;;  %v8935_v50 = vpop.f32.mrb[109].mxu0  ;;  %v3903_v17 = vadd.f32 %v3832_v8, %v13893_v7  ;;  %v8815_v43 = vpop.f32.mrb[109].mxu1  ;;  %v4830_v27 = vsel %vm1803_vm2, %v4820_v36, %v4829_v4  ;;  %v13897_v53 = vshll.u32 %v13895_v3, 16 }
 0x452   : > { %v4471_v32 = vpop.f32.mrb[110].mxu0  ;;  %v3835_v48 = vpop.f32.mrb[110].mxu1  ;;  %v13896_v50 = vshrl.u32 %v13895_v3, 16  ;;  %v4841_v7 = vshrl.u32 %v12776_v28, 16  ;;  %v4844_v36 = vshll.u32 %v12776_v28, 16 }
 0x453   : > { %v12761_v22 = vadd.f32 %v4471_v32, %v3902_v31  ;;  %v8936_v30 = vpop.f32.mrb[111].mxu0  ;;  %v13894_v31 = vld [vmem:[#allocation27_spill] sm:$0xff]  ;;  %v8816_v26 = vpop.f32.mrb[111].mxu1  ;;  %v4837_v44 = vrot.slane %v13897_v53, 4 }
 0x454   : > { %v3904_v2 = vadd.f32 %v3835_v48, %v13894_v31  ;;  %v4834_v32 = vrot.slane %v13896_v50, 3  ;;  %v12793_v31 = vadd.f32 %v12516_v57, %v12505_v54  ;;  %v12799_v50 = vadd.f32 %v12523_v45, %v12514_v35  ;;  %v13899_v54 = vld [vmem:[#allocation29_spill] sm:$0xff] }
 0x455   : > { %9182 = vmatmul.mubr.bf16.gmra.mrb[216].mxu0 %v5321_v42  ;;  %9062 = vmatmul.mubr.bf16.gmra.mrb[216].mxu1 %v4830_v27  ;;  %v13898_v27 = vld [vmem:[#allocation28_spill] sm:$0xff] }
 0x456   : > { %9185 = vmatprep.mubr.msk.bf16.mxu0 %vm9713_vm0, %v13577_v61  ;;  %9065 = vmatprep.mubr.msk.bf16.mxu1 %vm9713_vm0, %v13577_v61 }
 0x457   : > { %v3840_v26 = vpop.f32.mrb[112].mxu1 }
 0x458   : > { %v4476_v63 = vpop.f32.mrb[112].mxu0  ;;  %v3905_v52 = vadd.f32 %v3840_v26, %v13898_v27  ;;  %v8819_v3 = vpop.f32.mrb[113].mxu1 }
 0x459   : > { %v12783_v30 = vadd.f32 %v4476_v63, %v3903_v17  ;;  %v8939_v8 = vpop.f32.mrb[113].mxu0  ;;  %v5323_v17 = vsel %vm1423_vm1, %v5320_v39, %v5322_v55  ;;  %v4838_v63 = vor.u32 %v4837_v44, %v4834_v32  ;;  %v3843_v53 = vpop.f32.mrb[114].mxu1  ;;  %v9675_v32 = vld [vmem:[#allocation2] sm:$0xff] }
 0x45a   : > { %v4479_v42 = vpop.f32.mrb[114].mxu0  ;;  %v4846_v8 = vrot.slane %v4844_v36, 4  ;;  %v3906_v57 = vadd.f32 %v3843_v53, %v13899_v54  ;;  %v5324_v44 = vrot.slane %v9675_v32, 4  ;;  %v9586_v36 = vld [vmem:[%s13394_s6 + $0x20] sm:$0xff]   ;;  %v13900_v53 = vld [vmem:[#allocation31_spill] sm:$0xff] }
 0x45b   : > { %v12789_v43 = vadd.f32 %v4479_v42, %v3904_v2  ;;  %v8940_v48 = vpop.f32.mrb[115].mxu0  ;;  %v4843_v2 = vrot.slane %v4841_v7, 3  ;;  %v8820_v42 = vpop.f32.mrb[115].mxu1  ;;  %v4839_v39 = vsel %vm1803_vm2, %v4829_v4, %v4838_v63  ;;  %v12816_v4 = vadd.f32 %v12544_v34, %v12533_v5  ;;  %9330 = vmatpush3.bf16.msra.mxu0 %v9586_v36  ;;  %v13901_v34 = vld [vmem:[#allocation32_spill] sm:$0xff] }
 0x45c   : > { %v5325_v3 = vsel %vm1423_vm1, %v5322_v55, %v5324_v44  ;;  %v5326_v5 = vrot.slane %v12776_v28, 4  ;;  %9331 = vmatprep.subr.bf16.mxu0 %v13577_v61 }
 0x45d   : > { %9186 = vmatmul.mubr.bf16.gmra.mrb[220].mxu0 %v5323_v17  ;;  %9066 = vmatmul.mubr.bf16.gmra.mrb[220].mxu1 %v4839_v39  ;;  %v4847_v35 = vor.u32 %v4846_v8, %v4843_v2  ;;  %v12822_v2 = vadd.f32 %v12551_v29, %v12542_v20 }
 0x45e   : > { %9189 = vmatprep.mubr.msk.bf16.mxu0 %vm9713_vm0, %v13577_v61  ;;  %9069 = vmatprep.mubr.msk.bf16.mxu1 %vm9713_vm0, %v13577_v61  ;;  %v5327_v20 = vsel %vm1423_vm1, %v5324_v44, %v5326_v5 }
 0x460   : > { %v4484_v48 = vpop.f32.mrb[116].mxu0 }
 0x461   : > { %v12805_v26 = vadd.f32 %v4484_v48, %v3905_v52  ;;  %v8943_v17 = vpop.f32.mrb[117].mxu0  ;;  %v3848_v52 = vpop.f32.mrb[116].mxu1 }
 0x462   : > { %v4487_v45 = vpop.f32.mrb[118].mxu0  ;;  %v3907_v54 = vadd.f32 %v3848_v52, %v13900_v53  ;;  %v8823_v42 = vpop.f32.mrb[117].mxu1  ;;  %v13903_v53 = vld [vmem:[#allocation82_spill] sm:$0xff] }
 0x463   : > { %v12809_v27 = vadd.f32 %v4487_v45, %v3906_v57  ;;  %v8944_v7 = vpop.f32.mrb[119].mxu0  ;;  %v3851_v8 = vpop.f32.mrb[118].mxu1  ;;  %v4848_v57 = vsel %vm1803_vm2, %v4838_v63, %v4847_v35  ;;  %v12839_v45 = vadd.f32 %v12576_v21, %v12564_v51  ;;  %v13904_v21 = vld [vmem:[#allocation53_spill] sm:$0xff] }
 0x464   : > { %v3908_v48 = vadd.f32 %v3851_v8, %v13901_v34  ;;  %v8824_v55 = vpop.f32.mrb[119].mxu1  ;;  %v13902_v7 = vld [vmem:[#allocation33_spill] sm:$0xff] }
 0x465   : > { %9190 = vmatmul.mubr.bf16.gmra.mrb[224].mxu0 %v5325_v3  ;;  %9070 = vmatmul.mubr.bf16.gmra.mrb[224].mxu1 %v4848_v57  ;;  %v12844_v3 = vadd.f32 %v12583_v13, %v12573_v24 }
 0x466   : > { %9193 = vmatprep.mubr.msk.bf16.mxu0 %vm9713_vm0, %v13577_v61  ;;  %9213 = vmatprep.mubr.msk.bf16.mxu1 %vm9713_vm0, %v13577_v61 }
 0x467   : > { %v4958_v35 = vpop.f32.mrb[120].mxu1 }
 0x468   : > { %v4492_v39 = vpop.f32.mrb[120].mxu0  ;;  %v5173_v36 = vadd.f32 %v4958_v35, %v13902_v7  ;;  %v8967_v52 = vpop.f32.mrb[121].mxu1 }
 0x469   : > { %v12830_v32 = vadd.f32 %v4492_v39, %v3907_v54  ;;  %v8947_v17 = vpop.f32.mrb[121].mxu0  ;;  %v4961_v44 = vpop.f32.mrb[122].mxu1  ;;  %v13907_v52 = vld [vmem:[#allocation54_spill] sm:$0xff] }
 0x46a   : > { %v4495_v29 = vpop.f32.mrb[122].mxu0  ;;  %v5174_v54 = vadd.f32 %v4961_v44, %v13903_v53  ;;  %v8968_v42 = vpop.f32.mrb[123].mxu1 }
 0x46b   : > { %v12835_v63 = vadd.f32 %v4495_v29, %v3908_v48  ;;  %v8948_v28 = vpop.f32.mrb[123].mxu0  ;;  %v13905_v48 = vld [vmem:[#allocation13_spill] sm:$0xff]  ;;  %v13906_v29 = vld [vmem:[#allocation84_spill] sm:$0xff] }
 0x46d   : > { %9194 = vmatmul.mubr.bf16.gmra.mrb[228].mxu0 %v5327_v20  ;;  %9214 = vmatmul.mubr.bf16.vlgmr.msra.gmra.mrb[228].mxu1 %v13904_v21 }
 0x46e   : > { %9337 = vmatprep.mubr.msk.bf16.mxu0 %vm9713_vm0, %v13577_v61  ;;  %9217 = vmatprep.mubr.msk.bf16.mxu1 %vm9713_vm0, %v13577_v61 }
 0x46f   : > { %v4966_v13 = vpop.f32.mrb[124].mxu1 }
 0x470   : > { %v5437_v8 = vpop.f32.mrb[124].mxu0  ;;  %v5175_v55 = vadd.f32 %v4966_v13, %v13905_v48  ;;  %v8971_v39 = vpop.f32.mrb[125].mxu1 }
 0x471   : > { %v12849_v57 = vadd.f32 %v5437_v8, %v5173_v36  ;;  %v9091_v51 = vpop.f32.mrb[125].mxu0  ;;  %v4969_v17 = vpop.f32.mrb[126].mxu1  ;;  %v13908_v8 = vld [vmem:[#allocation8_spill] sm:$0xff] }
 0x472   : > { %v5440_v5 = vpop.f32.mrb[126].mxu0  ;;  %v5176_v20 = vadd.f32 %v4969_v17, %v13906_v29  ;;  %v8972_v28 = vpop.f32.mrb[127].mxu1 }
 0x473   : > { %v12854_v34 = vadd.f32 %v5440_v5, %v5174_v54  ;;  %v9092_v24 = vpop.f32.mrb[127].mxu0  ;;  %v13910_v28 = vld [vmem:[#allocation55_spill] sm:$0xff] }
 0x474   : > { %v13909_v24 = vld [vmem:[#allocation9_spill] sm:$0xff] }
 0x475   : > { %9218 = vmatmul.mubr.bf16.gmra.mrb[232].mxu1 %v13907_v52 }
 0x476   : > { %9221 = vmatprep.mubr.msk.bf16.mxu1 %vm9713_vm0, %v13577_v61 }
 0x477   : > { %v4974_v42 = vpop.f32.mrb[128].mxu1 }
 0x478   : > { %v5445_v35 = vpop.f32.mrb[128].mxu0  ;;  %v5177_v51 = vadd.f32 %v4974_v42, %v13908_v8  ;;  %v8975_v21 = vpop.f32.mrb[129].mxu1 }
 0x479   : > { %v12858_v7 = vadd.f32 %v5445_v35, %v5175_v55  ;;  %v9095_v36 = vpop.f32.mrb[129].mxu0  ;;  %v4977_v5 = vpop.f32.mrb[130].mxu1  ;;  %v9587_v55 = vld [vmem:[%s13394_s6 + $0x28] sm:$0xff]  }
 0x47a   : > { %v5448_v44 = vpop.f32.mrb[130].mxu0  ;;  %v5178_v13 = vadd.f32 %v4977_v5, %v13909_v24  ;;  %v8976_v48 = vpop.f32.mrb[131].mxu1  ;;  %9332 = vmatpush3.bf16.msra.mxu0 %v9587_v55 }
 0x47b   : > { %v12863_v53 = vadd.f32 %v5448_v44, %v5176_v20  ;;  %v9096_v54 = vpop.f32.mrb[131].mxu0  ;;  %9333 = vmatprep.subr.bf16.mxu0 %v13577_v61  ;;  %v13911_v44 = vld [vmem:[#allocation37_spill] sm:$0xff] }
 0x47d   : > { %9222 = vmatmul.mubr.bf16.gmra.mrb[236].mxu1 %v13910_v28 }
 0x47e   : > { %9225 = vmatprep.mubr.msk.bf16.mxu1 %vm9713_vm0, %v13577_v61 }
 0x47f   : > { %v4982_v52 = vpop.f32.mrb[132].mxu1 }
 0x480   : > { %v5453_v39 = vpop.f32.mrb[132].mxu0  ;;  %v5179_v54 = vadd.f32 %v4982_v52, %v13911_v44  ;;  %v8979_v42 = vpop.f32.mrb[133].mxu1 }
 0x481   : > { %v12870_v17 = vadd.f32 %v5453_v39, %v5177_v51  ;;  %v9099_v29 = vpop.f32.mrb[133].mxu0  ;;  %v4985_v8 = vpop.f32.mrb[134].mxu1  ;;  %v13912_v51 = vld [vmem:[#allocation85_spill] sm:$0xff]  ;;  %v13914_v39 = vld [vmem:[#allocation56_spill] sm:$0xff] }
 0x482   : > { %v5456_v20 = vpop.f32.mrb[134].mxu0  ;;  %v5180_v21 = vadd.f32 %v4985_v8, %v13912_v51  ;;  %v8980_v5 = vpop.f32.mrb[135].mxu1  ;;  %v13917_v8 = vld [vmem:[#allocation10_spill] sm:$0xff] }
 0x483   : > { %v12876_v35 = vadd.f32 %v5456_v20, %v5178_v13  ;;  %v9100_v36 = vpop.f32.mrb[135].mxu0 }
 0x484   : > { %v13916_v36 = vld [vmem:[#allocation18_spill] sm:$0xff] }
 0x485   : > { %9226 = vmatmul.mubr.bf16.gmra.mrb[240].mxu1 %v13914_v39  ;;  %v13919_v39 = vld [vmem:[#allocation57_spill] sm:$0xff] }
 0x486   : > { %9229 = vmatprep.mubr.msk.bf16.mxu1 %vm9713_vm0, %v13577_v61 }
 0x487   : > { %v4990_v20 = vpop.f32.mrb[136].mxu1 }
 0x488   : > { %v5461_v24 = vpop.f32.mrb[136].mxu0  ;;  %v5181_v52 = vadd.f32 %v4990_v20, %v13916_v36  ;;  %v8983_v44 = vpop.f32.mrb[137].mxu1  ;;  %v13921_v20 = vld [vmem:[#allocation38_spill] sm:$0xff] }
 0x489   : > { %v12880_v48 = vadd.f32 %v5461_v24, %v5179_v54  ;;  %v9103_v55 = vpop.f32.mrb[137].mxu0  ;;  %v4993_v42 = vpop.f32.mrb[138].mxu1 }
 0x48a   : > { %v5464_v29 = vpop.f32.mrb[138].mxu0  ;;  %v5182_v51 = vadd.f32 %v4993_v42, %v13917_v8  ;;  %v8984_v5 = vpop.f32.mrb[139].mxu1  ;;  %v13922_v42 = vld [vmem:[#allocation14_spill] sm:$0xff] }
 0x48b   : > { %13913 = vst [vmem:[#allocation12_spill] sm:$0xff] %v12880_v48  ;;  %v12885_v13 = vadd.f32 %v5464_v29, %v5180_v21  ;;  %v9104_v28 = vpop.f32.mrb[139].mxu0 }
 0x48d   : > { %13915 = vst [vmem:[#allocation34_spill] sm:$0xff] %v12885_v13  ;;  %9230 = vmatmul.mubr.bf16.gmra.mrb[244].mxu1 %v13919_v39  ;;  %v13924_v39 = vld [vmem:[#allocation58_spill] sm:$0xff] }
 0x48e   : > { %9233 = vmatprep.mubr.msk.bf16.mxu1 %vm9713_vm0, %v13577_v61 }
 0x48f   : > { %v4998_v28 = vpop.f32.mrb[140].mxu1 }
 0x490   : > { %v5469_v54 = vpop.f32.mrb[140].mxu0  ;;  %v5183_v36 = vadd.f32 %v4998_v28, %v13921_v20  ;;  %v8987_v44 = vpop.f32.mrb[141].mxu1  ;;  %v13925_v20 = vld [vmem:[#allocation23_spill] sm:$0xff] }
 0x491   : > { %v12889_v24 = vadd.f32 %v5469_v54, %v5181_v52  ;;  %v9107_v55 = vpop.f32.mrb[141].mxu0  ;;  %v5001_v13 = vpop.f32.mrb[142].mxu1 }
 0x492   : > { %v5472_v48 = vpop.f32.mrb[142].mxu0  ;;  %v5184_v8 = vadd.f32 %v5001_v13, %v13922_v42  ;;  %v8988_v5 = vpop.f32.mrb[143].mxu1 }
 0x493   : > { %13918 = vst [vmem:[#allocation19_spill] sm:$0xff] %v12889_v24  ;;  %v12894_v21 = vadd.f32 %v5472_v48, %v5182_v51  ;;  %v9108_v29 = vpop.f32.mrb[143].mxu0  ;;  %v9588_v48 = vld [vmem:[%s13394_s6 + $0x30] sm:$0xff]   ;;  %v13926_v5 = vld [vmem:[#allocation11_spill] sm:$0xff] }
 0x494   : > { %9334 = vmatpush3.bf16.msra.mxu0 %v9588_v48  ;;  %v13927_v24 = vld [vmem:[#allocation59_spill] sm:$0xff] }
 0x495   : > { %13920 = vst [vmem:[#allocation20_spill] sm:$0xff] %v12894_v21  ;;  %9234 = vmatmul.mubr.bf16.gmra.mrb[248].mxu1 %v13924_v39  ;;  %9335 = vmatprep.subr.bf16.mxu0 %v13577_v61 }
 0x496   : > { %9237 = vmatprep.mubr.msk.bf16.mxu1 %vm9713_vm0, %v13577_v61 }
 0x497   : > { %v5006_v13 = vpop.f32.mrb[144].mxu1 }
 0x498   : > { %v5477_v52 = vpop.f32.mrb[144].mxu0  ;;  %v8991_v44 = vpop.f32.mrb[145].mxu1 }
 0x499   : > { %v12898_v54 = vadd.f32 %v5477_v52, %v5183_v36  ;;  %v9111_v55 = vpop.f32.mrb[145].mxu0  ;;  %v5185_v36 = vadd.f32 %v5006_v13, %v13925_v20  ;;  %v5009_v42 = vpop.f32.mrb[146].mxu1 }
 0x49a   : > { %v5480_v51 = vpop.f32.mrb[146].mxu0  ;;  %v5186_v52 = vadd.f32 %v5009_v42, %v13926_v5  ;;  %v8992_v55 = vpop.f32.mrb[147].mxu1 }
 0x49b   : > { %13923 = vst [vmem:[#allocation35_spill] sm:$0xff] %v12898_v54  ;;  %v12906_v29 = vadd.f32 %v5480_v51, %v5184_v8  ;;  %v9112_v28 = vpop.f32.mrb[147].mxu0 }
 0x49d   : > { %9238 = vmatmul.mubr.bf16.gmra.mrb[252].mxu1 %v13927_v24  ;;  %v13928_v24 = vld [vmem:[#allocation60_spill] sm:$0xff] }
 0x49e   : > { %9241 = vmatprep.mubr.msk.bf16.mxu1 %vm9713_vm0, %v13577_v61 }
 0x49f   : > { %v5014_v28 = vpop.f32.mrb[148].mxu1 }
 0x4a0   : > { %v5485_v39 = vpop.f32.mrb[148].mxu0  ;;  %v5187_v13 = vadd.f32 %v5014_v28, %v12613_v62  ;;  %v8995_v20 = vpop.f32.mrb[149].mxu1 }
 0x4a1   : > { %v12911_v54 = vadd.f32 %v5485_v39, %v5185_v36  ;;  %v9115_v21 = vpop.f32.mrb[149].mxu0  ;;  %v5017_v44 = vpop.f32.mrb[150].mxu1 }
 0x4a2   : > { %v5488_v8 = vpop.f32.mrb[150].mxu0  ;;  %v5188_v42 = vadd.f32 %v5017_v44, %v12619_v23  ;;  %v8996_v5 = vpop.f32.mrb[151].mxu1 }
 0x4a3   : > { %v12916_v48 = vadd.f32 %v5488_v8, %v5186_v52  ;;  %v9116_v51 = vpop.f32.mrb[151].mxu0 }
 0x4a5   : > { %9242 = vmatmul.mubr.bf16.gmra.mrb[0].mxu1 %v13928_v24 }
 0x4a6   : > { %9245 = vmatprep.mubr.msk.bf16.mxu1 %vm9713_vm0, %v13577_v61 }
 0x4a7   : > { %v5022_v51 = vpop.f32.mrb[152].mxu1 }
 0x4a8   : > { %v5493_v36 = vpop.f32.mrb[152].mxu0  ;;  %v5189_v62 = vadd.f32 %v5022_v51, %v12637_v47  ;;  %v8999_v28 = vpop.f32.mrb[153].mxu1 }
 0x4a9   : > { %v12920_v55 = vadd.f32 %v5493_v36, %v5187_v13  ;;  %v9119_v21 = vpop.f32.mrb[153].mxu0  ;;  %v5025_v20 = vpop.f32.mrb[154].mxu1 }
 0x4aa   : > { %v5496_v39 = vpop.f32.mrb[154].mxu0  ;;  %v5190_v23 = vadd.f32 %v5025_v20, %v12646_v1  ;;  %v9000_v44 = vpop.f32.mrb[155].mxu1  ;;  %v13929_v21 = vld [vmem:[#allocation61_spill] sm:$0xff]  ;;  %v9589_v1 = vld [vmem:[%s13394_s6 + $0x38] sm:$0xff]  }
 0x4ab   : > { %v12925_v52 = vadd.f32 %v5496_v39, %v5188_v42  ;;  %v9120_v8 = vpop.f32.mrb[155].mxu0  ;;  %9336 = vmatpush3.bf16.msra.mxu0 %v9589_v1 }
 0x4ad   : > { %9246 = vmatmul.mubr.bf16.gmra.mrb[4].mxu1 %v13929_v21 }
 0x4ae   : > { %9249 = vmatprep.mubr.msk.bf16.mxu1 %vm9713_vm0, %v13577_v61 }
 0x4af   : > { %v5030_v8 = vpop.f32.mrb[156].mxu1 }
 0x4b0   : > { %v5501_v13 = vpop.f32.mrb[156].mxu0  ;;  %v5191_v47 = vadd.f32 %v5030_v8, %v12665_v58  ;;  %v9003_v51 = vpop.f32.mrb[157].mxu1 }
 0x4b1   : > { %v12929_v5 = vadd.f32 %v5501_v13, %v5189_v62  ;;  %v9123_v36 = vpop.f32.mrb[157].mxu0  ;;  %v5033_v62 = vpop.f32.mrb[158].mxu1 }
 0x4b2   : > { %v5504_v24 = vpop.f32.mrb[158].mxu0  ;;  %v5192_v28 = vadd.f32 %v5033_v62, %v12671_v10  ;;  %v9004_v20 = vpop.f32.mrb[159].mxu1 }
 0x4b3   : > { %v12934_v42 = vadd.f32 %v5504_v24, %v5190_v23  ;;  %v9124_v39 = vpop.f32.mrb[159].mxu0  ;;  %v13930_v23 = vld [vmem:[#allocation62_spill] sm:$0xff] }
 0x4b5   : > { %9250 = vmatmul.mubr.bf16.gmra.mrb[8].mxu1 %v13930_v23 }
 0x4b6   : > { %9253 = vmatprep.mubr.msk.bf16.mxu1 %vm9713_vm0, %v13577_v61 }
 0x4b7   : > { %v5038_v39 = vpop.f32.mrb[160].mxu1 }
 0x4b8   : > { %v5509_v44 = vpop.f32.mrb[160].mxu0  ;;  %v5193_v8 = vadd.f32 %v5038_v39, %v12689_v12  ;;  %v9007_v51 = vpop.f32.mrb[161].mxu1 }
 0x4b9   : > { %v12941_v13 = vadd.f32 %v5509_v44, %v5191_v47  ;;  %v9127_v36 = vpop.f32.mrb[161].mxu0  ;;  %v5041_v10 = vpop.f32.mrb[162].mxu1 }
 0x4ba   : > { %v5512_v21 = vpop.f32.mrb[162].mxu0  ;;  %v5194_v1 = vadd.f32 %v5041_v10, %v12695_v33  ;;  %v9008_v62 = vpop.f32.mrb[163].mxu1  ;;  %v13931_v36 = vld [vmem:[#allocation63_spill] sm:$0xff] }
 0x4bb   : > { %v12946_v58 = vadd.f32 %v5512_v21, %v5192_v28  ;;  %v9128_v24 = vpop.f32.mrb[163].mxu0 }
 0x4bd   : > { %9254 = vmatmul.mubr.bf16.gmra.mrb[12].mxu1 %v13931_v36 }
 0x4be   : > { %9257 = vmatprep.mubr.msk.bf16.mxu1 %vm9713_vm0, %v13577_v61 }
 0x4bf   : > { %v5046_v24 = vpop.f32.mrb[164].mxu1 }
 0x4c0   : > { %v5517_v47 = vpop.f32.mrb[164].mxu0  ;;  %v5195_v12 = vadd.f32 %v5046_v24, %v12713_v16  ;;  %v9011_v39 = vpop.f32.mrb[165].mxu1 }
 0x4c1   : > { %v12950_v20 = vadd.f32 %v5517_v47, %v5193_v8  ;;  %v9131_v44 = vpop.f32.mrb[165].mxu0  ;;  %v5049_v51 = vpop.f32.mrb[166].mxu1 }
 0x4c2   : > { %v5520_v23 = vpop.f32.mrb[166].mxu0  ;;  %v5196_v33 = vadd.f32 %v5049_v51, %v12719_v59  ;;  %v9012_v10 = vpop.f32.mrb[167].mxu1  ;;  %v13932_v44 = vld [vmem:[#allocation64_spill] sm:$0xff] }
 0x4c3   : > { %v12955_v28 = vadd.f32 %v5520_v23, %v5194_v1  ;;  %v9132_v21 = vpop.f32.mrb[167].mxu0 }
 0x4c5   : > { %9258 = vmatmul.mubr.bf16.gmra.mrb[16].mxu1 %v13932_v44 }
 0x4c6   : > { %9261 = vmatprep.mubr.msk.bf16.mxu1 %vm9713_vm0, %v13577_v61 }
 0x4c8   : > { %v5525_v8 = vpop.f32.mrb[168].mxu0  ;;  %v5054_v21 = vpop.f32.mrb[168].mxu1 }
 0x4c9   : > { %v12959_v62 = vadd.f32 %v5525_v8, %v5195_v12  ;;  %v9135_v47 = vpop.f32.mrb[169].mxu0  ;;  %v5197_v16 = vadd.f32 %v5054_v21, %v12740_v46  ;;  %v9015_v24 = vpop.f32.mrb[169].mxu1 }
 0x4ca   : > { %v5528_v36 = vpop.f32.mrb[170].mxu0  ;;  %v5057_v39 = vpop.f32.mrb[170].mxu1  ;;  %v13933_v47 = vld [vmem:[#allocation65_spill] sm:$0xff] }
 0x4cb   : > { %v12964_v1 = vadd.f32 %v5528_v36, %v5196_v33  ;;  %v9136_v23 = vpop.f32.mrb[171].mxu0  ;;  %v5198_v59 = vadd.f32 %v5057_v39, %v12747_v9  ;;  %v9016_v51 = vpop.f32.mrb[171].mxu1 }
 0x4cd   : > { %9262 = vmatmul.mubr.bf16.gmra.mrb[20].mxu1 %v13933_v47 }
 0x4ce   : > { %9265 = vmatprep.mubr.msk.bf16.mxu1 %vm9713_vm0, %v13577_v61 }
 0x4d0   : > { %v5533_v12 = vpop.f32.mrb[172].mxu0  ;;  %v5062_v23 = vpop.f32.mrb[172].mxu1 }
 0x4d1   : > { %v12968_v10 = vadd.f32 %v5533_v12, %v5197_v16  ;;  %v9139_v8 = vpop.f32.mrb[173].mxu0  ;;  %v5199_v46 = vadd.f32 %v5062_v23, %v12765_v15  ;;  %v9019_v21 = vpop.f32.mrb[173].mxu1 }
 0x4d2   : > { %v5536_v44 = vpop.f32.mrb[174].mxu0  ;;  %v5065_v24 = vpop.f32.mrb[174].mxu1  ;;  %v13934_v8 = vld [vmem:[#allocation66_spill] sm:$0xff] }
 0x4d3   : > { %v12973_v33 = vadd.f32 %v5536_v44, %v5198_v59  ;;  %v9140_v36 = vpop.f32.mrb[175].mxu0  ;;  %v5200_v9 = vadd.f32 %v5065_v24, %v12771_v38  ;;  %v9020_v39 = vpop.f32.mrb[175].mxu1 }
 0x4d5   : > { %9266 = vmatmul.mubr.bf16.gmra.mrb[24].mxu1 %v13934_v8 }
 0x4d6   : > { %9269 = vmatprep.mubr.msk.bf16.mxu1 %vm9713_vm0, %v13577_v61 }
 0x4d8   : > { %v5541_v16 = vpop.f32.mrb[176].mxu0  ;;  %v5070_v36 = vpop.f32.mrb[176].mxu1 }
 0x4d9   : > { %v12977_v51 = vadd.f32 %v5541_v16, %v5199_v46  ;;  %v9143_v12 = vpop.f32.mrb[177].mxu0  ;;  %v5201_v15 = vadd.f32 %v5070_v36, %v12793_v31  ;;  %v9023_v23 = vpop.f32.mrb[177].mxu1 }
 0x4da   : > { %v5544_v47 = vpop.f32.mrb[178].mxu0  ;;  %v5073_v21 = vpop.f32.mrb[178].mxu1  ;;  %v13935_v12 = vld [vmem:[#allocation67_spill] sm:$0xff] }
 0x4db   : > { %v12982_v59 = vadd.f32 %v5544_v47, %v5200_v9  ;;  %v9144_v44 = vpop.f32.mrb[179].mxu0  ;;  %v5202_v38 = vadd.f32 %v5073_v21, %v12799_v50  ;;  %v9024_v24 = vpop.f32.mrb[179].mxu1 }
 0x4dd   : > { %9270 = vmatmul.mubr.bf16.gmra.mrb[28].mxu1 %v13935_v12 }
 0x4de   : > { %9273 = vmatprep.mubr.msk.bf16.mxu1 %vm9713_vm0, %v13577_v61 }
 0x4e0   : > { %v5549_v46 = vpop.f32.mrb[180].mxu0  ;;  %v5078_v44 = vpop.f32.mrb[180].mxu1 }
 0x4e1   : > { %v12986_v39 = vadd.f32 %v5549_v46, %v5201_v15  ;;  %v9147_v16 = vpop.f32.mrb[181].mxu0  ;;  %v5203_v31 = vadd.f32 %v5078_v44, %v12816_v4  ;;  %v9027_v36 = vpop.f32.mrb[181].mxu1 }
 0x4e2   : > { %v5552_v8 = vpop.f32.mrb[182].mxu0  ;;  %v5081_v23 = vpop.f32.mrb[182].mxu1  ;;  %v13936_v16 = vld [vmem:[#allocation68_spill] sm:$0xff] }
 0x4e3   : > { %v12991_v9 = vadd.f32 %v5552_v8, %v5202_v38  ;;  %v9148_v47 = vpop.f32.mrb[183].mxu0  ;;  %v5204_v50 = vadd.f32 %v5081_v23, %v12822_v2  ;;  %v9028_v21 = vpop.f32.mrb[183].mxu1 }
 0x4e5   : > { %9274 = vmatmul.mubr.bf16.gmra.mrb[32].mxu1 %v13936_v16 }
 0x4e6   : > { %9277 = vmatprep.mubr.msk.bf16.mxu1 %vm9713_vm0, %v13577_v61 }
 0x4e8   : > { %v5557_v15 = vpop.f32.mrb[184].mxu0  ;;  %v5086_v47 = vpop.f32.mrb[184].mxu1 }
 0x4e9   : > { %v12995_v24 = vadd.f32 %v5557_v15, %v5203_v31  ;;  %v9151_v46 = vpop.f32.mrb[185].mxu0  ;;  %v5205_v4 = vadd.f32 %v5086_v47, %v12839_v45  ;;  %v9031_v44 = vpop.f32.mrb[185].mxu1 }
 0x4ea   : > { %v5560_v12 = vpop.f32.mrb[186].mxu0  ;;  %v5089_v36 = vpop.f32.mrb[186].mxu1  ;;  %v13937_v46 = vld [vmem:[#allocation69_spill] sm:$0xff] }
 0x4eb   : > { %v13000_v38 = vadd.f32 %v5560_v12, %v5204_v50  ;;  %v9152_v8 = vpop.f32.mrb[187].mxu0  ;;  %v5206_v2 = vadd.f32 %v5089_v36, %v12844_v3  ;;  %v9032_v23 = vpop.f32.mrb[187].mxu1 }
 0x4ed   : > { %9278 = vmatmul.mubr.bf16.gmra.mrb[36].mxu1 %v13937_v46 }
 0x4ee   : > { %9281 = vmatprep.mubr.msk.bf16.mxu1 %vm9713_vm0, %v13577_v61 }
 0x4f0   : > { %v5565_v31 = vpop.f32.mrb[188].mxu0  ;;  %v5094_v8 = vpop.f32.mrb[188].mxu1 }
 0x4f1   : > { %v13004_v21 = vadd.f32 %v5565_v31, %v5205_v4  ;;  %v9155_v15 = vpop.f32.mrb[189].mxu0  ;;  %v5207_v45 = vadd.f32 %v5094_v8, %v12605_v0  ;;  %v9035_v47 = vpop.f32.mrb[189].mxu1 }
 0x4f2   : > { %v5568_v16 = vpop.f32.mrb[190].mxu0  ;;  %v5097_v44 = vpop.f32.mrb[190].mxu1  ;;  %v13938_v15 = vld [vmem:[#allocation70_spill] sm:$0xff] }
 0x4f3   : > { %v13009_v50 = vadd.f32 %v5568_v16, %v5206_v2  ;;  %v9156_v12 = vpop.f32.mrb[191].mxu0  ;;  %v5208_v3 = vadd.f32 %v5097_v44, %v12609_v37  ;;  %v9036_v36 = vpop.f32.mrb[191].mxu1 }
 0x4f5   : > { %9282 = vmatmul.mubr.bf16.gmra.mrb[40].mxu1 %v13938_v15 }
 0x4f6   : > { %9285 = vmatprep.mubr.msk.bf16.mxu1 %vm9713_vm0, %v13577_v61 }
 0x4f8   : > { %v5573_v4 = vpop.f32.mrb[192].mxu0  ;;  %v5102_v12 = vpop.f32.mrb[192].mxu1 }
 0x4f9   : > { %v13013_v23 = vadd.f32 %v5573_v4, %v5207_v45  ;;  %v9159_v31 = vpop.f32.mrb[193].mxu0  ;;  %v5209_v0 = vadd.f32 %v5102_v12, %v12629_v40  ;;  %v9039_v8 = vpop.f32.mrb[193].mxu1 }
 0x4fa   : > { %v5576_v46 = vpop.f32.mrb[194].mxu0  ;;  %v5105_v47 = vpop.f32.mrb[194].mxu1  ;;  %v13939_v31 = vld [vmem:[#allocation71_spill] sm:$0xff] }
 0x4fb   : > { %v13018_v2 = vadd.f32 %v5576_v46, %v5208_v3  ;;  %v9160_v16 = vpop.f32.mrb[195].mxu0  ;;  %v5210_v37 = vadd.f32 %v5105_v47, %v12633_v41  ;;  %v9040_v44 = vpop.f32.mrb[195].mxu1 }
 0x4fd   : > { %9286 = vmatmul.mubr.bf16.gmra.mrb[44].mxu1 %v13939_v31 }
 0x4fe   : > { %9289 = vmatprep.mubr.msk.bf16.mxu1 %vm9713_vm0, %v13577_v61 }
 0x500   : > { %v5581_v45 = vpop.f32.mrb[196].mxu0  ;;  %v5110_v16 = vpop.f32.mrb[196].mxu1 }
 0x501   : > { %v13022_v36 = vadd.f32 %v5581_v45, %v5209_v0  ;;  %v9163_v4 = vpop.f32.mrb[197].mxu0  ;;  %v5211_v40 = vadd.f32 %v5110_v16, %v12657_v6  ;;  %v9043_v12 = vpop.f32.mrb[197].mxu1 }
 0x502   : > { %v5584_v15 = vpop.f32.mrb[198].mxu0  ;;  %v5113_v8 = vpop.f32.mrb[198].mxu1  ;;  %v13940_v4 = vld [vmem:[#allocation72_spill] sm:$0xff] }
 0x503   : > { %v13027_v3 = vadd.f32 %v5584_v15, %v5210_v37  ;;  %v9164_v46 = vpop.f32.mrb[199].mxu0  ;;  %v5212_v41 = vadd.f32 %v5113_v8, %v12661_v11  ;;  %v9044_v47 = vpop.f32.mrb[199].mxu1 }
 0x505   : > { %9290 = vmatmul.mubr.bf16.gmra.mrb[48].mxu1 %v13940_v4 }
 0x506   : > { %9293 = vmatprep.mubr.msk.bf16.mxu1 %vm9713_vm0, %v13577_v61 }
 0x508   : > { %v5589_v0 = vpop.f32.mrb[200].mxu0  ;;  %v5118_v46 = vpop.f32.mrb[200].mxu1 }
 0x509   : > { %v13031_v44 = vadd.f32 %v5589_v0, %v5211_v40  ;;  %v9167_v45 = vpop.f32.mrb[201].mxu0  ;;  %v5213_v6 = vadd.f32 %v5118_v46, %v12681_v14  ;;  %v9047_v16 = vpop.f32.mrb[201].mxu1 }
 0x50a   : > { %v5592_v31 = vpop.f32.mrb[202].mxu0  ;;  %v5121_v12 = vpop.f32.mrb[202].mxu1  ;;  %v13941_v45 = vld [vmem:[#allocation73_spill] sm:$0xff] }
 0x50b   : > { %v13036_v37 = vadd.f32 %v5592_v31, %v5212_v41  ;;  %v9168_v15 = vpop.f32.mrb[203].mxu0  ;;  %v5214_v11 = vadd.f32 %v5121_v12, %v12685_v56  ;;  %v9048_v8 = vpop.f32.mrb[203].mxu1 }
 0x50d   : > { %9294 = vmatmul.mubr.bf16.gmra.mrb[52].mxu1 %v13941_v45 }
 0x50e   : > { %9297 = vmatprep.mubr.msk.bf16.mxu1 %vm9713_vm0, %v13577_v61 }
 0x510   : > { %v5597_v40 = vpop.f32.mrb[204].mxu0  ;;  %v5126_v15 = vpop.f32.mrb[204].mxu1 }
 0x511   : > { %v13040_v47 = vadd.f32 %v5597_v40, %v5213_v6  ;;  %v9171_v0 = vpop.f32.mrb[205].mxu0  ;;  %v5215_v14 = vadd.f32 %v5126_v15, %v12705_v19  ;;  %v9051_v46 = vpop.f32.mrb[205].mxu1 }
 0x512   : > { %v5600_v4 = vpop.f32.mrb[206].mxu0  ;;  %v5129_v16 = vpop.f32.mrb[206].mxu1  ;;  %v13942_v0 = vld [vmem:[#allocation74_spill] sm:$0xff] }
 0x513   : > { %v13045_v41 = vadd.f32 %v5600_v4, %v5214_v11  ;;  %v9172_v31 = vpop.f32.mrb[207].mxu0  ;;  %v5216_v56 = vadd.f32 %v5129_v16, %v12709_v18  ;;  %v9052_v12 = vpop.f32.mrb[207].mxu1 }
 0x515   : > { %9298 = vmatmul.mubr.bf16.gmra.mrb[56].mxu1 %v13942_v0 }
 0x516   : > { %9301 = vmatprep.mubr.msk.bf16.mxu1 %vm9713_vm0, %v13577_v61 }
 0x518   : > { %v5605_v6 = vpop.f32.mrb[208].mxu0  ;;  %v5134_v31 = vpop.f32.mrb[208].mxu1 }
 0x519   : > { %v13049_v8 = vadd.f32 %v5605_v6, %v5215_v14  ;;  %v9175_v40 = vpop.f32.mrb[209].mxu0  ;;  %v5217_v19 = vadd.f32 %v5134_v31, %v12729_v49  ;;  %v9055_v15 = vpop.f32.mrb[209].mxu1 }
 0x51a   : > { %v5608_v45 = vpop.f32.mrb[210].mxu0  ;;  %v5137_v46 = vpop.f32.mrb[210].mxu1  ;;  %v13943_v40 = vld [vmem:[#allocation75_spill] sm:$0xff] }
 0x51b   : > { %v13054_v11 = vadd.f32 %v5608_v45, %v5216_v56  ;;  %v9176_v4 = vpop.f32.mrb[211].mxu0  ;;  %v5218_v18 = vadd.f32 %v5137_v46, %v12736_v25  ;;  %v9056_v16 = vpop.f32.mrb[211].mxu1 }
 0x51d   : > { %9302 = vmatmul.mubr.bf16.gmra.mrb[60].mxu1 %v13943_v40 }
 0x51e   : > { %9305 = vmatprep.mubr.msk.bf16.mxu1 %vm9713_vm0, %v13577_v61 }
 0x520   : > { %v5613_v14 = vpop.f32.mrb[212].mxu0  ;;  %v5142_v4 = vpop.f32.mrb[212].mxu1 }
 0x521   : > { %v13058_v12 = vadd.f32 %v5613_v14, %v5217_v19  ;;  %v9179_v6 = vpop.f32.mrb[213].mxu0  ;;  %v5219_v49 = vadd.f32 %v5142_v4, %v12757_v60  ;;  %v9059_v31 = vpop.f32.mrb[213].mxu1 }
 0x522   : > { %v5616_v0 = vpop.f32.mrb[214].mxu0  ;;  %v5145_v15 = vpop.f32.mrb[214].mxu1  ;;  %v13946_v6 = vld [vmem:[#allocation76_spill] sm:$0xff] }
 0x523   : > { %v13063_v56 = vadd.f32 %v5616_v0, %v5218_v18  ;;  %v9180_v45 = vpop.f32.mrb[215].mxu0  ;;  %v5220_v25 = vadd.f32 %v5145_v15, %v12761_v22  ;;  %v9060_v46 = vpop.f32.mrb[215].mxu1 }
 0x525   : > { %13944 = vst [vmem:[#allocation21_spill] sm:$0xff] %v13063_v56  ;;  %9306 = vmatmul.mubr.bf16.gmra.mrb[64].mxu1 %v13946_v6  ;;  %v13949_v6 = vld [vmem:[#allocation78_spill] sm:$0xff]  ;;  %v13950_v56 = vld [vmem:[#allocation79_spill] sm:$0xff] }
 0x526   : > { %9309 = vmatprep.mubr.msk.bf16.mxu1 %vm9713_vm0, %v13577_v61 }
 0x528   : > { %v5621_v19 = vpop.f32.mrb[216].mxu0  ;;  %v5150_v45 = vpop.f32.mrb[216].mxu1 }
 0x529   : > { %v13067_v16 = vadd.f32 %v5621_v19, %v5219_v49  ;;  %v9183_v14 = vpop.f32.mrb[217].mxu0  ;;  %v5221_v60 = vadd.f32 %v5150_v45, %v12783_v30  ;;  %v9063_v4 = vpop.f32.mrb[217].mxu1  ;;  %v5706_v49 = vld [vmem:[#allocation2 + $0xf0] sm:$0x1f] }
 0x52a   : > { %v5624_v40 = vpop.f32.mrb[218].mxu0  ;;  %v5153_v31 = vpop.f32.mrb[218].mxu1 }
 0x52b   : > { %13945 = vst [vmem:[#allocation22_spill] sm:$0xff] %v13067_v16  ;;  %v13072_v18 = vadd.f32 %v5624_v40, %v5220_v25  ;;  %v9184_v0 = vpop.f32.mrb[219].mxu0  ;;  %v5222_v22 = vadd.f32 %v5153_v31, %v12789_v43  ;;  %v9064_v15 = vpop.f32.mrb[219].mxu1  ;;  %v5837_v25 = vshrl.u32 %v5706_v49, 16  ;;  %v5840_v40 = vshll.u32 %v5706_v49, 16 }
 0x52d   : > { %13947 = vst [vmem:[#allocation39_spill] sm:$0xff] %v13072_v18  ;;  %9310 = vmatmul.mubr.bf16.gmra.mrb[68].mxu1 %v13949_v6  ;;  %v5839_v15 = vrot.slane %v5837_v25, 4 }
 0x52e   : > { %9313 = vmatprep.mubr.msk.bf16.mxu1 %vm9713_vm0, %v13577_v61 }
 0x530   : > { %v5629_v46 = vpop.f32.mrb[220].mxu0  ;;  %v5158_v45 = vpop.f32.mrb[220].mxu1 }
 0x531   : > { %v13076_v19 = vadd.f32 %v5629_v46, %v5221_v60  ;;  %v9187_v14 = vpop.f32.mrb[221].mxu0  ;;  %v5223_v43 = vadd.f32 %v5158_v45, %v12805_v26  ;;  %v9067_v4 = vpop.f32.mrb[221].mxu1  ;;  %v5842_v60 = vrot.slane %v5840_v40, 5  ;;  %v13951_v45 = vld [vmem:[#allocation77_spill] sm:$0xff] }
 0x532   : > { %v5632_v16 = vpop.f32.mrb[222].mxu0  ;;  %v5161_v31 = vpop.f32.mrb[222].mxu1 }
 0x533   : > { %13948 = vst [vmem:[#allocation30_spill] sm:$0xff] %v13076_v19  ;;  %v13081_v0 = vadd.f32 %v5632_v16, %v5222_v22  ;;  %v9188_v30 = vpop.f32.mrb[223].mxu0  ;;  %v5224_v46 = vadd.f32 %v5161_v31, %v12809_v27  ;;  %v9068_v14 = vpop.f32.mrb[223].mxu1  ;;  %v5843_v16 = vor.u32 %v5842_v60, %v5839_v15 }
 0x535   : > { %9314 = vmatmul.mubr.bf16.gmra.mrb[72].mxu1 %v13950_v56 }
 0x536   : > { %9317 = vmatprep.mubr.msk.bf16.mxu1 %vm9713_vm0, %v13577_v61 }
 0x538   : > { %v5637_v6 = vpop.f32.mrb[224].mxu0  ;;  %v5166_v30 = vpop.f32.mrb[224].mxu1 }
 0x539   : > { %v13085_v19 = vadd.f32 %v5637_v6, %v5223_v43  ;;  %v9191_v18 = vpop.f32.mrb[225].mxu0  ;;  %v5225_v25 = vadd.f32 %v5166_v30, %v12830_v32  ;;  %v9071_v40 = vpop.f32.mrb[225].mxu1  ;;  %v5844_v43 = vsel %vm2397_vm3, %v13951_v45, %v5843_v16  ;;  %v13103_v32 = vld [vmem:[%s13393_s5] ss:$0 sm:$0xff] }
 0x53a   : > { %v5640_v49 = vpop.f32.mrb[226].mxu0  ;;  %v5169_v27 = vpop.f32.mrb[226].mxu1 }
 0x53b   : > { %v13090_v22 = vadd.f32 %v5640_v49, %v5224_v46  ;;  %v9192_v26 = vpop.f32.mrb[227].mxu0  ;;  %v5226_v18 = vadd.f32 %v5169_v27, %v12835_v63  ;;  %v9072_v4 = vpop.f32.mrb[227].mxu1 }
 0x53d   : > { %9318 = vmatmul.mubr.bf16.gmra.mrb[76].mxu1 %v5844_v43 }
 0x540   : > { %v5645_v56 = vpop.f32.mrb[228].mxu0  ;;  %v5954_v6 = vpop.f32.mrb[228].mxu1 }
 0x541   : > { %v13096_v31 = vadd.f32 %v5645_v56, %v5225_v25  ;;  %v9195_v14 = vpop.f32.mrb[229].mxu0  ;;  %v6169_v49 = vadd.f32 %v5954_v6, %v12849_v57  ;;  %v9215_v16 = vpop.f32.mrb[229].mxu1 }
 0x542   : > { %v5648_v15 = vpop.f32.mrb[230].mxu0  ;;  %v5957_v63 = vpop.f32.mrb[230].mxu1 }
 0x543   : > { %v13098_v60 = vadd.f32 %v5648_v15, %v5226_v18  ;;  %v9196_v46 = vpop.f32.mrb[231].mxu0  ;;  %v6230_v26 = vadd.f32 %v13103_v32, %v6169_v49  ;;  %v6170_v30 = vadd.f32 %v5957_v63, %v12854_v34  ;;  %v9216_v25 = vpop.f32.mrb[231].mxu1 }
 0x545   : > { %v6231_v40 = vadd.f32 %v13103_v32, %v6170_v30  ;;  %v6284_v27 = vmax.f32 %v6230_v26, 0.0 }
 0x547   : > { %v6285_v45 = vmax.f32 %v6231_v40, 0.0 }
 0x548   : > { %v5962_v43 = vpop.f32.mrb[232].mxu1 }
 0x549   : > { %v6338_v18 = vpack.c.bf16 %v6285_v45, %v6284_v27  ;;  %v6171_v4 = vadd.f32 %v5962_v43, %v12858_v7  ;;  %v9219_v56 = vpop.f32.mrb[233].mxu1 }
 0x54a   : > { %v5965_v14 = vpop.f32.mrb[234].mxu1  ;;  %v13952_v56 = vld [vmem:[#allocation12_spill] sm:$0xff] }
 0x54b   : > { %v6232_v15 = vadd.f32 %v13103_v32, %v6171_v4  ;;  %v6172_v57 = vadd.f32 %v5965_v14, %v12863_v53  ;;  %v9220_v46 = vpop.f32.mrb[235].mxu1  ;;  %9338 = vmatmul.mubr.bf16.vlgmr.msra.gmra.mrb[232].mxu0 %v6338_v18 }
 0x54c   : > { %9341 = vmatprep.mubr.msk.bf16.mxu0 %vm9713_vm0, %v13577_v61  ;;  %v13953_v46 = vld [vmem:[#allocation34_spill] sm:$0xff] }
 0x54d   : > { %v6233_v34 = vadd.f32 %v13103_v32, %v6172_v57  ;;  %v6286_v6 = vmax.f32 %v6232_v15, 0.0 }
 0x54f   : > { %v6287_v49 = vmax.f32 %v6233_v34, 0.0 }
 0x550   : > { %v5970_v16 = vpop.f32.mrb[236].mxu1 }
 0x551   : > { %v6339_v63 = vpack.c.bf16 %v6287_v49, %v6286_v6  ;;  %v6173_v26 = vadd.f32 %v5970_v16, %v12870_v17  ;;  %v9223_v7 = vpop.f32.mrb[237].mxu1 }
 0x552   : > { %v5973_v30 = vpop.f32.mrb[238].mxu1  ;;  %v13954_v7 = vld [vmem:[#allocation19_spill] sm:$0xff] }
 0x553   : > { %v6234_v25 = vadd.f32 %v13103_v32, %v6173_v26  ;;  %v6174_v40 = vadd.f32 %v5973_v30, %v12876_v35  ;;  %v9224_v53 = vpop.f32.mrb[239].mxu1  ;;  %9342 = vmatmul.mubr.bf16.gmra.mrb[236].mxu0 %v6339_v63 }
 0x554   : > { %9345 = vmatprep.mubr.msk.bf16.mxu0 %vm9713_vm0, %v13577_v61 }
 0x555   : > { %v6235_v27 = vadd.f32 %v13103_v32, %v6174_v40  ;;  %v6288_v45 = vmax.f32 %v6234_v25, 0.0 }
 0x557   : > { %v6289_v43 = vmax.f32 %v6235_v27, 0.0  ;;  %v13955_v27 = vld [vmem:[#allocation20_spill] sm:$0xff] }
 0x558   : > { %v5978_v18 = vpop.f32.mrb[240].mxu1 }
 0x559   : > { %v6340_v4 = vpack.c.bf16 %v6289_v43, %v6288_v45  ;;  %v6175_v14 = vadd.f32 %v5978_v18, %v13952_v56  ;;  %v9227_v17 = vpop.f32.mrb[241].mxu1 }
 0x55a   : > { %v5981_v15 = vpop.f32.mrb[242].mxu1 }
 0x55b   : > { %v6236_v57 = vadd.f32 %v13103_v32, %v6175_v14  ;;  %v6176_v34 = vadd.f32 %v5981_v15, %v13953_v46  ;;  %v9228_v35 = vpop.f32.mrb[243].mxu1  ;;  %9346 = vmatmul.mubr.bf16.gmra.mrb[240].mxu0 %v6340_v4  ;;  %v13956_v15 = vld [vmem:[#allocation35_spill] sm:$0xff] }
 0x55c   : > { %9349 = vmatprep.mubr.msk.bf16.mxu0 %vm9713_vm0, %v13577_v61 }
 0x55d   : > { %v6237_v6 = vadd.f32 %v13103_v32, %v6176_v34  ;;  %v6290_v49 = vmax.f32 %v6236_v57, 0.0 }
 0x55f   : > { %v6291_v16 = vmax.f32 %v6237_v6, 0.0 }
 0x560   : > { %v5986_v63 = vpop.f32.mrb[244].mxu1 }
 0x561   : > { %v6341_v26 = vpack.c.bf16 %v6291_v16, %v6290_v49  ;;  %v6177_v30 = vadd.f32 %v5986_v63, %v13954_v7  ;;  %v9231_v25 = vpop.f32.mrb[245].mxu1 }
 0x562   : > { %v5989_v40 = vpop.f32.mrb[246].mxu1 }
 0x563   : > { %v6238_v53 = vadd.f32 %v13103_v32, %v6177_v30  ;;  %v6178_v45 = vadd.f32 %v5989_v40, %v13955_v27  ;;  %v9232_v43 = vpop.f32.mrb[247].mxu1  ;;  %9350 = vmatmul.mubr.bf16.gmra.mrb[244].mxu0 %v6341_v26 }
 0x564   : > { %9353 = vmatprep.mubr.msk.bf16.mxu0 %vm9713_vm0, %v13577_v61 }
 0x565   : > { %v6239_v18 = vadd.f32 %v13103_v32, %v6178_v45  ;;  %v6292_v4 = vmax.f32 %v6238_v53, 0.0 }
 0x567   : > { %v6293_v56 = vmax.f32 %v6239_v18, 0.0 }
 0x568   : > { %v5994_v14 = vpop.f32.mrb[248].mxu1 }
 0x569   : > { %v6342_v17 = vpack.c.bf16 %v6293_v56, %v6292_v4  ;;  %v6179_v57 = vadd.f32 %v5994_v14, %v13956_v15  ;;  %v9235_v46 = vpop.f32.mrb[249].mxu1 }
 0x56a   : > { %v5997_v34 = vpop.f32.mrb[250].mxu1 }
 0x56b   : > { %v6240_v35 = vadd.f32 %v13103_v32, %v6179_v57  ;;  %v6180_v6 = vadd.f32 %v5997_v34, %v12906_v29  ;;  %v9236_v49 = vpop.f32.mrb[251].mxu1  ;;  %9354 = vmatmul.mubr.bf16.gmra.mrb[248].mxu0 %v6342_v17 }
 0x56c   : > { %9357 = vmatprep.mubr.msk.bf16.mxu0 %vm9713_vm0, %v13577_v61 }
 0x56d   : > { %v6241_v16 = vadd.f32 %v13103_v32, %v6180_v6  ;;  %v6294_v63 = vmax.f32 %v6240_v35, 0.0 }
 0x56f   : > { %v6295_v26 = vmax.f32 %v6241_v16, 0.0 }
 0x570   : > { %v6002_v7 = vpop.f32.mrb[252].mxu1 }
 0x571   : > { %v6343_v30 = vpack.c.bf16 %v6295_v26, %v6294_v63  ;;  %v6181_v25 = vadd.f32 %v6002_v7, %v12911_v54  ;;  %v9239_v40 = vpop.f32.mrb[253].mxu1 }
 0x572   : > { %v6005_v53 = vpop.f32.mrb[254].mxu1 }
 0x573   : > { %v6242_v27 = vadd.f32 %v13103_v32, %v6181_v25  ;;  %v6182_v45 = vadd.f32 %v6005_v53, %v12916_v48  ;;  %v9240_v29 = vpop.f32.mrb[255].mxu1  ;;  %9358 = vmatmul.mubr.bf16.gmra.mrb[252].mxu0 %v6343_v30 }
 0x574   : > { %9361 = vmatprep.mubr.msk.bf16.mxu0 %vm9713_vm0, %v13577_v61 }
 0x575   : > { %v6243_v43 = vadd.f32 %v13103_v32, %v6182_v45  ;;  %v6296_v18 = vmax.f32 %v6242_v27, 0.0 }
 0x577   : > { %v6297_v4 = vmax.f32 %v6243_v43, 0.0 }
 0x578   : > { %v6010_v56 = vpop.f32.mrb[0].mxu1 }
 0x579   : > { %v6344_v14 = vpack.c.bf16 %v6297_v4, %v6296_v18  ;;  %v6183_v17 = vadd.f32 %v6010_v56, %v12920_v55  ;;  %v9243_v54 = vpop.f32.mrb[1].mxu1 }
 0x57a   : > { %v6013_v15 = vpop.f32.mrb[2].mxu1 }
 0x57b   : > { %v6244_v57 = vadd.f32 %v13103_v32, %v6183_v17  ;;  %v6184_v46 = vadd.f32 %v6013_v15, %v12925_v52  ;;  %v9244_v48 = vpop.f32.mrb[3].mxu1  ;;  %9362 = vmatmul.mubr.bf16.gmra.mrb[0].mxu0 %v6344_v14 }
 0x57c   : > { %9365 = vmatprep.mubr.msk.bf16.mxu0 %vm9713_vm0, %v13577_v61 }
 0x57d   : > { %v6245_v34 = vadd.f32 %v13103_v32, %v6184_v46  ;;  %v6298_v35 = vmax.f32 %v6244_v57, 0.0 }
 0x57f   : > { %v6299_v6 = vmax.f32 %v6245_v34, 0.0 }
 0x580   : > { %v6018_v49 = vpop.f32.mrb[4].mxu1 }
 0x581   : > { %v6345_v16 = vpack.c.bf16 %v6299_v6, %v6298_v35  ;;  %v6185_v63 = vadd.f32 %v6018_v49, %v12929_v5  ;;  %v9247_v55 = vpop.f32.mrb[5].mxu1 }
 0x582   : > { %v6021_v26 = vpop.f32.mrb[6].mxu1 }
 0x583   : > { %v6246_v7 = vadd.f32 %v13103_v32, %v6185_v63  ;;  %v6186_v30 = vadd.f32 %v6021_v26, %v12934_v42  ;;  %v9248_v52 = vpop.f32.mrb[7].mxu1  ;;  %9366 = vmatmul.mubr.bf16.gmra.mrb[4].mxu0 %v6345_v16 }
 0x584   : > { %9369 = vmatprep.mubr.msk.bf16.mxu0 %vm9713_vm0, %v13577_v61 }
 0x585   : > { %v6247_v25 = vadd.f32 %v13103_v32, %v6186_v30  ;;  %v6300_v40 = vmax.f32 %v6246_v7, 0.0 }
 0x587   : > { %v6301_v53 = vmax.f32 %v6247_v25, 0.0 }
 0x588   : > { %v6026_v27 = vpop.f32.mrb[8].mxu1 }
 0x589   : > { %v6346_v45 = vpack.c.bf16 %v6301_v53, %v6300_v40  ;;  %v6187_v29 = vadd.f32 %v6026_v27, %v12941_v13  ;;  %v9251_v5 = vpop.f32.mrb[9].mxu1 }
 0x58a   : > { %v6029_v43 = vpop.f32.mrb[10].mxu1 }
 0x58b   : > { %v6248_v18 = vadd.f32 %v13103_v32, %v6187_v29  ;;  %v6188_v4 = vadd.f32 %v6029_v43, %v12946_v58  ;;  %v9252_v42 = vpop.f32.mrb[11].mxu1  ;;  %9370 = vmatmul.mubr.bf16.gmra.mrb[8].mxu0 %v6346_v45 }
 0x58c   : > { %9373 = vmatprep.mubr.msk.bf16.mxu0 %vm9713_vm0, %v13577_v61 }
 0x58d   : > { %v6249_v56 = vadd.f32 %v13103_v32, %v6188_v4  ;;  %v6302_v14 = vmax.f32 %v6248_v18, 0.0 }
 0x58f   : > { %v6303_v17 = vmax.f32 %v6249_v56, 0.0 }
 0x590   : > { %v6034_v54 = vpop.f32.mrb[12].mxu1 }
 0x591   : > { %v6347_v15 = vpack.c.bf16 %v6303_v17, %v6302_v14  ;;  %v6189_v57 = vadd.f32 %v6034_v54, %v12950_v20  ;;  %v9255_v13 = vpop.f32.mrb[13].mxu1 }
 0x592   : > { %v6037_v46 = vpop.f32.mrb[14].mxu1 }
 0x593   : > { %v6250_v48 = vadd.f32 %v13103_v32, %v6189_v57  ;;  %v6190_v34 = vadd.f32 %v6037_v46, %v12955_v28  ;;  %v9256_v58 = vpop.f32.mrb[15].mxu1  ;;  %9374 = vmatmul.mubr.bf16.gmra.mrb[12].mxu0 %v6347_v15 }
 0x594   : > { %9377 = vmatprep.mubr.msk.bf16.mxu0 %vm9713_vm0, %v13577_v61 }
 0x595   : > { %v6251_v35 = vadd.f32 %v13103_v32, %v6190_v34  ;;  %v6304_v6 = vmax.f32 %v6250_v48, 0.0 }
 0x597   : > { %v6305_v49 = vmax.f32 %v6251_v35, 0.0 }
 0x598   : > { %v6042_v16 = vpop.f32.mrb[16].mxu1 }
 0x599   : > { %v6348_v63 = vpack.c.bf16 %v6305_v49, %v6304_v6  ;;  %v6191_v55 = vadd.f32 %v6042_v16, %v12959_v62  ;;  %v9259_v20 = vpop.f32.mrb[17].mxu1 }
 0x59a   : > { %v6045_v26 = vpop.f32.mrb[18].mxu1 }
 0x59b   : > { %v6252_v7 = vadd.f32 %v13103_v32, %v6191_v55  ;;  %v6192_v30 = vadd.f32 %v6045_v26, %v12964_v1  ;;  %v9260_v28 = vpop.f32.mrb[19].mxu1  ;;  %9378 = vmatmul.mubr.bf16.gmra.mrb[16].mxu0 %v6348_v63 }
 0x59c   : > { %9381 = vmatprep.mubr.msk.bf16.mxu0 %vm9713_vm0, %v13577_v61 }
 0x59d   : > { %v6253_v52 = vadd.f32 %v13103_v32, %v6192_v30  ;;  %v6306_v25 = vmax.f32 %v6252_v7, 0.0 }
 0x59f   : > { %v6307_v40 = vmax.f32 %v6253_v52, 0.0 }
 0x5a0   : > { %v6050_v53 = vpop.f32.mrb[20].mxu1 }
 0x5a1   : > { %v6349_v27 = vpack.c.bf16 %v6307_v40, %v6306_v25  ;;  %v6193_v45 = vadd.f32 %v6050_v53, %v12968_v10  ;;  %v9263_v62 = vpop.f32.mrb[21].mxu1 }
 0x5a2   : > { %v6053_v29 = vpop.f32.mrb[22].mxu1 }
 0x5a3   : > { %v6254_v5 = vadd.f32 %v13103_v32, %v6193_v45  ;;  %v6194_v43 = vadd.f32 %v6053_v29, %v12973_v33  ;;  %v9264_v1 = vpop.f32.mrb[23].mxu1  ;;  %9382 = vmatmul.mubr.bf16.gmra.mrb[20].mxu0 %v6349_v27 }
 0x5a4   : > { %9385 = vmatprep.mubr.msk.bf16.mxu0 %vm9713_vm0, %v13577_v61 }
 0x5a5   : > { %v6255_v18 = vadd.f32 %v13103_v32, %v6194_v43  ;;  %v6308_v4 = vmax.f32 %v6254_v5, 0.0 }
 0x5a7   : > { %v6309_v42 = vmax.f32 %v6255_v18, 0.0 }
 0x5a8   : > { %v6058_v56 = vpop.f32.mrb[24].mxu1 }
 0x5a9   : > { %v6350_v14 = vpack.c.bf16 %v6309_v42, %v6308_v4  ;;  %v6195_v17 = vadd.f32 %v6058_v56, %v12977_v51  ;;  %v9267_v10 = vpop.f32.mrb[25].mxu1 }
 0x5aa   : > { %v6061_v54 = vpop.f32.mrb[26].mxu1 }
 0x5ab   : > { %v6256_v15 = vadd.f32 %v13103_v32, %v6195_v17  ;;  %v6196_v57 = vadd.f32 %v6061_v54, %v12982_v59  ;;  %v9268_v33 = vpop.f32.mrb[27].mxu1  ;;  %9386 = vmatmul.mubr.bf16.gmra.mrb[24].mxu0 %v6350_v14 }
 0x5ac   : > { %9389 = vmatprep.mubr.msk.bf16.mxu0 %vm9713_vm0, %v13577_v61 }
 0x5ad   : > { %v6257_v13 = vadd.f32 %v13103_v32, %v6196_v57  ;;  %v6310_v46 = vmax.f32 %v6256_v15, 0.0 }
 0x5af   : > { %v6311_v48 = vmax.f32 %v6257_v13, 0.0 }
 0x5b0   : > { %v6066_v34 = vpop.f32.mrb[28].mxu1 }
 0x5b1   : > { %v6351_v58 = vpack.c.bf16 %v6311_v48, %v6310_v46  ;;  %v6197_v35 = vadd.f32 %v6066_v34, %v12986_v39  ;;  %v9271_v51 = vpop.f32.mrb[29].mxu1 }
 0x5b2   : > { %v6069_v6 = vpop.f32.mrb[30].mxu1 }
 0x5b3   : > { %v6258_v49 = vadd.f32 %v13103_v32, %v6197_v35  ;;  %v6198_v16 = vadd.f32 %v6069_v6, %v12991_v9  ;;  %v9272_v59 = vpop.f32.mrb[31].mxu1  ;;  %9390 = vmatmul.mubr.bf16.gmra.mrb[28].mxu0 %v6351_v58 }
 0x5b4   : > { %9393 = vmatprep.mubr.msk.bf16.mxu0 %vm9713_vm0, %v13577_v61 }
 0x5b5   : > { %v6259_v63 = vadd.f32 %v13103_v32, %v6198_v16  ;;  %v6312_v55 = vmax.f32 %v6258_v49, 0.0 }
 0x5b7   : > { %v6313_v20 = vmax.f32 %v6259_v63, 0.0 }
 0x5b8   : > { %v6074_v26 = vpop.f32.mrb[32].mxu1 }
 0x5b9   : > { %v6352_v7 = vpack.c.bf16 %v6313_v20, %v6312_v55  ;;  %v6199_v30 = vadd.f32 %v6074_v26, %v12995_v24  ;;  %v9275_v39 = vpop.f32.mrb[33].mxu1 }
 0x5ba   : > { %v6077_v28 = vpop.f32.mrb[34].mxu1 }
 0x5bb   : > { %v6260_v52 = vadd.f32 %v13103_v32, %v6199_v30  ;;  %v6200_v25 = vadd.f32 %v6077_v28, %v13000_v38  ;;  %v9276_v9 = vpop.f32.mrb[35].mxu1  ;;  %9394 = vmatmul.mubr.bf16.gmra.mrb[32].mxu0 %v6352_v7 }
 0x5bc   : > { %9397 = vmatprep.mubr.msk.bf16.mxu0 %vm9713_vm0, %v13577_v61 }
 0x5bd   : > { %v6261_v40 = vadd.f32 %v13103_v32, %v6200_v25  ;;  %v6314_v53 = vmax.f32 %v6260_v52, 0.0 }
 0x5bf   : > { %v6315_v27 = vmax.f32 %v6261_v40, 0.0 }
 0x5c0   : > { %v6082_v45 = vpop.f32.mrb[36].mxu1 }
 0x5c1   : > { %v6353_v62 = vpack.c.bf16 %v6315_v27, %v6314_v53  ;;  %v6201_v29 = vadd.f32 %v6082_v45, %v13004_v21  ;;  %v9279_v24 = vpop.f32.mrb[37].mxu1 }
 0x5c2   : > { %v6085_v5 = vpop.f32.mrb[38].mxu1 }
 0x5c3   : > { %v6262_v43 = vadd.f32 %v13103_v32, %v6201_v29  ;;  %v6202_v1 = vadd.f32 %v6085_v5, %v13009_v50  ;;  %v9280_v38 = vpop.f32.mrb[39].mxu1  ;;  %9398 = vmatmul.mubr.bf16.gmra.mrb[36].mxu0 %v6353_v62 }
 0x5c4   : > { %9401 = vmatprep.mubr.msk.bf16.mxu0 %vm9713_vm0, %v13577_v61 }
 0x5c5   : > { %v6263_v18 = vadd.f32 %v13103_v32, %v6202_v1  ;;  %v6316_v4 = vmax.f32 %v6262_v43, 0.0 }
 0x5c7   : > { %v6317_v42 = vmax.f32 %v6263_v18, 0.0 }
 0x5c8   : > { %v6090_v56 = vpop.f32.mrb[40].mxu1 }
 0x5c9   : > { %v6354_v14 = vpack.c.bf16 %v6317_v42, %v6316_v4  ;;  %v6203_v17 = vadd.f32 %v6090_v56, %v13013_v23  ;;  %v9283_v21 = vpop.f32.mrb[41].mxu1 }
 0x5ca   : > { %v6093_v10 = vpop.f32.mrb[42].mxu1 }
 0x5cb   : > { %v6264_v54 = vadd.f32 %v13103_v32, %v6203_v17  ;;  %v6204_v15 = vadd.f32 %v6093_v10, %v13018_v2  ;;  %v9284_v50 = vpop.f32.mrb[43].mxu1  ;;  %9402 = vmatmul.mubr.bf16.gmra.mrb[40].mxu0 %v6354_v14 }
 0x5cc   : > { %9405 = vmatprep.mubr.msk.bf16.mxu0 %vm9713_vm0, %v13577_v61 }
 0x5cd   : > { %v6265_v57 = vadd.f32 %v13103_v32, %v6204_v15  ;;  %v6318_v33 = vmax.f32 %v6264_v54, 0.0  ;;  %v13957_v15 = vld [vmem:[#allocation21_spill] sm:$0xff] }
 0x5cf   : > { %v6319_v13 = vmax.f32 %v6265_v57, 0.0 }
 0x5d0   : > { %v6098_v46 = vpop.f32.mrb[44].mxu1 }
 0x5d1   : > { %v6355_v48 = vpack.c.bf16 %v6319_v13, %v6318_v33  ;;  %v6205_v34 = vadd.f32 %v6098_v46, %v13022_v36  ;;  %v9287_v23 = vpop.f32.mrb[45].mxu1 }
 0x5d2   : > { %v6101_v58 = vpop.f32.mrb[46].mxu1 }
 0x5d3   : > { %v6266_v35 = vadd.f32 %v13103_v32, %v6205_v34  ;;  %v6206_v51 = vadd.f32 %v6101_v58, %v13027_v3  ;;  %v9288_v2 = vpop.f32.mrb[47].mxu1  ;;  %9406 = vmatmul.mubr.bf16.gmra.mrb[44].mxu0 %v6355_v48  ;;  %v13958_v34 = vld [vmem:[#allocation22_spill] sm:$0xff] }
 0x5d4   : > { %9409 = vmatprep.mubr.msk.bf16.mxu0 %vm9713_vm0, %v13577_v61 }
 0x5d5   : > { %v6267_v6 = vadd.f32 %v13103_v32, %v6206_v51  ;;  %v6320_v49 = vmax.f32 %v6266_v35, 0.0  ;;  %v13959_v51 = vld [vmem:[#allocation39_spill] sm:$0xff] }
 0x5d7   : > { %v6321_v16 = vmax.f32 %v6267_v6, 0.0 }
 0x5d8   : > { %v6106_v59 = vpop.f32.mrb[48].mxu1 }
 0x5d9   : > { %v6356_v63 = vpack.c.bf16 %v6321_v16, %v6320_v49  ;;  %v6207_v55 = vadd.f32 %v6106_v59, %v13031_v44  ;;  %v9291_v36 = vpop.f32.mrb[49].mxu1 }
 0x5da   : > { %v6109_v20 = vpop.f32.mrb[50].mxu1  ;;  %v13960_v36 = vld [vmem:[#allocation30_spill] sm:$0xff] }
 0x5db   : > { %v6268_v26 = vadd.f32 %v13103_v32, %v6207_v55  ;;  %v6208_v7 = vadd.f32 %v6109_v20, %v13036_v37  ;;  %v9292_v3 = vpop.f32.mrb[51].mxu1  ;;  %9410 = vmatmul.mubr.bf16.gmra.mrb[48].mxu0 %v6356_v63 }
 0x5dc   : > { %9413 = vmatprep.mubr.msk.bf16.mxu0 %vm9713_vm0, %v13577_v61 }
 0x5dd   : > { %v6269_v30 = vadd.f32 %v13103_v32, %v6208_v7  ;;  %v6322_v39 = vmax.f32 %v6268_v26, 0.0 }
 0x5df   : > { %v6323_v28 = vmax.f32 %v6269_v30, 0.0 }
 0x5e0   : > { %v6114_v52 = vpop.f32.mrb[52].mxu1 }
 0x5e1   : > { %v6357_v25 = vpack.c.bf16 %v6323_v28, %v6322_v39  ;;  %v6209_v9 = vadd.f32 %v6114_v52, %v13040_v47  ;;  %v9295_v44 = vpop.f32.mrb[53].mxu1 }
 0x5e2   : > { %v6117_v40 = vpop.f32.mrb[54].mxu1 }
 0x5e3   : > { %v6270_v53 = vadd.f32 %v13103_v32, %v6209_v9  ;;  %v6210_v27 = vadd.f32 %v6117_v40, %v13045_v41  ;;  %v9296_v37 = vpop.f32.mrb[55].mxu1  ;;  %9414 = vmatmul.mubr.bf16.gmra.mrb[52].mxu0 %v6357_v25 }
 0x5e4   : > { %9417 = vmatprep.mubr.msk.bf16.mxu0 %vm9713_vm0, %v13577_v61 }
 0x5e5   : > { %v6271_v45 = vadd.f32 %v13103_v32, %v6210_v27  ;;  %v6324_v62 = vmax.f32 %v6270_v53, 0.0 }
 0x5e7   : > { %v6325_v29 = vmax.f32 %v6271_v45, 0.0 }
 0x5e8   : > { %v6122_v24 = vpop.f32.mrb[56].mxu1 }
 0x5e9   : > { %v6358_v5 = vpack.c.bf16 %v6325_v29, %v6324_v62  ;;  %v6211_v43 = vadd.f32 %v6122_v24, %v13049_v8  ;;  %v9299_v47 = vpop.f32.mrb[57].mxu1 }
 0x5ea   : > { %v6125_v1 = vpop.f32.mrb[58].mxu1 }
 0x5eb   : > { %v6272_v38 = vadd.f32 %v13103_v32, %v6211_v43  ;;  %v6212_v18 = vadd.f32 %v6125_v1, %v13054_v11  ;;  %v9300_v41 = vpop.f32.mrb[59].mxu1  ;;  %9418 = vmatmul.mubr.bf16.gmra.mrb[56].mxu0 %v6358_v5 }
 0x5ec   : > { %9421 = vmatprep.mubr.msk.bf16.mxu0 %vm9713_vm0, %v13577_v61 }
 0x5ed   : > { %v6273_v4 = vadd.f32 %v13103_v32, %v6212_v18  ;;  %v6326_v42 = vmax.f32 %v6272_v38, 0.0 }
 0x5ef   : > { %v6327_v56 = vmax.f32 %v6273_v4, 0.0 }
 0x5f0   : > { %v6130_v14 = vpop.f32.mrb[60].mxu1 }
 0x5f1   : > { %v6359_v17 = vpack.c.bf16 %v6327_v56, %v6326_v42  ;;  %v6213_v21 = vadd.f32 %v6130_v14, %v13058_v12  ;;  %v9303_v8 = vpop.f32.mrb[61].mxu1  ;;  %v9676_v14 = vld [vmem:[%s9857_s26] sm:$0xff]  }
 0x5f2   : > { %v6133_v10 = vpop.f32.mrb[62].mxu1 }
 0x5f3   : > { %v6274_v54 = vadd.f32 %v13103_v32, %v6213_v21  ;;  %v6214_v50 = vadd.f32 %v6133_v10, %v13957_v15  ;;  %v9304_v11 = vpop.f32.mrb[63].mxu1  ;;  %9422 = vmatmul.mubr.bf16.gmra.mrb[60].mxu0 %v6359_v17 }
 0x5f4   : > { %9425 = vmatprep.mubr.msk.bf16.mxu0 %vm9713_vm0, %v13577_v61 }
 0x5f5   : > { %v6275_v57 = vadd.f32 %v13103_v32, %v6214_v50  ;;  %v6328_v33 = vmax.f32 %v6274_v54, 0.0 }
 0x5f7   : > { %v6329_v13 = vmax.f32 %v6275_v57, 0.0 }
 0x5f8   : > { %v6138_v46 = vpop.f32.mrb[64].mxu1 }
 0x5f9   : > { %v6360_v48 = vpack.c.bf16 %v6329_v13, %v6328_v33  ;;  %v6215_v23 = vadd.f32 %v6138_v46, %v13958_v34  ;;  %v9307_v12 = vpop.f32.mrb[65].mxu1  ;;  %v9677_v33 = vld [vmem:[%s9857_s26 + $0x8] sm:$0xff]  }
 0x5fa   : > { %v6141_v58 = vpop.f32.mrb[66].mxu1  ;;  %v6687_v13 = vunpack.c.l.bf16 %v9677_v33  ;;  %v6688_v12 = vunpack.c.h.bf16 %v9677_v33 }
 0x5fb   : > { %v6276_v35 = vadd.f32 %v13103_v32, %v6215_v23  ;;  %v6216_v2 = vadd.f32 %v6141_v58, %v13959_v51  ;;  %v9308_v6 = vpop.f32.mrb[67].mxu1  ;;  %9426 = vmatmul.mubr.bf16.gmra.mrb[64].mxu0 %v6360_v48 }
 0x5fc   : > { %9429 = vmatprep.mubr.msk.bf16.mxu0 %vm9713_vm0, %v13577_v61 }
 0x5fd   : > { %v6277_v49 = vadd.f32 %v13103_v32, %v6216_v2  ;;  %v6330_v16 = vmax.f32 %v6276_v35, 0.0 }
 0x5ff   : > { %v6331_v59 = vmax.f32 %v6277_v49, 0.0 }
 0x600   : > { %v6146_v63 = vpop.f32.mrb[68].mxu1 }
 0x601   : > { %v6361_v55 = vpack.c.bf16 %v6331_v59, %v6330_v16  ;;  %v6217_v20 = vadd.f32 %v6146_v63, %v13960_v36  ;;  %v9311_v26 = vpop.f32.mrb[69].mxu1  ;;  %v9678_v59 = vld [vmem:[%s9857_s26 + $0x10] sm:$0xff]  }
 0x602   : > { %v6149_v7 = vpop.f32.mrb[70].mxu1  ;;  %v6689_v63 = vunpack.c.l.bf16 %v9678_v59 }
 0x603   : > { %v6278_v3 = vadd.f32 %v13103_v32, %v6217_v20  ;;  %v6218_v30 = vadd.f32 %v6149_v7, %v13081_v0  ;;  %v9312_v39 = vpop.f32.mrb[71].mxu1  ;;  %9430 = vmatmul.mubr.bf16.gmra.mrb[68].mxu0 %v6361_v55  ;;  %v6690_v7 = vunpack.c.h.bf16 %v9678_v59 }
 0x604   : > { %9433 = vmatprep.mubr.msk.bf16.mxu0 %vm9713_vm0, %v13577_v61 }
 0x605   : > { %v6279_v28 = vadd.f32 %v13103_v32, %v6218_v30  ;;  %v6332_v52 = vmax.f32 %v6278_v3, 0.0 }
 0x607   : > { %v6333_v25 = vmax.f32 %v6279_v28, 0.0 }
 0x608   : > { %v6154_v9 = vpop.f32.mrb[72].mxu1 }
 0x609   : > { %v6362_v44 = vpack.c.bf16 %v6333_v25, %v6332_v52  ;;  %v6219_v40 = vadd.f32 %v6154_v9, %v13085_v19  ;;  %v9315_v53 = vpop.f32.mrb[73].mxu1 }
 0x60a   : > { %v6157_v27 = vpop.f32.mrb[74].mxu1 }
 0x60b   : > { %v6280_v37 = vadd.f32 %v13103_v32, %v6219_v40  ;;  %v6220_v45 = vadd.f32 %v6157_v27, %v13090_v22  ;;  %v9316_v0 = vpop.f32.mrb[75].mxu1  ;;  %9434 = vmatmul.mubr.bf16.gmra.mrb[72].mxu0 %v6362_v44  ;;  %v9679_v44 = vld [vmem:[%s9857_s26 + $0x18] sm:$0xff]  }
 0x60c   : > { %9437 = vmatprep.mubr.msk.bf16.mxu0 %vm9713_vm0, %v13577_v61  ;;  %v6691_v40 = vunpack.c.l.bf16 %v9679_v44  ;;  %v6692_v0 = vunpack.c.h.bf16 %v9679_v44 }
 0x60d   : > { %v6281_v62 = vadd.f32 %v13103_v32, %v6220_v45  ;;  %v6334_v29 = vmax.f32 %v6280_v37, 0.0 }
 0x60f   : > { %v6335_v24 = vmax.f32 %v6281_v62, 0.0 }
 0x610   : > { %v6162_v5 = vpop.f32.mrb[76].mxu1 }
 0x611   : > { %v6363_v43 = vpack.c.bf16 %v6335_v24, %v6334_v29  ;;  %v6221_v19 = vadd.f32 %v6162_v5, %v13096_v31  ;;  %v9319_v47 = vpop.f32.mrb[77].mxu1  ;;  %v13268_v31 = vld [vmem:[%s13395_s7] ss:$0 sm:$0xff] }
 0x612   : > { %v6165_v1 = vpop.f32.mrb[78].mxu1 }
 0x613   : > { %v6282_v38 = vadd.f32 %v13103_v32, %v6221_v19  ;;  %v6222_v22 = vadd.f32 %v6165_v1, %v13098_v60  ;;  %v9320_v18 = vpop.f32.mrb[79].mxu1  ;;  %9438 = vmatmul.mubr.bf16.gmra.mrb[76].mxu0 %v6363_v43  ;;  %v6685_v60 = vunpack.c.l.bf16 %v9676_v14  ;;  %v9680_v1 = vld [vmem:[%s9857_s26 + $0x20] sm:$0xff]  }
 0x614   : > { %9441 = vmatprep.mubr.msk.bf16.mxu0 %vm9713_vm0, %v13577_v61  ;;  %v6686_v61 = vunpack.c.h.bf16 %v9676_v14 }
 0x615   : > { %v6283_v41 = vadd.f32 %v13103_v32, %v6222_v22  ;;  %v6336_v4 = vmax.f32 %v6282_v38, 0.0  ;;  %v6693_v38 = vunpack.c.l.bf16 %v9680_v1 }
 0x617   : > { %v6337_v42 = vmax.f32 %v6283_v41, 0.0 }
 0x619   : > { %v6364_v56 = vpack.c.bf16 %v6337_v42, %v6336_v4  ;;  %v6694_v42 = vunpack.c.h.bf16 %v9680_v1 }
 0x61b   : > { %9442 = vmatmul.mubr.bf16.gmra.mrb[80].mxu0 %v6364_v56 }
 0x61e   : > { %v6470_v17 = vpop.f32.mrb[232].mxu0 }
 0x61f   : > { %v6471_v21 = vadd.f32 %v13268_v31, %v6470_v17  ;;  %v9339_v8 = vpop.f32.mrb[233].mxu0 }
 0x620   : > { %v6473_v10 = vpop.f32.mrb[234].mxu0 }
 0x621   : > { %v6739_v32 = vadd.f32 %v6685_v60, %v6471_v21  ;;  %v6474_v54 = vadd.f32 %v13268_v31, %v6473_v10  ;;  %v9340_v15 = vpop.f32.mrb[235].mxu0  ;;  %v9681_v10 = vld [vmem:[%s9857_s26 + $0x28] sm:$0xff]  }
 0x623   : > { %v6740_v50 = vadd.f32 %v6686_v61, %v6474_v54  ;;  %v6793_v11 = vmax.f32 %v6739_v32, 0.0  ;;  %v6695_v32 = vunpack.c.l.bf16 %v9681_v10 }
 0x625   : > { %v6794_v57 = vmax.f32 %v6740_v50, 0.0 }
 0x626   : > { %v6478_v46 = vpop.f32.mrb[236].mxu0 }
 0x627   : > { %v7538_v48 = vpack.c.bf16 %v6794_v57, %v6793_v11  ;;  %v6479_v34 = vadd.f32 %v13268_v31, %v6478_v46  ;;  %v9343_v23 = vpop.f32.mrb[237].mxu0  ;;  %v6696_v57 = vunpack.c.h.bf16 %v9681_v10 }
 0x628   : > { %v6481_v58 = vpop.f32.mrb[238].mxu0 }
 0x629   : > { %7539 = vst [vmem:[%s13279_s13] sm:$0xff] %v7538_v48   ;;  %v6741_v35 = vadd.f32 %v6687_v13, %v6479_v34  ;;  %v6482_v51 = vadd.f32 %v13268_v31, %v6481_v58  ;;  %v9344_v2 = vpop.f32.mrb[239].mxu0  ;;  %v9682_v58 = vld [vmem:[%s9857_s26 + $0x30] sm:$0xff]  }
 0x62b   : > { %v6742_v6 = vadd.f32 %v6688_v12, %v6482_v51  ;;  %v6795_v49 = vmax.f32 %v6741_v35, 0.0  ;;  %v6697_v35 = vunpack.c.l.bf16 %v9682_v58 }
 0x62d   : > { %v6796_v16 = vmax.f32 %v6742_v6, 0.0 }
 0x62e   : > { %v6486_v55 = vpop.f32.mrb[240].mxu0 }
 0x62f   : > { %v7543_v36 = vpack.c.bf16 %v6796_v16, %v6795_v49  ;;  %v6487_v20 = vadd.f32 %v13268_v31, %v6486_v55  ;;  %v9347_v26 = vpop.f32.mrb[241].mxu0  ;;  %v6698_v16 = vunpack.c.h.bf16 %v9682_v58 }
 0x630   : > { %v6489_v3 = vpop.f32.mrb[242].mxu0 }
 0x631   : > { %7670 = vst [vmem:[%s13279_s13 + $0x8] sm:$0xff] %v7543_v36   ;;  %v6743_v30 = vadd.f32 %v6689_v63, %v6487_v20  ;;  %v6490_v39 = vadd.f32 %v13268_v31, %v6489_v3  ;;  %v9348_v28 = vpop.f32.mrb[243].mxu0  ;;  %v9683_v3 = vld [vmem:[%s9857_s26 + $0x38] sm:$0xff]  }
 0x633   : > { %v6744_v52 = vadd.f32 %v6690_v7, %v6490_v39  ;;  %v6797_v25 = vmax.f32 %v6743_v30, 0.0  ;;  %v6699_v30 = vunpack.c.l.bf16 %v9683_v3 }
 0x635   : > { %v6798_v9 = vmax.f32 %v6744_v52, 0.0 }
 0x636   : > { %v6494_v53 = vpop.f32.mrb[244].mxu0 }
 0x637   : > { %v7548_v27 = vpack.c.bf16 %v6798_v9, %v6797_v25  ;;  %v6495_v37 = vadd.f32 %v13268_v31, %v6494_v53  ;;  %v9351_v45 = vpop.f32.mrb[245].mxu0  ;;  %v6700_v9 = vunpack.c.h.bf16 %v9683_v3 }
 0x638   : > { %v6497_v62 = vpop.f32.mrb[246].mxu0 }
 0x639   : > { %7671 = vst [vmem:[%s13279_s13 + $0x10] sm:$0xff] %v7548_v27   ;;  %v6745_v29 = vadd.f32 %v6691_v40, %v6495_v37  ;;  %v6498_v24 = vadd.f32 %v13268_v31, %v6497_v62  ;;  %v9352_v5 = vpop.f32.mrb[247].mxu0  ;;  %v9684_v62 = vld [vmem:[%s9857_s26 + $0x40] sm:$0xff]  }
 0x63b   : > { %v6746_v43 = vadd.f32 %v6692_v0, %v6498_v24  ;;  %v6799_v19 = vmax.f32 %v6745_v29, 0.0  ;;  %v6701_v29 = vunpack.c.l.bf16 %v9684_v62 }
 0x63d   : > { %v6800_v47 = vmax.f32 %v6746_v43, 0.0 }
 0x63e   : > { %v6502_v22 = vpop.f32.mrb[248].mxu0 }
 0x63f   : > { %v7553_v18 = vpack.c.bf16 %v6800_v47, %v6799_v19  ;;  %v6503_v41 = vadd.f32 %v13268_v31, %v6502_v22  ;;  %v9355_v4 = vpop.f32.mrb[249].mxu0  ;;  %v6702_v47 = vunpack.c.h.bf16 %v9684_v62 }
 0x640   : > { %v6505_v56 = vpop.f32.mrb[250].mxu0 }
 0x641   : > { %7672 = vst [vmem:[%s13279_s13 + $0x18] sm:$0xff] %v7553_v18   ;;  %v6747_v14 = vadd.f32 %v6693_v38, %v6503_v41  ;;  %v6506_v60 = vadd.f32 %v13268_v31, %v6505_v56  ;;  %v9356_v17 = vpop.f32.mrb[251].mxu0  ;;  %v9685_v56 = vld [vmem:[%s9857_s26 + $0x48] sm:$0xff]  }
 0x643   : > { %v6748_v21 = vadd.f32 %v6694_v42, %v6506_v60  ;;  %v6801_v8 = vmax.f32 %v6747_v14, 0.0  ;;  %v6703_v14 = vunpack.c.l.bf16 %v9685_v56 }
 0x645   : > { %v6802_v61 = vmax.f32 %v6748_v21, 0.0 }
 0x646   : > { %v6510_v54 = vpop.f32.mrb[252].mxu0 }
 0x647   : > { %v7558_v15 = vpack.c.bf16 %v6802_v61, %v6801_v8  ;;  %v6511_v50 = vadd.f32 %v13268_v31, %v6510_v54  ;;  %v9359_v11 = vpop.f32.mrb[253].mxu0  ;;  %v6704_v61 = vunpack.c.h.bf16 %v9685_v56 }
 0x648   : > { %v6513_v33 = vpop.f32.mrb[254].mxu0 }
 0x649   : > { %7673 = vst [vmem:[%s13279_s13 + $0x20] sm:$0xff] %v7558_v15   ;;  %v6749_v13 = vadd.f32 %v6695_v32, %v6511_v50  ;;  %v6514_v46 = vadd.f32 %v13268_v31, %v6513_v33  ;;  %v9360_v48 = vpop.f32.mrb[255].mxu0  ;;  %v9686_v33 = vld [vmem:[%s9857_s26 + $0x50] sm:$0xff]  }
 0x64b   : > { %v6750_v34 = vadd.f32 %v6696_v57, %v6514_v46  ;;  %v6803_v23 = vmax.f32 %v6749_v13, 0.0  ;;  %v6705_v13 = vunpack.c.l.bf16 %v9686_v33 }
 0x64d   : > { %v6804_v12 = vmax.f32 %v6750_v34, 0.0 }
 0x64e   : > { %v6518_v51 = vpop.f32.mrb[0].mxu0 }
 0x64f   : > { %v7563_v2 = vpack.c.bf16 %v6804_v12, %v6803_v23  ;;  %v6519_v6 = vadd.f32 %v13268_v31, %v6518_v51  ;;  %v9363_v49 = vpop.f32.mrb[1].mxu0  ;;  %v6706_v12 = vunpack.c.h.bf16 %v9686_v33 }
 0x650   : > { %v6521_v59 = vpop.f32.mrb[2].mxu0 }
 0x651   : > { %7674 = vst [vmem:[%s13279_s13 + $0x28] sm:$0xff] %v7563_v2   ;;  %v6751_v63 = vadd.f32 %v6697_v35, %v6519_v6  ;;  %v6522_v55 = vadd.f32 %v13268_v31, %v6521_v59  ;;  %v9364_v36 = vpop.f32.mrb[3].mxu0  ;;  %v9687_v59 = vld [vmem:[%s9857_s26 + $0x58] sm:$0xff]  }
 0x653   : > { %v6752_v20 = vadd.f32 %v6698_v16, %v6522_v55  ;;  %v6805_v26 = vmax.f32 %v6751_v63, 0.0  ;;  %v6707_v63 = vunpack.c.l.bf16 %v9687_v59 }
 0x655   : > { %v6806_v7 = vmax.f32 %v6752_v20, 0.0 }
 0x656   : > { %v6526_v39 = vpop.f32.mrb[4].mxu0 }
 0x657   : > { %v7568_v28 = vpack.c.bf16 %v6806_v7, %v6805_v26  ;;  %v6527_v52 = vadd.f32 %v13268_v31, %v6526_v39  ;;  %v9367_v25 = vpop.f32.mrb[5].mxu0  ;;  %v6708_v7 = vunpack.c.h.bf16 %v9687_v59 }
 0x658   : > { %v6529_v44 = vpop.f32.mrb[6].mxu0 }
 0x659   : > { %7675 = vst [vmem:[%s13279_s13 + $0x30] sm:$0xff] %v7568_v28   ;;  %v6753_v40 = vadd.f32 %v6699_v30, %v6527_v52  ;;  %v6530_v53 = vadd.f32 %v13268_v31, %v6529_v44  ;;  %v9368_v27 = vpop.f32.mrb[7].mxu0  ;;  %v9688_v44 = vld [vmem:[%s9857_s26 + $0x60] sm:$0xff]  }
 0x65b   : > { %v6754_v37 = vadd.f32 %v6700_v9, %v6530_v53  ;;  %v6807_v45 = vmax.f32 %v6753_v40, 0.0  ;;  %v6709_v40 = vunpack.c.l.bf16 %v9688_v44 }
 0x65d   : > { %v6808_v0 = vmax.f32 %v6754_v37, 0.0 }
 0x65e   : > { %v6534_v24 = vpop.f32.mrb[8].mxu0 }
 0x65f   : > { %v7573_v5 = vpack.c.bf16 %v6808_v0, %v6807_v45  ;;  %v6535_v43 = vadd.f32 %v13268_v31, %v6534_v24  ;;  %v9371_v19 = vpop.f32.mrb[9].mxu0  ;;  %v6710_v0 = vunpack.c.h.bf16 %v9688_v44 }
 0x660   : > { %v6537_v1 = vpop.f32.mrb[10].mxu0 }
 0x661   : > { %7676 = vst [vmem:[%s13279_s13 + $0x38] sm:$0xff] %v7573_v5   ;;  %v6755_v38 = vadd.f32 %v6701_v29, %v6535_v43  ;;  %v6538_v22 = vadd.f32 %v13268_v31, %v6537_v1  ;;  %v9372_v18 = vpop.f32.mrb[11].mxu0  ;;  %v9689_v1 = vld [vmem:[%s9857_s26 + $0x68] sm:$0xff]  }
 0x663   : > { %v6756_v41 = vadd.f32 %v6702_v47, %v6538_v22  ;;  %v6809_v4 = vmax.f32 %v6755_v38, 0.0  ;;  %v6711_v38 = vunpack.c.l.bf16 %v9689_v1 }
 0x665   : > { %v6810_v42 = vmax.f32 %v6756_v41, 0.0 }
 0x666   : > { %v6542_v60 = vpop.f32.mrb[12].mxu0 }
 0x667   : > { %v7578_v17 = vpack.c.bf16 %v6810_v42, %v6809_v4  ;;  %v6543_v21 = vadd.f32 %v13268_v31, %v6542_v60  ;;  %v9375_v8 = vpop.f32.mrb[13].mxu0  ;;  %v6712_v42 = vunpack.c.h.bf16 %v9689_v1 }
 0x668   : > { %v6545_v10 = vpop.f32.mrb[14].mxu0 }
 0x669   : > { %7677 = vst [vmem:[%s13279_s13 + $0x40] sm:$0xff] %v7578_v17   ;;  %v6757_v32 = vadd.f32 %v6703_v14, %v6543_v21  ;;  %v6546_v54 = vadd.f32 %v13268_v31, %v6545_v10  ;;  %v9376_v15 = vpop.f32.mrb[15].mxu0  ;;  %v9690_v10 = vld [vmem:[%s9857_s26 + $0x70] sm:$0xff]  }
 0x66b   : > { %v6758_v50 = vadd.f32 %v6704_v61, %v6546_v54  ;;  %v6811_v11 = vmax.f32 %v6757_v32, 0.0  ;;  %v6713_v32 = vunpack.c.l.bf16 %v9690_v10 }
 0x66d   : > { %v6812_v57 = vmax.f32 %v6758_v50, 0.0 }
 0x66e   : > { %v6550_v46 = vpop.f32.mrb[16].mxu0 }
 0x66f   : > { %v7583_v48 = vpack.c.bf16 %v6812_v57, %v6811_v11  ;;  %v6551_v34 = vadd.f32 %v13268_v31, %v6550_v46  ;;  %v9379_v23 = vpop.f32.mrb[17].mxu0  ;;  %v6714_v57 = vunpack.c.h.bf16 %v9690_v10 }
 0x670   : > { %v6553_v58 = vpop.f32.mrb[18].mxu0 }
 0x671   : > { %7678 = vst [vmem:[%s13279_s13 + $0x48] sm:$0xff] %v7583_v48   ;;  %v6759_v35 = vadd.f32 %v6705_v13, %v6551_v34  ;;  %v6554_v51 = vadd.f32 %v13268_v31, %v6553_v58  ;;  %v9380_v2 = vpop.f32.mrb[19].mxu0  ;;  %v9691_v58 = vld [vmem:[%s9857_s26 + $0x78] sm:$0xff]  }
 0x673   : > { %v6760_v6 = vadd.f32 %v6706_v12, %v6554_v51  ;;  %v6813_v49 = vmax.f32 %v6759_v35, 0.0  ;;  %v6715_v35 = vunpack.c.l.bf16 %v9691_v58 }
 0x675   : > { %v6814_v16 = vmax.f32 %v6760_v6, 0.0 }
 0x676   : > { %v6558_v55 = vpop.f32.mrb[20].mxu0 }
 0x677   : > { %v7588_v36 = vpack.c.bf16 %v6814_v16, %v6813_v49  ;;  %v6559_v20 = vadd.f32 %v13268_v31, %v6558_v55  ;;  %v9383_v26 = vpop.f32.mrb[21].mxu0  ;;  %v6716_v16 = vunpack.c.h.bf16 %v9691_v58 }
 0x678   : > { %v6561_v3 = vpop.f32.mrb[22].mxu0 }
 0x679   : > { %7679 = vst [vmem:[%s13279_s13 + $0x50] sm:$0xff] %v7588_v36   ;;  %v6761_v30 = vadd.f32 %v6707_v63, %v6559_v20  ;;  %v6562_v39 = vadd.f32 %v13268_v31, %v6561_v3  ;;  %v9384_v28 = vpop.f32.mrb[23].mxu0  ;;  %v9692_v3 = vld [vmem:[%s9857_s26 + $0x80] sm:$0xff]  }
 0x67b   : > { %v6762_v52 = vadd.f32 %v6708_v7, %v6562_v39  ;;  %v6815_v25 = vmax.f32 %v6761_v30, 0.0  ;;  %v6717_v30 = vunpack.c.l.bf16 %v9692_v3 }
 0x67d   : > { %v6816_v9 = vmax.f32 %v6762_v52, 0.0 }
 0x67e   : > { %v6566_v53 = vpop.f32.mrb[24].mxu0 }
 0x67f   : > { %v7593_v27 = vpack.c.bf16 %v6816_v9, %v6815_v25  ;;  %v6567_v37 = vadd.f32 %v13268_v31, %v6566_v53  ;;  %v9387_v45 = vpop.f32.mrb[25].mxu0  ;;  %v6718_v9 = vunpack.c.h.bf16 %v9692_v3 }
 0x680   : > { %v6569_v62 = vpop.f32.mrb[26].mxu0 }
 0x681   : > { %7680 = vst [vmem:[%s13279_s13 + $0x58] sm:$0xff] %v7593_v27   ;;  %v6763_v29 = vadd.f32 %v6709_v40, %v6567_v37  ;;  %v6570_v24 = vadd.f32 %v13268_v31, %v6569_v62  ;;  %v9388_v5 = vpop.f32.mrb[27].mxu0  ;;  %v9693_v62 = vld [vmem:[%s9857_s26 + $0x88] sm:$0xff]  }
 0x683   : > { %v6764_v43 = vadd.f32 %v6710_v0, %v6570_v24  ;;  %v6817_v19 = vmax.f32 %v6763_v29, 0.0  ;;  %v6719_v29 = vunpack.c.l.bf16 %v9693_v62 }
 0x685   : > { %v6818_v47 = vmax.f32 %v6764_v43, 0.0 }
 0x686   : > { %v6574_v22 = vpop.f32.mrb[28].mxu0 }
 0x687   : > { %v7598_v18 = vpack.c.bf16 %v6818_v47, %v6817_v19  ;;  %v6575_v41 = vadd.f32 %v13268_v31, %v6574_v22  ;;  %v9391_v4 = vpop.f32.mrb[29].mxu0  ;;  %v6720_v47 = vunpack.c.h.bf16 %v9693_v62 }
 0x688   : > { %v6577_v56 = vpop.f32.mrb[30].mxu0 }
 0x689   : > { %7681 = vst [vmem:[%s13279_s13 + $0x60] sm:$0xff] %v7598_v18   ;;  %v6765_v14 = vadd.f32 %v6711_v38, %v6575_v41  ;;  %v6578_v60 = vadd.f32 %v13268_v31, %v6577_v56  ;;  %v9392_v17 = vpop.f32.mrb[31].mxu0  ;;  %v9694_v56 = vld [vmem:[%s9857_s26 + $0x90] sm:$0xff]  }
 0x68b   : > { %v6766_v21 = vadd.f32 %v6712_v42, %v6578_v60  ;;  %v6819_v8 = vmax.f32 %v6765_v14, 0.0  ;;  %v6721_v14 = vunpack.c.l.bf16 %v9694_v56 }
 0x68d   : > { %v6820_v61 = vmax.f32 %v6766_v21, 0.0 }
 0x68e   : > { %v6582_v54 = vpop.f32.mrb[32].mxu0 }
 0x68f   : > { %v7603_v15 = vpack.c.bf16 %v6820_v61, %v6819_v8  ;;  %v6583_v50 = vadd.f32 %v13268_v31, %v6582_v54  ;;  %v9395_v11 = vpop.f32.mrb[33].mxu0  ;;  %v6722_v61 = vunpack.c.h.bf16 %v9694_v56 }
 0x690   : > { %v6585_v33 = vpop.f32.mrb[34].mxu0 }
 0x691   : > { %7682 = vst [vmem:[%s13279_s13 + $0x68] sm:$0xff] %v7603_v15   ;;  %v6767_v13 = vadd.f32 %v6713_v32, %v6583_v50  ;;  %v6586_v46 = vadd.f32 %v13268_v31, %v6585_v33  ;;  %v9396_v48 = vpop.f32.mrb[35].mxu0  ;;  %v9695_v33 = vld [vmem:[%s9857_s26 + $0x98] sm:$0xff]  }
 0x693   : > { %v6768_v34 = vadd.f32 %v6714_v57, %v6586_v46  ;;  %v6821_v23 = vmax.f32 %v6767_v13, 0.0  ;;  %v6723_v13 = vunpack.c.l.bf16 %v9695_v33 }
 0x695   : > { %v6822_v12 = vmax.f32 %v6768_v34, 0.0 }
 0x696   : > { %v6590_v51 = vpop.f32.mrb[36].mxu0 }
 0x697   : > { %v7608_v2 = vpack.c.bf16 %v6822_v12, %v6821_v23  ;;  %v6591_v6 = vadd.f32 %v13268_v31, %v6590_v51  ;;  %v9399_v49 = vpop.f32.mrb[37].mxu0  ;;  %v6724_v12 = vunpack.c.h.bf16 %v9695_v33 }
 0x698   : > { %v6593_v59 = vpop.f32.mrb[38].mxu0 }
 0x699   : > { %7683 = vst [vmem:[%s13279_s13 + $0x70] sm:$0xff] %v7608_v2   ;;  %v6769_v63 = vadd.f32 %v6715_v35, %v6591_v6  ;;  %v6594_v55 = vadd.f32 %v13268_v31, %v6593_v59  ;;  %v9400_v36 = vpop.f32.mrb[39].mxu0  ;;  %v9696_v59 = vld [vmem:[%s9857_s26 + $0xa0] sm:$0xff]  }
 0x69b   : > { %v6770_v20 = vadd.f32 %v6716_v16, %v6594_v55  ;;  %v6823_v26 = vmax.f32 %v6769_v63, 0.0  ;;  %v6725_v63 = vunpack.c.l.bf16 %v9696_v59 }
 0x69d   : > { %v6824_v7 = vmax.f32 %v6770_v20, 0.0 }
 0x69e   : > { %v6598_v39 = vpop.f32.mrb[40].mxu0 }
 0x69f   : > { %v7613_v28 = vpack.c.bf16 %v6824_v7, %v6823_v26  ;;  %v6599_v52 = vadd.f32 %v13268_v31, %v6598_v39  ;;  %v9403_v25 = vpop.f32.mrb[41].mxu0  ;;  %v6726_v7 = vunpack.c.h.bf16 %v9696_v59 }
 0x6a0   : > { %v6601_v44 = vpop.f32.mrb[42].mxu0 }
 0x6a1   : > { %7684 = vst [vmem:[%s13279_s13 + $0x78] sm:$0xff] %v7613_v28   ;;  %v6771_v40 = vadd.f32 %v6717_v30, %v6599_v52  ;;  %v6602_v53 = vadd.f32 %v13268_v31, %v6601_v44  ;;  %v9404_v27 = vpop.f32.mrb[43].mxu0  ;;  %v9697_v44 = vld [vmem:[%s9857_s26 + $0xa8] sm:$0xff]  }
 0x6a3   : > { %v6772_v37 = vadd.f32 %v6718_v9, %v6602_v53  ;;  %v6825_v45 = vmax.f32 %v6771_v40, 0.0  ;;  %v6727_v40 = vunpack.c.l.bf16 %v9697_v44 }
 0x6a5   : > { %v6826_v0 = vmax.f32 %v6772_v37, 0.0 }
 0x6a6   : > { %v6606_v24 = vpop.f32.mrb[44].mxu0 }
 0x6a7   : > { %v7618_v5 = vpack.c.bf16 %v6826_v0, %v6825_v45  ;;  %v6607_v43 = vadd.f32 %v13268_v31, %v6606_v24  ;;  %v9407_v19 = vpop.f32.mrb[45].mxu0  ;;  %v6728_v0 = vunpack.c.h.bf16 %v9697_v44 }
 0x6a8   : > { %v6609_v1 = vpop.f32.mrb[46].mxu0 }
 0x6a9   : > { %7685 = vst [vmem:[%s13279_s13 + $0x80] sm:$0xff] %v7618_v5   ;;  %v6773_v38 = vadd.f32 %v6719_v29, %v6607_v43  ;;  %v6610_v22 = vadd.f32 %v13268_v31, %v6609_v1  ;;  %v9408_v18 = vpop.f32.mrb[47].mxu0  ;;  %v9698_v1 = vld [vmem:[%s9857_s26 + $0xb0] sm:$0xff]  }
 0x6ab   : > { %v6774_v41 = vadd.f32 %v6720_v47, %v6610_v22  ;;  %v6827_v4 = vmax.f32 %v6773_v38, 0.0  ;;  %v6729_v38 = vunpack.c.l.bf16 %v9698_v1 }
 0x6ad   : > { %v6828_v42 = vmax.f32 %v6774_v41, 0.0 }
 0x6ae   : > { %v6614_v60 = vpop.f32.mrb[48].mxu0 }
 0x6af   : > { %v7623_v17 = vpack.c.bf16 %v6828_v42, %v6827_v4  ;;  %v6615_v21 = vadd.f32 %v13268_v31, %v6614_v60  ;;  %v9411_v8 = vpop.f32.mrb[49].mxu0  ;;  %v6730_v42 = vunpack.c.h.bf16 %v9698_v1 }
 0x6b0   : > { %v6617_v10 = vpop.f32.mrb[50].mxu0 }
 0x6b1   : > { %7686 = vst [vmem:[%s13279_s13 + $0x88] sm:$0xff] %v7623_v17   ;;  %v6775_v32 = vadd.f32 %v6721_v14, %v6615_v21  ;;  %v6618_v54 = vadd.f32 %v13268_v31, %v6617_v10  ;;  %v9412_v15 = vpop.f32.mrb[51].mxu0  ;;  %v9699_v10 = vld [vmem:[%s9857_s26 + $0xb8] sm:$0xff]  }
 0x6b3   : > { %v6776_v50 = vadd.f32 %v6722_v61, %v6618_v54  ;;  %v6829_v11 = vmax.f32 %v6775_v32, 0.0  ;;  %v6731_v32 = vunpack.c.l.bf16 %v9699_v10 }
 0x6b5   : > { %v6830_v57 = vmax.f32 %v6776_v50, 0.0 }
 0x6b6   : > { %v6622_v46 = vpop.f32.mrb[52].mxu0 }
 0x6b7   : > { %v7628_v48 = vpack.c.bf16 %v6830_v57, %v6829_v11  ;;  %v6623_v34 = vadd.f32 %v13268_v31, %v6622_v46  ;;  %v9415_v23 = vpop.f32.mrb[53].mxu0  ;;  %v6732_v57 = vunpack.c.h.bf16 %v9699_v10 }
 0x6b8   : > { %v6625_v58 = vpop.f32.mrb[54].mxu0 }
 0x6b9   : > { %7687 = vst [vmem:[%s13279_s13 + $0x90] sm:$0xff] %v7628_v48   ;;  %v6777_v35 = vadd.f32 %v6723_v13, %v6623_v34  ;;  %v6626_v51 = vadd.f32 %v13268_v31, %v6625_v58  ;;  %v9416_v2 = vpop.f32.mrb[55].mxu0  ;;  %v9700_v58 = vld [vmem:[%s9857_s26 + $0xc0] sm:$0xff]  }
 0x6bb   : > { %v6778_v6 = vadd.f32 %v6724_v12, %v6626_v51  ;;  %v6831_v49 = vmax.f32 %v6777_v35, 0.0  ;;  %v6733_v35 = vunpack.c.l.bf16 %v9700_v58 }
 0x6bd   : > { %v6832_v16 = vmax.f32 %v6778_v6, 0.0 }
 0x6be   : > { %v6630_v55 = vpop.f32.mrb[56].mxu0 }
 0x6bf   : > { %v7633_v36 = vpack.c.bf16 %v6832_v16, %v6831_v49  ;;  %v6631_v20 = vadd.f32 %v13268_v31, %v6630_v55  ;;  %v9419_v26 = vpop.f32.mrb[57].mxu0  ;;  %v6734_v16 = vunpack.c.h.bf16 %v9700_v58 }
 0x6c0   : > { %v6633_v3 = vpop.f32.mrb[58].mxu0 }
 0x6c1   : > { %7688 = vst [vmem:[%s13279_s13 + $0x98] sm:$0xff] %v7633_v36   ;;  %v6779_v30 = vadd.f32 %v6725_v63, %v6631_v20  ;;  %v6634_v39 = vadd.f32 %v13268_v31, %v6633_v3  ;;  %v9420_v28 = vpop.f32.mrb[59].mxu0  ;;  %v9701_v3 = vld [vmem:[%s9857_s26 + $0xc8] sm:$0xff]  }
 0x6c3   : > { %v6780_v52 = vadd.f32 %v6726_v7, %v6634_v39  ;;  %v6833_v25 = vmax.f32 %v6779_v30, 0.0  ;;  %v6735_v30 = vunpack.c.l.bf16 %v9701_v3 }
 0x6c5   : > { %v6834_v9 = vmax.f32 %v6780_v52, 0.0 }
 0x6c6   : > { %v6638_v53 = vpop.f32.mrb[60].mxu0 }
 0x6c7   : > { %v7638_v27 = vpack.c.bf16 %v6834_v9, %v6833_v25  ;;  %v6639_v37 = vadd.f32 %v13268_v31, %v6638_v53  ;;  %v9423_v45 = vpop.f32.mrb[61].mxu0  ;;  %v6736_v9 = vunpack.c.h.bf16 %v9701_v3 }
 0x6c8   : > { %v6641_v62 = vpop.f32.mrb[62].mxu0 }
 0x6c9   : > { %7689 = vst [vmem:[%s13279_s13 + $0xa0] sm:$0xff] %v7638_v27   ;;  %v6781_v29 = vadd.f32 %v6727_v40, %v6639_v37  ;;  %v6642_v24 = vadd.f32 %v13268_v31, %v6641_v62  ;;  %v9424_v5 = vpop.f32.mrb[63].mxu0  ;;  %v9702_v62 = vld [vmem:[%s9857_s26 + $0xd0] sm:$0xff]  }
 0x6cb   : > { %v6782_v43 = vadd.f32 %v6728_v0, %v6642_v24  ;;  %v6835_v19 = vmax.f32 %v6781_v29, 0.0  ;;  %v6737_v29 = vunpack.c.l.bf16 %v9702_v62 }
 0x6cd   : > { %v6836_v47 = vmax.f32 %v6782_v43, 0.0 }
 0x6ce   : > { %v6646_v22 = vpop.f32.mrb[64].mxu0 }
 0x6cf   : > { %v7643_v18 = vpack.c.bf16 %v6836_v47, %v6835_v19  ;;  %v6647_v41 = vadd.f32 %v13268_v31, %v6646_v22  ;;  %v9427_v4 = vpop.f32.mrb[65].mxu0  ;;  %v6738_v47 = vunpack.c.h.bf16 %v9702_v62 }
 0x6d0   : > { %v6649_v56 = vpop.f32.mrb[66].mxu0 }
 0x6d1   : > { %7690 = vst [vmem:[%s13279_s13 + $0xa8] sm:$0xff] %v7643_v18   ;;  %v6783_v14 = vadd.f32 %v6729_v38, %v6647_v41  ;;  %v6650_v60 = vadd.f32 %v13268_v31, %v6649_v56  ;;  %v9428_v17 = vpop.f32.mrb[67].mxu0 }
 0x6d3   : > { %v6784_v21 = vadd.f32 %v6730_v42, %v6650_v60  ;;  %v6837_v8 = vmax.f32 %v6783_v14, 0.0 }
 0x6d5   : > { %v6838_v61 = vmax.f32 %v6784_v21, 0.0 }
 0x6d6   : > { %v6654_v54 = vpop.f32.mrb[68].mxu0 }
 0x6d7   : > { %v7648_v15 = vpack.c.bf16 %v6838_v61, %v6837_v8  ;;  %v6655_v50 = vadd.f32 %v13268_v31, %v6654_v54  ;;  %v9431_v11 = vpop.f32.mrb[69].mxu0 }
 0x6d8   : > { %v6657_v33 = vpop.f32.mrb[70].mxu0 }
 0x6d9   : > { %7691 = vst [vmem:[%s13279_s13 + $0xb0] sm:$0xff] %v7648_v15   ;;  %v6785_v13 = vadd.f32 %v6731_v32, %v6655_v50  ;;  %v6658_v46 = vadd.f32 %v13268_v31, %v6657_v33  ;;  %v9432_v48 = vpop.f32.mrb[71].mxu0 }
 0x6db   : > { %v6786_v34 = vadd.f32 %v6732_v57, %v6658_v46  ;;  %v6839_v23 = vmax.f32 %v6785_v13, 0.0 }
 0x6dd   : > { %v6840_v12 = vmax.f32 %v6786_v34, 0.0 }
 0x6de   : > { %v6662_v51 = vpop.f32.mrb[72].mxu0 }
 0x6df   : > { %v7653_v2 = vpack.c.bf16 %v6840_v12, %v6839_v23  ;;  %v6663_v6 = vadd.f32 %v13268_v31, %v6662_v51  ;;  %v9435_v49 = vpop.f32.mrb[73].mxu0 }
 0x6e0   : > { %v6665_v59 = vpop.f32.mrb[74].mxu0 }
 0x6e1   : > { %7692 = vst [vmem:[%s13279_s13 + $0xb8] sm:$0xff] %v7653_v2   ;;  %v6787_v63 = vadd.f32 %v6733_v35, %v6663_v6  ;;  %v6666_v55 = vadd.f32 %v13268_v31, %v6665_v59  ;;  %v9436_v36 = vpop.f32.mrb[75].mxu0 }
 0x6e3   : > { %v6788_v20 = vadd.f32 %v6734_v16, %v6666_v55  ;;  %v6841_v26 = vmax.f32 %v6787_v63, 0.0 }
 0x6e5   : > { %v6842_v7 = vmax.f32 %v6788_v20, 0.0 }
 0x6e6   : > { %v6670_v39 = vpop.f32.mrb[76].mxu0 }
 0x6e7   : > { %v7658_v28 = vpack.c.bf16 %v6842_v7, %v6841_v26  ;;  %v6671_v52 = vadd.f32 %v13268_v31, %v6670_v39  ;;  %v9439_v25 = vpop.f32.mrb[77].mxu0 }
 0x6e8   : > { %v6673_v44 = vpop.f32.mrb[78].mxu0 }
 0x6e9   : > { %7693 = vst [vmem:[%s13279_s13 + $0xc0] sm:$0xff] %v7658_v28   ;;  %v6789_v40 = vadd.f32 %v6735_v30, %v6671_v52  ;;  %v6674_v53 = vadd.f32 %v13268_v31, %v6673_v44  ;;  %v9440_v27 = vpop.f32.mrb[79].mxu0 }
 0x6eb   : > { %v6790_v37 = vadd.f32 %v6736_v9, %v6674_v53  ;;  %v6843_v45 = vmax.f32 %v6789_v40, 0.0 }
 0x6ed   : > { %v6844_v0 = vmax.f32 %v6790_v37, 0.0 }
 0x6ee   : > { %v6678_v24 = vpop.f32.mrb[80].mxu0 }
 0x6ef   : > { %v7663_v5 = vpack.c.bf16 %v6844_v0, %v6843_v45  ;;  %v6679_v43 = vadd.f32 %v13268_v31, %v6678_v24  ;;  %v9443_v19 = vpop.f32.mrb[81].mxu0 }
 0x6f0   : > { %v6681_v1 = vpop.f32.mrb[82].mxu0 }
 0x6f1   : > { %7694 = vst [vmem:[%s13279_s13 + $0xc8] sm:$0xff] %v7663_v5   ;;  %v6791_v38 = vadd.f32 %v6737_v29, %v6679_v43  ;;  %v6682_v22 = vadd.f32 %v13268_v31, %v6681_v1  ;;  %v9444_v18 = vpop.f32.mrb[83].mxu0 }
 0x6f3   : > { %v6792_v41 = vadd.f32 %v6738_v47, %v6682_v22  ;;  %v6845_v4 = vmax.f32 %v6791_v38, 0.0 }
 0x6f5   : > { %v6846_v42 = vmax.f32 %v6792_v41, 0.0 }
 0x6f7   : > { %v7668_v56 = vpack.c.bf16 %v6846_v42, %v6845_v4 }
 0x6f9   : > { %7695 = vst [vmem:[%s13279_s13 + $0xd0] sm:$0xff] %v7668_v56  }
 0x6fa PF: > { %s18_s27 = sadd.s32 1, %s9709_s27  }
 0x6fb   : > { %p15_p4 = scmp.ge.s32.totalorder %s18_s27, 4  }
 0x6fd   :  { %17 = sbr.rel (!%p15_p4) target bundleno = 1 (0x1), region = 90 }

</bundles_post_ra>
